<compile_context>
chip_gen: v7x
topology: tpu7x:2x2x1
jax: 0.10.0
libtpu: 0.0.40
codegen_flags: <defaults>
</compile_context>

<pallas_src>
import math

import jax
import jax.numpy as jnp
from jax.experimental import pallas as pl
from jax.experimental.pallas import tpu as pltpu


def _num_tensorcores():
    """2 on v7x (2 TensorCores/chip), else 1 (v5e/v6e). Only affects the tiling choice."""
    try:
        kind = jax.devices()[0].device_kind.lower()
    except Exception:
        return 1
    return 2 if ("v7" in kind or "tpu7" in kind or "7x" in kind) else 1


# -------------------- Pallas kernel --------------------

def make_vae_kernel(n_hidden):
    """n_hidden = true (unpadded) GatedDense width; gated fused weights are lane-padded
    so each half starts on a 128-lane boundary (h at col 0, g at col w.shape[1]//2)."""

    def vae_kernel(x_ref, eps_ref,
                   e1w, e1b, e2w, e2b, zw, zb,                          # encoder side (VMEM)
                   d1w_hbm, d1b_hbm, d2w_hbm, d2b_hbm, pw_hbm, pb_hbm,  # decoder side (HBM)
                   p_out_ref, lat_out_ref,
                   d1w, d1b, d2w, d2b, pw, pb, dma_sem):
        bf16 = jnp.bfloat16

        # ---- start decoder-side weight/bias DMAs; they land while the encoder computes ----
        dec_pairs = [(d1w_hbm, d1w), (d1b_hbm, d1b), (d2w_hbm, d2w),
                     (d2b_hbm, d2b), (pw_hbm, pw), (pb_hbm, pb)]
        copies = [pltpu.make_async_copy(src, dst, dma_sem.at[i])
                  for i, (src, dst) in enumerate(dec_pairs)]
        for cp in copies:
            cp.start()

        def fused_lin(x_bf, w_ref, b_ref):
            # bf16 x bf16 matmul on the MXU, f32 accumulation, f32 bias add.
            return jnp.dot(x_bf, w_ref[...], preferred_element_type=jnp.float32) + b_ref[...]

        def gated(x_bf, w_ref, b_ref):
            y = fused_lin(x_bf, w_ref, b_ref)          # [TB, 2*half]
            half = w_ref.shape[1] // 2                 # 128-lane aligned (384 for H=300)
            h = y[:, :n_hidden]
            g = y[:, half:half + n_hidden]             # lane-aligned start -> no relayout
            return (h * jax.nn.sigmoid(g)).astype(bf16)

        x = x_ref[...].astype(bf16)                    # already bf16 from the wrapper

        # ---- encoder: GatedDense(Din->H) -> GatedDense(H->H) ----
        xh = gated(x, e1w, e1b)
        xh = gated(xh, e2w, e2b)

        # ---- z_mean (linear) | z_logvar (linear + Hardtanh(-6, 2)), one fused matmul ----
        y = fused_lin(xh, zw, zb)                      # [TB, 2*Z]
        Z = zw.shape[1] // 2
        mean_enc = y[:, :Z]
        logvar_enc = jnp.clip(y[:, Z:], -6.0, 2.0)

        # ---- reparameterization: shared eps of shape [1, Z] (torch.randn(z1_size)) ----
        stddev = jnp.exp(logvar_enc * 0.5)
        z = mean_enc + stddev * eps_ref[...]

        # ---- decoder weights must have landed by now ----
        for cp in copies:
            cp.wait()

        # ---- decoder: GatedDense(Z->H) -> GatedDense(H->H) ----
        zh = gated(z.astype(bf16), d1w, d1b)
        zh = gated(zh, d2w, d2b)

        # ---- p_mean (linear + Sigmoid) | p_logvar (linear + Hardtanh(-4.5, 0)) ----
        y = fused_lin(zh, pw, pb)                      # [TB, 2*Din]
        D = pw.shape[1] // 2
        p_mean = jax.nn.sigmoid(y[:, :D])
        p_logvar = jnp.clip(y[:, D:], -4.5, 0.0)

        # lane-dense packed outputs (unmasked vst)
        p_out_ref[...] = jnp.concatenate([p_mean, p_logvar], axis=1)

        lat = jnp.concatenate([z, mean_enc, logvar_enc], axis=1)      # [TB, 3*Z]
        pad = lat_out_ref.shape[1] - lat.shape[1]
        if pad:  # static
            lat = jnp.concatenate(
                [lat, jnp.zeros((lat.shape[0], pad), jnp.float32)], axis=1)
        lat_out_ref[...] = lat

    return vae_kernel


# -------------------- wrapper --------------------

def vae_forward(x, eps, params, *, batch_tile=None):
    """x: [B, Din] f32 (flattened), eps: [1, Z] f32, params: fused bf16 weights / f32 biases."""
    B, Din = x.shape
    H = params["enc2_w"].shape[0]            # true hidden width (300)
    Z = params["zmv_w"].shape[1] // 2
    if batch_tile is None:
        ncores = _num_tensorcores()
        if ncores > 1 and B % ncores == 0 and (B // ncores) % 8 == 0:
            batch_tile = B // ncores         # v7x: one grid step per TensorCore
        else:
            batch_tile = B                   # v5e/v6e: whole batch, grid=(1,)
    TB = batch_tile
    assert B % TB == 0, "batch must be divisible by the batch tile"
    LATP = ((3 * Z + 127) // 128) * 128      # lane-dense latent slab width

    x_bf = x.astype(jnp.bfloat16)            # halve x DMA bytes; kernel uses bf16 anyway

    enc_wb, dec_wb = [], []
    for name in ("enc1", "enc2", "zmv"):
        enc_wb += [params[name + "_w"], params[name + "_b"]]
    for name in ("dec1", "dec2", "pmv"):
        dec_wb += [params[name + "_w"], params[name + "_b"]]
    args = [x_bf, eps] + enc_wb + dec_wb

    def const_spec(a):
        # full-array block, constant index -> stays resident across grid steps
        return pl.BlockSpec(a.shape, lambda i: (0, 0))

    in_specs = ([pl.BlockSpec((TB, Din), lambda i: (i, 0)),    # x: tiled over batch
                 const_spec(eps)]
                + [const_spec(a) for a in enc_wb]
                # decoder-side params stay in HBM; DMA'd manually inside the kernel
                + [pl.BlockSpec(memory_space=pl.ANY) for _ in dec_wb])
    out_specs = (pl.BlockSpec((TB, 2 * Din), lambda i: (i, 0)),
                 pl.BlockSpec((TB, LATP), lambda i: (i, 0)))
    out_shape = (jax.ShapeDtypeStruct((B, 2 * Din), jnp.float32),   # p_mean | p_logvar
                 jax.ShapeDtypeStruct((B, LATP), jnp.float32))      # z | mean | logvar (+pad)

    scratch_shapes = ([pltpu.VMEM(a.shape, a.dtype) for a in dec_wb]
                      + [pltpu.SemaphoreType.DMA((len(dec_wb),))])

    p_out, lat_out = pl.pallas_call(
        make_vae_kernel(H),
        out_shape=out_shape,
        grid=(B // TB,),
        in_specs=in_specs,
        out_specs=out_specs,
        scratch_shapes=scratch_shapes,
        compiler_params=pltpu.CompilerParams(
            dimension_semantics=("parallel",),      # v7x: the two TCs split the batch
            vmem_limit_bytes=16 << 20),
    )(*args)

    p_mean = p_out[:, :Din]
    p_logvar = p_out[:, Din:]
    z = lat_out[:, :Z]
    mean_enc = lat_out[:, Z:2 * Z]
    logvar_enc = lat_out[:, 2 * Z:3 * Z]
    return p_mean, p_logvar, z, mean_enc, logvar_enc


# -------------------- deterministic parameter init (fused, lane-padded layout) --------------------

def xavier_uniform(key, fan_in, fan_out):
    # matches torch.nn.init.xavier_uniform_ for a Linear [out, in]; returned pre-transposed [in, out]
    bound = math.sqrt(6.0 / (fan_in + fan_out))
    return jax.random.uniform(key, (fan_in, fan_out), jnp.float32, -bound, bound)


def make_params(key, d_in, n_hidden, z_size):
    """Each entry fuses two parallel Linear layers into one [in, 2*fo_pad] weight.
    Gated layers use fo_pad = round_up(H, 128) so each half starts on a 128-lane
    boundary; pad columns hold zero weights/bias and are never read by the kernel."""
    Hp = ((n_hidden + 127) // 128) * 128     # 300 -> 384

    def fused_pair(k1, k2, fi, fo, fo_pad):
        def one(k):
            w = xavier_uniform(k, fi, fo)
            b = jnp.full((1, fo), 0.01, jnp.float32)        # bias.data.fill_(0.01)
            if fo_pad > fo:
                w = jnp.concatenate([w, jnp.zeros((fi, fo_pad - fo), jnp.float32)], axis=1)
                b = jnp.concatenate([b, jnp.zeros((1, fo_pad - fo), jnp.float32)], axis=1)
            return w, b
        w1, b1 = one(k1)
        w2, b2 = one(k2)
        return (jnp.concatenate([w1, w2], axis=1).astype(jnp.bfloat16),   # streamed as bf16
                jnp.concatenate([b1, b2], axis=1))                        # bias stays f32

    layer_shapes = {
        "enc1": (d_in, n_hidden, Hp),        # GatedDense(Din, H):  h | g
        "enc2": (n_hidden, n_hidden, Hp),    # GatedDense(H, H):    h | g
        "zmv":  (n_hidden, z_size, z_size),  # z_mean | z_logvar (tiny, no padding)
        "dec1": (z_size, n_hidden, Hp),      # GatedDense(Z, H):    h | g
        "dec2": (n_hidden, n_hidden, Hp),    # GatedDense(H, H):    h | g
        "pmv":  (n_hidden, d_in, d_in),      # p_mean | p_logvar (Din already 128-aligned)
    }
    params = {}
    keys = jax.random.split(key, 2 * len(layer_shapes))
    for idx, (name, (fi, fo, fo_pad)) in enumerate(sorted(layer_shapes.items())):
        w, b = fused_pair(keys[2 * idx], keys[2 * idx + 1], fi, fo, fo_pad)
        params[name + "_w"] = w
        params[name + "_b"] = b
    return params


# -------------------- pure-JAX reference (mirrors kernel's bf16/f32 numerics & layout) --------------------

def vae_reference(x, eps, p, n_hidden):
    bf16 = jnp.bfloat16

    def fused_lin(xv, w, b):
        return jnp.dot(xv.astype(bf16), w, preferred_element_type=jnp.float32) + b

    def gated(xv, w, b):
        y = fused_lin(xv, w, b)
        half = w.shape[1] // 2
        return y[:, :n_hidden] * jax.nn.sigmoid(y[:, half:half + n_hidden])

    xh = gated(x, p["enc1_w"], p["enc1_b"])
    xh = gated(xh, p["enc2_w"], p["enc2_b"])
    y = fused_lin(xh, p["zmv_w"], p["zmv_b"])
    Z = p["zmv_w"].shape[1] // 2
    mean_enc = y[:, :Z]
    logvar_enc = jnp.clip(y[:, Z:], -6.0, 2.0)
    z = mean_enc + jnp.exp(logvar_enc * 0.5) * eps
    zh = gated(z, p["dec1_w"], p["dec1_b"])
    zh = gated(zh, p["dec2_w"], p["dec2_b"])
    y = fused_lin(zh, p["pmv_w"], p["pmv_b"])
    D = p["pmv_w"].shape[1] // 2
    p_mean = jax.nn.sigmoid(y[:, :D])
    p_logvar = jnp.clip(y[:, D:], -4.5, 0.0)
    return p_mean, p_logvar, z, mean_enc, logvar_enc


# -------------------- main --------------------

if __name__ == "__main__":
    # config equivalent: input_size = (1, 16, 16) -> Din = 256; z1_size = 32; n_hidden = 300
    B, Din, H, Z = 128, 256, 300, 32

    key = jax.random.PRNGKey(0)
    k_x, k_eps, k_p = jax.random.split(key, 3)

    x = jax.random.uniform(k_x, (B, Din), jnp.float32)       # flattened input batch
    eps = jax.random.normal(k_eps, (1, Z), jnp.float32)      # torch.randn(z1_size), shared across batch
    params = make_params(k_p, Din, H, Z)

    outs = vae_forward(x, eps, params)                       # batch tile chosen per chip generation
    outs = jax.block_until_ready(outs)

    refs = vae_reference(x, eps, params, H)
    names = ["p_mean", "p_logvar", "z", "mean_enc", "logvar_enc"]
    for name, o, r in zip(names, outs, refs):
        assert o.shape == r.shape and o.dtype == r.dtype, name
        assert jnp.allclose(o, r, atol=5e-3, rtol=5e-3), f"mismatch vs reference: {name}"

    print("KERNEL_OK")
</pallas_src>

<mosaic_0001>
module attributes {stable_mosaic.version = 11 : i64} {
  func.func @vae_kernel(%arg0: i32, %arg1: memref<128x256xbf16, #tpu.memory_space<vmem>>, %arg2: memref<1x32xf32, #tpu.memory_space<vmem>>, %arg3: memref<256x768xbf16, #tpu.memory_space<vmem>>, %arg4: memref<1x768xf32, #tpu.memory_space<vmem>>, %arg5: memref<300x768xbf16, #tpu.memory_space<vmem>>, %arg6: memref<1x768xf32, #tpu.memory_space<vmem>>, %arg7: memref<300x64xbf16, #tpu.memory_space<vmem>>, %arg8: memref<1x64xf32, #tpu.memory_space<vmem>>, %arg9: memref<32x768xbf16, #tpu.memory_space<any>>, %arg10: memref<1x768xf32, #tpu.memory_space<any>>, %arg11: memref<300x768xbf16, #tpu.memory_space<any>>, %arg12: memref<1x768xf32, #tpu.memory_space<any>>, %arg13: memref<300x512xbf16, #tpu.memory_space<any>>, %arg14: memref<1x512xf32, #tpu.memory_space<any>>, %arg15: memref<128x512xf32, #tpu.memory_space<vmem>>, %arg16: memref<128x128xf32, #tpu.memory_space<vmem>>, %arg17: memref<32x768xbf16, #tpu.memory_space<vmem>>, %arg18: memref<1x768xf32, #tpu.memory_space<vmem>>, %arg19: memref<300x768xbf16, #tpu.memory_space<vmem>>, %arg20: memref<1x768xf32, #tpu.memory_space<vmem>>, %arg21: memref<300x512xbf16, #tpu.memory_space<vmem>>, %arg22: memref<1x512xf32, #tpu.memory_space<vmem>>, %arg23: memref<6x!tpu.dma_semaphore, #tpu.memory_space<semaphore_mem>>) attributes {dimension_semantics = [#tpu.dimension_semantics<parallel>], iteration_bounds = array<i64: 1>, scalar_prefetch = 0 : i64, scratch_operands = 7 : i64, tpu.core_type = #tpu.core_type<tc>, window_params = [{transform_indices = @transform_0, window_bounds = array<i64: 128, 256>}, {pipeline_mode = #tpu.pipeline_mode<synchronous>, transform_indices = @transform_1, window_bounds = array<i64: 1, 32>}, {pipeline_mode = #tpu.pipeline_mode<synchronous>, transform_indices = @transform_2, window_bounds = array<i64: 256, 768>}, {pipeline_mode = #tpu.pipeline_mode<synchronous>, transform_indices = @transform_3, window_bounds = array<i64: 1, 768>}, {pipeline_mode = #tpu.pipeline_mode<synchronous>, transform_indices = @transform_4, window_bounds = array<i64: 300, 768>}, {pipeline_mode = #tpu.pipeline_mode<synchronous>, transform_indices = @transform_5, window_bounds = array<i64: 1, 768>}, {pipeline_mode = #tpu.pipeline_mode<synchronous>, transform_indices = @transform_6, window_bounds = array<i64: 300, 64>}, {pipeline_mode = #tpu.pipeline_mode<synchronous>, transform_indices = @transform_7, window_bounds = array<i64: 1, 64>}, {}, {}, {}, {}, {}, {}, {transform_indices = @transform_14, window_bounds = array<i64: 128, 512>}, {transform_indices = @transform_15, window_bounds = array<i64: 128, 128>}]} {
    %c0_i32 = arith.constant 0 : i32
    %0 = tpu.memref_slice %arg23[%c0_i32] : memref<6x!tpu.dma_semaphore, #tpu.memory_space<semaphore_mem>> -> memref<1x!tpu.dma_semaphore, #tpu.memory_space<semaphore_mem>>
    %1 = tpu.memref_squeeze %0 : memref<1x!tpu.dma_semaphore, #tpu.memory_space<semaphore_mem>> -> memref<!tpu.dma_semaphore, #tpu.memory_space<semaphore_mem>>
    tpu.enqueue_dma source(%arg9 : memref<32x768xbf16, #tpu.memory_space<any>>) target(%arg17 : memref<32x768xbf16, #tpu.memory_space<vmem>>) target_semaphore(%1 : memref<!tpu.dma_semaphore, #tpu.memory_space<semaphore_mem>>)
    %c1_i32 = arith.constant 1 : i32
    %2 = tpu.memref_slice %arg23[%c1_i32] : memref<6x!tpu.dma_semaphore, #tpu.memory_space<semaphore_mem>> -> memref<1x!tpu.dma_semaphore, #tpu.memory_space<semaphore_mem>>
    %3 = tpu.memref_squeeze %2 : memref<1x!tpu.dma_semaphore, #tpu.memory_space<semaphore_mem>> -> memref<!tpu.dma_semaphore, #tpu.memory_space<semaphore_mem>>
    tpu.enqueue_dma source(%arg10 : memref<1x768xf32, #tpu.memory_space<any>>) target(%arg18 : memref<1x768xf32, #tpu.memory_space<vmem>>) target_semaphore(%3 : memref<!tpu.dma_semaphore, #tpu.memory_space<semaphore_mem>>)
    %c2_i32 = arith.constant 2 : i32
    %4 = tpu.memref_slice %arg23[%c2_i32] : memref<6x!tpu.dma_semaphore, #tpu.memory_space<semaphore_mem>> -> memref<1x!tpu.dma_semaphore, #tpu.memory_space<semaphore_mem>>
    %5 = tpu.memref_squeeze %4 : memref<1x!tpu.dma_semaphore, #tpu.memory_space<semaphore_mem>> -> memref<!tpu.dma_semaphore, #tpu.memory_space<semaphore_mem>>
    tpu.enqueue_dma source(%arg11 : memref<300x768xbf16, #tpu.memory_space<any>>) target(%arg19 : memref<300x768xbf16, #tpu.memory_space<vmem>>) target_semaphore(%5 : memref<!tpu.dma_semaphore, #tpu.memory_space<semaphore_mem>>)
    %c3_i32 = arith.constant 3 : i32
    %6 = tpu.memref_slice %arg23[%c3_i32] : memref<6x!tpu.dma_semaphore, #tpu.memory_space<semaphore_mem>> -> memref<1x!tpu.dma_semaphore, #tpu.memory_space<semaphore_mem>>
    %7 = tpu.memref_squeeze %6 : memref<1x!tpu.dma_semaphore, #tpu.memory_space<semaphore_mem>> -> memref<!tpu.dma_semaphore, #tpu.memory_space<semaphore_mem>>
    tpu.enqueue_dma source(%arg12 : memref<1x768xf32, #tpu.memory_space<any>>) target(%arg20 : memref<1x768xf32, #tpu.memory_space<vmem>>) target_semaphore(%7 : memref<!tpu.dma_semaphore, #tpu.memory_space<semaphore_mem>>)
    %c4_i32 = arith.constant 4 : i32
    %8 = tpu.memref_slice %arg23[%c4_i32] : memref<6x!tpu.dma_semaphore, #tpu.memory_space<semaphore_mem>> -> memref<1x!tpu.dma_semaphore, #tpu.memory_space<semaphore_mem>>
    %9 = tpu.memref_squeeze %8 : memref<1x!tpu.dma_semaphore, #tpu.memory_space<semaphore_mem>> -> memref<!tpu.dma_semaphore, #tpu.memory_space<semaphore_mem>>
    tpu.enqueue_dma source(%arg13 : memref<300x512xbf16, #tpu.memory_space<any>>) target(%arg21 : memref<300x512xbf16, #tpu.memory_space<vmem>>) target_semaphore(%9 : memref<!tpu.dma_semaphore, #tpu.memory_space<semaphore_mem>>)
    %c5_i32 = arith.constant 5 : i32
    %10 = tpu.memref_slice %arg23[%c5_i32] : memref<6x!tpu.dma_semaphore, #tpu.memory_space<semaphore_mem>> -> memref<1x!tpu.dma_semaphore, #tpu.memory_space<semaphore_mem>>
    %11 = tpu.memref_squeeze %10 : memref<1x!tpu.dma_semaphore, #tpu.memory_space<semaphore_mem>> -> memref<!tpu.dma_semaphore, #tpu.memory_space<semaphore_mem>>
    tpu.enqueue_dma source(%arg14 : memref<1x512xf32, #tpu.memory_space<any>>) target(%arg22 : memref<1x512xf32, #tpu.memory_space<vmem>>) target_semaphore(%11 : memref<!tpu.dma_semaphore, #tpu.memory_space<semaphore_mem>>)
    %c0 = arith.constant 0 : index
    %c0_0 = arith.constant 0 : index
    %12 = vector.load %arg1[%c0, %c0_0] : memref<128x256xbf16, #tpu.memory_space<vmem>>, vector<128x256xbf16>
    %c0_1 = arith.constant 0 : index
    %c0_2 = arith.constant 0 : index
    %13 = vector.load %arg3[%c0_1, %c0_2] : memref<256x768xbf16, #tpu.memory_space<vmem>>, vector<256x768xbf16>
    %cst = arith.constant dense<0.000000e+00> : vector<128x768xf32>
    %14 = tpu.matmul %12, %13, %cst {dimension_numbers = #tpu.dot_dimension_numbers<[1], [0], [0], [1], [0, 0, 1, 1], [], []>} : vector<128x256xbf16>, vector<256x768xbf16>, vector<128x768xf32> -> vector<128x768xf32>
    %c0_3 = arith.constant 0 : index
    %c0_4 = arith.constant 0 : index
    %15 = vector.load %arg4[%c0_3, %c0_4] : memref<1x768xf32, #tpu.memory_space<vmem>>, vector<1x768xf32>
    %16 = vector.broadcast %15 : vector<1x768xf32> to vector<128x768xf32>
    %17 = arith.addf %14, %16 : vector<128x768xf32>
    %18 = vector.extract_strided_slice %17 {offsets = [0, 0], sizes = [128, 300], strides = [1, 1]} : vector<128x768xf32> to vector<128x300xf32>
    %19 = vector.extract_strided_slice %17 {offsets = [0, 384], sizes = [128, 300], strides = [1, 1]} : vector<128x768xf32> to vector<128x300xf32>
    %20 = arith.negf %19 : vector<128x300xf32>
    %21 = math.exp %20 : vector<128x300xf32>
    %cst_5 = arith.constant 1.000000e+00 : f32
    %22 = vector.broadcast %cst_5 : f32 to vector<128x300xf32>
    %23 = arith.addf %22, %21 : vector<128x300xf32>
    %24 = arith.divf %22, %23 : vector<128x300xf32>
    %25 = arith.mulf %18, %24 : vector<128x300xf32>
    %26 = arith.truncf %25 : vector<128x300xf32> to vector<128x300xbf16>
    %c0_6 = arith.constant 0 : index
    %c0_7 = arith.constant 0 : index
    %27 = vector.load %arg5[%c0_6, %c0_7] : memref<300x768xbf16, #tpu.memory_space<vmem>>, vector<300x768xbf16>
    %cst_8 = arith.constant dense<0.000000e+00> : vector<128x768xf32>
    %28 = tpu.matmul %26, %27, %cst_8 {dimension_numbers = #tpu.dot_dimension_numbers<[1], [0], [0], [1], [0, 0, 1, 1], [], []>} : vector<128x300xbf16>, vector<300x768xbf16>, vector<128x768xf32> -> vector<128x768xf32>
    %c0_9 = arith.constant 0 : index
    %c0_10 = arith.constant 0 : index
    %29 = vector.load %arg6[%c0_9, %c0_10] : memref<1x768xf32, #tpu.memory_space<vmem>>, vector<1x768xf32>
    %30 = vector.broadcast %29 : vector<1x768xf32> to vector<128x768xf32>
    %31 = arith.addf %28, %30 : vector<128x768xf32>
    %32 = vector.extract_strided_slice %31 {offsets = [0, 0], sizes = [128, 300], strides = [1, 1]} : vector<128x768xf32> to vector<128x300xf32>
    %33 = vector.extract_strided_slice %31 {offsets = [0, 384], sizes = [128, 300], strides = [1, 1]} : vector<128x768xf32> to vector<128x300xf32>
    %34 = arith.negf %33 : vector<128x300xf32>
    %35 = math.exp %34 : vector<128x300xf32>
    %cst_11 = arith.constant 1.000000e+00 : f32
    %36 = vector.broadcast %cst_11 : f32 to vector<128x300xf32>
    %37 = arith.addf %36, %35 : vector<128x300xf32>
    %38 = arith.divf %36, %37 : vector<128x300xf32>
    %39 = arith.mulf %32, %38 : vector<128x300xf32>
    %40 = arith.truncf %39 : vector<128x300xf32> to vector<128x300xbf16>
    %c0_12 = arith.constant 0 : index
    %c0_13 = arith.constant 0 : index
    %41 = vector.load %arg7[%c0_12, %c0_13] : memref<300x64xbf16, #tpu.memory_space<vmem>>, vector<300x64xbf16>
    %cst_14 = arith.constant dense<0.000000e+00> : vector<128x64xf32>
    %42 = tpu.matmul %40, %41, %cst_14 {dimension_numbers = #tpu.dot_dimension_numbers<[1], [0], [0], [1], [0, 0, 1, 1], [], []>} : vector<128x300xbf16>, vector<300x64xbf16>, vector<128x64xf32> -> vector<128x64xf32>
    %c0_15 = arith.constant 0 : index
    %c0_16 = arith.constant 0 : index
    %43 = vector.load %arg8[%c0_15, %c0_16] : memref<1x64xf32, #tpu.memory_space<vmem>>, vector<1x64xf32>
    %44 = vector.broadcast %43 : vector<1x64xf32> to vector<128x64xf32>
    %45 = arith.addf %42, %44 : vector<128x64xf32>
    %46 = vector.extract_strided_slice %45 {offsets = [0, 0], sizes = [128, 32], strides = [1, 1]} : vector<128x64xf32> to vector<128x32xf32>
    %47 = vector.extract_strided_slice %45 {offsets = [0, 32], sizes = [128, 32], strides = [1, 1]} : vector<128x64xf32> to vector<128x32xf32>
    %cst_17 = arith.constant -6.000000e+00 : f32
    %cst_18 = arith.constant 2.000000e+00 : f32
    %48 = vector.broadcast %cst_17 : f32 to vector<128x32xf32>
    %49 = arith.maximumf %48, %47 : vector<128x32xf32>
    %50 = vector.broadcast %cst_18 : f32 to vector<128x32xf32>
    %51 = arith.minimumf %50, %49 : vector<128x32xf32>
    %cst_19 = arith.constant 5.000000e-01 : f32
    %52 = vector.broadcast %cst_19 : f32 to vector<128x32xf32>
    %53 = arith.mulf %51, %52 : vector<128x32xf32>
    %54 = math.exp %53 : vector<128x32xf32>
    %c0_20 = arith.constant 0 : index
    %c0_21 = arith.constant 0 : index
    %55 = vector.load %arg2[%c0_20, %c0_21] : memref<1x32xf32, #tpu.memory_space<vmem>>, vector<1x32xf32>
    %56 = vector.broadcast %55 : vector<1x32xf32> to vector<128x32xf32>
    %57 = arith.mulf %54, %56 : vector<128x32xf32>
    %58 = arith.addf %46, %57 : vector<128x32xf32>
    %c0_i32_22 = arith.constant 0 : i32
    %59 = tpu.memref_slice %arg23[%c0_i32_22] : memref<6x!tpu.dma_semaphore, #tpu.memory_space<semaphore_mem>> -> memref<1x!tpu.dma_semaphore, #tpu.memory_space<semaphore_mem>>
    %60 = tpu.memref_squeeze %59 : memref<1x!tpu.dma_semaphore, #tpu.memory_space<semaphore_mem>> -> memref<!tpu.dma_semaphore, #tpu.memory_space<semaphore_mem>>
    tpu.wait_dma2 semaphore(%60 : memref<!tpu.dma_semaphore, #tpu.memory_space<semaphore_mem>>) src(%arg9 : memref<32x768xbf16, #tpu.memory_space<any>>) dst(%arg17 : memref<32x768xbf16, #tpu.memory_space<vmem>>)
    %c1_i32_23 = arith.constant 1 : i32
    %61 = tpu.memref_slice %arg23[%c1_i32_23] : memref<6x!tpu.dma_semaphore, #tpu.memory_space<semaphore_mem>> -> memref<1x!tpu.dma_semaphore, #tpu.memory_space<semaphore_mem>>
    %62 = tpu.memref_squeeze %61 : memref<1x!tpu.dma_semaphore, #tpu.memory_space<semaphore_mem>> -> memref<!tpu.dma_semaphore, #tpu.memory_space<semaphore_mem>>
    tpu.wait_dma2 semaphore(%62 : memref<!tpu.dma_semaphore, #tpu.memory_space<semaphore_mem>>) src(%arg10 : memref<1x768xf32, #tpu.memory_space<any>>) dst(%arg18 : memref<1x768xf32, #tpu.memory_space<vmem>>)
    %c2_i32_24 = arith.constant 2 : i32
    %63 = tpu.memref_slice %arg23[%c2_i32_24] : memref<6x!tpu.dma_semaphore, #tpu.memory_space<semaphore_mem>> -> memref<1x!tpu.dma_semaphore, #tpu.memory_space<semaphore_mem>>
    %64 = tpu.memref_squeeze %63 : memref<1x!tpu.dma_semaphore, #tpu.memory_space<semaphore_mem>> -> memref<!tpu.dma_semaphore, #tpu.memory_space<semaphore_mem>>
    tpu.wait_dma2 semaphore(%64 : memref<!tpu.dma_semaphore, #tpu.memory_space<semaphore_mem>>) src(%arg11 : memref<300x768xbf16, #tpu.memory_space<any>>) dst(%arg19 : memref<300x768xbf16, #tpu.memory_space<vmem>>)
    %c3_i32_25 = arith.constant 3 : i32
    %65 = tpu.memref_slice %arg23[%c3_i32_25] : memref<6x!tpu.dma_semaphore, #tpu.memory_space<semaphore_mem>> -> memref<1x!tpu.dma_semaphore, #tpu.memory_space<semaphore_mem>>
    %66 = tpu.memref_squeeze %65 : memref<1x!tpu.dma_semaphore, #tpu.memory_space<semaphore_mem>> -> memref<!tpu.dma_semaphore, #tpu.memory_space<semaphore_mem>>
    tpu.wait_dma2 semaphore(%66 : memref<!tpu.dma_semaphore, #tpu.memory_space<semaphore_mem>>) src(%arg12 : memref<1x768xf32, #tpu.memory_space<any>>) dst(%arg20 : memref<1x768xf32, #tpu.memory_space<vmem>>)
    %c4_i32_26 = arith.constant 4 : i32
    %67 = tpu.memref_slice %arg23[%c4_i32_26] : memref<6x!tpu.dma_semaphore, #tpu.memory_space<semaphore_mem>> -> memref<1x!tpu.dma_semaphore, #tpu.memory_space<semaphore_mem>>
    %68 = tpu.memref_squeeze %67 : memref<1x!tpu.dma_semaphore, #tpu.memory_space<semaphore_mem>> -> memref<!tpu.dma_semaphore, #tpu.memory_space<semaphore_mem>>
    tpu.wait_dma2 semaphore(%68 : memref<!tpu.dma_semaphore, #tpu.memory_space<semaphore_mem>>) src(%arg13 : memref<300x512xbf16, #tpu.memory_space<any>>) dst(%arg21 : memref<300x512xbf16, #tpu.memory_space<vmem>>)
    %c5_i32_27 = arith.constant 5 : i32
    %69 = tpu.memref_slice %arg23[%c5_i32_27] : memref<6x!tpu.dma_semaphore, #tpu.memory_space<semaphore_mem>> -> memref<1x!tpu.dma_semaphore, #tpu.memory_space<semaphore_mem>>
    %70 = tpu.memref_squeeze %69 : memref<1x!tpu.dma_semaphore, #tpu.memory_space<semaphore_mem>> -> memref<!tpu.dma_semaphore, #tpu.memory_space<semaphore_mem>>
    tpu.wait_dma2 semaphore(%70 : memref<!tpu.dma_semaphore, #tpu.memory_space<semaphore_mem>>) src(%arg14 : memref<1x512xf32, #tpu.memory_space<any>>) dst(%arg22 : memref<1x512xf32, #tpu.memory_space<vmem>>)
    %71 = arith.truncf %58 : vector<128x32xf32> to vector<128x32xbf16>
    %c0_28 = arith.constant 0 : index
    %c0_29 = arith.constant 0 : index
    %72 = vector.load %arg17[%c0_28, %c0_29] : memref<32x768xbf16, #tpu.memory_space<vmem>>, vector<32x768xbf16>
    %cst_30 = arith.constant dense<0.000000e+00> : vector<128x768xf32>
    %73 = tpu.matmul %71, %72, %cst_30 {dimension_numbers = #tpu.dot_dimension_numbers<[1], [0], [0], [1], [0, 0, 1, 1], [], []>} : vector<128x32xbf16>, vector<32x768xbf16>, vector<128x768xf32> -> vector<128x768xf32>
    %c0_31 = arith.constant 0 : index
    %c0_32 = arith.constant 0 : index
    %74 = vector.load %arg18[%c0_31, %c0_32] : memref<1x768xf32, #tpu.memory_space<vmem>>, vector<1x768xf32>
    %75 = vector.broadcast %74 : vector<1x768xf32> to vector<128x768xf32>
    %76 = arith.addf %73, %75 : vector<128x768xf32>
    %77 = vector.extract_strided_slice %76 {offsets = [0, 0], sizes = [128, 300], strides = [1, 1]} : vector<128x768xf32> to vector<128x300xf32>
    %78 = vector.extract_strided_slice %76 {offsets = [0, 384], sizes = [128, 300], strides = [1, 1]} : vector<128x768xf32> to vector<128x300xf32>
    %79 = arith.negf %78 : vector<128x300xf32>
    %80 = math.exp %79 : vector<128x300xf32>
    %cst_33 = arith.constant 1.000000e+00 : f32
    %81 = vector.broadcast %cst_33 : f32 to vector<128x300xf32>
    %82 = arith.addf %81, %80 : vector<128x300xf32>
    %83 = arith.divf %81, %82 : vector<128x300xf32>
    %84 = arith.mulf %77, %83 : vector<128x300xf32>
    %85 = arith.truncf %84 : vector<128x300xf32> to vector<128x300xbf16>
    %c0_34 = arith.constant 0 : index
    %c0_35 = arith.constant 0 : index
    %86 = vector.load %arg19[%c0_34, %c0_35] : memref<300x768xbf16, #tpu.memory_space<vmem>>, vector<300x768xbf16>
    %cst_36 = arith.constant dense<0.000000e+00> : vector<128x768xf32>
    %87 = tpu.matmul %85, %86, %cst_36 {dimension_numbers = #tpu.dot_dimension_numbers<[1], [0], [0], [1], [0, 0, 1, 1], [], []>} : vector<128x300xbf16>, vector<300x768xbf16>, vector<128x768xf32> -> vector<128x768xf32>
    %c0_37 = arith.constant 0 : index
    %c0_38 = arith.constant 0 : index
    %88 = vector.load %arg20[%c0_37, %c0_38] : memref<1x768xf32, #tpu.memory_space<vmem>>, vector<1x768xf32>
    %89 = vector.broadcast %88 : vector<1x768xf32> to vector<128x768xf32>
    %90 = arith.addf %87, %89 : vector<128x768xf32>
    %91 = vector.extract_strided_slice %90 {offsets = [0, 0], sizes = [128, 300], strides = [1, 1]} : vector<128x768xf32> to vector<128x300xf32>
    %92 = vector.extract_strided_slice %90 {offsets = [0, 384], sizes = [128, 300], strides = [1, 1]} : vector<128x768xf32> to vector<128x300xf32>
    %93 = arith.negf %92 : vector<128x300xf32>
    %94 = math.exp %93 : vector<128x300xf32>
    %cst_39 = arith.constant 1.000000e+00 : f32
    %95 = vector.broadcast %cst_39 : f32 to vector<128x300xf32>
    %96 = arith.addf %95, %94 : vector<128x300xf32>
    %97 = arith.divf %95, %96 : vector<128x300xf32>
    %98 = arith.mulf %91, %97 : vector<128x300xf32>
    %99 = arith.truncf %98 : vector<128x300xf32> to vector<128x300xbf16>
    %c0_40 = arith.constant 0 : index
    %c0_41 = arith.constant 0 : index
    %100 = vector.load %arg21[%c0_40, %c0_41] : memref<300x512xbf16, #tpu.memory_space<vmem>>, vector<300x512xbf16>
    %cst_42 = arith.constant dense<0.000000e+00> : vector<128x512xf32>
    %101 = tpu.matmul %99, %100, %cst_42 {dimension_numbers = #tpu.dot_dimension_numbers<[1], [0], [0], [1], [0, 0, 1, 1], [], []>} : vector<128x300xbf16>, vector<300x512xbf16>, vector<128x512xf32> -> vector<128x512xf32>
    %c0_43 = arith.constant 0 : index
    %c0_44 = arith.constant 0 : index
    %102 = vector.load %arg22[%c0_43, %c0_44] : memref<1x512xf32, #tpu.memory_space<vmem>>, vector<1x512xf32>
    %103 = vector.broadcast %102 : vector<1x512xf32> to vector<128x512xf32>
    %104 = arith.addf %101, %103 : vector<128x512xf32>
    %105 = vector.extract_strided_slice %104 {offsets = [0, 0], sizes = [128, 256], strides = [1, 1]} : vector<128x512xf32> to vector<128x256xf32>
    %106 = arith.negf %105 : vector<128x256xf32>
    %107 = math.exp %106 : vector<128x256xf32>
    %cst_45 = arith.constant 1.000000e+00 : f32
    %108 = vector.broadcast %cst_45 : f32 to vector<128x256xf32>
    %109 = arith.addf %108, %107 : vector<128x256xf32>
    %110 = arith.divf %108, %109 : vector<128x256xf32>
    %111 = vector.extract_strided_slice %104 {offsets = [0, 256], sizes = [128, 256], strides = [1, 1]} : vector<128x512xf32> to vector<128x256xf32>
    %cst_46 = arith.constant -4.500000e+00 : f32
    %cst_47 = arith.constant 0.000000e+00 : f32
    %112 = vector.broadcast %cst_46 : f32 to vector<128x256xf32>
    %113 = arith.maximumf %112, %111 : vector<128x256xf32>
    %114 = vector.broadcast %cst_47 : f32 to vector<128x256xf32>
    %115 = arith.minimumf %114, %113 : vector<128x256xf32>
    %116 = tpu.concatenate %110, %115 in 1 : vector<128x256xf32>, vector<128x256xf32> -> vector<128x512xf32>
    %c0_48 = arith.constant 0 : index
    %c0_49 = arith.constant 0 : index
    %117 = vector.load %arg15[%c0_48, %c0_49] : memref<128x512xf32, #tpu.memory_space<vmem>>, vector<128x512xf32>
    tpu.vector_store %arg15[%c0_48, %c0_49], %116 {strides = array<i32>} : memref<128x512xf32, #tpu.memory_space<vmem>>, vector<128x512xf32>,
    %118 = tpu.concatenate %58, %46, %51 in 1 : vector<128x32xf32>, vector<128x32xf32>, vector<128x32xf32> -> vector<128x96xf32>
    %cst_50 = arith.constant 0.000000e+00 : f32
    %119 = vector.broadcast %cst_50 : f32 to vector<128x32xf32>
    %120 = tpu.concatenate %118, %119 in 1 : vector<128x96xf32>, vector<128x32xf32> -> vector<128x128xf32>
    %c0_51 = arith.constant 0 : index
    %c0_52 = arith.constant 0 : index
    %121 = vector.load %arg16[%c0_51, %c0_52] : memref<128x128xf32, #tpu.memory_space<vmem>>, vector<128x128xf32>
    tpu.vector_store %arg16[%c0_51, %c0_52], %120 {strides = array<i32>} : memref<128x128xf32, #tpu.memory_space<vmem>>, vector<128x128xf32>,
    return
  }
  func.func @transform_0(%arg0: i32) -> (i32, i32) {
    %c0_i32 = arith.constant 0 : i32
    %c0_i32_0 = arith.constant 0 : i32
    return %arg0, %c0_i32 : i32, i32
  }
  func.func @transform_1(%arg0: i32) -> (i32, i32) {
    %c0_i32 = arith.constant 0 : i32
    %c0_i32_0 = arith.constant 0 : i32
    %c0_i32_1 = arith.constant 0 : i32
    return %c0_i32, %c0_i32_0 : i32, i32
  }
  func.func @transform_2(%arg0: i32) -> (i32, i32) {
    %c0_i32 = arith.constant 0 : i32
    %c0_i32_0 = arith.constant 0 : i32
    %c0_i32_1 = arith.constant 0 : i32
    return %c0_i32, %c0_i32_0 : i32, i32
  }
  func.func @transform_3(%arg0: i32) -> (i32, i32) {
    %c0_i32 = arith.constant 0 : i32
    %c0_i32_0 = arith.constant 0 : i32
    %c0_i32_1 = arith.constant 0 : i32
    return %c0_i32, %c0_i32_0 : i32, i32
  }
  func.func @transform_4(%arg0: i32) -> (i32, i32) {
    %c0_i32 = arith.constant 0 : i32
    %c0_i32_0 = arith.constant 0 : i32
    %c0_i32_1 = arith.constant 0 : i32
    return %c0_i32, %c0_i32_0 : i32, i32
  }
  func.func @transform_5(%arg0: i32) -> (i32, i32) {
    %c0_i32 = arith.constant 0 : i32
    %c0_i32_0 = arith.constant 0 : i32
    %c0_i32_1 = arith.constant 0 : i32
    return %c0_i32, %c0_i32_0 : i32, i32
  }
  func.func @transform_6(%arg0: i32) -> (i32, i32) {
    %c0_i32 = arith.constant 0 : i32
    %c0_i32_0 = arith.constant 0 : i32
    %c0_i32_1 = arith.constant 0 : i32
    return %c0_i32, %c0_i32_0 : i32, i32
  }
  func.func @transform_7(%arg0: i32) -> (i32, i32) {
    %c0_i32 = arith.constant 0 : i32
    %c0_i32_0 = arith.constant 0 : i32
    %c0_i32_1 = arith.constant 0 : i32
    return %c0_i32, %c0_i32_0 : i32, i32
  }
  func.func @transform_14(%arg0: i32) -> (i32, i32) {
    %c0_i32 = arith.constant 0 : i32
    %c0_i32_0 = arith.constant 0 : i32
    return %arg0, %c0_i32 : i32, i32
  }
  func.func @transform_15(%arg0: i32) -> (i32, i32) {
    %c0_i32 = arith.constant 0 : i32
    %c0_i32_0 = arith.constant 0 : i32
    return %arg0, %c0_i32 : i32, i32
  }
}

</mosaic_0001>

<bundles_post_ra>
// kernel: tpu_custom_call.1
= control target key start
LH: loop header
LB: loop body
LE: loop exit
PB: predicated region body
PF: predicated region fallthrough
CT: control target
= control target key end

     0   :  { %21 = vsyncpa [#allocation10], 0  ;;  %s13946_s0 = inlined_call_operand.vmem [shape: bf16[128,256], index: 0, kind: input, shape index: {}]   ;;  %s13947_s1 = inlined_call_operand.vmem [shape: f32[1,32], index: 1, kind: input, shape index: {}]   ;;  %s13948_s2 = inlined_call_operand.hbm [shape: bf16[256,768], index: 2, kind: input, shape index: {}]   ;;  %s13949_s3 = inlined_call_operand.vmem [shape: f32[1,768], index: 3, kind: input, shape index: {}]   ;;  %s13950_s4 = inlined_call_operand.hbm [shape: bf16[300,768], index: 4, kind: input, shape index: {}]   ;;  %s13951_s5 = inlined_call_operand.vmem [shape: f32[1,768], index: 5, kind: input, shape index: {}]   ;;  %s13952_s6 = inlined_call_operand.vmem [shape: bf16[300,64], index: 6, kind: input, shape index: {}]   ;;  %s13953_s7 = inlined_call_operand.vmem [shape: f32[1,64], index: 7, kind: input, shape index: {}]   ;;  %s13954_s8 = inlined_call_operand.vmem [shape: bf16[32,768], index: 8, kind: input, shape index: {}]   ;;  %s13955_s9 = inlined_call_operand.vmem [shape: f32[1,768], index: 9, kind: input, shape index: {}]   ;;  %s13956_s10 = inlined_call_operand.hbm [shape: bf16[300,768], index: 10, kind: input, shape index: {}]   ;;  %s13957_s11 = inlined_call_operand.vmem [shape: f32[1,768], index: 11, kind: input, shape index: {}]   ;;  %s13958_s12 = inlined_call_operand.hbm [shape: bf16[300,512], index: 12, kind: input, shape index: {}]   ;;  %s13959_s13 = inlined_call_operand.vmem [shape: f32[1,512], index: 13, kind: input, shape index: {}]   ;;  %s13960_s14 = inlined_call_operand.hbm [shape: f32[128,512], index: 14, kind: output, shape index: {0}]   ;;  %s13961_s15 = inlined_call_operand.hbm [shape: f32[128,128], index: 15, kind: output, shape index: {1}]  }
   0x1   :  { %22 = vsyncpa [#allocation13], 0 }
   0x2   :  { %23 = vsyncpa [#allocation11], 0 }
   0x3   :  { %24 = vsyncpa [#allocation16], 0  ;;  %s11444_s18 = smov [#allocation9]   ;;  %s11292_s22 = scalar_lea.hbm %s13948_s2, 12288 }
   0x4   :  { %s34_s19 = sshll.u32 %s11444_s18, 4  ;;  %p11293_p0 = scmp.ne.s32.totalorder %s13948_s2, %s11292_s22  ;;  %s35_s19 = int_to_ptr.vmem [resolvable:$true] %s34_s19 }
   0x5   :  { %p11296_p1 = scmp.lt.u32.totalorder %s11292_s22, %s13948_s2 }
   0x7   :  { %p11298_p2 = pnand %p11296_p1, %p11293_p0 }
   0x9   :  { %11301 = shalt.err (!%p11298_p2)
}
   0xa   :  { %s11302_s27 = scalar_lea.vmem %s35_s19, 12288  ;;  %p11307_p4 = scmp.lt.s32.totalorder %s35_s19, %s35_s19 }
   0xb   :  { %p11303_p3 = scmp.ne.s32.totalorder %s35_s19, %s11302_s27  ;;  %p11308_p5 = scmp.lt.s32.totalorder %s11302_s27, %s11302_s27 }
   0xd   :  { %p11309_p6 = por %p11308_p5, %p11307_p4 }
   0xf   :  { %p11310_p7 = pnand %p11309_p6, %p11303_p3 }
  0x11   :  { %11313 = shalt.err (!%p11310_p7)
}
  0x12   :  { %s11445_s28 = smov 384   ;;  %s11446_s29 = smov 24  }
  0x13   :  { %40 = dma.hbm_to_vmem [thread:$0]  %s13948_s2, 12288, %s35_s19, [#allocation10], %s11445_s28, %s11445_s28, %s11446_s29  }
  0x14   :  { %s11447_s17 = smov [#allocation12]   ;;  %s11314_s22 = scalar_lea.hbm %s13950_s4, 14592 }
  0x15   :  { %s48_s18 = sshll.u32 %s11447_s17, 4  ;;  %p11315_p8 = scmp.ne.s32.totalorder %s13950_s4, %s11314_s22  ;;  %s49_s18 = int_to_ptr.vmem [resolvable:$true] %s48_s18 }
  0x16   :  { %p11318_p9 = scmp.lt.u32.totalorder %s11314_s22, %s13950_s4 }
  0x18   :  { %p11320_p10 = pnand %p11318_p9, %p11315_p8 }
  0x1a   :  { %11323 = shalt.err (!%p11320_p10)
}
  0x1b   :  { %s11324_s27 = scalar_lea.vmem %s49_s18, 14592  ;;  %p11329_p12 = scmp.lt.s32.totalorder %s49_s18, %s49_s18 }
  0x1c   :  { %p11325_p11 = scmp.ne.s32.totalorder %s49_s18, %s11324_s27  ;;  %p11330_p13 = scmp.lt.s32.totalorder %s11324_s27, %s11324_s27 }
  0x1e   :  { %p11331_p0 = por %p11330_p13, %p11329_p12 }
  0x20   :  { %p11332_p1 = pnand %p11331_p0, %p11325_p11 }
  0x22   :  { %11335 = shalt.err (!%p11332_p1)
}
  0x23   :  { %54 = dma.hbm_to_vmem [thread:$0]  %s13950_s4, 14592, %s49_s18, [#allocation13], %s11445_s28, %s11445_s28, %s11446_s29  }
  0x24   :  { %11424 = dma.done.wait [#allocation10], 12288  }
  0x25   :  { %11425 = vsyncadd [#allocation10], 4294955008 }
  0x26   :  { %11426 = dma.done.wait [#allocation13], 14592  }
  0x27   :  { %11427 = vsyncadd [#allocation13], 4294952704  ;;  %v85_v0 = vld [vmem:[%s13954_s8] sm:$0xf]  ;;  %v87_v1 = vld [vmem:[%s13954_s8 + $0x18] sm:$0xf] }
  0x28   :  { %v89_v2 = vld [vmem:[%s13954_s8 + $0x4] sm:$0xf]  ;;  %86 = vst [vmem:[#allocation2] sm:$0xf] %v85_v0  ;;  %88 = vst [vmem:[#allocation2 + $0x4] sm:$0xf] %v87_v1 }
  0x29   :  { %90 = vst [vmem:[#allocation2 + $0x8] sm:$0xf] %v89_v2  ;;  %v91_v3 = vld [vmem:[%s13954_s8 + $0x1c] sm:$0xf]  ;;  %v93_v4 = vld [vmem:[%s13954_s8 + $0x8] sm:$0xf] }
  0x2a   :  { %v95_v5 = vld [vmem:[%s13954_s8 + $0x20] sm:$0xf]  ;;  %92 = vst [vmem:[#allocation2 + $0xc] sm:$0xf] %v91_v3  ;;  %94 = vst [vmem:[#allocation2 + $0x10] sm:$0xf] %v93_v4 }
  0x2b   :  { %96 = vst [vmem:[#allocation2 + $0x14] sm:$0xf] %v95_v5  ;;  %v97_v6 = vld [vmem:[%s13954_s8 + $0xc] sm:$0xf]  ;;  %v99_v7 = vld [vmem:[%s13954_s8 + $0x24] sm:$0xf] }
  0x2c   :  { %v101_v8 = vld [vmem:[%s13954_s8 + $0x10] sm:$0xf]  ;;  %98 = vst [vmem:[#allocation2 + $0x18] sm:$0xf] %v97_v6  ;;  %100 = vst [vmem:[#allocation2 + $0x1c] sm:$0xf] %v99_v7 }
  0x2d   :  { %102 = vst [vmem:[#allocation2 + $0x20] sm:$0xf] %v101_v8  ;;  %v103_v9 = vld [vmem:[%s13954_s8 + $0x28] sm:$0xf]  ;;  %v105_v10 = vld [vmem:[%s13954_s8 + $0x14] sm:$0xf] }
  0x2e   :  { %v107_v11 = vld [vmem:[%s13954_s8 + $0x2c] sm:$0xff]   ;;  %104 = vst [vmem:[#allocation2 + $0x24] sm:$0xf] %v103_v9  ;;  %106 = vst [vmem:[#allocation2 + $0x28] sm:$0xf] %v105_v10 }
  0x2f   :  { %108 = vst [vmem:[#allocation2 + $0x2c] sm:$0xff] %v107_v11   ;;  %v111_v12 = vld [vmem:[%s13954_s8 + $0x48] sm:$0xf]  ;;  %v113_v13 = vld [vmem:[%s13954_s8 + $0x34] sm:$0xf] }
  0x30   :  { %v115_v14 = vld [vmem:[%s13954_s8 + $0x4c] sm:$0xf]  ;;  %112 = vst [vmem:[#allocation2 + $0x34] sm:$0xf] %v111_v12  ;;  %114 = vst [vmem:[#allocation2 + $0x38] sm:$0xf] %v113_v13 }
  0x31   :  { %116 = vst [vmem:[#allocation2 + $0x3c] sm:$0xf] %v115_v14  ;;  %v117_v15 = vld [vmem:[%s13954_s8 + $0x38] sm:$0xf]  ;;  %v119_v16 = vld [vmem:[%s13954_s8 + $0x50] sm:$0xf] }
  0x32   :  { %v121_v17 = vld [vmem:[%s13954_s8 + $0x3c] sm:$0xf]  ;;  %118 = vst [vmem:[#allocation2 + $0x40] sm:$0xf] %v117_v15  ;;  %120 = vst [vmem:[#allocation2 + $0x44] sm:$0xf] %v119_v16 }
  0x33   :  { %122 = vst [vmem:[#allocation2 + $0x48] sm:$0xf] %v121_v17  ;;  %v123_v18 = vld [vmem:[%s13954_s8 + $0x54] sm:$0xf]  ;;  %v125_v19 = vld [vmem:[%s13954_s8 + $0x40] sm:$0xf] }
  0x34   :  { %v127_v20 = vld [vmem:[%s13954_s8 + $0x58] sm:$0xf]  ;;  %124 = vst [vmem:[#allocation2 + $0x4c] sm:$0xf] %v123_v18  ;;  %126 = vst [vmem:[#allocation2 + $0x50] sm:$0xf] %v125_v19 }
  0x35   :  { %128 = vst [vmem:[#allocation2 + $0x54] sm:$0xf] %v127_v20  ;;  %v129_v21 = vld [vmem:[%s13954_s8 + $0x44] sm:$0xf]  ;;  %v131_v22 = vld [vmem:[%s13954_s8 + $0x5c] sm:$0xf] }
  0x36   :  { %130 = vst [vmem:[#allocation2 + $0x58] sm:$0xf] %v129_v21  ;;  %132 = vst [vmem:[#allocation2 + $0x5c] sm:$0xf] %v131_v22 }
  0x37   :  { %211 = vsyncadd [#allocation8], 1536  ;;  %v230_v23 = vld [vmem:[%s13955_s9] sm:$0x3f] }
  0x38   :  { %231 = vst [vmem:[#allocation3] sm:$0x3f] %v230_v23 }
  0x39   :  { %256 = vsyncadd [#allocation8 + $0x1], 96  ;;  %v287_v24 = vld [vmem:[%s13957_s11] sm:$0x3f]  ;;  %s11448_s19 = smov [#allocation4]   ;;  %s11336_s8 = scalar_lea.hbm %s13956_s10, 14592 }
  0x3a   :  { %s265_s30 = sshll.u32 %s11448_s19, 4  ;;  %288 = vst [vmem:[#allocation5] sm:$0x3f] %v287_v24  ;;  %p11337_p2 = scmp.ne.s32.totalorder %s13956_s10, %s11336_s8  ;;  %s266_s30 = int_to_ptr.vmem [resolvable:$true] %s265_s30 }
  0x3b   :  { %p11340_p3 = scmp.lt.u32.totalorder %s11336_s8, %s13956_s10 }
  0x3d   :  { %p11342_p4 = pnand %p11340_p3, %p11337_p2 }
  0x3f   :  { %11345 = shalt.err (!%p11342_p4)  }
  0x40   :  { %s11346_s4 = scalar_lea.vmem %s266_s30, 14592  ;;  %p11351_p6 = scmp.lt.s32.totalorder %s266_s30, %s266_s30 }
  0x41   :  { %p11347_p5 = scmp.ne.s32.totalorder %s266_s30, %s11346_s4  ;;  %p11352_p7 = scmp.lt.s32.totalorder %s11346_s4, %s11346_s4 }
  0x43   :  { %p11353_p8 = por %p11352_p7, %p11351_p6 }
  0x45   :  { %p11354_p9 = pnand %p11353_p8, %p11347_p5 }
  0x47   :  { %11357 = shalt.err (!%p11354_p9)  }
  0x48   :  { %268 = dma.hbm_to_vmem [thread:$0]  %s13956_s10, 14592, %s266_s30, [#allocation8 + $0x2] }
  0x49   :  { %313 = vsyncadd [#allocation8 + $0x3], 96  ;;  %v344_v25 = vld [vmem:[%s13959_s13] sm:$0xf]  ;;  %s11449_s23 = smov [#allocation6]   ;;  %s11358_s27 = scalar_lea.hbm %s13958_s12, 9728 }
  0x4a   :  { %s322_s24 = sshll.u32 %s11449_s23, 4  ;;  %345 = vst [vmem:[#allocation7] sm:$0xf] %v344_v25  ;;  %p11359_p10 = scmp.ne.s32.totalorder %s13958_s12, %s11358_s27  ;;  %s323_s24 = int_to_ptr.vmem [resolvable:$true] %s322_s24 }
  0x4b   :  { %p11362_p11 = scmp.lt.u32.totalorder %s11358_s27, %s13958_s12 }
  0x4d   :  { %p11364_p12 = pnand %p11362_p11, %p11359_p10 }
  0x4f   :  { %11367 = shalt.err (!%p11364_p12)  }
  0x50   :  { %s11368_s10 = scalar_lea.vmem %s323_s24, 9728  ;;  %p11373_p0 = scmp.lt.s32.totalorder %s323_s24, %s323_s24 }
  0x51   :  { %p11369_p13 = scmp.ne.s32.totalorder %s323_s24, %s11368_s10  ;;  %p11374_p1 = scmp.lt.s32.totalorder %s11368_s10, %s11368_s10 }
  0x53   :  { %p11375_p2 = por %p11374_p1, %p11373_p0 }
  0x55   :  { %p11376_p3 = pnand %p11375_p2, %p11369_p13 }
  0x57   :  { %11379 = shalt.err (!%p11376_p3)  }
  0x58   :  { %325 = dma.hbm_to_vmem [thread:$0]  %s13958_s12, 9728, %s323_s24, [#allocation8 + $0x4] }
  0x59   :  { %370 = vsyncadd [#allocation8 + $0x5], 64  ;;  %v9721_v26 = vld [vmem:[#allocation9 + $0x4] ss:$24 sps:$4 sm:$0xff]   ;;  %v9725_v28 = vld [vmem:[#allocation9] ss:$24 sps:$4 sm:$0xff]  }
  0x5a   :  { %v9723_v27 = vld [vmem:[#allocation9 + $0xc] ss:$24 sps:$4 sm:$0xff]   ;;  %v9726_v29 = vld [vmem:[#allocation9 + $0x8] ss:$24 sps:$4 sm:$0xff]   ;;  %1075 = vmatprep.subr.bf16.mxu0 %v9721_v26  ;;  %v9729_v31 = vld [vmem:[#allocation9 + $0x3c] ss:$24 sps:$4 sm:$0xff]  }
  0x5b   :  { %v9727_v30 = vld [vmem:[#allocation9 + $0x34] ss:$24 sps:$4 sm:$0xff]   ;;  %1188 = vmatprep.subr.bf16.mxu1 %v9723_v27  ;;  %1076 = vmatpush1.bf16.msra.mxu0 %v9725_v28  ;;  %v9731_v32 = vld [vmem:[#allocation9 + $0x30] ss:$24 sps:$4 sm:$0xff]   ;;  %v9733_v34 = vld [vmem:[#allocation9 + $0x64] ss:$24 sps:$4 sm:$0xff]  }
  0x5c   :  { %1189 = vmatpush1.bf16.msra.mxu1 %v9726_v29  ;;  %1077 = vmatprep.subr.bf16.mxu0 %v9727_v30  ;;  %v9732_v33 = vld [vmem:[#allocation9 + $0x38] ss:$24 sps:$4 sm:$0xff]   ;;  %v9735_v35 = vld [vmem:[#allocation9 + $0x6c] ss:$24 sps:$4 sm:$0xff]   ;;  %v9738_v37 = vld [vmem:[#allocation9 + $0x68] ss:$24 sps:$4 sm:$0xff]  }
  0x5d   :  { %1190 = vmatprep.subr.bf16.mxu1 %v9729_v31  ;;  %v9737_v36 = vld [vmem:[#allocation9 + $0x60] ss:$24 sps:$4 sm:$0xff]   ;;  %v9739_v38 = vld [vmem:[#allocation9 + $0x94] ss:$24 sps:$4 sm:$0xff]   ;;  %v9743_v40 = vld [vmem:[#allocation9 + $0x90] ss:$24 sps:$4 sm:$0xff]  }
  0x5e   :  { %v9741_v39 = vld [vmem:[#allocation9 + $0x9c] ss:$24 sps:$4 sm:$0xff]   ;;  %v9744_v41 = vld [vmem:[#allocation9 + $0x98] ss:$24 sps:$4 sm:$0xff]   ;;  %v9747_v43 = vld [vmem:[#allocation9 + $0xcc] ss:$24 sps:$4 sm:$0xff]  }
  0x5f   :  { %1078 = vmatpush1.bf16.msra.mxu0 %v9731_v32  ;;  %v9745_v42 = vld [vmem:[#allocation9 + $0xc4] ss:$24 sps:$4 sm:$0xff]   ;;  %v9749_v44 = vld [vmem:[#allocation9 + $0xc0] ss:$24 sps:$4 sm:$0xff]   ;;  %v9751_v46 = vld [vmem:[#allocation9 + $0xf4] ss:$24 sps:$4 sm:$0xff]  }
  0x60   :  { %1191 = vmatpush1.bf16.msra.mxu1 %v9732_v33  ;;  %1079 = vmatprep.subr.bf16.mxu0 %v9733_v34  ;;  %v9750_v45 = vld [vmem:[#allocation9 + $0xc8] ss:$24 sps:$4 sm:$0xff]   ;;  %v9753_v47 = vld [vmem:[#allocation9 + $0xfc] ss:$24 sps:$4 sm:$0xff]   ;;  %v9756_v49 = vld [vmem:[#allocation9 + $0xf8] ss:$24 sps:$4 sm:$0xff]  }
  0x61   :  { %1192 = vmatprep.subr.bf16.mxu1 %v9735_v35  ;;  %v9755_v48 = vld [vmem:[#allocation9 + $0xf0] ss:$24 sps:$4 sm:$0xff]   ;;  %v9757_v50 = vld [vmem:[#allocation9 + $0x124] ss:$24 sps:$4 sm:$0xff]   ;;  %v9761_v52 = vld [vmem:[#allocation9 + $0x120] ss:$24 sps:$4 sm:$0xff]  }
  0x62   :  { %v9759_v51 = vld [vmem:[#allocation9 + $0x12c] ss:$24 sps:$4 sm:$0xff]   ;;  %v9762_v53 = vld [vmem:[#allocation9 + $0x128] ss:$24 sps:$4 sm:$0xff]   ;;  %v9765_v55 = vld [vmem:[#allocation9 + $0x15c] ss:$24 sps:$4 sm:$0xff]  }
  0x63   :  { %1080 = vmatpush1.bf16.msra.mxu0 %v9737_v36  ;;  %v9763_v54 = vld [vmem:[#allocation9 + $0x154] ss:$24 sps:$4 sm:$0xff]   ;;  %v9767_v56 = vld [vmem:[#allocation9 + $0x150] ss:$24 sps:$4 sm:$0xff]   ;;  %v9769_v58 = vld [vmem:[#allocation9 + $0x184] ss:$24 sps:$4 sm:$0xff]  }
  0x64   :  { %1193 = vmatpush1.bf16.msra.mxu1 %v9738_v37  ;;  %1081 = vmatprep.subr.bf16.mxu0 %v9739_v38  ;;  %v9768_v57 = vld [vmem:[#allocation9 + $0x158] ss:$24 sps:$4 sm:$0xff]   ;;  %v9771_v59 = vld [vmem:[#allocation9 + $0x18c] ss:$24 sps:$4 sm:$0xff]   ;;  %v9774_v61 = vld [vmem:[#allocation9 + $0x188] ss:$24 sps:$4 sm:$0xff]  }
  0x65   :  { %1194 = vmatprep.subr.bf16.mxu1 %v9741_v39  ;;  %v9773_v60 = vld [vmem:[#allocation9 + $0x180] ss:$24 sps:$4 sm:$0xff]   ;;  %v9775_v62 = vld [vmem:[#allocation9 + $0x1b4] ss:$24 sps:$4 sm:$0xff]   ;;  %v9779_v0 = vld [vmem:[#allocation9 + $0x1b0] ss:$24 sps:$4 sm:$0xff]  }
  0x66   :  { %v9777_v63 = vld [vmem:[#allocation9 + $0x1bc] ss:$24 sps:$4 sm:$0xff]   ;;  %v9780_v1 = vld [vmem:[#allocation9 + $0x1b8] ss:$24 sps:$4 sm:$0xff]   ;;  %v9783_v3 = vld [vmem:[#allocation9 + $0x1ec] ss:$24 sps:$4 sm:$0xff]  }
  0x67   :  { %1082 = vmatpush1.bf16.msra.mxu0 %v9743_v40  ;;  %v9781_v2 = vld [vmem:[#allocation9 + $0x1e4] ss:$24 sps:$4 sm:$0xff]   ;;  %v9785_v4 = vld [vmem:[#allocation9 + $0x1e0] ss:$24 sps:$4 sm:$0xff]   ;;  %v9787_v6 = vld [vmem:[#allocation9 + $0x214] ss:$24 sps:$4 sm:$0xff]  }
  0x68   :  { %1195 = vmatpush1.bf16.msra.mxu1 %v9744_v41  ;;  %1083 = vmatprep.subr.bf16.mxu0 %v9745_v42  ;;  %v9786_v5 = vld [vmem:[#allocation9 + $0x1e8] ss:$24 sps:$4 sm:$0xff]   ;;  %v9789_v7 = vld [vmem:[#allocation9 + $0x21c] ss:$24 sps:$4 sm:$0xff]   ;;  %v11667_v8 = vld [vmem:[%s13946_s0 + $0x4] ss:$8 sps:$4 sm:$0xff]  }
  0x69   :  { %1196 = vmatprep.subr.bf16.mxu1 %v9747_v43  ;;  %v9791_v9 = vld [vmem:[#allocation9 + $0x210] ss:$24 sps:$4 sm:$0xff]   ;;  %v9793_v11 = vld [vmem:[#allocation9 + $0x244] ss:$24 sps:$4 sm:$0xff]   ;;  %1107 = vmatprep.mubr.bf16.mxu0 %v11667_v8  ;;  %v9797_v13 = vld [vmem:[#allocation9 + $0x240] ss:$24 sps:$4 sm:$0xff]  }
  0x6a   :  { %v9792_v10 = vld [vmem:[#allocation9 + $0x218] ss:$24 sps:$4 sm:$0xff]   ;;  %v9795_v12 = vld [vmem:[#allocation9 + $0x24c] ss:$24 sps:$4 sm:$0xff]   ;;  %1220 = vmatprep.mubr.bf16.mxu1 %v11667_v8  ;;  %v9798_v14 = vld [vmem:[#allocation9 + $0x248] ss:$24 sps:$4 sm:$0xff]  }
  0x6b   :  { %1084 = vmatpush1.bf16.msra.mxu0 %v9749_v44  ;;  %v9799_v15 = vld [vmem:[#allocation9 + $0x274] ss:$24 sps:$4 sm:$0xff]   ;;  %v9803_v17 = vld [vmem:[#allocation9 + $0x270] ss:$24 sps:$4 sm:$0xff]   ;;  %v9805_v19 = vld [vmem:[#allocation9 + $0x2a4] ss:$24 sps:$4 sm:$0xff]  }
  0x6c   :  { %1197 = vmatpush1.bf16.msra.mxu1 %v9750_v45  ;;  %1085 = vmatprep.subr.bf16.mxu0 %v9751_v46  ;;  %v9801_v16 = vld [vmem:[#allocation9 + $0x27c] ss:$24 sps:$4 sm:$0xff]   ;;  %v9804_v18 = vld [vmem:[#allocation9 + $0x278] ss:$24 sps:$4 sm:$0xff]   ;;  %v9807_v20 = vld [vmem:[#allocation9 + $0x2ac] ss:$24 sps:$4 sm:$0xff]  }
  0x6d   :  { %1198 = vmatprep.subr.bf16.mxu1 %v9753_v47  ;;  %v9809_v21 = vld [vmem:[#allocation9 + $0x2a0] ss:$24 sps:$4 sm:$0xff]   ;;  %v9811_v23 = vld [vmem:[#allocation9 + $0x2d4] ss:$24 sps:$4 sm:$0xff]   ;;  %v9815_v25 = vld [vmem:[#allocation9 + $0x2d0] ss:$24 sps:$4 sm:$0xff]  }
  0x6e   :  { %v9810_v22 = vld [vmem:[#allocation9 + $0x2a8] ss:$24 sps:$4 sm:$0xff]   ;;  %v9813_v24 = vld [vmem:[#allocation9 + $0x2dc] ss:$24 sps:$4 sm:$0xff]   ;;  %v9816_v26 = vld [vmem:[#allocation9 + $0x2d8] ss:$24 sps:$4 sm:$0xff]  }
  0x6f   :  { %1086 = vmatpush1.bf16.msra.mxu0 %v9755_v48  ;;  %v9822_v27 = vld [vmem:[#allocation9 + $0x14] ss:$24 sps:$4 sm:$0xff]   ;;  %v11674_v28 = vld [vmem:[%s13946_s0] ss:$8 sps:$4 sm:$0xff]   ;;  %v9825_v30 = vld [vmem:[#allocation9 + $0x44] ss:$24 sps:$4 sm:$0xff]  }
  0x70   :  { %1199 = vmatpush1.bf16.msra.mxu1 %v9756_v49  ;;  %1087 = vmatprep.subr.bf16.mxu0 %v9757_v50  ;;  %v9820_v29 = vld [vmem:[#allocation9 + $0x10] ss:$24 sps:$4 sm:$0xff]   ;;  %v11679_v31 = vld [vmem:[%s13946_s0 + $0x14] ss:$8 sps:$4 sm:$0xff]   ;;  %v9823_v32 = vld [vmem:[#allocation9 + $0x40] ss:$24 sps:$4 sm:$0xff]  }
  0x71   :  { %1200 = vmatprep.subr.bf16.mxu1 %v9759_v51  ;;  %v9831_v33 = vld [vmem:[#allocation9 + $0x74] ss:$24 sps:$4 sm:$0xff]   ;;  %v11688_v34 = vld [vmem:[%s13946_s0 + $0x10] ss:$8 sps:$4 sm:$0xff]   ;;  %v9834_v36 = vld [vmem:[#allocation9 + $0xa4] ss:$24 sps:$4 sm:$0xff]  }
  0x72   :  { %v9829_v35 = vld [vmem:[#allocation9 + $0x70] ss:$24 sps:$4 sm:$0xff]   ;;  %v11693_v37 = vld [vmem:[%s13946_s0 + $0x24] ss:$8 sps:$4 sm:$0xff]   ;;  %v9832_v38 = vld [vmem:[#allocation9 + $0xa0] ss:$24 sps:$4 sm:$0xff]  }
  0x73   :  { %1088 = vmatpush1.bf16.msra.mxu0 %v9761_v52  ;;  %v9840_v39 = vld [vmem:[#allocation9 + $0xd4] ss:$24 sps:$4 sm:$0xff]   ;;  %v11701_v40 = vld [vmem:[%s13946_s0 + $0x20] ss:$8 sps:$4 sm:$0xff]   ;;  %v9843_v42 = vld [vmem:[#allocation9 + $0x104] ss:$24 sps:$4 sm:$0xff]  }
  0x74   :  { %1201 = vmatpush1.bf16.msra.mxu1 %v9762_v53  ;;  %1089 = vmatprep.subr.bf16.mxu0 %v9763_v54  ;;  %v9838_v41 = vld [vmem:[#allocation9 + $0xd0] ss:$24 sps:$4 sm:$0xff]   ;;  %v11707_v43 = vld [vmem:[%s13946_s0 + $0x34] ss:$8 sps:$4 sm:$0xff]   ;;  %v9841_v44 = vld [vmem:[#allocation9 + $0x100] ss:$24 sps:$4 sm:$0xff]  }
  0x75   :  { %1202 = vmatprep.subr.bf16.mxu1 %v9765_v55  ;;  %v9849_v45 = vld [vmem:[#allocation9 + $0x134] ss:$24 sps:$4 sm:$0xff]   ;;  %v11715_v46 = vld [vmem:[%s13946_s0 + $0x30] ss:$8 sps:$4 sm:$0xff]   ;;  %v9852_v48 = vld [vmem:[#allocation9 + $0x164] ss:$24 sps:$4 sm:$0xff]  }
  0x76   :  { %v9847_v47 = vld [vmem:[#allocation9 + $0x130] ss:$24 sps:$4 sm:$0xff]   ;;  %v11721_v49 = vld [vmem:[%s13946_s0 + $0x44] ss:$8 sps:$4 sm:$0xff]   ;;  %v9850_v50 = vld [vmem:[#allocation9 + $0x160] ss:$24 sps:$4 sm:$0xff]  }
  0x77   :  { %1090 = vmatpush1.bf16.msra.mxu0 %v9767_v56  ;;  %v9858_v51 = vld [vmem:[#allocation9 + $0x194] ss:$24 sps:$4 sm:$0xff]   ;;  %v9855_v52 = vld [vmem:[%s13946_s0 + $0x40] ss:$8 sps:$4 sm:$0xff]   ;;  %v9861_v54 = vld [vmem:[#allocation9 + $0x1c4] ss:$24 sps:$4 sm:$0xff]  }
  0x78   :  { %1203 = vmatpush1.bf16.msra.mxu1 %v9768_v57  ;;  %1091 = vmatprep.subr.bf16.mxu0 %v9769_v58  ;;  %v9856_v53 = vld [vmem:[#allocation9 + $0x190] ss:$24 sps:$4 sm:$0xff]   ;;  %v9862_v55 = vld [vmem:[%s13946_s0 + $0x54] ss:$8 sps:$4 sm:$0xff]   ;;  %v9859_v56 = vld [vmem:[#allocation9 + $0x1c0] ss:$24 sps:$4 sm:$0xff]  }
  0x79   :  { %1204 = vmatprep.subr.bf16.mxu1 %v9771_v59  ;;  %v9867_v57 = vld [vmem:[#allocation9 + $0x1f4] ss:$24 sps:$4 sm:$0xff]   ;;  %v9864_v58 = vld [vmem:[%s13946_s0 + $0x50] ss:$8 sps:$4 sm:$0xff]   ;;  %vm2509_vm0 = vcmask 1045504   ;;  %vm2484_vm1 = vcmask 359424  }
  0x7a   :  { %v9865_v59 = vld [vmem:[#allocation9 + $0x1f0] ss:$24 sps:$4 sm:$0xff]   ;;  %s11451_s10 = smov 32  }
  0x7b   :  { %1092 = vmatpush1.bf16.msra.mxu0 %v9773_v60  ;;  %v9870_v60 = vld [vmem:[#allocation9 + $0x224] ss:$24 sps:$4 sm:$0xff]  }
  0x7c   :  { %1205 = vmatpush1.bf16.msra.mxu1 %v9774_v61  ;;  %1093 = vmatprep.subr.bf16.mxu0 %v9775_v62  ;;  %v9871_v61 = vld [vmem:[%s13946_s0 + $0x64] ss:$8 sps:$4 sm:$0xff]   ;;  %v9868_v62 = vld [vmem:[#allocation9 + $0x220] ss:$24 sps:$4 sm:$0xff]  }
  0x7d   :  { %1206 = vmatprep.subr.bf16.mxu1 %v9777_v63  ;;  %v9876_v63 = vld [vmem:[#allocation9 + $0x254] ss:$24 sps:$4 sm:$0xff]  }
  0x7f   :  { %1094 = vmatpush1.bf16.msra.mxu0 %v9779_v0  ;;  %v9873_v0 = vld [vmem:[%s13946_s0 + $0x60] ss:$8 sps:$4 sm:$0xff]  }
  0x80   :  { %1207 = vmatpush1.bf16.msra.mxu1 %v9780_v1  ;;  %1095 = vmatprep.subr.bf16.mxu0 %v9781_v2  ;;  %v9874_v1 = vld [vmem:[#allocation9 + $0x250] ss:$24 sps:$4 sm:$0xff]   ;;  %v9879_v2 = vld [vmem:[#allocation9 + $0x284] ss:$24 sps:$4 sm:$0xff]  }
  0x81   :  { %1208 = vmatprep.subr.bf16.mxu1 %v9783_v3  ;;  %v9880_v3 = vld [vmem:[%s13946_s0 + $0x74] ss:$8 sps:$4 sm:$0xff]  }
  0x83   :  { %1096 = vmatpush1.bf16.msra.mxu0 %v9785_v4  ;;  %v9877_v4 = vld [vmem:[#allocation9 + $0x280] ss:$24 sps:$4 sm:$0xff]  }
  0x84   :  { %1209 = vmatpush1.bf16.msra.mxu1 %v9786_v5  ;;  %1097 = vmatprep.subr.bf16.mxu0 %v9787_v6  ;;  %v9885_v5 = vld [vmem:[#allocation9 + $0x2b4] ss:$24 sps:$4 sm:$0xff]   ;;  %v9882_v6 = vld [vmem:[%s13946_s0 + $0x70] ss:$8 sps:$4 sm:$0xff]  }
  0x85   :  { %1210 = vmatprep.subr.bf16.mxu1 %v9789_v7  ;;  %v9883_v7 = vld [vmem:[#allocation9 + $0x2b0] ss:$24 sps:$4 sm:$0xff]  }
  0x87   :  { %1098 = vmatpush1.bf16.msra.mxu0 %v9791_v9  ;;  %v9888_v9 = vld [vmem:[#allocation9 + $0x2e4] ss:$24 sps:$4 sm:$0xff]  }
  0x88   :  { %1211 = vmatpush1.bf16.msra.mxu1 %v9792_v10  ;;  %1099 = vmatprep.subr.bf16.mxu0 %v9793_v11  ;;  %v9886_v10 = vld [vmem:[#allocation9 + $0x2e0] ss:$24 sps:$4 sm:$0xff]   ;;  %v9894_v11 = vld [vmem:[#allocation12 + $0xc] ss:$24 sps:$4 sm:$0xff]  }
  0x89   :  { %1212 = vmatprep.subr.bf16.mxu1 %v9795_v12  ;;  %v9889_v12 = vld [vmem:[#allocation12] ss:$24 sps:$4 sm:$0xff]  }
  0x8b   :  { %1100 = vmatpush1.bf16.msra.mxu0 %v9797_v13  ;;  %v9892_v13 = vld [vmem:[#allocation12 + $0x8] ss:$24 sps:$4 sm:$0xff]  }
  0x8c   :  { %1213 = vmatpush1.bf16.msra.mxu1 %v9798_v14  ;;  %1101 = vmatprep.subr.bf16.mxu0 %v9799_v15  ;;  %v9897_v14 = vld [vmem:[#allocation12 + $0x34] ss:$24 sps:$4 sm:$0xff]  }
  0x8d   :  { %1214 = vmatprep.subr.bf16.mxu1 %v9801_v16  ;;  %v9900_v15 = vld [vmem:[#allocation12 + $0x3c] ss:$24 sps:$4 sm:$0xff]   ;;  %v9895_v16 = vld [vmem:[#allocation12 + $0x30] ss:$24 sps:$4 sm:$0xff]  }
  0x8f   :  { %1102 = vmatpush1.bf16.msra.mxu0 %v9803_v17  ;;  %v9898_v17 = vld [vmem:[#allocation12 + $0x38] ss:$24 sps:$4 sm:$0xff]  }
  0x90   :  { %1215 = vmatpush1.bf16.msra.mxu1 %v9804_v18  ;;  %1103 = vmatprep.subr.bf16.mxu0 %v9805_v19  ;;  %v9903_v18 = vld [vmem:[#allocation12 + $0x64] ss:$24 sps:$4 sm:$0xff]  }
  0x91   :  { %1216 = vmatprep.subr.bf16.mxu1 %v9807_v20  ;;  %v9906_v19 = vld [vmem:[#allocation12 + $0x6c] ss:$24 sps:$4 sm:$0xff]   ;;  %v9901_v20 = vld [vmem:[#allocation12 + $0x60] ss:$24 sps:$4 sm:$0xff]  }
  0x93   :  { %1104 = vmatpush1.bf16.msra.mxu0 %v9809_v21  ;;  %v9904_v21 = vld [vmem:[#allocation12 + $0x68] ss:$24 sps:$4 sm:$0xff]  }
  0x94   :  { %1217 = vmatpush1.bf16.msra.mxu1 %v9810_v22  ;;  %1105 = vmatprep.subr.bf16.mxu0 %v9811_v23  ;;  %v9909_v22 = vld [vmem:[#allocation12 + $0x94] ss:$24 sps:$4 sm:$0xff]  }
  0x95   :  { %1218 = vmatprep.subr.bf16.mxu1 %v9813_v24  ;;  %v9912_v23 = vld [vmem:[#allocation12 + $0x9c] ss:$24 sps:$4 sm:$0xff]   ;;  %v9907_v24 = vld [vmem:[#allocation12 + $0x90] ss:$24 sps:$4 sm:$0xff]  }
  0x97   :  { %1106 = vmatpush1.bf16.msra.mxu0 %v9815_v25  ;;  %v9910_v25 = vld [vmem:[#allocation12 + $0x98] ss:$24 sps:$4 sm:$0xff]  }
  0x98   :  { %1219 = vmatpush1.bf16.msra.mxu1 %v9816_v26  ;;  %1301 = vmatprep.subr.bf16.mxu0 %v9822_v27  ;;  %v9915_v26 = vld [vmem:[#allocation12 + $0xc4] ss:$24 sps:$4 sm:$0xff]  }
  0x99   :  { %v9918_v27 = vld [vmem:[#allocation12 + $0xcc] ss:$24 sps:$4 sm:$0xff]  }
  0x9a   :  { %1108 = vmatmul.mubr.bf16.vlgmr.msra.gmra.mrb[0].mxu0 %v11674_v28 }
  0x9b   :  { %1221 = vmatmul.mubr.bf16.vlgmr.msra.gmra.mrb[0].mxu1 %v11674_v28  ;;  %1302 = vmatpush1.bf16.msra.mxu0 %v9820_v29  ;;  %v9916_v29 = vld [vmem:[#allocation12 + $0xc8] ss:$24 sps:$4 sm:$0xff]  }
  0x9c   :  { %1303 = vmatprep.subr.bf16.mxu0 %v9825_v30  ;;  %1117 = vmatprep.mubr.bf16.mxu0 %v11679_v31  ;;  %v9921_v30 = vld [vmem:[#allocation12 + $0xf4] ss:$24 sps:$4 sm:$0xff]  }
  0x9d   :  { %1230 = vmatprep.mubr.bf16.mxu1 %v11679_v31 }
  0x9f   :  { %1304 = vmatpush1.bf16.msra.mxu0 %v9823_v32  ;;  %v9919_v32 = vld [vmem:[#allocation12 + $0xf0] ss:$24 sps:$4 sm:$0xff]  }
  0xa0   :  { %1305 = vmatprep.subr.bf16.mxu0 %v9831_v33  ;;  %v9922_v33 = vld [vmem:[#allocation12 + $0xf8] ss:$24 sps:$4 sm:$0xff]  }
  0xa2   :  { %1118 = vmatmul.mubr.bf16.gmra.mrb[4].mxu0 %v11688_v34 }
  0xa3   :  { %1231 = vmatmul.mubr.bf16.gmra.mrb[4].mxu1 %v11688_v34  ;;  %1306 = vmatpush1.bf16.msra.mxu0 %v9829_v35  ;;  %v9930_v35 = vld [vmem:[#allocation12 + $0x12c] ss:$24 sps:$4 sm:$0xff]  }
  0xa4   :  { %1307 = vmatprep.subr.bf16.mxu0 %v9834_v36  ;;  %1127 = vmatprep.mubr.bf16.mxu0 %v11693_v37  ;;  %v9925_v36 = vld [vmem:[#allocation12 + $0x120] ss:$24 sps:$4 sm:$0xff]  }
  0xa5   :  { %1240 = vmatprep.mubr.bf16.mxu1 %v11693_v37 }
  0xa7   :  { %1308 = vmatpush1.bf16.msra.mxu0 %v9832_v38  ;;  %v9933_v38 = vld [vmem:[#allocation12 + $0x154] ss:$24 sps:$4 sm:$0xff]  }
  0xa8   :  { %1309 = vmatprep.subr.bf16.mxu0 %v9840_v39  ;;  %v9936_v39 = vld [vmem:[#allocation12 + $0x15c] ss:$24 sps:$4 sm:$0xff]  }
  0xaa   :  { %1128 = vmatmul.mubr.bf16.gmra.mrb[8].mxu0 %v11701_v40 }
  0xab   :  { %1241 = vmatmul.mubr.bf16.gmra.mrb[8].mxu1 %v11701_v40  ;;  %1310 = vmatpush1.bf16.msra.mxu0 %v9838_v41  ;;  %v9934_v41 = vld [vmem:[#allocation12 + $0x158] ss:$24 sps:$4 sm:$0xff]  }
  0xac   :  { %1311 = vmatprep.subr.bf16.mxu0 %v9843_v42  ;;  %1137 = vmatprep.mubr.bf16.mxu0 %v11707_v43  ;;  %v9939_v42 = vld [vmem:[#allocation12 + $0x184] ss:$24 sps:$4 sm:$0xff]  }
  0xad   :  { %1250 = vmatprep.mubr.bf16.mxu1 %v11707_v43 }
  0xaf   :  { %1312 = vmatpush1.bf16.msra.mxu0 %v9841_v44  ;;  %v9937_v44 = vld [vmem:[#allocation12 + $0x180] ss:$24 sps:$4 sm:$0xff]  }
  0xb0   :  { %1313 = vmatprep.subr.bf16.mxu0 %v9849_v45  ;;  %v9940_v45 = vld [vmem:[#allocation12 + $0x188] ss:$24 sps:$4 sm:$0xff]  }
  0xb2   :  { %1138 = vmatmul.mubr.bf16.gmra.mrb[12].mxu0 %v11715_v46 }
  0xb3   :  { %1251 = vmatmul.mubr.bf16.gmra.mrb[12].mxu1 %v11715_v46  ;;  %1314 = vmatpush1.bf16.msra.mxu0 %v9847_v47  ;;  %v9948_v47 = vld [vmem:[#allocation12 + $0x1bc] ss:$24 sps:$4 sm:$0xff]  }
  0xb4   :  { %1315 = vmatprep.subr.bf16.mxu0 %v9852_v48  ;;  %1147 = vmatprep.mubr.bf16.mxu0 %v11721_v49  ;;  %v9943_v48 = vld [vmem:[#allocation12 + $0x1b0] ss:$24 sps:$4 sm:$0xff]  }
  0xb5   :  { %1260 = vmatprep.mubr.bf16.mxu1 %v11721_v49 }
  0xb7   :  { %1316 = vmatpush1.bf16.msra.mxu0 %v9850_v50  ;;  %v9951_v50 = vld [vmem:[#allocation12 + $0x1e4] ss:$24 sps:$4 sm:$0xff]  }
  0xb8   :  { %1317 = vmatprep.subr.bf16.mxu0 %v9858_v51  ;;  %v9954_v51 = vld [vmem:[#allocation12 + $0x1ec] ss:$24 sps:$4 sm:$0xff]  }
  0xba   :  { %1148 = vmatmul.mubr.bf16.gmra.mrb[16].mxu0 %v9855_v52 }
  0xbb   :  { %1261 = vmatmul.mubr.bf16.gmra.mrb[16].mxu1 %v9855_v52  ;;  %1318 = vmatpush1.bf16.msra.mxu0 %v9856_v53  ;;  %v9952_v53 = vld [vmem:[#allocation12 + $0x1e8] ss:$24 sps:$4 sm:$0xff]  }
  0xbc   :  { %1319 = vmatprep.subr.bf16.mxu0 %v9861_v54  ;;  %1157 = vmatprep.mubr.bf16.mxu0 %v9862_v55  ;;  %v9957_v54 = vld [vmem:[#allocation12 + $0x214] ss:$24 sps:$4 sm:$0xff]  }
  0xbd   :  { %1270 = vmatprep.mubr.bf16.mxu1 %v9862_v55 }
  0xbf   :  { %1320 = vmatpush1.bf16.msra.mxu0 %v9859_v56  ;;  %v9955_v56 = vld [vmem:[#allocation12 + $0x210] ss:$24 sps:$4 sm:$0xff]  }
  0xc0   :  { %1321 = vmatprep.subr.bf16.mxu0 %v9867_v57  ;;  %v9958_v57 = vld [vmem:[#allocation12 + $0x218] ss:$24 sps:$4 sm:$0xff]  }
  0xc2   :  { %1158 = vmatmul.mubr.bf16.gmra.mrb[20].mxu0 %v9864_v58 }
  0xc3   :  { %1271 = vmatmul.mubr.bf16.gmra.mrb[20].mxu1 %v9864_v58  ;;  %1322 = vmatpush1.bf16.msra.mxu0 %v9865_v59  ;;  %v9966_v59 = vld [vmem:[#allocation12 + $0x24c] ss:$24 sps:$4 sm:$0xff]  }
  0xc4   :  { %1323 = vmatprep.subr.bf16.mxu0 %v9870_v60  ;;  %1167 = vmatprep.mubr.bf16.mxu0 %v9871_v61  ;;  %v9961_v60 = vld [vmem:[#allocation12 + $0x240] ss:$24 sps:$4 sm:$0xff]  }
  0xc5   :  { %1280 = vmatprep.mubr.bf16.mxu1 %v9871_v61 }
  0xc7   :  { %1324 = vmatpush1.bf16.msra.mxu0 %v9868_v62  ;;  %v9969_v62 = vld [vmem:[#allocation12 + $0x274] ss:$24 sps:$4 sm:$0xff]  }
  0xc8   :  { %1325 = vmatprep.subr.bf16.mxu0 %v9876_v63  ;;  %v9972_v63 = vld [vmem:[#allocation12 + $0x27c] ss:$24 sps:$4 sm:$0xff]  }
  0xca   :  { %1168 = vmatmul.mubr.bf16.gmra.mrb[24].mxu0 %v9873_v0 }
  0xcb   :  { %1281 = vmatmul.mubr.bf16.gmra.mrb[24].mxu1 %v9873_v0  ;;  %1326 = vmatpush1.bf16.msra.mxu0 %v9874_v1  ;;  %v9970_v1 = vld [vmem:[#allocation12 + $0x278] ss:$24 sps:$4 sm:$0xff]  }
  0xcc   :  { %1327 = vmatprep.subr.bf16.mxu0 %v9879_v2  ;;  %1177 = vmatprep.mubr.bf16.mxu0 %v9880_v3  ;;  %v9975_v2 = vld [vmem:[#allocation12 + $0x2a4] ss:$24 sps:$4 sm:$0xff]  }
  0xcd   :  { %1290 = vmatprep.mubr.bf16.mxu1 %v9880_v3 }
  0xcf   :  { %1328 = vmatpush1.bf16.msra.mxu0 %v9877_v4  ;;  %v9973_v4 = vld [vmem:[#allocation12 + $0x2a0] ss:$24 sps:$4 sm:$0xff]  }
  0xd0   :  { %1329 = vmatprep.subr.bf16.mxu0 %v9885_v5  ;;  %v9976_v5 = vld [vmem:[#allocation12 + $0x2a8] ss:$24 sps:$4 sm:$0xff]  }
  0xd2   :  { %1178 = vmatmul.mubr.bf16.gmra.mrb[28].mxu0 %v9882_v6 }
  0xd3   :  { %1291 = vmatmul.mubr.bf16.gmra.mrb[28].mxu1 %v9882_v6  ;;  %1330 = vmatpush1.bf16.msra.mxu0 %v9883_v7  ;;  %v9984_v7 = vld [vmem:[#allocation12 + $0x2dc] ss:$24 sps:$4 sm:$0xff]  }
  0xd4   :  { %1331 = vmatprep.subr.bf16.mxu0 %v9888_v9  ;;  %1333 = vmatprep.mubr.bf16.mxu0 %v11667_v8  ;;  %v9891_v8 = vld [vmem:[#allocation12 + $0x4] ss:$24 sps:$4 sm:$0xff]   ;;  %v9979_v9 = vld [vmem:[#allocation12 + $0x2d0] ss:$24 sps:$4 sm:$0xff]  }
  0xd5   :  { %2528 = vmatprep.subr.bf16.mxu1 %v9891_v8  ;;  %v485_v8 = vlaneseq }
  0xd6   :  { %2529 = vmatpush1.bf16.msra.mxu1 %v9889_v12  ;;  %v9987_v12 = vld [vmem:[#allocation12 + $0x304] ss:$24 sps:$4 sm:$0xff]  }
  0xd7   :  { %1332 = vmatpush1.bf16.msra.mxu0 %v9886_v10  ;;  %2530 = vmatprep.subr.bf16.mxu1 %v9897_v14  ;;  %v9982_v10 = vld [vmem:[#allocation12 + $0x2d8] ss:$24 sps:$4 sm:$0xff]   ;;  %v11765_v14 = vld [vmem:[%s13949_s3] sm:$0x3f] }
  0xd8   :  { %2754 = vmatprep.subr.bf16.mxu0 %v9894_v11  ;;  %v11757_v11 = vshrl.u32 %v485_v8, 7 }
  0xda   :  { %1334 = vmatmul.mubr.bf16.vlgmr.msra.gmra.mrb[32].mxu0 %v11674_v28  ;;  %2531 = vmatpush1.bf16.msra.mxu1 %v9895_v16  ;;  %v9913_v28 = vld [vmem:[#allocation12 + $0xc0] ss:$24 sps:$4 sm:$0xff]  }
  0xdb   :  { %1343 = vmatprep.mubr.bf16.mxu0 %v11679_v31  ;;  %2755 = vmatpush1.bf16.msra.mxu0 %v9892_v13  ;;  %v9924_v31 = vld [vmem:[#allocation12 + $0xfc] ss:$24 sps:$4 sm:$0xff]   ;;  %v11760_v13 = vsub.s32 3, %v11757_v11 }
  0xdc   :  { %2756 = vmatprep.subr.bf16.mxu0 %v9900_v15  ;;  %2532 = vmatprep.subr.bf16.mxu1 %v9903_v18 }
  0xdd   :  { %14002 = vst [vmem:[#allocation37_spill] sm:$0xff] %v11760_v13  ;;  %v11769_v15 = vrot.slane %v11765_v14, %v11760_v13 }
  0xde   :  { %2533 = vmatpush1.bf16.msra.mxu1 %v9901_v20 }
  0xdf   :  { %2757 = vmatpush1.bf16.msra.mxu0 %v9898_v17  ;;  %2534 = vmatprep.subr.bf16.mxu1 %v9909_v22 }
  0xe0   :  { %2758 = vmatprep.subr.bf16.mxu0 %v9906_v19 }
  0xe2   :  { %1344 = vmatmul.mubr.bf16.gmra.mrb[36].mxu0 %v11688_v34  ;;  %2535 = vmatpush1.bf16.msra.mxu1 %v9907_v24  ;;  %v9927_v34 = vld [vmem:[#allocation12 + $0x124] ss:$24 sps:$4 sm:$0xff]  }
  0xe3   :  { %1353 = vmatprep.mubr.bf16.mxu0 %v11693_v37  ;;  %2759 = vmatpush1.bf16.msra.mxu0 %v9904_v21  ;;  %v9928_v37 = vld [vmem:[#allocation12 + $0x128] ss:$24 sps:$4 sm:$0xff]  }
  0xe4   :  { %2760 = vmatprep.subr.bf16.mxu0 %v9912_v23  ;;  %2536 = vmatprep.subr.bf16.mxu1 %v9915_v26 }
  0xe6   :  { %2537 = vmatpush1.bf16.msra.mxu1 %v9913_v28 }
  0xe7   :  { %2761 = vmatpush1.bf16.msra.mxu0 %v9910_v25  ;;  %2538 = vmatprep.subr.bf16.mxu1 %v9921_v30 }
  0xe8   :  { %2762 = vmatprep.subr.bf16.mxu0 %v9918_v27 }
  0xea   :  { %1354 = vmatmul.mubr.bf16.gmra.mrb[40].mxu0 %v11701_v40  ;;  %2539 = vmatpush1.bf16.msra.mxu1 %v9919_v32  ;;  %v9931_v40 = vld [vmem:[#allocation12 + $0x150] ss:$24 sps:$4 sm:$0xff]  }
  0xeb   :  { %1363 = vmatprep.mubr.bf16.mxu0 %v11707_v43  ;;  %2763 = vmatpush1.bf16.msra.mxu0 %v9916_v29  ;;  %v9942_v43 = vld [vmem:[#allocation12 + $0x18c] ss:$24 sps:$4 sm:$0xff]  }
  0xec   :  { %2764 = vmatprep.subr.bf16.mxu0 %v9924_v31  ;;  %2540 = vmatprep.subr.bf16.mxu1 %v9927_v34 }
  0xee   :  { %2541 = vmatpush1.bf16.msra.mxu1 %v9925_v36 }
  0xef   :  { %2765 = vmatpush1.bf16.msra.mxu0 %v9922_v33  ;;  %2542 = vmatprep.subr.bf16.mxu1 %v9933_v38 }
  0xf0   :  { %2766 = vmatprep.subr.bf16.mxu0 %v9930_v35 }
  0xf2   :  { %1364 = vmatmul.mubr.bf16.gmra.mrb[44].mxu0 %v11715_v46  ;;  %2543 = vmatpush1.bf16.msra.mxu1 %v9931_v40  ;;  %v9945_v46 = vld [vmem:[#allocation12 + $0x1b4] ss:$24 sps:$4 sm:$0xff]  }
  0xf3   :  { %1373 = vmatprep.mubr.bf16.mxu0 %v11721_v49  ;;  %2767 = vmatpush1.bf16.msra.mxu0 %v9928_v37  ;;  %v9946_v49 = vld [vmem:[#allocation12 + $0x1b8] ss:$24 sps:$4 sm:$0xff]  }
  0xf4   :  { %2768 = vmatprep.subr.bf16.mxu0 %v9936_v39  ;;  %2544 = vmatprep.subr.bf16.mxu1 %v9939_v42 }
  0xf6   :  { %2545 = vmatpush1.bf16.msra.mxu1 %v9937_v44 }
  0xf7   :  { %2769 = vmatpush1.bf16.msra.mxu0 %v9934_v41  ;;  %2546 = vmatprep.subr.bf16.mxu1 %v9945_v46 }
  0xf8   :  { %2770 = vmatprep.subr.bf16.mxu0 %v9942_v43 }
  0xfa   :  { %1374 = vmatmul.mubr.bf16.gmra.mrb[48].mxu0 %v9855_v52  ;;  %2547 = vmatpush1.bf16.msra.mxu1 %v9943_v48  ;;  %v9949_v52 = vld [vmem:[#allocation12 + $0x1e0] ss:$24 sps:$4 sm:$0xff]  }
  0xfb   :  { %1383 = vmatprep.mubr.bf16.mxu0 %v9862_v55  ;;  %2771 = vmatpush1.bf16.msra.mxu0 %v9940_v45  ;;  %v9960_v55 = vld [vmem:[#allocation12 + $0x21c] ss:$24 sps:$4 sm:$0xff]  }
  0xfc   :  { %2772 = vmatprep.subr.bf16.mxu0 %v9948_v47  ;;  %2548 = vmatprep.subr.bf16.mxu1 %v9951_v50 }
  0xfe   :  { %2549 = vmatpush1.bf16.msra.mxu1 %v9949_v52 }
  0xff   :  { %2773 = vmatpush1.bf16.msra.mxu0 %v9946_v49  ;;  %2550 = vmatprep.subr.bf16.mxu1 %v9957_v54 }
 0x100   :  { %2774 = vmatprep.subr.bf16.mxu0 %v9954_v51 }
 0x102   :  { %1384 = vmatmul.mubr.bf16.gmra.mrb[52].mxu0 %v9864_v58  ;;  %2551 = vmatpush1.bf16.msra.mxu1 %v9955_v56  ;;  %v9963_v58 = vld [vmem:[#allocation12 + $0x244] ss:$24 sps:$4 sm:$0xff]  }
 0x103   :  { %1393 = vmatprep.mubr.bf16.mxu0 %v9871_v61  ;;  %2775 = vmatpush1.bf16.msra.mxu0 %v9952_v53  ;;  %v9964_v61 = vld [vmem:[#allocation12 + $0x248] ss:$24 sps:$4 sm:$0xff]   ;;  %v11813_v53 = vsub.s32 0, %v11757_v11 }
 0x104   :  { %2776 = vmatprep.subr.bf16.mxu0 %v9960_v55  ;;  %2552 = vmatprep.subr.bf16.mxu1 %v9963_v58 }
 0x105   :  { %14003 = vst [vmem:[#allocation38_spill] sm:$0xff] %v11813_v53 }
 0x106   :  { %2553 = vmatpush1.bf16.msra.mxu1 %v9961_v60  ;;  %v11820_v60 = vrot.slane %v11765_v14, %v11813_v53 }
 0x107   :  { %2777 = vmatpush1.bf16.msra.mxu0 %v9958_v57  ;;  %2554 = vmatprep.subr.bf16.mxu1 %v9969_v62  ;;  %v9996_v57 = vld [vmem:[#allocation12 + $0x30c] ss:$24 sps:$4 sm:$0xff]  }
 0x108   :  { %2778 = vmatprep.subr.bf16.mxu0 %v9966_v59 }
 0x10a   :  { %1394 = vmatmul.mubr.bf16.gmra.mrb[56].mxu0 %v9873_v0  ;;  %v9967_v0 = vld [vmem:[#allocation12 + $0x270] ss:$24 sps:$4 sm:$0xff]  }
 0x10b   :  { %1403 = vmatprep.mubr.bf16.mxu0 %v9880_v3  ;;  %2779 = vmatpush1.bf16.msra.mxu0 %v9964_v61  ;;  %v9978_v3 = vld [vmem:[#allocation12 + $0x2ac] ss:$24 sps:$4 sm:$0xff]  }
 0x10c   :  { %2780 = vmatprep.subr.bf16.mxu0 %v9972_v63  ;;  %2555 = vmatpush1.bf16.msra.mxu1 %v9967_v0 }
 0x10d   :  { %2556 = vmatprep.subr.bf16.mxu1 %v9975_v2 }
 0x10f   :  { %2781 = vmatpush1.bf16.msra.mxu0 %v9970_v1 }
 0x110   :  { %2782 = vmatprep.subr.bf16.mxu0 %v9978_v3  ;;  %2557 = vmatpush1.bf16.msra.mxu1 %v9973_v4 }
 0x112   :  { %1404 = vmatmul.mubr.bf16.gmra.mrb[60].mxu0 %v9882_v6  ;;  %v9981_v6 = vld [vmem:[#allocation12 + $0x2d4] ss:$24 sps:$4 sm:$0xff]  }
 0x113   :  { %2783 = vmatpush1.bf16.msra.mxu0 %v9976_v5  ;;  %2558 = vmatprep.subr.bf16.mxu1 %v9981_v6 }
 0x114   :  { %2784 = vmatprep.subr.bf16.mxu0 %v9984_v7  ;;  %2559 = vmatpush1.bf16.msra.mxu1 %v9979_v9 }
 0x115   :  { %2641 = vmatprep.subr.bf16.mxu1 %v9987_v12 }
 0x117   :  { %2785 = vmatpush1.bf16.msra.mxu0 %v9982_v10 }
 0x118   :  { %2867 = vmatprep.subr.bf16.mxu0 %v9996_v57 }
 0x16d   :  { %v11771_v16 = vpop.f32.mrb[0].mxu0 }
 0x16e   :  { %v11773_v17 = vpop.f32.mrb[0].mxu1  ;;  %v11775_v18 = vpop.f32.mrb[1].mxu0  ;;  %v1110_v9 = vadd.f32 %v11771_v16, %v11820_v60 }
 0x16f   :  { %v1224_v19 = vpop.f32.mrb[1].mxu1  ;;  %v11777_v20 = vpop.f32.mrb[2].mxu0 }
 0x170   :  { %v1225_v21 = vadd.f32 %v1224_v19, %v11769_v15  ;;  %v11780_v22 = vpop.f32.mrb[2].mxu1  ;;  %v11782_v23 = vpop.f32.mrb[3].mxu0  ;;  %v1114_v19 = vadd.f32 %v11777_v20, %v11820_v60 }
 0x171   :  { %v1228_v24 = vpop.f32.mrb[3].mxu1 }
 0x172   :  { %v8422_v25 = vmul.f32 -1.442695, %v1225_v21  ;;  %v1229_v26 = vadd.f32 %v1228_v24, %v11769_v15 }
 0x174   :  { %10079 = vpow2.f32 %v8422_v25  ;;  %v8425_v27 = vmul.f32 -1.442695, %v1229_v26 }
 0x175   :  { %v11785_v28 = vpop.f32.mrb[4].mxu0 }
 0x176   :  { %10081 = vpow2.f32 %v8425_v27  ;;  %v11787_v29 = vpop.f32.mrb[4].mxu1  ;;  %v11789_v30 = vpop.f32.mrb[5].mxu0 }
 0x177   :  { %v1234_v31 = vpop.f32.mrb[5].mxu1  ;;  %v11791_v32 = vpop.f32.mrb[6].mxu0 }
 0x178   :  { %v1235_v33 = vadd.f32 %v1234_v31, %v11769_v15  ;;  %v11794_v34 = vpop.f32.mrb[6].mxu1  ;;  %v11796_v35 = vpop.f32.mrb[7].mxu0 }
 0x179   :  { %v1238_v36 = vpop.f32.mrb[7].mxu1 }
 0x17a   :  { %v8428_v37 = vmul.f32 -1.442695, %v1235_v33  ;;  %v1239_v38 = vadd.f32 %v1238_v36, %v11769_v15 }
 0x17c   :  { %10083 = vpow2.f32 %v8428_v37  ;;  %v8431_v39 = vmul.f32 -1.442695, %v1239_v38 }
 0x17d   :  { %v11799_v40 = vpop.f32.mrb[8].mxu0 }
 0x17e   :  { %v10080_v41 = vpop.eup %10079  ;;  %10085 = vpow2.f32 %v8431_v39  ;;  %v11801_v42 = vpop.f32.mrb[8].mxu1 }
 0x17f   :  { %v11803_v43 = vpop.f32.mrb[9].mxu0  ;;  %v1558_v44 = vadd.f32 1.0, %v10080_v41  ;;  %v1244_v45 = vpop.f32.mrb[9].mxu1 }
 0x180   :  { %v11805_v46 = vpop.f32.mrb[10].mxu0  ;;  %v10082_v47 = vpop.eup %10081  ;;  %v1245_v48 = vadd.f32 %v1244_v45, %v11769_v15 }
 0x181   :  { %v11808_v49 = vpop.f32.mrb[10].mxu1  ;;  %v11810_v50 = vpop.f32.mrb[11].mxu0  ;;  %10087 = vrcp.f32 %v1558_v44  ;;  %v1561_v51 = vadd.f32 1.0, %v10082_v47 }
 0x182   :  { %v1248_v52 = vpop.f32.mrb[11].mxu1  ;;  %v8434_v54 = vmul.f32 -1.442695, %v1245_v48 }
 0x183   :  { %v1249_v55 = vadd.f32 %v1248_v52, %v11769_v15  ;;  %10089 = vrcp.f32 %v1561_v51  ;;  %v1120_v51 = vadd.f32 %v11785_v28, %v11820_v60 }
 0x184   :  { %10091 = vpow2.f32 %v8434_v54 }
 0x185   :  { %v8437_v56 = vmul.f32 -1.442695, %v1249_v55  ;;  %v11816_v58 = vpop.f32.mrb[12].mxu0 }
 0x186   :  { %v10084_v59 = vpop.eup %10083  ;;  %v11822_v61 = vpop.f32.mrb[12].mxu1 }
 0x187   :  { %10093 = vpow2.f32 %v8437_v56  ;;  %v11824_v62 = vpop.f32.mrb[13].mxu0  ;;  %v1564_v63 = vadd.f32 1.0, %v10084_v59  ;;  %v1254_v0 = vpop.f32.mrb[13].mxu1  ;;  %v1124_v56 = vadd.f32 %v11791_v32, %v11820_v60 }
 0x188   :  { %v11826_v1 = vpop.f32.mrb[14].mxu0  ;;  %v10086_v2 = vpop.eup %10085  ;;  %v1255_v3 = vadd.f32 %v1254_v0, %v11769_v15 }
 0x189   :  { %v11829_v4 = vpop.f32.mrb[14].mxu1  ;;  %v11831_v5 = vpop.f32.mrb[15].mxu0  ;;  %10095 = vrcp.f32 %v1564_v63  ;;  %v1567_v6 = vadd.f32 1.0, %v10086_v2 }
 0x18a   :  { %v1258_v7 = vpop.f32.mrb[15].mxu1  ;;  %v8440_v10 = vmul.f32 -1.442695, %v1255_v3 }
 0x18b   :  { %v1259_v8 = vadd.f32 %v1258_v7, %v11769_v15  ;;  %v10088_v12 = vpop.eup %10087  ;;  %10097 = vrcp.f32 %v1567_v6 }
 0x18c   :  { %10099 = vpow2.f32 %v8440_v10  ;;  %v1702_v24 = vmul.f32 %v10088_v12, %v1110_v9 }
 0x18d   :  { %v8443_v21 = vmul.f32 -1.442695, %v1259_v8  ;;  %v10090_v25 = vpop.eup %10089  ;;  %v11838_v26 = vpop.f32.mrb[16].mxu0 }
 0x18e   :  { %v10092_v27 = vpop.eup %10091  ;;  %v11840_v31 = vpop.f32.mrb[16].mxu1  ;;  %v1705_v16 = vmul.f32 %v10090_v25, %v1114_v19 }
 0x18f   :  { %10101 = vpow2.f32 %v8443_v21  ;;  %v11842_v33 = vpop.f32.mrb[17].mxu0  ;;  %v1570_v36 = vadd.f32 1.0, %v10092_v27  ;;  %v1264_v37 = vpop.f32.mrb[17].mxu1  ;;  %v1130_v27 = vadd.f32 %v11799_v40, %v11820_v60 }
 0x190   :  { %v11844_v38 = vpop.f32.mrb[18].mxu0  ;;  %v1265_v20 = vadd.f32 %v1264_v37, %v11769_v15  ;;  %v11847_v41 = vpop.f32.mrb[18].mxu1  ;;  %v11851_v45 = vpack.c.bf16 %v1705_v16, %v1702_v24 }
 0x191   :  { %v10094_v39 = vpop.eup %10093  ;;  %v11849_v44 = vpop.f32.mrb[19].mxu0  ;;  %10103 = vrcp.f32 %v1570_v36 }
 0x192   :  { %v1573_v47 = vadd.f32 1.0, %v10094_v39  ;;  %v1268_v48 = vpop.f32.mrb[19].mxu1  ;;  %v8446_v52 = vmul.f32 -1.442695, %v1265_v20  ;;  %v1134_v39 = vadd.f32 %v11805_v46, %v11820_v60 }
 0x193   :  { %v1269_v54 = vadd.f32 %v1268_v48, %v11769_v15  ;;  %v10096_v55 = vpop.eup %10095 }
 0x194   :  { %10105 = vrcp.f32 %v1573_v47  ;;  %v1708_v59 = vmul.f32 %v10096_v55, %v1120_v51 }
 0x195   :  { %10107 = vpow2.f32 %v8446_v52  ;;  %v8449_v57 = vmul.f32 -1.442695, %v1269_v54  ;;  %v10098_v63 = vpop.eup %10097  ;;  %v11858_v0 = vpop.f32.mrb[20].mxu0 }
 0x196   :  { %v10100_v2 = vpop.eup %10099  ;;  %v11860_v3 = vpop.f32.mrb[20].mxu1  ;;  %v1711_v28 = vmul.f32 %v10098_v63, %v1124_v56 }
 0x197   :  { %10109 = vpow2.f32 %v8449_v57  ;;  %v11862_v6 = vpop.f32.mrb[21].mxu0  ;;  %v1576_v7 = vadd.f32 1.0, %v10100_v2  ;;  %v1274_v9 = vpop.f32.mrb[21].mxu1 }
 0x198   :  { %v11864_v10 = vpop.f32.mrb[22].mxu0  ;;  %v1275_v32 = vadd.f32 %v1274_v9, %v11769_v15  ;;  %v11867_v12 = vpop.f32.mrb[22].mxu1  ;;  %v11871_v21 = vpack.c.bf16 %v1711_v28, %v1708_v59 }
 0x199   :  { %v10102_v8 = vpop.eup %10101  ;;  %v11869_v19 = vpop.f32.mrb[23].mxu0  ;;  %10111 = vrcp.f32 %v1576_v7 }
 0x19a   :  { %v1579_v24 = vadd.f32 1.0, %v10102_v8  ;;  %v1278_v25 = vpop.f32.mrb[23].mxu1  ;;  %v8452_v16 = vmul.f32 -1.442695, %v1275_v32  ;;  %v1140_v32 = vadd.f32 %v11816_v58, %v11820_v60  ;;  %v11905_v58 = vsub.s32 4, %v11757_v11 }
 0x19b   :  { %v1279_v36 = vadd.f32 %v1278_v25, %v11769_v15  ;;  %v10104_v37 = vpop.eup %10103 }
 0x19c   :  { %10113 = vrcp.f32 %v1579_v24  ;;  %v1714_v47 = vmul.f32 %v10104_v37, %v1130_v27  ;;  %14005 = vst [vmem:[#allocation40_spill] sm:$0xff] %v11905_v58 }
 0x19d   :  { %10115 = vpow2.f32 %v8452_v16  ;;  %v8455_v20 = vmul.f32 -1.442695, %v1279_v36  ;;  %v11878_v51 = vpop.f32.mrb[24].mxu0  ;;  %v1144_v16 = vadd.f32 %v11826_v1, %v11820_v60  ;;  %v11910_v1 = vsub.s32 5, %v11757_v11 }
 0x19e   :  { %v10106_v48 = vpop.eup %10105  ;;  %v11880_v54 = vpop.f32.mrb[24].mxu1 }
 0x19f   :  { %v10108_v52 = vpop.eup %10107  ;;  %10117 = vpow2.f32 %v8455_v20  ;;  %v11882_v55 = vpop.f32.mrb[25].mxu0  ;;  %v1717_v40 = vmul.f32 %v10106_v48, %v1134_v39  ;;  %14006 = vst [vmem:[#allocation41_spill] sm:$0xff] %v11910_v1  ;;  %v11928_v53 = vrot.slane %v11765_v14, %v11910_v1 }
 0x1a0   :  { %v1582_v56 = vadd.f32 1.0, %v10108_v52  ;;  %v1284_v57 = vpop.f32.mrb[25].mxu1  ;;  %v11884_v59 = vpop.f32.mrb[26].mxu0 }
 0x1a1   :  { %v10110_v63 = vpop.eup %10109  ;;  %v1285_v46 = vadd.f32 %v1284_v57, %v11769_v15  ;;  %v11887_v2 = vpop.f32.mrb[26].mxu1  ;;  %v11891_v7 = vpack.c.bf16 %v1717_v40, %v1714_v47 }
 0x1a2   :  { %v11889_v28 = vpop.f32.mrb[27].mxu0  ;;  %10119 = vrcp.f32 %v1582_v56  ;;  %v1585_v9 = vadd.f32 1.0, %v10110_v63  ;;  %v1288_v8 = vpop.f32.mrb[27].mxu1 }
 0x1a3   :  { %v8458_v24 = vmul.f32 -1.442695, %v1285_v46  ;;  %v1289_v25 = vadd.f32 %v1288_v8, %v11769_v15  ;;  %v10112_v27 = vpop.eup %10111 }
 0x1a4   :  { %10121 = vrcp.f32 %v1585_v9  ;;  %v1720_v37 = vmul.f32 %v10112_v27, %v1140_v32 }
 0x1a5   :  { %10123 = vpow2.f32 %v8458_v24  ;;  %v8461_v36 = vmul.f32 -1.442695, %v1289_v25  ;;  %v11898_v20 = vpop.f32.mrb[28].mxu0 }
 0x1a6   :  { %v10114_v39 = vpop.eup %10113  ;;  %v11900_v48 = vpop.f32.mrb[28].mxu1 }
 0x1a7   :  { %v10116_v47 = vpop.eup %10115  ;;  %10125 = vpow2.f32 %v8461_v36  ;;  %14004 = vst [vmem:[#allocation39_spill] sm:$0xff] %v11900_v48  ;;  %v11902_v52 = vpop.f32.mrb[29].mxu0  ;;  %v1723_v40 = vmul.f32 %v10114_v39, %v1144_v16  ;;  %v1150_v16 = vadd.f32 %v11838_v26, %v11820_v60 }
 0x1a8   :  { %v1588_v56 = vadd.f32 1.0, %v10116_v47  ;;  %v1294_v57 = vpop.f32.mrb[29].mxu1  ;;  %v11907_v63 = vpop.f32.mrb[30].mxu0  ;;  %v11924_v47 = vrot.slane %v11765_v14, %v11905_v58 }
 0x1a9   :  { %v10118_v46 = vpop.eup %10117  ;;  %v1295_v9 = vadd.f32 %v1294_v57, %v11769_v15  ;;  %v11913_v8 = vpop.f32.mrb[30].mxu1  ;;  %v11917_v24 = vpack.c.bf16 %v1723_v40, %v1720_v37  ;;  %v1154_v37 = vadd.f32 %v11844_v38, %v11820_v60 }
 0x1aa   :  { %14007 = vst [vmem:[#allocation42_spill] sm:$0xff] %v11913_v8  ;;  %v11915_v32 = vpop.f32.mrb[31].mxu0  ;;  %10127 = vrcp.f32 %v1588_v56  ;;  %v1591_v25 = vadd.f32 1.0, %v10118_v46  ;;  %v1298_v27 = vpop.f32.mrb[31].mxu1 }
 0x1ab   :  { %14008 = vst [vmem:[#allocation43_spill] sm:$0xff] %v11915_v32  ;;  %v8464_v36 = vmul.f32 -1.442695, %v1295_v9  ;;  %v1299_v39 = vadd.f32 %v1298_v27, %v11769_v15 }
 0x1ac   :  { %v10120_v57 = vpop.eup %10119  ;;  %10129 = vrcp.f32 %v1591_v25 }
 0x1ad   :  { %10131 = vpow2.f32 %v8464_v36  ;;  %v8467_v40 = vmul.f32 -1.442695, %v1299_v39  ;;  %v1726_v56 = vmul.f32 %v10120_v57, %v1150_v16  ;;  %v1335_v46 = vpop.f32.mrb[32].mxu0 }
 0x1ae   :  { %v10122_v26 = vpop.eup %10121  ;;  %v1336_v15 = vadd.f32 %v1335_v46, %v11924_v47  ;;  %v1337_v27 = vpop.f32.mrb[33].mxu0 }
 0x1af   :  { %v10124_v9 = vpop.eup %10123  ;;  %10133 = vpow2.f32 %v8467_v40  ;;  %v1729_v58 = vmul.f32 %v10122_v26, %v1154_v37  ;;  %v1338_v25 = vadd.f32 %v1337_v27, %v11928_v53  ;;  %v1339_v8 = vpop.f32.mrb[34].mxu0  ;;  %v1160_v40 = vadd.f32 %v11858_v0, %v11820_v60 }
 0x1b0   :  { %v1594_v13 = vadd.f32 1.0, %v10124_v9  ;;  %v8423_v32 = vmul.f32 -1.442695, %v1336_v15  ;;  %v1340_v48 = vadd.f32 %v1339_v8, %v11924_v47  ;;  %v1341_v38 = vpop.f32.mrb[35].mxu0  ;;  %v1164_v9 = vadd.f32 %v11864_v10, %v11820_v60 }
 0x1b1   :  { %v10126_v1 = vpop.eup %10125  ;;  %v11935_v36 = vpack.c.bf16 %v1729_v58, %v1726_v56  ;;  %v8424_v39 = vmul.f32 -1.442695, %v1338_v25  ;;  %v1342_v57 = vadd.f32 %v1341_v38, %v11928_v53 }
 0x1b2   :  { %10135 = vrcp.f32 %v1594_v13  ;;  %v1597_v16 = vadd.f32 1.0, %v10126_v1  ;;  %v8426_v37 = vmul.f32 -1.442695, %v1340_v48 }
 0x1b3   :  { %10137 = vpow2.f32 %v8423_v32  ;;  %v8427_v46 = vmul.f32 -1.442695, %v1342_v57 }
 0x1b4   :  { %v10128_v26 = vpop.eup %10127  ;;  %10139 = vrcp.f32 %v1597_v16 }
 0x1b5   :  { %10141 = vpow2.f32 %v8424_v39  ;;  %v1732_v8 = vmul.f32 %v10128_v26, %v1160_v40  ;;  %v1345_v13 = vpop.f32.mrb[36].mxu0  ;;  %v1170_v26 = vadd.f32 %v11878_v51, %v11820_v60 }
 0x1b6   :  { %v10130_v58 = vpop.eup %10129  ;;  %10143 = vpow2.f32 %v8426_v37  ;;  %v1346_v56 = vadd.f32 %v1345_v13, %v11924_v47  ;;  %v1347_v15 = vpop.f32.mrb[37].mxu0 }
 0x1b7   :  { %v10132_v1 = vpop.eup %10131  ;;  %10145 = vpow2.f32 %v8427_v46  ;;  %v1735_v27 = vmul.f32 %v10130_v58, %v1164_v9  ;;  %v1348_v48 = vadd.f32 %v1347_v15, %v11928_v53  ;;  %v1349_v32 = vpop.f32.mrb[38].mxu0 }
 0x1b8   :  { %v1600_v0 = vadd.f32 1.0, %v10132_v1  ;;  %v8429_v38 = vmul.f32 -1.442695, %v1346_v56  ;;  %v1350_v16 = vadd.f32 %v1349_v32, %v11924_v47  ;;  %v1351_v10 = vpop.f32.mrb[39].mxu0  ;;  %v1174_v1 = vadd.f32 %v11884_v59, %v11820_v60 }
 0x1b9   :  { %v10134_v25 = vpop.eup %10133  ;;  %v11945_v39 = vpack.c.bf16 %v1735_v27, %v1732_v8  ;;  %v8430_v40 = vmul.f32 -1.442695, %v1348_v48  ;;  %v1352_v37 = vadd.f32 %v1351_v10, %v11928_v53  ;;  %v11953_v48 = vsub.s32 2, %v11757_v11 }
 0x1ba   :  { %10147 = vrcp.f32 %v1600_v0  ;;  %v1603_v57 = vadd.f32 1.0, %v10134_v25  ;;  %v8432_v46 = vmul.f32 -1.442695, %v1350_v16  ;;  %v11957_v16 = vsub.s32 1, %v11757_v11 }
 0x1bb   :  { %10149 = vpow2.f32 %v8429_v38  ;;  %v8433_v58 = vmul.f32 -1.442695, %v1352_v37  ;;  %14009 = vst [vmem:[#allocation44_spill] sm:$0xff] %v11953_v48  ;;  %v11966_v11 = vrot.slane %v11765_v14, %v11953_v48 }
 0x1bc   :  { %v10136_v9 = vpop.eup %10135  ;;  %10151 = vrcp.f32 %v1603_v57  ;;  %14010 = vst [vmem:[#allocation45_spill] sm:$0xff] %v11957_v16 }
 0x1bd   :  { %v10138_v13 = vpop.eup %10137  ;;  %10153 = vpow2.f32 %v8430_v40  ;;  %v1738_v8 = vmul.f32 %v10136_v9, %v1170_v26  ;;  %v1355_v27 = vpop.f32.mrb[40].mxu0 }
 0x1be   :  { %v10140_v56 = vpop.eup %10139  ;;  %v1559_v15 = vadd.f32 1.0, %v10138_v13  ;;  %10155 = vpow2.f32 %v8432_v46  ;;  %v1356_v51 = vadd.f32 %v1355_v27, %v11924_v47  ;;  %v1357_v32 = vpop.f32.mrb[41].mxu0 }
 0x1bf   :  { %v10142_v0 = vpop.eup %10141  ;;  %10157 = vpow2.f32 %v8433_v58  ;;  %v1741_v25 = vmul.f32 %v10140_v56, %v1174_v1  ;;  %v1358_v10 = vadd.f32 %v1357_v32, %v11928_v53  ;;  %v1359_v57 = vpop.f32.mrb[42].mxu0  ;;  %v1184_v32 = vadd.f32 %v11907_v63, %v11820_v60 }
 0x1c0   :  { %v10144_v38 = vpop.eup %10143  ;;  %10159 = vrcp.f32 %v1559_v15  ;;  %v1560_v59 = vadd.f32 1.0, %v10142_v0  ;;  %v8435_v26 = vmul.f32 -1.442695, %v1356_v51  ;;  %v1360_v46 = vadd.f32 %v1359_v57, %v11924_v47  ;;  %v1361_v9 = vpop.f32.mrb[43].mxu0 }
 0x1c1   :  { %v10146_v40 = vpop.eup %10145  ;;  %v1562_v37 = vadd.f32 1.0, %v10144_v38  ;;  %v11961_v58 = vpack.c.bf16 %v1741_v25, %v1738_v8  ;;  %v8436_v1 = vmul.f32 -1.442695, %v1358_v10  ;;  %v1362_v56 = vadd.f32 %v1361_v9, %v11928_v53 }
 0x1c2   :  { %10161 = vrcp.f32 %v1560_v59  ;;  %v1563_v13 = vadd.f32 1.0, %v10146_v40  ;;  %v1180_v15 = vadd.f32 %v11898_v20, %v11820_v60  ;;  %v8438_v27 = vmul.f32 -1.442695, %v1360_v46 }
 0x1c3   :  { %10163 = vrcp.f32 %v1562_v37  ;;  %v11972_v51 = vrot.slane %v11765_v14, %v11957_v16  ;;  %v8439_v25 = vmul.f32 -1.442695, %v1362_v56  ;;  %v1223_v40 = vadd.f32 %v11773_v17, %v11966_v11 }
 0x1c4   :  { %v10148_v0 = vpop.eup %10147  ;;  %10165 = vrcp.f32 %v1563_v13 }
 0x1c5   :  { %v10150_v8 = vpop.eup %10149  ;;  %10167 = vpow2.f32 %v8435_v26  ;;  %v1744_v38 = vmul.f32 %v10148_v0, %v1180_v15  ;;  %v1365_v57 = vpop.f32.mrb[44].mxu0  ;;  %v1112_v60 = vadd.f32 %v11775_v18, %v11972_v51 }
 0x1c6   :  { %v10152_v59 = vpop.eup %10151  ;;  %v1565_v10 = vadd.f32 1.0, %v10150_v8  ;;  %10169 = vpow2.f32 %v8436_v1  ;;  %v1366_v14 = vadd.f32 %v1365_v57, %v11924_v47  ;;  %v1367_v37 = vpop.f32.mrb[45].mxu0 }
 0x1c7   :  { %v10154_v20 = vpop.eup %10153  ;;  %10171 = vpow2.f32 %v8438_v27  ;;  %v1747_v46 = vmul.f32 %v10152_v59, %v1184_v32  ;;  %v1368_v26 = vadd.f32 %v1367_v37, %v11928_v53  ;;  %v1369_v13 = vpop.f32.mrb[46].mxu0  ;;  %v1116_v37 = vadd.f32 %v11782_v23, %v11972_v51 }
 0x1c8   :  { %v10156_v9 = vpop.eup %10155  ;;  %10173 = vrcp.f32 %v1565_v10  ;;  %v1566_v63 = vadd.f32 1.0, %v10154_v20  ;;  %v8441_v15 = vmul.f32 -1.442695, %v1366_v14  ;;  %v1370_v17 = vadd.f32 %v1369_v13, %v11924_v47  ;;  %v1371_v27 = vpop.f32.mrb[47].mxu0 }
 0x1c9   :  { %v10158_v1 = vpop.eup %10157  ;;  %v1568_v56 = vadd.f32 1.0, %v10156_v9  ;;  %10175 = vpow2.f32 %v8439_v25  ;;  %v8442_v32 = vmul.f32 -1.442695, %v1368_v26  ;;  %v1372_v59 = vadd.f32 %v1371_v27, %v11928_v53 }
 0x1ca   :  { %v10160_v0 = vpop.eup %10159  ;;  %10177 = vrcp.f32 %v1566_v63  ;;  %v1569_v8 = vadd.f32 1.0, %v10158_v1  ;;  %v8444_v18 = vmul.f32 -1.442695, %v1370_v17  ;;  %v11984_v57 = vpack.c.bf16 %v1747_v46, %v1744_v38  ;;  %v9985_v17 = vld [vmem:[#allocation12 + $0x300] ss:$24 sps:$4 sm:$0xff]  }
 0x1cb   :  { %10179 = vrcp.f32 %v1568_v56  ;;  %v1703_v10 = vmul.f32 %v10160_v0, %v1112_v60  ;;  %v8445_v25 = vmul.f32 -1.442695, %v1372_v59  ;;  %v1227_v9 = vadd.f32 %v11780_v22, %v11966_v11 }
 0x1cc   :  { %v10162_v20 = vpop.eup %10161  ;;  %10181 = vrcp.f32 %v1569_v8  ;;  %v1122_v38 = vadd.f32 %v11789_v30, %v11972_v51  ;;  %v9990_v8 = vld [vmem:[#allocation12 + $0x334] ss:$24 sps:$4 sm:$0xff]  }
 0x1cd   :  { %v10164_v14 = vpop.eup %10163  ;;  %v1704_v63 = vmul.f32 %v10162_v20, %v1223_v40  ;;  %10183 = vpow2.f32 %v8441_v15  ;;  %v1375_v13 = vpop.f32.mrb[48].mxu0 }
 0x1ce   :  { %v10166_v26 = vpop.eup %10165  ;;  %10185 = vpow2.f32 %v8442_v32  ;;  %v1706_v1 = vmul.f32 %v10164_v14, %v1116_v37  ;;  %v1376_v23 = vadd.f32 %v1375_v13, %v11924_v47  ;;  %v1377_v60 = vpop.f32.mrb[49].mxu0  ;;  %v9994_v32 = vld [vmem:[#allocation12 + $0x308] ss:$24 sps:$4 sm:$0xff]   ;;  %v9999_v14 = vld [vmem:[#allocation12 + $0x33c] ss:$24 sps:$4 sm:$0xff]  }
 0x1cf   :  { %v10168_v56 = vpop.eup %10167  ;;  %v1707_v46 = vmul.f32 %v10166_v26, %v1227_v9  ;;  %10187 = vpow2.f32 %v8444_v18  ;;  %v1378_v22 = vadd.f32 %v1377_v60, %v11928_v53  ;;  %v1379_v40 = vpop.f32.mrb[50].mxu0 }
 0x1d0   :  { %v10170_v27 = vpop.eup %10169  ;;  %v1571_v0 = vadd.f32 1.0, %v10168_v56  ;;  %10189 = vpow2.f32 %v8445_v25  ;;  %v11994_v15 = vpack.c.bf16 %v1706_v1, %v1703_v10  ;;  %v8447_v37 = vmul.f32 -1.442695, %v1376_v23  ;;  %v1381_v18 = vpop.f32.mrb[51].mxu0  ;;  %v9988_v1 = vld [vmem:[#allocation12 + $0x330] ss:$24 sps:$4 sm:$0xff]  }
 0x1d1   :  { %v10172_v59 = vpop.eup %10171  ;;  %v1572_v20 = vadd.f32 1.0, %v10170_v27  ;;  %v1380_v30 = vadd.f32 %v1379_v40, %v11924_v47  ;;  %v11997_v9 = vpack.c.bf16 %v1707_v46, %v1704_v63  ;;  %v1233_v25 = vadd.f32 %v11787_v29, %v11966_v11  ;;  %v9993_v56 = vld [vmem:[#allocation12 + $0x360] ss:$24 sps:$4 sm:$0x3f]  }
 0x1d2   :  { %v10174_v26 = vpop.eup %10173  ;;  %10191 = vrcp.f32 %v1571_v0  ;;  %v1574_v13 = vadd.f32 1.0, %v10172_v59  ;;  %v1382_v10 = vadd.f32 %v1381_v18, %v11928_v53  ;;  %2560 = vmatprep.mubr.bf16.mxu1 %v11994_v15  ;;  %2786 = vmatprep.mubr.bf16.mxu0 %v11994_v15  ;;  %v8448_v60 = vmul.f32 -1.442695, %v1378_v22  ;;  %v9991_v46 = vld [vmem:[#allocation12 + $0x364] ss:$24 sps:$4 sm:$0x3f]  }
 0x1d3   :  { %v10176_v23 = vpop.eup %10175  ;;  %10193 = vrcp.f32 %v1572_v20  ;;  %2561 = vmatmul.mubr.bf16.vlgmr.msra.gmra.mrb[32].mxu1 %v11851_v45  ;;  %2787 = vmatmul.mubr.bf16.vlgmr.msra.gmra.mrb[64].mxu0 %v11851_v45  ;;  %v1709_v63 = vmul.f32 %v10174_v26, %v1122_v38  ;;  %v9997_v29 = vld [vmem:[#allocation12 + $0x338] ss:$24 sps:$4 sm:$0xff]   ;;  %v1126_v0 = vadd.f32 %v11796_v35, %v11972_v51  ;;  %v8450_v59 = vmul.f32 -1.442695, %v1380_v30 }
 0x1d4   :  { %v10178_v27 = vpop.eup %10177  ;;  %10195 = vrcp.f32 %v1574_v13  ;;  %v1575_v40 = vadd.f32 1.0, %v10176_v23  ;;  %2642 = vmatpush1.bf16.msra.mxu1 %v9985_v17  ;;  %2868 = vmatpush1.bf16.msra.mxu0 %v9994_v32  ;;  %v10000_v18 = vld [vmem:[#allocation12 + $0x36c] ss:$24 sps:$4 sm:$0x3f]   ;;  %v1237_v22 = vadd.f32 %v11794_v34, %v11966_v11  ;;  %v8451_v48 = vmul.f32 -1.442695, %v1382_v10 }
 0x1d5   :  { %v10180_v20 = vpop.eup %10179  ;;  %10197 = vpow2.f32 %v8447_v37  ;;  %2643 = vmatprep.subr.bf16.mxu1 %v9990_v8  ;;  %2869 = vmatprep.subr.bf16.mxu0 %v9999_v14  ;;  %v10002_v38 = vld [vmem:[#allocation12 + $0x368] ss:$24 sps:$4 sm:$0x3f]   ;;  %v1710_v26 = vmul.f32 %v10178_v27, %v1233_v25  ;;  %v1132_v35 = vadd.f32 %v11803_v43, %v11972_v51  ;;  %v1385_v13 = vpop.f32.mrb[52].mxu0  ;;  %v2511_v34 = vsel %vm2509_vm0, %v9993_v56, 0 }
 0x1d6   :  { %v10182_v16 = vpop.eup %10181  ;;  %10199 = vrcp.f32 %v1575_v40  ;;  %v1712_v30 = vmul.f32 %v10180_v20, %v1126_v0  ;;  %v1386_v32 = vadd.f32 %v1385_v13, %v11924_v47  ;;  %v1387_v23 = vpop.f32.mrb[53].mxu0  ;;  %v10005_v56 = vld [vmem:[#allocation12 + $0x14] ss:$24 sps:$4 sm:$0xff]  }
 0x1d7   :  { %v10184_v17 = vpop.eup %10183  ;;  %10201 = vpow2.f32 %v8448_v60  ;;  %v1713_v37 = vmul.f32 %v10182_v16, %v1237_v22  ;;  %v1388_v14 = vadd.f32 %v1387_v23, %v11928_v53  ;;  %v1389_v25 = vpop.f32.mrb[54].mxu0  ;;  %v2517_v16 = vsel %vm2509_vm0, %v10002_v38, 0 }
 0x1d8   :  { %v10186_v10 = vpop.eup %10185  ;;  %v1577_v8 = vadd.f32 1.0, %v10184_v17  ;;  %10203 = vpow2.f32 %v8450_v59  ;;  %v12015_v27 = vpack.c.bf16 %v1712_v30, %v1709_v63  ;;  %2644 = vmatpush1.bf16.msra.mxu1 %v9988_v1  ;;  %2870 = vmatpush1.bf16.msra.mxu0 %v9997_v29  ;;  %v1390_v60 = vadd.f32 %v1389_v25, %v11924_v47  ;;  %v1391_v40 = vpop.f32.mrb[55].mxu0 }
 0x1d9   :  { %v10188_v43 = vpop.eup %10187  ;;  %v1578_v0 = vadd.f32 1.0, %v10186_v10  ;;  %10205 = vpow2.f32 %v8451_v48  ;;  %8584 = vmatprep.subr.msk.bf16.mxu1 %vm2509_vm0, %v9991_v46  ;;  %8593 = vmatprep.subr.msk.bf16.mxu0 %vm2509_vm0, %v10000_v18  ;;  %v8453_v63 = vmul.f32 -1.442695, %v1386_v32  ;;  %v1392_v1 = vadd.f32 %v1391_v40, %v11928_v53 }
 0x1da   :  { %v10190_v59 = vpop.eup %10189  ;;  %10207 = vrcp.f32 %v1577_v8  ;;  %v1580_v20 = vadd.f32 1.0, %v10188_v43  ;;  %2570 = vmatprep.mubr.bf16.mxu1 %v12015_v27  ;;  %2796 = vmatprep.mubr.bf16.mxu0 %v12015_v27  ;;  %v8454_v29 = vmul.f32 -1.442695, %v1388_v14  ;;  %v12026_v46 = vpack.c.bf16 %v1713_v37, %v1710_v26 }
 0x1db   :  { %10209 = vrcp.f32 %v1578_v0  ;;  %v1581_v48 = vadd.f32 1.0, %v10190_v59  ;;  %2571 = vmatmul.mubr.bf16.gmra.mrb[36].mxu1 %v11871_v21  ;;  %2797 = vmatmul.mubr.bf16.gmra.mrb[68].mxu0 %v11871_v21  ;;  %v1243_v22 = vadd.f32 %v11801_v42, %v11966_v11  ;;  %v8456_v38 = vmul.f32 -1.442695, %v1390_v60 }
 0x1dc   :  { %v10192_v18 = vpop.eup %10191  ;;  %10211 = vrcp.f32 %v1580_v20  ;;  %2646 = vmatpush1.bf16.msra.mxu1 %v2511_v34  ;;  %2872 = vmatpush1.bf16.msra.mxu0 %v2517_v16  ;;  %v1136_v30 = vadd.f32 %v11810_v50, %v11972_v51  ;;  %v8457_v17 = vmul.f32 -1.442695, %v1392_v1  ;;  %v1247_v42 = vadd.f32 %v11808_v49, %v11966_v11 }
 0x1dd   :  { %v10194_v13 = vpop.eup %10193  ;;  %10213 = vrcp.f32 %v1581_v48  ;;  %v1715_v32 = vmul.f32 %v10192_v18, %v1132_v35  ;;  %2980 = vmatprep.subr.bf16.mxu1 %v10005_v56  ;;  %v1395_v26 = vpop.f32.mrb[56].mxu0  ;;  %v1253_v50 = vadd.f32 %v11822_v61, %v11966_v11  ;;  %v1142_v20 = vadd.f32 %v11824_v62, %v11972_v51 }
 0x1de   :  { %v10196_v23 = vpop.eup %10195  ;;  %10215 = vpow2.f32 %v8453_v63  ;;  %v1716_v37 = vmul.f32 %v10194_v13, %v1243_v22  ;;  %v1396_v34 = vadd.f32 %v1395_v26, %v11924_v47  ;;  %v1397_v8 = vpop.f32.mrb[57].mxu0 }
 0x1df   :  { %v10198_v10 = vpop.eup %10197  ;;  %10217 = vpow2.f32 %v8454_v29  ;;  %v1718_v14 = vmul.f32 %v10196_v23, %v1136_v30  ;;  %v1398_v35 = vadd.f32 %v1397_v8, %v11928_v53  ;;  %v1399_v0 = vpop.f32.mrb[58].mxu0 }
 0x1e0   :  { %v10200_v25 = vpop.eup %10199  ;;  %v1583_v43 = vadd.f32 1.0, %v10198_v10  ;;  %10219 = vpow2.f32 %v8456_v38  ;;  %v8459_v40 = vmul.f32 -1.442695, %v1396_v34  ;;  %v1400_v16 = vadd.f32 %v1399_v0, %v11924_v47  ;;  %v1401_v49 = vpop.f32.mrb[59].mxu0 }
 0x1e1   :  { %v10202_v60 = vpop.eup %10201  ;;  %10221 = vpow2.f32 %v8457_v17  ;;  %v12039_v56 = vpack.c.bf16 %v1718_v14, %v1715_v32  ;;  %v1402_v61 = vadd.f32 %v1401_v49, %v11928_v53  ;;  %v8460_v29 = vmul.f32 -1.442695, %v1398_v35 }
 0x1e2   :  { %v10204_v59 = vpop.eup %10203  ;;  %10223 = vrcp.f32 %v1583_v43  ;;  %v1584_v63 = vadd.f32 1.0, %v10202_v60  ;;  %v1719_v18 = vmul.f32 %v10200_v25, %v1247_v42  ;;  %v1146_v38 = vadd.f32 %v11831_v5, %v11972_v51 }
 0x1e3   :  { %v10206_v1 = vpop.eup %10205  ;;  %v1586_v48 = vadd.f32 1.0, %v10204_v59  ;;  %10225 = vpow2.f32 %v8459_v40  ;;  %2580 = vmatprep.mubr.bf16.mxu1 %v12039_v56  ;;  %2806 = vmatprep.mubr.bf16.mxu0 %v12039_v56  ;;  %v8462_v62 = vmul.f32 -1.442695, %v1400_v16  ;;  %v8463_v17 = vmul.f32 -1.442695, %v1402_v61 }
 0x1e4   :  { %v10208_v22 = vpop.eup %10207  ;;  %10227 = vrcp.f32 %v1584_v63  ;;  %v1587_v13 = vadd.f32 1.0, %v10206_v1  ;;  %2581 = vmatmul.mubr.bf16.gmra.mrb[40].mxu1 %v11891_v7  ;;  %2807 = vmatmul.mubr.bf16.gmra.mrb[72].mxu0 %v11891_v7  ;;  %v12050_v23 = vpack.c.bf16 %v1719_v18, %v1716_v37  ;;  %v1257_v10 = vadd.f32 %v11829_v4, %v11966_v11 }
 0x1e5   :  { %v10210_v30 = vpop.eup %10209  ;;  %10229 = vrcp.f32 %v1586_v48  ;;  %v1721_v32 = vmul.f32 %v10208_v22, %v1142_v20  ;;  %v1405_v42 = vpop.f32.mrb[60].mxu0  ;;  %v1152_v37 = vadd.f32 %v11842_v33, %v11972_v51 }
 0x1e6   :  { %v10212_v26 = vpop.eup %10211  ;;  %10231 = vrcp.f32 %v1587_v13  ;;  %v1722_v5 = vmul.f32 %v10210_v30, %v1253_v50  ;;  %v1406_v8 = vadd.f32 %v1405_v42, %v11924_v47  ;;  %v1407_v14 = vpop.f32.mrb[61].mxu0 }
 0x1e7   :  { %v10214_v34 = vpop.eup %10213  ;;  %10233 = vpow2.f32 %v8460_v29  ;;  %v1724_v25 = vmul.f32 %v10212_v26, %v1146_v38  ;;  %v1409_v35 = vpop.f32.mrb[62].mxu0  ;;  %v1408_v4 = vadd.f32 %v1407_v14, %v11928_v53  ;;  %v1267_v26 = vadd.f32 %v11847_v41, %v11966_v11 }
 0x1e8   :  { %v10216_v43 = vpop.eup %10215  ;;  %10235 = vpow2.f32 %v8462_v62  ;;  %v1725_v0 = vmul.f32 %v10214_v34, %v1257_v10  ;;  %v1411_v16 = vpop.f32.mrb[63].mxu0  ;;  %v8465_v59 = vmul.f32 -1.442695, %v1406_v8  ;;  %v1410_v20 = vadd.f32 %v1409_v35, %v11924_v47 }
 0x1e9   :  { %v10218_v60 = vpop.eup %10217  ;;  %v1589_v40 = vadd.f32 1.0, %v10216_v43  ;;  %10237 = vpow2.f32 %v8463_v17  ;;  %v12059_v63 = vpack.c.bf16 %v1724_v25, %v1721_v32  ;;  %v1412_v48 = vadd.f32 %v1411_v16, %v11928_v53 }
 0x1ea   :  { %v10220_v50 = vpop.eup %10219  ;;  %v1590_v49 = vadd.f32 1.0, %v10218_v60  ;;  %v12062_v29 = vpack.c.bf16 %v1725_v0, %v1722_v5  ;;  %v1263_v47 = vadd.f32 %v11840_v31, %v11966_v11  ;;  %v8466_v38 = vmul.f32 -1.442695, %v1408_v4 }
 0x1eb   :  { %v10222_v61 = vpop.eup %10221  ;;  %10239 = vrcp.f32 %v1589_v40  ;;  %v1592_v1 = vadd.f32 1.0, %v10220_v50  ;;  %2590 = vmatprep.mubr.bf16.mxu1 %v12059_v63  ;;  %2816 = vmatprep.mubr.bf16.mxu0 %v12059_v63  ;;  %v1156_v62 = vadd.f32 %v11849_v44, %v11972_v51  ;;  %v8468_v17 = vmul.f32 -1.442695, %v1410_v20 }
 0x1ec   :  { %v10224_v33 = vpop.eup %10223  ;;  %10241 = vrcp.f32 %v1590_v49  ;;  %v1593_v18 = vadd.f32 1.0, %v10222_v61  ;;  %2591 = vmatmul.mubr.bf16.gmra.mrb[44].mxu1 %v11917_v24  ;;  %2817 = vmatmul.mubr.bf16.gmra.mrb[76].mxu0 %v11917_v24  ;;  %v8469_v31 = vmul.f32 -1.442695, %v1412_v48  ;;  %v1162_v41 = vadd.f32 %v11862_v6, %v11972_v51 }
 0x1ed   :  { %v10226_v22 = vpop.eup %10225  ;;  %10243 = vrcp.f32 %v1592_v1  ;;  %v1727_v53 = vmul.f32 %v10224_v33, %v1152_v37  ;;  %v1273_v40 = vadd.f32 %v11860_v3, %v11966_v11  ;;  %v1166_v16 = vadd.f32 %v11869_v19, %v11972_v51 }
 0x1ee   :  { %v10228_v13 = vpop.eup %10227  ;;  %10245 = vrcp.f32 %v1593_v18  ;;  %v1595_v30 = vadd.f32 1.0, %v10226_v22  ;;  %v1277_v49 = vadd.f32 %v11867_v12, %v11966_v11  ;;  %v1172_v3 = vadd.f32 %v11882_v55, %v11972_v51 }
 0x1ef   :  { %v10230_v32 = vpop.eup %10229  ;;  %10247 = vpow2.f32 %v8465_v59  ;;  %v1728_v10 = vmul.f32 %v10228_v13, %v1263_v47  ;;  %v1283_v55 = vadd.f32 %v11880_v54, %v11966_v11 }
 0x1f0   :  { %v10232_v42 = vpop.eup %10231  ;;  %10249 = vrcp.f32 %v1595_v30  ;;  %v1730_v5 = vmul.f32 %v10230_v32, %v1156_v62 }
 0x1f1   :  { %v10234_v34 = vpop.eup %10233  ;;  %10251 = vpow2.f32 %v8466_v38  ;;  %v1731_v8 = vmul.f32 %v10232_v42, %v1267_v26 }
 0x1f2   :  { %v10236_v14 = vpop.eup %10235  ;;  %v1596_v25 = vadd.f32 1.0, %v10234_v34  ;;  %10253 = vpow2.f32 %v8468_v17  ;;  %v12074_v44 = vpack.c.bf16 %v1730_v5, %v1727_v53  ;;  %v1176_v17 = vadd.f32 %v11889_v28, %v11972_v51 }
 0x1f3   :  { %v10238_v43 = vpop.eup %10237  ;;  %v1598_v35 = vadd.f32 1.0, %v10236_v14  ;;  %10255 = vpow2.f32 %v8469_v31  ;;  %v12076_v0 = vpack.c.bf16 %v1731_v8, %v1728_v10  ;;  %v1287_v31 = vadd.f32 %v11887_v2, %v11966_v11  ;;  %v14011_v14 = vld [vmem:[#allocation39_spill] sm:$0xff] }
 0x1f4   :  { %10257 = vrcp.f32 %v1596_v25  ;;  %v1599_v60 = vadd.f32 1.0, %v10238_v43  ;;  %2600 = vmatprep.mubr.bf16.mxu1 %v12074_v44  ;;  %2826 = vmatprep.mubr.bf16.mxu0 %v12074_v44  ;;  %v1182_v28 = vadd.f32 %v11902_v52, %v11972_v51  ;;  %v1293_v25 = vadd.f32 %v14011_v14, %v11966_v11  ;;  %v10042_v14 = vld [vmem:[#allocation12 + $0x280] ss:$24 sps:$4 sm:$0xff]  }
 0x1f5   :  { %v10240_v37 = vpop.eup %10239  ;;  %10259 = vrcp.f32 %v1598_v35  ;;  %2601 = vmatmul.mubr.bf16.gmra.mrb[48].mxu1 %v11935_v36  ;;  %2827 = vmatmul.mubr.bf16.gmra.mrb[80].mxu0 %v11935_v36 }
 0x1f6   :  { %v10242_v4 = vpop.eup %10241  ;;  %10261 = vrcp.f32 %v1599_v60  ;;  %v1733_v6 = vmul.f32 %v10240_v37, %v1162_v41  ;;  %v14012_v41 = vld [vmem:[#allocation43_spill] sm:$0xff] }
 0x1f7   :  { %v10244_v50 = vpop.eup %10243  ;;  %v1734_v59 = vmul.f32 %v10242_v4, %v1273_v40  ;;  %v1186_v60 = vadd.f32 %v14012_v41, %v11972_v51  ;;  %v14013_v40 = vld [vmem:[#allocation42_spill] sm:$0xff]  ;;  %v13974_v51 = vmov 0  }
 0x1f8   :  { %v10246_v20 = vpop.eup %10245  ;;  %v1736_v61 = vmul.f32 %v10244_v50, %v1166_v16  ;;  %v1297_v4 = vadd.f32 %v14013_v40, %v11966_v11  ;;  %v10003_v11 = vld [vmem:[#allocation12 + $0x10] ss:$24 sps:$4 sm:$0xff]   ;;  %v10048_v41 = vld [vmem:[#allocation12 + $0x2e0] ss:$24 sps:$4 sm:$0xff]   ;;  %v10056_v40 = vld [vmem:[#allocation12 + $0x344] ss:$24 sps:$4 sm:$0xff]  }
 0x1f9   :  { %v10248_v1 = vpop.eup %10247  ;;  %v1737_v48 = vmul.f32 %v10246_v20, %v1277_v49  ;;  %v10008_v20 = vld [vmem:[#allocation12 + $0x44] ss:$24 sps:$4 sm:$0xff]  }
 0x1fa   :  { %v10250_v33 = vpop.eup %10249  ;;  %v1601_v18 = vadd.f32 1.0, %v10248_v1  ;;  %v12092_v22 = vpack.c.bf16 %v1736_v61, %v1733_v6  ;;  %v10006_v61 = vld [vmem:[#allocation12 + $0x40] ss:$24 sps:$4 sm:$0xff]   ;;  %v10011_v1 = vld [vmem:[#allocation12 + $0x74] ss:$24 sps:$4 sm:$0xff]  }
 0x1fb   :  { %v10252_v47 = vpop.eup %10251  ;;  %v1739_v19 = vmul.f32 %v10250_v33, %v1172_v3  ;;  %v12094_v38 = vpack.c.bf16 %v1737_v48, %v1734_v59  ;;  %v10009_v3 = vld [vmem:[#allocation12 + $0x70] ss:$24 sps:$4 sm:$0xff]   ;;  %v10014_v48 = vld [vmem:[#allocation12 + $0xa4] ss:$24 sps:$4 sm:$0xff]   ;;  %v10012_v33 = vld [vmem:[#allocation12 + $0xa0] ss:$24 sps:$4 sm:$0xff]  }
 0x1fc   :  { %v10254_v53 = vpop.eup %10253  ;;  %10263 = vrcp.f32 %v1601_v18  ;;  %v1602_v13 = vadd.f32 1.0, %v10252_v47  ;;  %2610 = vmatprep.mubr.bf16.mxu1 %v12092_v22  ;;  %2836 = vmatprep.mubr.bf16.mxu0 %v12092_v22  ;;  %v10017_v18 = vld [vmem:[#allocation12 + $0xd4] ss:$24 sps:$4 sm:$0xff]   ;;  %v10015_v47 = vld [vmem:[#allocation12 + $0xd0] ss:$24 sps:$4 sm:$0xff]  }
 0x1fd   :  { %v10256_v12 = vpop.eup %10255  ;;  %v1604_v62 = vadd.f32 1.0, %v10254_v53  ;;  %2611 = vmatmul.mubr.bf16.gmra.mrb[52].mxu1 %v11945_v39  ;;  %2837 = vmatmul.mubr.bf16.gmra.mrb[84].mxu0 %v11945_v39  ;;  %v10018_v53 = vld [vmem:[#allocation12 + $0x100] ss:$24 sps:$4 sm:$0xff]  }
 0x1fe   :  { %v10258_v30 = vpop.eup %10257  ;;  %10265 = vrcp.f32 %v1602_v13  ;;  %v1605_v32 = vadd.f32 1.0, %v10256_v12  ;;  %v10023_v13 = vld [vmem:[#allocation12 + $0x134] ss:$24 sps:$4 sm:$0xff]   ;;  %v10021_v12 = vld [vmem:[#allocation12 + $0x130] ss:$24 sps:$4 sm:$0xff]  }
 0x1ff   :  { %v10260_v26 = vpop.eup %10259  ;;  %10267 = vrcp.f32 %v1604_v62  ;;  %v1740_v10 = vmul.f32 %v10258_v30, %v1283_v55  ;;  %v10026_v55 = vld [vmem:[#allocation12 + $0x164] ss:$24 sps:$4 sm:$0xff]   ;;  %v10024_v62 = vld [vmem:[#allocation12 + $0x160] ss:$24 sps:$4 sm:$0xff]   ;;  %v10029_v30 = vld [vmem:[#allocation12 + $0x194] ss:$24 sps:$4 sm:$0xff]  }
 0x200   :  { %v10262_v42 = vpop.eup %10261  ;;  %10269 = vrcp.f32 %v1605_v32  ;;  %v1742_v54 = vmul.f32 %v10260_v26, %v1176_v17  ;;  %v10027_v17 = vld [vmem:[#allocation12 + $0x190] ss:$24 sps:$4 sm:$0xff]   ;;  %v10032_v32 = vld [vmem:[#allocation12 + $0x1c4] ss:$24 sps:$4 sm:$0xff]   ;;  %v10030_v26 = vld [vmem:[#allocation12 + $0x1c0] ss:$24 sps:$4 sm:$0xff]  }
 0x201   :  { %v1743_v5 = vmul.f32 %v10262_v42, %v1287_v31  ;;  %v10035_v31 = vld [vmem:[#allocation12 + $0x1f4] ss:$24 sps:$4 sm:$0xff]   ;;  %v10038_v42 = vld [vmem:[#allocation12 + $0x224] ss:$24 sps:$4 sm:$0xff]  }
 0x202   :  { %v12106_v34 = vpack.c.bf16 %v1742_v54, %v1739_v19  ;;  %v10020_v19 = vld [vmem:[#allocation12 + $0x104] ss:$24 sps:$4 sm:$0xff]   ;;  %v10036_v54 = vld [vmem:[#allocation12 + $0x220] ss:$24 sps:$4 sm:$0xff]  }
 0x203   :  { %v12108_v8 = vpack.c.bf16 %v1743_v5, %v1740_v10  ;;  %v10033_v10 = vld [vmem:[#allocation12 + $0x1f0] ss:$24 sps:$4 sm:$0xff]   ;;  %v10041_v5 = vld [vmem:[#allocation12 + $0x254] ss:$24 sps:$4 sm:$0xff]  }
 0x204   :  { %2620 = vmatprep.mubr.bf16.mxu1 %v12106_v34  ;;  %2846 = vmatprep.mubr.bf16.mxu0 %v12106_v34 }
 0x205   :  { %2621 = vmatmul.mubr.bf16.gmra.mrb[56].mxu1 %v11961_v58  ;;  %2847 = vmatmul.mubr.bf16.gmra.mrb[88].mxu0 %v11961_v58 }
 0x206   :  { %v10264_v2 = vpop.eup %10263 }
 0x207   :  { %v1745_v43 = vmul.f32 %v10264_v2, %v1182_v28  ;;  %v10039_v28 = vld [vmem:[#allocation12 + $0x250] ss:$24 sps:$4 sm:$0xff]   ;;  %v10044_v2 = vld [vmem:[#allocation12 + $0x284] ss:$24 sps:$4 sm:$0xff]  }
 0x208   :  { %v10266_v35 = vpop.eup %10265 }
 0x209   :  { %v10268_v37 = vpop.eup %10267  ;;  %v1746_v16 = vmul.f32 %v10266_v35, %v1293_v25  ;;  %v10047_v25 = vld [vmem:[#allocation12 + $0x2b4] ss:$24 sps:$4 sm:$0xff]   ;;  %v10050_v35 = vld [vmem:[#allocation12 + $0x2e4] ss:$24 sps:$4 sm:$0xff]  }
 0x20a   :  { %v10270_v6 = vpop.eup %10269  ;;  %v1748_v52 = vmul.f32 %v10268_v37, %v1186_v60  ;;  %v10053_v60 = vld [vmem:[#allocation12 + $0x314] ss:$24 sps:$4 sm:$0xff]   ;;  %v10051_v37 = vld [vmem:[#allocation12 + $0x310] ss:$24 sps:$4 sm:$0xff]  }
 0x20b   :  { %v1749_v50 = vmul.f32 %v10270_v6, %v1297_v4  ;;  %v10054_v4 = vld [vmem:[#allocation12 + $0x340] ss:$24 sps:$4 sm:$0xff]   ;;  %v10059_v6 = vld [vmem:[#allocation12 + $0x370] ss:$24 sps:$4 sm:$0x3f]  }
 0x20c   :  { %v12122_v49 = vpack.c.bf16 %v1748_v52, %v1745_v43  ;;  %v10045_v43 = vld [vmem:[#allocation12 + $0x2b0] ss:$24 sps:$4 sm:$0xff]  }
 0x20d   :  { %v12124_v59 = vpack.c.bf16 %v1749_v50, %v1746_v16  ;;  %v10057_v16 = vld [vmem:[#allocation12 + $0x374] ss:$24 sps:$4 sm:$0x3f]  }
 0x20e   :  { %2630 = vmatprep.mubr.bf16.mxu1 %v12122_v49  ;;  %2856 = vmatprep.mubr.bf16.mxu0 %v12122_v49 }
 0x20f   :  { %2631 = vmatmul.mubr.bf16.gmra.mrb[60].mxu1 %v11984_v57  ;;  %2857 = vmatmul.mubr.bf16.gmra.mrb[92].mxu0 %v11984_v57 }
 0x210   :  { %2673 = vmatprep.mubr.bf16.mxu1 %v13974_v51  ;;  %2899 = vmatprep.mubr.bf16.mxu0 %v13974_v51 }
 0x217   :  { %8585 = vmatmul.mubr.msk.bf16.vlgmr.msra.gmra.mrb[32].mxu1 %vm2484_vm1, %v11997_v9  ;;  %8594 = vmatmul.mubr.msk.bf16.vlgmr.msra.gmra.mrb[64].mxu0 %vm2484_vm1, %v11997_v9 }
 0x218   :  { %2981 = vmatpush1.bf16.msra.mxu1 %v10003_v11  ;;  %2683 = vmatprep.mubr.bf16.mxu1 %v13974_v51 }
 0x219   :  { %2982 = vmatprep.subr.bf16.mxu1 %v10008_v20  ;;  %2909 = vmatprep.mubr.bf16.mxu0 %v13974_v51  ;;  %v10064_v20 = vld [vmem:[%s13952_s6 + $0x50] sm:$0xff]  }
 0x21c   :  { %2983 = vmatpush1.bf16.msra.mxu1 %v10006_v61 }
 0x21d   :  { %2984 = vmatprep.subr.bf16.mxu1 %v10011_v1 }
 0x21f   :  { %8586 = vmatmul.mubr.msk.bf16.gmra.mrb[36].mxu1 %vm2484_vm1, %v12026_v46  ;;  %8595 = vmatmul.mubr.msk.bf16.gmra.mrb[68].mxu0 %vm2484_vm1, %v12026_v46 }
 0x220   :  { %2985 = vmatpush1.bf16.msra.mxu1 %v10009_v3  ;;  %2693 = vmatprep.mubr.bf16.mxu1 %v13974_v51  ;;  %v10065_v3 = vld [vmem:[%s13952_s6 + $0x10] sm:$0xff]  }
 0x221   :  { %2986 = vmatprep.subr.bf16.mxu1 %v10014_v48  ;;  %2919 = vmatprep.mubr.bf16.mxu0 %v13974_v51 }
 0x224   :  { %2987 = vmatpush1.bf16.msra.mxu1 %v10012_v33 }
 0x225   :  { %2988 = vmatprep.subr.bf16.mxu1 %v10017_v18 }
 0x227   :  { %8587 = vmatmul.mubr.msk.bf16.gmra.mrb[40].mxu1 %vm2484_vm1, %v12050_v23  ;;  %8596 = vmatmul.mubr.msk.bf16.gmra.mrb[72].mxu0 %vm2484_vm1, %v12050_v23 }
 0x228   :  { %2989 = vmatpush1.bf16.msra.mxu1 %v10015_v47  ;;  %2703 = vmatprep.mubr.bf16.mxu1 %v13974_v51  ;;  %v10066_v47 = vld [vmem:[%s13952_s6 + $0x58] sm:$0xff]  }
 0x229   :  { %2990 = vmatprep.subr.bf16.mxu1 %v10020_v19  ;;  %2929 = vmatprep.mubr.bf16.mxu0 %v13974_v51  ;;  %v10067_v19 = vld [vmem:[%s13952_s6 + $0x18] sm:$0xff]  }
 0x22c   :  { %2991 = vmatpush1.bf16.msra.mxu1 %v10018_v53 }
 0x22d   :  { %2992 = vmatprep.subr.bf16.mxu1 %v10023_v13 }
 0x22f   :  { %8588 = vmatmul.mubr.msk.bf16.gmra.mrb[44].mxu1 %vm2484_vm1, %v12062_v29  ;;  %8597 = vmatmul.mubr.msk.bf16.gmra.mrb[76].mxu0 %vm2484_vm1, %v12062_v29 }
 0x230   :  { %2993 = vmatpush1.bf16.msra.mxu1 %v10021_v12  ;;  %2713 = vmatprep.mubr.bf16.mxu1 %v13974_v51 }
 0x231   :  { %2994 = vmatprep.subr.bf16.mxu1 %v10026_v55  ;;  %2939 = vmatprep.mubr.bf16.mxu0 %v13974_v51 }
 0x234   :  { %2995 = vmatpush1.bf16.msra.mxu1 %v10024_v62 }
 0x235   :  { %2996 = vmatprep.subr.bf16.mxu1 %v10029_v30 }
 0x237   :  { %8589 = vmatmul.mubr.msk.bf16.gmra.mrb[48].mxu1 %vm2484_vm1, %v12076_v0  ;;  %8598 = vmatmul.mubr.msk.bf16.gmra.mrb[80].mxu0 %vm2484_vm1, %v12076_v0 }
 0x238   :  { %2997 = vmatpush1.bf16.msra.mxu1 %v10027_v17  ;;  %2723 = vmatprep.mubr.bf16.mxu1 %v13974_v51 }
 0x239   :  { %2998 = vmatprep.subr.bf16.mxu1 %v10032_v32  ;;  %2949 = vmatprep.mubr.bf16.mxu0 %v13974_v51 }
 0x23c   :  { %2999 = vmatpush1.bf16.msra.mxu1 %v10030_v26 }
 0x23d   :  { %3000 = vmatprep.subr.bf16.mxu1 %v10035_v31 }
 0x23f   :  { %8590 = vmatmul.mubr.msk.bf16.gmra.mrb[52].mxu1 %vm2484_vm1, %v12094_v38  ;;  %8599 = vmatmul.mubr.msk.bf16.gmra.mrb[84].mxu0 %vm2484_vm1, %v12094_v38 }
 0x240   :  { %3001 = vmatpush1.bf16.msra.mxu1 %v10033_v10  ;;  %2733 = vmatprep.mubr.bf16.mxu1 %v13974_v51 }
 0x241   :  { %3002 = vmatprep.subr.bf16.mxu1 %v10038_v42  ;;  %2959 = vmatprep.mubr.bf16.mxu0 %v13974_v51 }
 0x244   :  { %3003 = vmatpush1.bf16.msra.mxu1 %v10036_v54 }
 0x245   :  { %3004 = vmatprep.subr.bf16.mxu1 %v10041_v5  ;;  %v10068_v5 = vld [vmem:[%s13952_s6 + $0x60] sm:$0xff]  }
 0x247   :  { %8591 = vmatmul.mubr.msk.bf16.gmra.mrb[56].mxu1 %vm2484_vm1, %v12108_v8  ;;  %8600 = vmatmul.mubr.msk.bf16.gmra.mrb[88].mxu0 %vm2484_vm1, %v12108_v8 }
 0x248   :  { %3005 = vmatpush1.bf16.msra.mxu1 %v10039_v28  ;;  %2743 = vmatprep.mubr.bf16.mxu1 %v13974_v51 }
 0x249   :  { %3006 = vmatprep.subr.bf16.mxu1 %v10044_v2  ;;  %2969 = vmatprep.mubr.bf16.mxu0 %v13974_v51 }
 0x24c   :  { %3007 = vmatpush1.bf16.msra.mxu1 %v10042_v14  ;;  %v10069_v14 = vld [vmem:[%s13952_s6 + $0x20] sm:$0xff]  }
 0x24d   :  { %3008 = vmatprep.subr.bf16.mxu1 %v10047_v25 }
 0x24f   :  { %8592 = vmatmul.mubr.msk.bf16.gmra.mrb[60].mxu1 %vm2484_vm1, %v12124_v59  ;;  %8601 = vmatmul.mubr.msk.bf16.gmra.mrb[92].mxu0 %vm2484_vm1, %v12124_v59 }
 0x250   :  { %3009 = vmatpush1.bf16.msra.mxu1 %v10045_v43  ;;  %3012 = vmatprep.mubr.bf16.mxu1 %v11994_v15  ;;  %v2523_v15 = vsel %vm2509_vm0, %v10059_v6, 0  ;;  %v10070_v43 = vld [vmem:[%s13952_s6 + $0x68] sm:$0xff]  }
 0x251   :  { %3010 = vmatprep.subr.bf16.mxu1 %v10050_v35 }
 0x254   :  { %3011 = vmatpush1.bf16.msra.mxu1 %v10048_v41  ;;  %v14015_v41 = vld [vmem:[#allocation38_spill] sm:$0xff] }
 0x255   :  { %3093 = vmatprep.subr.bf16.mxu1 %v10053_v60 }
 0x257   :  { %3013 = vmatmul.mubr.bf16.vlgmr.msra.gmra.mrb[64].mxu1 %v11851_v45  ;;  %v10060_v45 = vld [vmem:[%s13952_s6 + $0x40] sm:$0xff]  }
 0x258   :  { %3022 = vmatprep.mubr.bf16.mxu1 %v12015_v27  ;;  %3094 = vmatpush1.bf16.msra.mxu1 %v10051_v37 }
 0x259   :  { %3095 = vmatprep.subr.bf16.mxu1 %v10056_v40  ;;  %9081 = vmatprep.subr.bf16.mxu0 %v10060_v45 }
 0x25c   :  { %3096 = vmatpush1.bf16.msra.mxu1 %v10054_v4  ;;  %v10071_v4 = vld [vmem:[%s13952_s6 + $0x28] sm:$0xff]  }
 0x25d   :  { %8602 = vmatprep.subr.msk.bf16.mxu1 %vm2509_vm0, %v10057_v16 }
 0x25f   :  { %3023 = vmatmul.mubr.bf16.gmra.mrb[68].mxu1 %v11871_v21  ;;  %v10061_v21 = vld [vmem:[%s13952_s6] sm:$0xff]  }
 0x260   :  { %3032 = vmatprep.mubr.bf16.mxu1 %v12039_v56  ;;  %3098 = vmatpush1.bf16.msra.mxu1 %v2523_v15 }
 0x261   :  { %9178 = vmatprep.subr.bf16.mxu1 %v10060_v45  ;;  %9082 = vmatpush3.bf16.msra.mxu0 %v10061_v21 }
 0x267   :  { %3033 = vmatmul.mubr.bf16.gmra.mrb[72].mxu1 %v11891_v7  ;;  %v10062_v7 = vld [vmem:[%s13952_s6 + $0x48] sm:$0xff]  }
 0x268   :  { %3042 = vmatprep.mubr.bf16.mxu1 %v12059_v63  ;;  %9083 = vmatprep.subr.bf16.mxu0 %v10062_v7 }
 0x26f   :  { %3043 = vmatmul.mubr.bf16.gmra.mrb[76].mxu1 %v11917_v24  ;;  %v10063_v24 = vld [vmem:[%s13952_s6 + $0x8] sm:$0xff]  }
 0x270   :  { %3052 = vmatprep.mubr.bf16.mxu1 %v12074_v44  ;;  %9084 = vmatpush3.bf16.msra.mxu0 %v10063_v24 }
 0x271   :  { %9085 = vmatprep.subr.bf16.mxu0 %v10064_v20 }
 0x274   :  { %9086 = vmatpush3.bf16.msra.mxu0 %v10065_v3 }
 0x275   :  { %9087 = vmatprep.subr.bf16.mxu0 %v10066_v47 }
 0x277   :  { %3053 = vmatmul.mubr.bf16.gmra.mrb[80].mxu1 %v11935_v36  ;;  %v12235_v36 = vld [vmem:[%s13951_s5] sm:$0x3f] }
 0x278   :  { %3062 = vmatprep.mubr.bf16.mxu1 %v12092_v22  ;;  %9088 = vmatpush3.bf16.msra.mxu0 %v10067_v19  ;;  %v12306_v60 = vrot.slane %v12235_v36, %v14015_v41 }
 0x279   :  { %9089 = vmatprep.subr.bf16.mxu0 %v10068_v5 }
 0x27c   :  { %9090 = vmatpush3.bf16.msra.mxu0 %v10069_v14 }
 0x27d   :  { %9091 = vmatprep.subr.bf16.mxu0 %v10070_v43 }
 0x27f   :  { %3063 = vmatmul.mubr.bf16.gmra.mrb[84].mxu1 %v11945_v39  ;;  %v14014_v39 = vld [vmem:[#allocation37_spill] sm:$0xff] }
 0x280   :  { %3072 = vmatprep.mubr.bf16.mxu1 %v12106_v34  ;;  %9092 = vmatpush3.bf16.msra.mxu0 %v10071_v4 }
 0x287   :  { %3073 = vmatmul.mubr.bf16.gmra.mrb[88].mxu1 %v11961_v58  ;;  %v12239_v58 = vrot.slane %v12235_v36, %v14014_v39 }
 0x288   :  { %3082 = vmatprep.mubr.bf16.mxu1 %v12122_v49 }
 0x28f   :  { %3083 = vmatmul.mubr.bf16.gmra.mrb[92].mxu1 %v11984_v57 }
 0x290   :  { %3125 = vmatprep.mubr.bf16.mxu1 %v13974_v51 }
 0x297   :  { %8603 = vmatmul.mubr.msk.bf16.vlgmr.msra.gmra.mrb[64].mxu1 %vm2484_vm1, %v11997_v9 }
 0x298   :  { %3135 = vmatprep.mubr.bf16.mxu1 %v13974_v51  ;;  %9186 = vmatpush3.bf16.msra.mxu1 %v10061_v21 }
 0x299   :  { %9179 = vmatprep.subr.bf16.mxu1 %v10062_v7 }
 0x29c   :  { %9187 = vmatpush3.bf16.msra.mxu1 %v10063_v24 }
 0x29d   :  { %9180 = vmatprep.subr.bf16.mxu1 %v10064_v20 }
 0x29f   :  { %8604 = vmatmul.mubr.msk.bf16.gmra.mrb[68].mxu1 %vm2484_vm1, %v12026_v46 }
 0x2a0   :  { %3145 = vmatprep.mubr.bf16.mxu1 %v13974_v51  ;;  %9188 = vmatpush3.bf16.msra.mxu1 %v10065_v3 }
 0x2a1   :  { %9181 = vmatprep.subr.bf16.mxu1 %v10066_v47 }
 0x2a4   :  { %9189 = vmatpush3.bf16.msra.mxu1 %v10067_v19  ;;  %v10074_v19 = vld [vmem:[%s13952_s6 + $0x78] sm:$0xff]  }
 0x2a5   :  { %9182 = vmatprep.subr.bf16.mxu1 %v10068_v5 }
 0x2a7   :  { %8605 = vmatmul.mubr.msk.bf16.gmra.mrb[72].mxu1 %vm2484_vm1, %v12050_v23 }
 0x2a8   :  { %3155 = vmatprep.mubr.bf16.mxu1 %v13974_v51  ;;  %9190 = vmatpush3.bf16.msra.mxu1 %v10069_v14 }
 0x2a9   :  { %9183 = vmatprep.subr.bf16.mxu1 %v10070_v43 }
 0x2ac   :  { %9191 = vmatpush3.bf16.msra.mxu1 %v10071_v4 }
 0x2af   :  { %8606 = vmatmul.mubr.msk.bf16.gmra.mrb[76].mxu1 %vm2484_vm1, %v12062_v29 }
 0x2b0   :  { %3165 = vmatprep.mubr.bf16.mxu1 %v13974_v51 }
 0x2b7   :  { %8607 = vmatmul.mubr.msk.bf16.gmra.mrb[80].mxu1 %vm2484_vm1, %v12076_v0 }
 0x2b8   :  { %3175 = vmatprep.mubr.bf16.mxu1 %v13974_v51 }
 0x2bf   :  { %8608 = vmatmul.mubr.msk.bf16.gmra.mrb[84].mxu1 %vm2484_vm1, %v12094_v38 }
 0x2c0   :  { %3185 = vmatprep.mubr.bf16.mxu1 %v13974_v51 }
 0x2c7   :  { %8609 = vmatmul.mubr.msk.bf16.gmra.mrb[88].mxu1 %vm2484_vm1, %v12108_v8 }
 0x2c8   :  { %3195 = vmatprep.mubr.bf16.mxu1 %v13974_v51 }
 0x2cf   :  { %8610 = vmatmul.mubr.msk.bf16.gmra.mrb[92].mxu1 %vm2484_vm1, %v12124_v59 }
 0x2ea   :  { %v12241_v57 = vpop.f32.mrb[32].mxu1  ;;  %v12243_v9 = vpop.f32.mrb[64].mxu0 }
 0x2eb   :  { %v12245_v27 = vpop.f32.mrb[33].mxu1  ;;  %v2903_v46 = vpop.f32.mrb[65].mxu0 }
 0x2ec   :  { %v9227_v56 = vadd.f32 %v2903_v46, %v12239_v58  ;;  %v12248_v23 = vpop.f32.mrb[34].mxu1  ;;  %v12250_v63 = vpop.f32.mrb[66].mxu0 }
 0x2ed   :  { %v12252_v29 = vpop.f32.mrb[35].mxu1  ;;  %v2907_v44 = vpop.f32.mrb[67].mxu0 }
 0x2ee   :  { %v8611_v0 = vmul.f32 -1.442695, %v9227_v56  ;;  %v9229_v22 = vadd.f32 %v2907_v44, %v12239_v58 }
 0x2f0   :  { %10271 = vpow2.f32 %v8611_v0  ;;  %v8614_v38 = vmul.f32 -1.442695, %v9229_v22  ;;  %v10072_v0 = vld [vmem:[%s13952_s6 + $0x70] sm:$0xff]   ;;  %v9194_v22 = vadd.f32 %v12241_v57, %v12306_v60 }
 0x2f1   :  { %9093 = vmatprep.subr.bf16.mxu0 %v10072_v0  ;;  %9184 = vmatprep.subr.bf16.mxu1 %v10072_v0 }
 0x2f2   :  { %10273 = vpow2.f32 %v8614_v38  ;;  %v12255_v34 = vpop.f32.mrb[36].mxu1  ;;  %v12257_v8 = vpop.f32.mrb[68].mxu0 }
 0x2f3   :  { %v12259_v52 = vpop.f32.mrb[37].mxu1  ;;  %v2913_v50 = vpop.f32.mrb[69].mxu0  ;;  %v9198_v43 = vadd.f32 %v12255_v34, %v12306_v60  ;;  %v12374_v34 = vld [vmem:[%s13952_s6 + $0x80] sm:$0xff]  }
 0x2f4   :  { %v9231_v49 = vadd.f32 %v2913_v50, %v12239_v58  ;;  %v12262_v59 = vpop.f32.mrb[38].mxu1  ;;  %v12264_v11 = vpop.f32.mrb[70].mxu0 }
 0x2f5   :  { %v12269_v61 = vpop.f32.mrb[39].mxu1  ;;  %v2917_v1 = vpop.f32.mrb[71].mxu0 }
 0x2f6   :  { %v8617_v48 = vmul.f32 -1.442695, %v9231_v49  ;;  %v9233_v33 = vadd.f32 %v2917_v1, %v12239_v58  ;;  %v10073_v49 = vld [vmem:[%s13952_s6 + $0x30] sm:$0xff]   ;;  %v9196_v1 = vadd.f32 %v12248_v23, %v12306_v60 }
 0x2f7   :  { %9094 = vmatpush3.bf16.msra.mxu0 %v10073_v49  ;;  %9192 = vmatpush3.bf16.msra.mxu1 %v10073_v49 }
 0x2f8   :  { %10275 = vpow2.f32 %v8617_v48  ;;  %v8620_v18 = vmul.f32 -1.442695, %v9233_v33  ;;  %9095 = vmatprep.subr.bf16.mxu0 %v10074_v19  ;;  %9185 = vmatprep.subr.bf16.mxu1 %v10074_v19 }
 0x2fa   :  { %v10272_v53 = vpop.eup %10271  ;;  %10277 = vpow2.f32 %v8620_v18  ;;  %v12281_v13 = vpop.f32.mrb[40].mxu1 }
 0x2fb   :  { %v12283_v12 = vpop.f32.mrb[72].mxu0  ;;  %v3350_v55 = vadd.f32 1.0, %v10272_v53  ;;  %v12285_v62 = vpop.f32.mrb[41].mxu1 }
 0x2fc   :  { %v2923_v30 = vpop.f32.mrb[73].mxu0  ;;  %v10274_v17 = vpop.eup %10273 }
 0x2fd   :  { %v9235_v32 = vadd.f32 %v2923_v30, %v12239_v58  ;;  %v12288_v26 = vpop.f32.mrb[42].mxu1  ;;  %v12290_v31 = vpop.f32.mrb[74].mxu0  ;;  %10279 = vrcp.f32 %v3350_v55  ;;  %v3353_v10 = vadd.f32 1.0, %v10274_v17  ;;  %v10075_v17 = vld [vmem:[%s13952_s6 + $0x38] sm:$0xff]  }
 0x2fe   :  { %v12292_v42 = vpop.f32.mrb[43].mxu1  ;;  %v2927_v54 = vpop.f32.mrb[75].mxu0  ;;  %9096 = vmatpush3.bf16.msra.mxu0 %v10075_v17  ;;  %9193 = vmatpush3.bf16.msra.mxu1 %v10075_v17  ;;  %v9202_v17 = vadd.f32 %v12281_v13, %v12306_v60 }
 0x2ff   :  { %v8623_v28 = vmul.f32 -1.442695, %v9235_v32  ;;  %v9237_v2 = vadd.f32 %v2927_v54, %v12239_v58  ;;  %10281 = vrcp.f32 %v3353_v10  ;;  %9156 = vmatprep.subr.bf16.mxu0 %v12374_v34 }
 0x301   :  { %10283 = vpow2.f32 %v8623_v28  ;;  %v8626_v25 = vmul.f32 -1.442695, %v9237_v2 }
 0x302   :  { %v10276_v35 = vpop.eup %10275  ;;  %v12308_v37 = vpop.f32.mrb[44].mxu1 }
 0x303   :  { %10285 = vpow2.f32 %v8626_v25  ;;  %v12310_v40 = vpop.f32.mrb[76].mxu0  ;;  %v3356_v16 = vadd.f32 1.0, %v10276_v35  ;;  %v12315_v6 = vpop.f32.mrb[45].mxu1 }
 0x304   :  { %v2933_v15 = vpop.f32.mrb[77].mxu0  ;;  %v10278_v45 = vpop.eup %10277 }
 0x305   :  { %v9239_v21 = vadd.f32 %v2933_v15, %v12239_v58  ;;  %v12318_v7 = vpop.f32.mrb[46].mxu1  ;;  %v12320_v24 = vpop.f32.mrb[78].mxu0  ;;  %10287 = vrcp.f32 %v3356_v16  ;;  %v3359_v46 = vadd.f32 1.0, %v10278_v45  ;;  %v9200_v15 = vadd.f32 %v12262_v59, %v12306_v60 }
 0x306   :  { %v12322_v56 = vpop.f32.mrb[47].mxu1  ;;  %v2937_v44 = vpop.f32.mrb[79].mxu0 }
 0x307   :  { %v8629_v38 = vmul.f32 -1.442695, %v9239_v21  ;;  %v9241_v50 = vadd.f32 %v2937_v44, %v12239_v58  ;;  %v10280_v20 = vpop.eup %10279  ;;  %10289 = vrcp.f32 %v3359_v46 }
 0x308   :  { %v12335_v48 = vmul.f32 %v10280_v20, %v9194_v22 }
 0x309   :  { %10291 = vpow2.f32 %v8629_v38  ;;  %v8632_v3 = vmul.f32 -1.442695, %v9241_v50  ;;  %v10282_v57 = vpop.eup %10281 }
 0x30a   :  { %v12337_v18 = vpop.f32.mrb[48].mxu1  ;;  %v12339_v47 = vpop.f32.mrb[80].mxu0  ;;  %v12344_v53 = vmul.f32 %v10282_v57, %v9196_v1 }
 0x30b   :  { %v10284_v33 = vpop.eup %10283  ;;  %10293 = vpow2.f32 %v8632_v3  ;;  %v12346_v55 = vpop.f32.mrb[49].mxu1 }
 0x30c   :  { %v3362_v23 = vadd.f32 1.0, %v10284_v33  ;;  %v2943_v30 = vpop.f32.mrb[81].mxu0  ;;  %v12352_v54 = vpop.f32.mrb[50].mxu1 }
 0x30d   :  { %v10286_v32 = vpop.eup %10285  ;;  %v9243_v10 = vadd.f32 %v2943_v30, %v12239_v58  ;;  %v12354_v5 = vpop.f32.mrb[82].mxu0 }
 0x30e   :  { %10295 = vrcp.f32 %v3362_v23  ;;  %v3365_v2 = vadd.f32 1.0, %v10286_v32  ;;  %v12358_v14 = vpop.f32.mrb[51].mxu1  ;;  %v2947_v25 = vpop.f32.mrb[83].mxu0 }
 0x30f   :  { %v8635_v35 = vmul.f32 -1.442695, %v9243_v10  ;;  %v9245_v4 = vadd.f32 %v2947_v25, %v12239_v58  ;;  %v10288_v16 = vpop.eup %10287  ;;  %v9204_v25 = vadd.f32 %v12288_v26, %v12306_v60 }
 0x310   :  { %10297 = vrcp.f32 %v3365_v2  ;;  %v12365_v21 = vmul.f32 %v10288_v16, %v9198_v43 }
 0x311   :  { %10299 = vpow2.f32 %v8635_v35  ;;  %v8638_v45 = vmul.f32 -1.442695, %v9245_v4  ;;  %v10290_v46 = vpop.eup %10289 }
 0x312   :  { %v12367_v0 = vpop.f32.mrb[52].mxu1  ;;  %v12369_v22 = vpop.f32.mrb[84].mxu0  ;;  %v12376_v38 = vmul.f32 %v10290_v46, %v9200_v15 }
 0x313   :  { %v10292_v44 = vpop.eup %10291  ;;  %10301 = vpow2.f32 %v8638_v45  ;;  %v12378_v59 = vpop.f32.mrb[53].mxu1 }
 0x314   :  { %v3368_v50 = vadd.f32 1.0, %v10292_v44  ;;  %v2953_v49 = vpop.f32.mrb[85].mxu0  ;;  %v12381_v3 = vpop.f32.mrb[54].mxu1 }
 0x315   :  { %v10294_v20 = vpop.eup %10293  ;;  %v9247_v1 = vadd.f32 %v2953_v49, %v12239_v58  ;;  %v12383_v57 = vpop.f32.mrb[86].mxu0 }
 0x316   :  { %10303 = vrcp.f32 %v3368_v50  ;;  %v3371_v19 = vadd.f32 1.0, %v10294_v20  ;;  %v12388_v23 = vpop.f32.mrb[55].mxu1  ;;  %v2957_v30 = vpop.f32.mrb[87].mxu0 }
 0x317   :  { %v8641_v32 = vmul.f32 -1.442695, %v9247_v1  ;;  %v9249_v10 = vadd.f32 %v2957_v30, %v12239_v58 }
 0x318   :  { %v10296_v2 = vpop.eup %10295  ;;  %10305 = vrcp.f32 %v3371_v19 }
 0x319   :  { %10307 = vpow2.f32 %v8641_v32  ;;  %v8644_v43 = vmul.f32 -1.442695, %v9249_v10  ;;  %v12395_v35 = vmul.f32 %v10296_v2, %v9202_v17  ;;  %v9206_v10 = vadd.f32 %v12308_v37, %v12306_v60 }
 0x31a   :  { %v10298_v4 = vpop.eup %10297  ;;  %v12397_v15 = vpop.f32.mrb[56].mxu1 }
 0x31b   :  { %v10300_v16 = vpop.eup %10299  ;;  %10309 = vpow2.f32 %v8644_v43  ;;  %v12399_v45 = vpop.f32.mrb[88].mxu0  ;;  %v12401_v13 = vmul.f32 %v10298_v4, %v9204_v25  ;;  %v9208_v4 = vadd.f32 %v12318_v7, %v12306_v60 }
 0x31c   :  { %v3374_v46 = vadd.f32 1.0, %v10300_v16  ;;  %v12403_v44 = vpop.f32.mrb[57].mxu1  ;;  %v2963_v50 = vpop.f32.mrb[89].mxu0 }
 0x31d   :  { %v10302_v49 = vpop.eup %10301  ;;  %v9251_v26 = vadd.f32 %v2963_v50, %v12239_v58  ;;  %v12406_v20 = vpop.f32.mrb[58].mxu1 }
 0x31e   :  { %v12408_v1 = vpop.f32.mrb[90].mxu0  ;;  %10311 = vrcp.f32 %v3374_v46  ;;  %v3377_v30 = vadd.f32 1.0, %v10302_v49  ;;  %v12412_v17 = vpop.f32.mrb[59].mxu1 }
 0x31f   :  { %v2967_v32 = vpop.f32.mrb[91].mxu0  ;;  %v8647_v2 = vmul.f32 -1.442695, %v9251_v26 }
 0x320   :  { %v9253_v25 = vadd.f32 %v2967_v32, %v12239_v58  ;;  %v10304_v43 = vpop.eup %10303  ;;  %10313 = vrcp.f32 %v3377_v30 }
 0x321   :  { %10315 = vpow2.f32 %v8647_v2  ;;  %v12419_v50 = vmul.f32 %v10304_v43, %v9206_v10 }
 0x322   :  { %v8650_v16 = vmul.f32 -1.442695, %v9253_v25  ;;  %v10306_v46 = vpop.eup %10305  ;;  %v2745_v51 = vpop.f32.mrb[60].mxu1 }
 0x323   :  { %v10308_v49 = vpop.eup %10307  ;;  %v12421_v19 = vpop.f32.mrb[92].mxu0  ;;  %v12423_v33 = vmul.f32 %v10306_v46, %v9208_v4  ;;  %v9210_v4 = vadd.f32 %v12337_v18, %v12306_v60 }
 0x324   :  { %10317 = vpow2.f32 %v8650_v16  ;;  %14016 = vst [vmem:[#allocation39_spill] sm:$0xff] %v12421_v19  ;;  %v3380_v37 = vadd.f32 1.0, %v10308_v49  ;;  %v12425_v26 = vpop.f32.mrb[61].mxu1  ;;  %v2973_v32 = vpop.f32.mrb[93].mxu0 }
 0x325   :  { %v10310_v30 = vpop.eup %10309  ;;  %v9255_v28 = vadd.f32 %v2973_v32, %v12239_v58  ;;  %v2749_v7 = vpop.f32.mrb[62].mxu1  ;;  %v9212_v32 = vadd.f32 %v12352_v54, %v12306_v60 }
 0x326   :  { %v12428_v2 = vpop.f32.mrb[94].mxu0  ;;  %10319 = vrcp.f32 %v3380_v37  ;;  %v3383_v25 = vadd.f32 1.0, %v10310_v30  ;;  %v12432_v43 = vpop.f32.mrb[63].mxu1 }
 0x327   :  { %14017 = vst [vmem:[#allocation43_spill] sm:$0xff] %v12428_v2  ;;  %14018 = vst [vmem:[#allocation42_spill] sm:$0xff] %v12432_v43  ;;  %v2977_v16 = vpop.f32.mrb[95].mxu0  ;;  %v8653_v46 = vmul.f32 -1.442695, %v9255_v28  ;;  %v9214_v28 = vadd.f32 %v12367_v0, %v12306_v60  ;;  %v9218_v0 = vadd.f32 %v12397_v15, %v12306_v60 }
 0x328   :  { %v9257_v49 = vadd.f32 %v2977_v16, %v12239_v58  ;;  %v10312_v41 = vpop.eup %10311  ;;  %10321 = vrcp.f32 %v3383_v25 }
 0x329   :  { %10323 = vpow2.f32 %v8653_v46  ;;  %v12439_v2 = vmul.f32 %v10312_v41, %v9210_v4  ;;  %v9216_v41 = vadd.f32 %v12381_v3, %v12306_v60  ;;  %v9220_v3 = vadd.f32 %v12406_v20, %v12306_v60 }
 0x32a   :  { %v8656_v39 = vmul.f32 -1.442695, %v9257_v49  ;;  %v10314_v37 = vpop.eup %10313 }
 0x32b   :  { %v10316_v30 = vpop.eup %10315  ;;  %v12441_v10 = vmul.f32 %v10314_v37, %v9212_v32 }
 0x32c   :  { %10325 = vpow2.f32 %v8656_v39  ;;  %v3386_v43 = vadd.f32 1.0, %v10316_v30 }
 0x32e   :  { %v10318_v19 = vpop.eup %10317  ;;  %10327 = vrcp.f32 %v3386_v43 }
 0x32f   :  { %v3389_v58 = vadd.f32 1.0, %v10318_v19 }
 0x330   :  { %v10320_v54 = vpop.eup %10319 }
 0x331   :  { %10329 = vrcp.f32 %v3389_v58  ;;  %v12449_v25 = vmul.f32 %v10320_v54, %v9214_v28  ;;  %v9222_v54 = vadd.f32 %v2745_v51, %v12306_v60 }
 0x332   :  { %v10322_v39 = vpop.eup %10321 }
 0x333   :  { %v10324_v16 = vpop.eup %10323  ;;  %v12451_v4 = vmul.f32 %v10322_v39, %v9216_v41  ;;  %v9224_v39 = vadd.f32 %v2749_v7, %v12306_v60  ;;  %v14024_v60 = vld [vmem:[#allocation41_spill] sm:$0xff] }
 0x334   :  { %v3392_v46 = vadd.f32 1.0, %v10324_v16  ;;  %v12483_v7 = vrot.slane %v12235_v36, %v14024_v60 }
 0x336   :  { %v10326_v49 = vpop.eup %10325  ;;  %10331 = vrcp.f32 %v3392_v46 }
 0x337   :  { %v3395_v19 = vadd.f32 1.0, %v10326_v49  ;;  %v8687_v49 = vld [vmem:[%s13947_s1] ss:$0 sm:$0xff] }
 0x338   :  { %v10328_v32 = vpop.eup %10327  ;;  %4031 = vrot.lane.b32.xlu0 %v8687_v49, %s11451_s10 }
 0x339   :  { %10333 = vrcp.f32 %v3395_v19  ;;  %v12459_v37 = vmul.f32 %v10328_v32, %v9218_v0  ;;  %v14023_v19 = vld [vmem:[#allocation40_spill] sm:$0xff] }
 0x33a   :  { %v12479_v51 = vrot.slane %v12235_v36, %v14023_v19 }
 0x33b   :  { %14019 = vst [vmem:[#allocation46_spill] sm:$0xff] %v12459_v37  ;;  %v10330_v30 = vpop.eup %10329 }
 0x33c   :  { %v12461_v58 = vmul.f32 %v10330_v30, %v9220_v3 }
 0x33e   :  { %14020 = vst [vmem:[#allocation47_spill] sm:$0xff] %v12461_v58 }
 0x340   :  { %v10332_v41 = vpop.eup %10331 }
 0x341   :  { %v12467_v16 = vmul.f32 %v10332_v41, %v9222_v54 }
 0x343   :  { %14021 = vst [vmem:[#allocation48_spill] sm:$0xff] %v12467_v16  ;;  %v10334_v15 = vpop.eup %10333 }
 0x344   :  { %v12469_v46 = vmul.f32 %v10334_v15, %v9224_v39 }
 0x346   :  { %14022 = vst [vmem:[#allocation49_spill] sm:$0xff] %v12469_v46 }
 0x36a   :  { %v3127_v0 = vpop.f32.mrb[64].mxu1 }
 0x36b   :  { %v9258_v32 = vadd.f32 %v3127_v0, %v12479_v51  ;;  %v3129_v3 = vpop.f32.mrb[65].mxu1 }
 0x36c   :  { %v9259_v30 = vadd.f32 %v3129_v3, %v12483_v7  ;;  %v3131_v54 = vpop.f32.mrb[66].mxu1 }
 0x36d   :  { %v8612_v41 = vmul.f32 -1.442695, %v9258_v32  ;;  %v9260_v39 = vadd.f32 %v3131_v54, %v12479_v51  ;;  %v3133_v15 = vpop.f32.mrb[67].mxu1 }
 0x36e   :  { %v8613_v49 = vmul.f32 -1.442695, %v9259_v30  ;;  %v9261_v20 = vadd.f32 %v3133_v15, %v12483_v7 }
 0x36f   :  { %10335 = vpow2.f32 %v8612_v41  ;;  %v8615_v28 = vmul.f32 -1.442695, %v9260_v39 }
 0x370   :  { %10337 = vpow2.f32 %v8613_v49  ;;  %v8616_v43 = vmul.f32 -1.442695, %v9261_v20 }
 0x371   :  { %10339 = vpow2.f32 %v8615_v28 }
 0x372   :  { %10341 = vpow2.f32 %v8616_v43  ;;  %v3137_v18 = vpop.f32.mrb[68].mxu1 }
 0x373   :  { %v9262_v0 = vadd.f32 %v3137_v18, %v12479_v51  ;;  %v3139_v60 = vpop.f32.mrb[69].mxu1 }
 0x374   :  { %v9263_v3 = vadd.f32 %v3139_v60, %v12483_v7  ;;  %v3141_v19 = vpop.f32.mrb[70].mxu1 }
 0x375   :  { %v8618_v32 = vmul.f32 -1.442695, %v9262_v0  ;;  %v9264_v54 = vadd.f32 %v3141_v19, %v12479_v51  ;;  %v3143_v16 = vpop.f32.mrb[71].mxu1 }
 0x376   :  { %v8619_v30 = vmul.f32 -1.442695, %v9263_v3  ;;  %v9265_v15 = vadd.f32 %v3143_v16, %v12483_v7 }
 0x377   :  { %10343 = vpow2.f32 %v8618_v32  ;;  %v8621_v41 = vmul.f32 -1.442695, %v9264_v54 }
 0x378   :  { %10345 = vpow2.f32 %v8619_v30  ;;  %v8622_v20 = vmul.f32 -1.442695, %v9265_v15 }
 0x379   :  { %v10336_v28 = vpop.eup %10335  ;;  %10347 = vpow2.f32 %v8621_v41 }
 0x37a   :  { %v10338_v43 = vpop.eup %10337  ;;  %v3351_v39 = vadd.f32 1.0, %v10336_v28  ;;  %10349 = vpow2.f32 %v8622_v20  ;;  %v3147_v18 = vpop.f32.mrb[72].mxu1 }
 0x37b   :  { %v10340_v49 = vpop.eup %10339  ;;  %v3352_v60 = vadd.f32 1.0, %v10338_v43  ;;  %v9266_v0 = vadd.f32 %v3147_v18, %v12479_v51  ;;  %v3149_v46 = vpop.f32.mrb[73].mxu1  ;;  %v14025_v18 = vld [vmem:[#allocation45_spill] sm:$0xff] }
 0x37c   :  { %v10342_v19 = vpop.eup %10341  ;;  %10351 = vrcp.f32 %v3351_v39  ;;  %v3354_v3 = vadd.f32 1.0, %v10340_v49  ;;  %v9267_v16 = vadd.f32 %v3149_v46, %v12483_v7  ;;  %v3151_v32 = vpop.f32.mrb[74].mxu1  ;;  %v12499_v37 = vrot.slane %v12235_v36, %v14025_v18 }
 0x37d   :  { %10353 = vrcp.f32 %v3352_v60  ;;  %v3355_v54 = vadd.f32 1.0, %v10342_v19  ;;  %v8624_v30 = vmul.f32 -1.442695, %v9266_v0  ;;  %v9268_v15 = vadd.f32 %v3151_v32, %v12479_v51  ;;  %v3153_v41 = vpop.f32.mrb[75].mxu1  ;;  %v14026_v60 = vld [vmem:[#allocation44_spill] sm:$0xff] }
 0x37e   :  { %10355 = vrcp.f32 %v3354_v3  ;;  %v8625_v20 = vmul.f32 -1.442695, %v9267_v16  ;;  %v9269_v28 = vadd.f32 %v3153_v41, %v12483_v7  ;;  %v12503_v0 = vrot.slane %v12235_v36, %v14026_v60 }
 0x37f   :  { %10357 = vrcp.f32 %v3355_v54  ;;  %v8627_v43 = vmul.f32 -1.442695, %v9268_v15 }
 0x380   :  { %10359 = vpow2.f32 %v8624_v30  ;;  %v8628_v39 = vmul.f32 -1.442695, %v9269_v28  ;;  %v9195_v30 = vadd.f32 %v12245_v27, %v12499_v37 }
 0x381   :  { %v10344_v46 = vpop.eup %10343  ;;  %10361 = vpow2.f32 %v8625_v20 }
 0x382   :  { %v10346_v49 = vpop.eup %10345  ;;  %v3357_v19 = vadd.f32 1.0, %v10344_v46  ;;  %10363 = vpow2.f32 %v8627_v43  ;;  %v3157_v3 = vpop.f32.mrb[76].mxu1 }
 0x383   :  { %v10348_v16 = vpop.eup %10347  ;;  %v3358_v32 = vadd.f32 1.0, %v10346_v49  ;;  %10365 = vpow2.f32 %v8628_v39  ;;  %v9270_v54 = vadd.f32 %v3157_v3, %v12479_v51  ;;  %v3159_v15 = vpop.f32.mrb[77].mxu1  ;;  %v9226_v39 = vadd.f32 %v12243_v9, %v12503_v0 }
 0x384   :  { %v10350_v41 = vpop.eup %10349  ;;  %10367 = vrcp.f32 %v3357_v19  ;;  %v3360_v20 = vadd.f32 1.0, %v10348_v16  ;;  %v9271_v28 = vadd.f32 %v3159_v15, %v12483_v7  ;;  %v3161_v18 = vpop.f32.mrb[78].mxu1  ;;  %v9197_v19 = vadd.f32 %v12252_v29, %v12499_v37 }
 0x385   :  { %10369 = vrcp.f32 %v3358_v32  ;;  %v3361_v36 = vadd.f32 1.0, %v10350_v41  ;;  %v8630_v46 = vmul.f32 -1.442695, %v9270_v54  ;;  %v9272_v43 = vadd.f32 %v3161_v18, %v12479_v51  ;;  %v3163_v60 = vpop.f32.mrb[79].mxu1 }
 0x386   :  { %v10352_v49 = vpop.eup %10351  ;;  %10371 = vrcp.f32 %v3360_v20  ;;  %v8631_v3 = vmul.f32 -1.442695, %v9271_v28  ;;  %v9273_v58 = vadd.f32 %v3163_v60, %v12483_v7  ;;  %v9228_v18 = vadd.f32 %v12250_v63, %v12503_v0 }
 0x387   :  { %v10354_v27 = vpop.eup %10353  ;;  %10373 = vrcp.f32 %v3361_v36  ;;  %v8633_v16 = vmul.f32 -1.442695, %v9272_v43  ;;  %v3495_v32 = vmul.f32 %v10352_v49, %v9195_v30  ;;  %v9230_v60 = vadd.f32 %v12257_v8, %v12503_v0  ;;  %v10077_v8 = vld [vmem:[%s13952_s6 + $0x88] sm:$0xff]  }
 0x388   :  { %v10356_v15 = vpop.eup %10355  ;;  %10375 = vpow2.f32 %v8630_v46  ;;  %v8634_v54 = vmul.f32 -1.442695, %v9273_v58  ;;  %v12517_v41 = vmul.f32 %v10354_v27, %v9226_v39  ;;  %v9199_v39 = vadd.f32 %v12259_v52, %v12499_v37 }
 0x389   :  { %v10358_v9 = vpop.eup %10357  ;;  %10377 = vpow2.f32 %v8631_v3  ;;  %v3498_v20 = vmul.f32 %v10356_v15, %v9197_v19 }
 0x38a   :  { %v10360_v28 = vpop.eup %10359  ;;  %10379 = vpow2.f32 %v8633_v16  ;;  %v3167_v29 = vpop.f32.mrb[80].mxu1  ;;  %v12521_v36 = vmul.f32 %v10358_v9, %v9228_v18 }
 0x38b   :  { %v10362_v30 = vpop.eup %10361  ;;  %v3363_v43 = vadd.f32 1.0, %v10360_v28  ;;  %10381 = vpow2.f32 %v8634_v54  ;;  %v9274_v63 = vadd.f32 %v3167_v29, %v12479_v51  ;;  %v3169_v46 = vpop.f32.mrb[81].mxu1  ;;  %v3543_v58 = vpack.c.bf16 %v3498_v20, %v3495_v32 }
 0x38c   :  { %v10364_v49 = vpop.eup %10363  ;;  %v3364_v3 = vadd.f32 1.0, %v10362_v30  ;;  %v9275_v27 = vadd.f32 %v3169_v46, %v12483_v7  ;;  %v3171_v19 = vpop.f32.mrb[82].mxu1  ;;  %v3544_v16 = vpack.c.bf16 %v12521_v36, %v12517_v41  ;;  %v14027_v30 = vpack.c.bf16 %v12344_v53, %v12335_v48 }
 0x38d   :  { %v10366_v15 = vpop.eup %10365  ;;  %10383 = vrcp.f32 %v3363_v43  ;;  %v3366_v18 = vadd.f32 1.0, %v10364_v49  ;;  %v8636_v54 = vmul.f32 -1.442695, %v9274_v63  ;;  %v9276_v32 = vadd.f32 %v3171_v19, %v12479_v51  ;;  %v3173_v9 = vpop.f32.mrb[83].mxu1  ;;  %3783 = vmatprep.mubr.bf16.mxu0 %v3543_v58  ;;  %v10078_v43 = vld [vmem:[%s13952_s6 + $0x90] sm:$0x3f]  }
 0x38e   :  { %v10368_v52 = vpop.eup %10367  ;;  %10385 = vrcp.f32 %v3364_v3  ;;  %v3367_v20 = vadd.f32 1.0, %v10366_v15  ;;  %v8637_v28 = vmul.f32 -1.442695, %v9275_v27  ;;  %v9277_v29 = vadd.f32 %v3173_v9, %v12483_v7  ;;  %3784 = vmatmul.mubr.bf16.vlgmr.msra.gmra.mrb[96].mxu0 %v14027_v30 }
 0x38f   :  { %v10370_v46 = vpop.eup %10369  ;;  %v9201_v63 = vadd.f32 %v12269_v61, %v12499_v37  ;;  %10387 = vrcp.f32 %v3366_v18  ;;  %v8639_v58 = vmul.f32 -1.442695, %v9276_v32  ;;  %9157 = vmatpush3.bf16.msra.mxu0 %v12374_v34  ;;  %v3501_v49 = vmul.f32 %v10368_v52, %v9199_v39 }
 0x390   :  { %v10372_v3 = vpop.eup %10371  ;;  %v9232_v27 = vadd.f32 %v12264_v11, %v12503_v0  ;;  %v12545_v19 = vmul.f32 %v10370_v46, %v9230_v60  ;;  %10389 = vrcp.f32 %v3367_v20  ;;  %v8640_v48 = vmul.f32 -1.442695, %v9277_v29  ;;  %9158 = vmatprep.subr.bf16.mxu0 %v10077_v8 }
 0x391   :  { %v10374_v53 = vpop.eup %10373  ;;  %10391 = vpow2.f32 %v8636_v54  ;;  %v3504_v15 = vmul.f32 %v10372_v3, %v9201_v63  ;;  %v9203_v61 = vadd.f32 %v12285_v62, %v12499_v37  ;;  %v3749_v39 = vsel %vm2509_vm0, %v10078_v43, 0 }
 0x392   :  { %v10376_v9 = vpop.eup %10375  ;;  %v12549_v18 = vmul.f32 %v10374_v53, %v9232_v27  ;;  %10393 = vpow2.f32 %v8637_v28  ;;  %v3177_v34 = vpop.f32.mrb[84].mxu1  ;;  %v14028_v53 = vpack.c.bf16 %v12376_v38, %v12365_v21 }
 0x393   :  { %v10378_v32 = vpop.eup %10377  ;;  %v3369_v11 = vadd.f32 1.0, %v10376_v9  ;;  %10395 = vpow2.f32 %v8639_v58  ;;  %v9278_v60 = vadd.f32 %v3177_v34, %v12479_v51  ;;  %v3179_v52 = vpop.f32.mrb[85].mxu1  ;;  %v3546_v20 = vpack.c.bf16 %v3504_v15, %v3501_v49  ;;  %9159 = vmatpush3.bf16.msra.mxu0 %v10077_v8 }
 0x394   :  { %v10380_v54 = vpop.eup %10379  ;;  %v3370_v29 = vadd.f32 1.0, %v10378_v32  ;;  %10397 = vpow2.f32 %v8640_v48  ;;  %v9279_v30 = vadd.f32 %v3179_v52, %v12483_v7  ;;  %v3181_v62 = vpop.f32.mrb[86].mxu1  ;;  %9706 = vmatprep.subr.msk.bf16.mxu0 %vm2509_vm0, %v10078_v43  ;;  %v3547_v28 = vpack.c.bf16 %v12549_v18, %v12545_v19 }
 0x395   :  { %v10382_v46 = vpop.eup %10381  ;;  %10399 = vrcp.f32 %v3369_v11  ;;  %v3372_v63 = vadd.f32 1.0, %v10380_v54  ;;  %v8642_v58 = vmul.f32 -1.442695, %v9278_v60  ;;  %v9280_v3 = vadd.f32 %v3181_v62, %v12479_v51  ;;  %v3183_v27 = vpop.f32.mrb[87].mxu1  ;;  %3791 = vmatprep.mubr.bf16.mxu0 %v3546_v20 }
 0x396   :  { %10401 = vrcp.f32 %v3370_v29  ;;  %v3373_v8 = vadd.f32 1.0, %v10382_v46  ;;  %v8643_v49 = vmul.f32 -1.442695, %v9279_v30  ;;  %v9281_v48 = vadd.f32 %v3183_v27, %v12483_v7  ;;  %3792 = vmatmul.mubr.bf16.gmra.mrb[100].mxu0 %v14028_v53 }
 0x397   :  { %v10384_v43 = vpop.eup %10383  ;;  %v9234_v19 = vadd.f32 %v12283_v12, %v12503_v0  ;;  %10403 = vrcp.f32 %v3372_v63  ;;  %v8645_v15 = vmul.f32 -1.442695, %v9280_v3  ;;  %9162 = vmatprep.mubr.msk.bf16.mxu0 %vm2484_vm1, %v3544_v16  ;;  %9161 = vmatpush3.bf16.msra.mxu0 %v3749_v39  ;;  %v9205_v18 = vadd.f32 %v12292_v42, %v12499_v37 }
 0x398   :  { %v10386_v9 = vpop.eup %10385  ;;  %10405 = vrcp.f32 %v3373_v8  ;;  %v8646_v34 = vmul.f32 -1.442695, %v9281_v48  ;;  %v3507_v21 = vmul.f32 %v10384_v43, %v9203_v61  ;;  %v9236_v32 = vadd.f32 %v12290_v31, %v12503_v0 }
 0x399   :  { %v10388_v38 = vpop.eup %10387  ;;  %10407 = vpow2.f32 %v8642_v58  ;;  %v3508_v12 = vmul.f32 %v10386_v9, %v9234_v19  ;;  %v9207_v30 = vadd.f32 %v12315_v6, %v12499_v37  ;;  %v9238_v53 = vadd.f32 %v12310_v40, %v12503_v0 }
 0x39a   :  { %v10390_v11 = vpop.eup %10389  ;;  %10409 = vpow2.f32 %v8643_v49  ;;  %v3187_v60 = vpop.f32.mrb[88].mxu1  ;;  %v3510_v41 = vmul.f32 %v10388_v38, %v9205_v18  ;;  %v14029_v19 = vpack.c.bf16 %v12401_v13, %v12395_v35  ;;  %v9209_v9 = vadd.f32 %v12322_v56, %v12499_v37 }
 0x39b   :  { %v10392_v36 = vpop.eup %10391  ;;  %10411 = vpow2.f32 %v8645_v15  ;;  %v9282_v16 = vadd.f32 %v3187_v60, %v12479_v51  ;;  %v3189_v39 = vpop.f32.mrb[89].mxu1  ;;  %v3511_v52 = vmul.f32 %v10390_v11, %v9236_v32  ;;  %v9240_v40 = vadd.f32 %v12320_v24, %v12503_v0 }
 0x39c   :  { %v10394_v42 = vpop.eup %10393  ;;  %v3375_v20 = vadd.f32 1.0, %v10392_v36  ;;  %10413 = vpow2.f32 %v8646_v34  ;;  %v9283_v61 = vadd.f32 %v3189_v39, %v12483_v7  ;;  %v3191_v54 = vpop.f32.mrb[90].mxu1  ;;  %v3549_v29 = vpack.c.bf16 %v3510_v41, %v3507_v21 }
 0x39d   :  { %v10396_v31 = vpop.eup %10395  ;;  %v3376_v62 = vadd.f32 1.0, %v10394_v42  ;;  %v9284_v46 = vadd.f32 %v3191_v54, %v12479_v51  ;;  %v3193_v63 = vpop.f32.mrb[91].mxu1  ;;  %v3550_v58 = vpack.c.bf16 %v3511_v52, %v3508_v12  ;;  %v8648_v8 = vmul.f32 -1.442695, %v9282_v16 }
 0x39e   :  { %v10398_v3 = vpop.eup %10397  ;;  %10415 = vrcp.f32 %v3375_v20  ;;  %v3378_v27 = vadd.f32 1.0, %v10396_v31  ;;  %v9285_v49 = vadd.f32 %v3193_v63, %v12483_v7  ;;  %3799 = vmatprep.mubr.bf16.mxu1 %v3549_v29  ;;  %9163 = vmatmul.mubr.msk.bf16.vlgmr.msra.gmra.mrb[104].mxu0 %vm2484_vm1, %v3547_v28  ;;  %v8649_v43 = vmul.f32 -1.442695, %v9283_v61 }
 0x39f   :  { %v10400_v48 = vpop.eup %10399  ;;  %10417 = vrcp.f32 %v3376_v62  ;;  %v3379_v6 = vadd.f32 1.0, %v10398_v3  ;;  %3800 = vmatmul.mubr.bf16.vlgmr.msra.gmra.mrb[96].mxu1 %v14029_v19  ;;  %9166 = vmatprep.mubr.msk.bf16.mxu0 %vm2484_vm1, %v3550_v58  ;;  %v8651_v18 = vmul.f32 -1.442695, %v9284_v46  ;;  %v9211_v42 = vadd.f32 %v12346_v55, %v12499_v37 }
 0x3a0   :  { %v10402_v15 = vpop.eup %10401  ;;  %10419 = vrcp.f32 %v3378_v27  ;;  %v3513_v28 = vmul.f32 %v10400_v48, %v9207_v30  ;;  %v8652_v21 = vmul.f32 -1.442695, %v9285_v49  ;;  %v14030_v58 = vpack.c.bf16 %v12423_v33, %v12419_v50 }
 0x3a1   :  { %v10404_v34 = vpop.eup %10403  ;;  %10421 = vrcp.f32 %v3379_v6  ;;  %v3514_v38 = vmul.f32 %v10402_v15, %v9238_v53  ;;  %v9213_v49 = vadd.f32 %v12358_v14, %v12499_v37  ;;  %v9244_v33 = vadd.f32 %v12354_v5, %v12503_v0 }
 0x3a2   :  { %v10406_v32 = vpop.eup %10405  ;;  %10423 = vpow2.f32 %v8648_v8  ;;  %v3197_v35 = vpop.f32.mrb[92].mxu1  ;;  %v3516_v13 = vmul.f32 %v10404_v34, %v9209_v9 }
 0x3a3   :  { %v10408_v12 = vpop.eup %10407  ;;  %10425 = vpow2.f32 %v8649_v43  ;;  %v9286_v11 = vadd.f32 %v3197_v35, %v12479_v51  ;;  %v3199_v60 = vpop.f32.mrb[93].mxu1  ;;  %v3517_v56 = vmul.f32 %v10406_v32, %v9240_v40  ;;  %v9246_v32 = vadd.f32 %v12369_v22, %v12503_v0 }
 0x3a4   :  { %v10410_v41 = vpop.eup %10409  ;;  %v3381_v36 = vadd.f32 1.0, %v10408_v12  ;;  %10427 = vpow2.f32 %v8651_v18  ;;  %v9287_v16 = vadd.f32 %v3199_v60, %v12483_v7  ;;  %v3201_v39 = vpop.f32.mrb[94].mxu1  ;;  %v3552_v24 = vpack.c.bf16 %v3516_v13, %v3513_v28 }
 0x3a5   :  { %v10412_v52 = vpop.eup %10411  ;;  %v3382_v20 = vadd.f32 1.0, %v10410_v41  ;;  %10429 = vpow2.f32 %v8652_v21  ;;  %v9288_v61 = vadd.f32 %v3201_v39, %v12479_v51  ;;  %v3203_v54 = vpop.f32.mrb[95].mxu1  ;;  %v8654_v30 = vmul.f32 -1.442695, %v9286_v11 }
 0x3a6   :  { %v10414_v29 = vpop.eup %10413  ;;  %10431 = vrcp.f32 %v3381_v36  ;;  %v3384_v31 = vadd.f32 1.0, %v10412_v52  ;;  %v9289_v62 = vadd.f32 %v3203_v54, %v12483_v7  ;;  %3807 = vmatprep.mubr.bf16.mxu1 %v3552_v24  ;;  %v8655_v63 = vmul.f32 -1.442695, %v9287_v16 }
 0x3a7   :  { %10433 = vrcp.f32 %v3382_v20  ;;  %v3385_v46 = vadd.f32 1.0, %v10414_v29  ;;  %3808 = vmatmul.mubr.bf16.gmra.mrb[100].mxu1 %v14030_v58  ;;  %v3553_v55 = vpack.c.bf16 %v3517_v56, %v3514_v38  ;;  %v9242_v51 = vadd.f32 %v12339_v47, %v12503_v0 }
 0x3a8   :  { %v10416_v3 = vpop.eup %10415  ;;  %10435 = vrcp.f32 %v3384_v31  ;;  %v8657_v27 = vmul.f32 -1.442695, %v9288_v61  ;;  %v8658_v7 = vmul.f32 -1.442695, %v9289_v62  ;;  %v9215_v21 = vadd.f32 %v12378_v59, %v12499_v37 }
 0x3a9   :  { %v10418_v8 = vpop.eup %10417  ;;  %10437 = vrcp.f32 %v3385_v46  ;;  %9167 = vmatmul.mubr.msk.bf16.gmra.mrb[108].mxu0 %vm2484_vm1, %v3553_v55  ;;  %v3519_v48 = vmul.f32 %v10416_v3, %v9211_v42  ;;  %v14031_v13 = vpack.c.bf16 %v12441_v10, %v12439_v2  ;;  %v9217_v11 = vadd.f32 %v12388_v23, %v12499_v37 }
 0x3aa   :  { %v10420_v53 = vpop.eup %10419  ;;  %10439 = vpow2.f32 %v8654_v30  ;;  %v3520_v50 = vmul.f32 %v10418_v8, %v9242_v51  ;;  %v9248_v56 = vadd.f32 %v12383_v57, %v12503_v0  ;;  %v9219_v54 = vadd.f32 %v12403_v44, %v12499_v37 }
 0x3ab   :  { %v10422_v6 = vpop.eup %10421  ;;  %10441 = vpow2.f32 %v8655_v63  ;;  %v3522_v47 = vmul.f32 %v10420_v53, %v9213_v49  ;;  %v14032_v29 = vpack.c.bf16 %v12451_v4, %v12449_v25  ;;  %v9250_v30 = vadd.f32 %v12399_v45, %v12503_v0  ;;  %v14033_v49 = vld [vmem:[#allocation39_spill] sm:$0xff] }
 0x3ac   :  { %v10424_v43 = vpop.eup %10423  ;;  %10443 = vpow2.f32 %v8657_v27  ;;  %v3523_v19 = vmul.f32 %v10422_v6, %v9244_v33  ;;  %v9221_v46 = vadd.f32 %v12412_v17, %v12499_v37  ;;  %v9252_v58 = vadd.f32 %v12408_v1, %v12503_v0  ;;  %v14037_v33 = vld [vmem:[#allocation42_spill] sm:$0xff] }
 0x3ad   :  { %v10426_v15 = vpop.eup %10425  ;;  %v3387_v9 = vadd.f32 1.0, %v10424_v43  ;;  %10445 = vpow2.f32 %v8658_v7  ;;  %v3555_v14 = vpack.c.bf16 %v3522_v47, %v3519_v48  ;;  %v9223_v45 = vadd.f32 %v12425_v26, %v12499_v37  ;;  %v14034_v7 = vld [vmem:[#allocation47_spill] sm:$0xff]  ;;  %v14035_v48 = vld [vmem:[#allocation46_spill] sm:$0xff] }
 0x3ae   :  { %v10428_v18 = vpop.eup %10427  ;;  %v3388_v28 = vadd.f32 1.0, %v10426_v15  ;;  %v3556_v34 = vpack.c.bf16 %v3523_v19, %v3520_v50  ;;  %v9254_v17 = vadd.f32 %v14033_v49, %v12503_v0  ;;  %v14036_v53 = vpack.c.bf16 %v14034_v7, %v14035_v48  ;;  %v14038_v43 = vld [vmem:[#allocation43_spill] sm:$0xff] }
 0x3af   :  { %v10430_v40 = vpop.eup %10429  ;;  %10447 = vrcp.f32 %v3387_v9  ;;  %v3390_v5 = vadd.f32 1.0, %v10428_v18  ;;  %3815 = vmatprep.mubr.bf16.mxu1 %v3555_v14  ;;  %v9225_v50 = vadd.f32 %v14037_v33, %v12499_v37  ;;  %v9256_v26 = vadd.f32 %v14038_v43, %v12503_v0 }
 0x3b0   :  { %v10432_v38 = vpop.eup %10431  ;;  %10449 = vrcp.f32 %v3388_v28  ;;  %v3391_v35 = vadd.f32 1.0, %v10430_v40  ;;  %3816 = vmatmul.mubr.bf16.gmra.mrb[104].mxu1 %v14031_v13  ;;  %9170 = vmatprep.mubr.msk.bf16.mxu0 %vm2484_vm1, %v3556_v34  ;;  %v14039_v34 = vld [vmem:[#allocation49_spill] sm:$0xff]  ;;  %v14040_v40 = vld [vmem:[#allocation48_spill] sm:$0xff] }
 0x3b1   :  { %v10434_v12 = vpop.eup %10433  ;;  %10451 = vrcp.f32 %v3390_v5  ;;  %v3525_v59 = vmul.f32 %v10432_v38, %v9215_v21  ;;  %v14041_v21 = vpack.c.bf16 %v14039_v34, %v14040_v40 }
 0x3b2   :  { %v10436_v60 = vpop.eup %10435  ;;  %10453 = vrcp.f32 %v3391_v35  ;;  %v3526_v22 = vmul.f32 %v10434_v12, %v9246_v32 }
 0x3b3   :  { %v10438_v41 = vpop.eup %10437  ;;  %v3528_v36 = vmul.f32 %v10436_v60, %v9217_v11 }
 0x3b4   :  { %v10440_v16 = vpop.eup %10439  ;;  %v3529_v39 = vmul.f32 %v10438_v41, %v9248_v56 }
 0x3b5   :  { %v10442_v2 = vpop.eup %10441  ;;  %v3393_v10 = vadd.f32 1.0, %v10440_v16  ;;  %v3558_v24 = vpack.c.bf16 %v3528_v36, %v3525_v59 }
 0x3b6   :  { %v10444_v52 = vpop.eup %10443  ;;  %v3394_v42 = vadd.f32 1.0, %v10442_v2  ;;  %v3559_v20 = vpack.c.bf16 %v3529_v39, %v3526_v22  ;;  %v12648_v22 = vld [vmem:[%s13953_s7] ss:$0 sm:$0xff]  ;;  %s11452_s7 = smov 96  }
 0x3b7   :  { %v10446_v61 = vpop.eup %10445  ;;  %10455 = vrcp.f32 %v3393_v10  ;;  %v3396_v23 = vadd.f32 1.0, %v10444_v52  ;;  %3823 = vmatprep.mubr.bf16.mxu1 %v3558_v24 }
 0x3b8   :  { %10457 = vrcp.f32 %v3394_v42  ;;  %v3397_v57 = vadd.f32 1.0, %v10446_v61  ;;  %3824 = vmatmul.mubr.bf16.gmra.mrb[108].mxu1 %v14032_v29  ;;  %9171 = vmatmul.mubr.msk.bf16.gmra.mrb[112].mxu0 %vm2484_vm1, %v3559_v20 }
 0x3b9   :  { %v10448_v31 = vpop.eup %10447  ;;  %10459 = vrcp.f32 %v3396_v23 }
 0x3ba   :  { %v10450_v62 = vpop.eup %10449  ;;  %10461 = vrcp.f32 %v3397_v57  ;;  %v3531_v63 = vmul.f32 %v10448_v31, %v9219_v54 }
 0x3bb   :  { %v10452_v44 = vpop.eup %10451  ;;  %v3532_v55 = vmul.f32 %v10450_v62, %v9250_v30 }
 0x3bc   :  { %v10454_v25 = vpop.eup %10453  ;;  %v3534_v4 = vmul.f32 %v10452_v44, %v9221_v46 }
 0x3bd   :  { %v3535_v3 = vmul.f32 %v10454_v25, %v9252_v58 }
 0x3be   :  { %v3561_v51 = vpack.c.bf16 %v3534_v4, %v3531_v63 }
 0x3bf   :  { %v3562_v27 = vpack.c.bf16 %v3535_v3, %v3532_v55 }
 0x3c0   :  { %3831 = vmatprep.mubr.bf16.mxu1 %v3561_v51 }
 0x3c1   :  { %v10456_v8 = vpop.eup %10455  ;;  %3832 = vmatmul.mubr.bf16.gmra.mrb[112].mxu1 %v14036_v53  ;;  %9174 = vmatprep.mubr.msk.bf16.mxu0 %vm2484_vm1, %v3562_v27 }
 0x3c2   :  { %v10458_v1 = vpop.eup %10457  ;;  %v3537_v6 = vmul.f32 %v10456_v8, %v9223_v45 }
 0x3c3   :  { %v10460_v47 = vpop.eup %10459  ;;  %v3538_v19 = vmul.f32 %v10458_v1, %v9254_v17 }
 0x3c4   :  { %v10462_v15 = vpop.eup %10461  ;;  %v3540_v9 = vmul.f32 %v10460_v47, %v9225_v50 }
 0x3c5   :  { %v3541_v14 = vmul.f32 %v10462_v15, %v9256_v26 }
 0x3c6   :  { %v3564_v18 = vpack.c.bf16 %v3540_v9, %v3537_v6 }
 0x3c7   :  { %v3565_v28 = vpack.c.bf16 %v3541_v14, %v3538_v19 }
 0x3c8   :  { %3839 = vmatprep.mubr.bf16.mxu1 %v3564_v18 }
 0x3c9   :  { %3840 = vmatmul.mubr.bf16.gmra.mrb[116].mxu1 %v14041_v21  ;;  %9175 = vmatmul.mubr.msk.bf16.gmra.mrb[116].mxu0 %vm2484_vm1, %v3565_v28 }
 0x461   :  { %v9097_v5 = vpop.f32.mrb[96].mxu0 }
 0x462   :  { %v9098_v37 = vpop.f32.mrb[97].mxu0 }
 0x463   :  { %v9099_v38 = vadd.f32 %v9098_v37, %v9097_v5  ;;  %v9100_v32 = vpop.f32.mrb[98].mxu0 }
 0x464   :  { %v9101_v35 = vpop.f32.mrb[99].mxu0 }
 0x465   :  { %v9102_v13 = vadd.f32 %v9101_v35, %v9100_v32  ;;  %v3786_v16 = vadd.f32 %v9099_v38, %v12648_v22 }
 0x467   :  { %v3789_v61 = vadd.f32 %v9102_v13, %v12648_v22 }
 0x469   :  { %v9103_v0 = vpop.f32.mrb[100].mxu0 }
 0x46a   :  { %v9104_v12 = vpop.f32.mrb[101].mxu0 }
 0x46b   :  { %v9105_v11 = vadd.f32 %v9104_v12, %v9103_v0  ;;  %v9106_v59 = vpop.f32.mrb[102].mxu0 }
 0x46c   :  { %v9107_v60 = vpop.f32.mrb[103].mxu0 }
 0x46d   :  { %v9108_v56 = vadd.f32 %v9107_v60, %v9106_v59  ;;  %v3794_v41 = vadd.f32 %v9105_v11, %v12648_v22 }
 0x46f   :  { %v3797_v24 = vadd.f32 %v9108_v56, %v12648_v22  ;;  %v12701_v56 = vpop.permute.xlu0 %4031 }
 0x471   :  { %v9164_v36 = vpop.f32.mrb[104].mxu0 }
 0x472   :  { %v9109_v39 = vpop.f32.mrb[96].mxu1  ;;  %v12652_v2 = vadd.f32 %v9164_v36, %v3794_v41  ;;  %v3882_v10 = vpop.f32.mrb[105].mxu0 }
 0x473   :  { %v9110_v52 = vpop.f32.mrb[97].mxu1  ;;  %v12655_v42 = vadd.f32 %v3882_v10, %v3786_v16  ;;  %v9165_v20 = vpop.f32.mrb[106].mxu0 }
 0x474   :  { %v3947_v23 = vmax.f32 %v12652_v2, -6.0  ;;  %v9111_v54 = vadd.f32 %v9110_v52, %v9109_v39  ;;  %v9112_v57 = vpop.f32.mrb[98].mxu1  ;;  %v12659_v29 = vadd.f32 %v9165_v20, %v3797_v24  ;;  %v3885_v31 = vpop.f32.mrb[107].mxu0 }
 0x475   :  { %v3945_v30 = vmax.f32 %v12655_v42, -6.0  ;;  %v9113_v62 = vpop.f32.mrb[99].mxu1  ;;  %v12662_v46 = vadd.f32 %v3885_v31, %v3789_v61 }
 0x476   :  { %v12664_v63 = vmin.f32 %v3947_v23, 2.0  ;;  %v3948_v44 = vmax.f32 %v12659_v29, -6.0  ;;  %v9114_v58 = vadd.f32 %v9113_v62, %v9112_v57  ;;  %v3802_v50 = vadd.f32 %v9111_v54, %v12648_v22 }
 0x477   :  { %v12667_v55 = vmin.f32 %v3945_v30, 2.0  ;;  %v3946_v25 = vmax.f32 %v12662_v46, -6.0 }
 0x478   :  { %v3979_v4 = vmul.f32 0.5, %v12664_v63  ;;  %v12671_v3 = vmin.f32 %v3948_v44, 2.0  ;;  %v3805_v19 = vadd.f32 %v9114_v58, %v12648_v22 }
 0x479   :  { %v3977_v51 = vmul.f32 0.5, %v12667_v55  ;;  %v12674_v27 = vmin.f32 %v3946_v25, 2.0 }
 0x47a   :  { %v3997_v45 = vmul.f32 1.442695, %v3979_v4  ;;  %v3980_v8 = vmul.f32 0.5, %v12671_v3  ;;  %v9115_v49 = vpop.f32.mrb[100].mxu1 }
 0x47b   :  { %v3993_v17 = vmul.f32 1.442695, %v3977_v51  ;;  %v3978_v7 = vmul.f32 0.5, %v12674_v27  ;;  %v9116_v48 = vpop.f32.mrb[101].mxu1 }
 0x47c   :  { %10463 = vpow2.f32 %v3997_v45  ;;  %v3999_v53 = vmul.f32 1.442695, %v3980_v8  ;;  %v9168_v1 = vpop.f32.mrb[108].mxu0  ;;  %v9117_v33 = vadd.f32 %v9116_v48, %v9115_v49  ;;  %v9118_v6 = vpop.f32.mrb[102].mxu1 }
 0x47d   :  { %10465 = vpow2.f32 %v3993_v17  ;;  %v3995_v47 = vmul.f32 1.442695, %v3978_v7  ;;  %v3898_v43 = vpop.f32.mrb[109].mxu0  ;;  %v9119_v26 = vpop.f32.mrb[103].mxu1 }
 0x47e   :  { %10467 = vpow2.f32 %v3999_v53  ;;  %v3810_v15 = vadd.f32 %v9117_v33, %v12648_v22  ;;  %v12681_v9 = vadd.f32 %v3898_v43, %v3802_v50  ;;  %v9169_v14 = vpop.f32.mrb[110].mxu0  ;;  %v9120_v18 = vadd.f32 %v9119_v26, %v9118_v6 }
 0x47f   :  { %10469 = vpow2.f32 %v3995_v47  ;;  %v3901_v28 = vpop.f32.mrb[111].mxu0 }
 0x480   :  { %v12683_v34 = vadd.f32 %v9168_v1, %v3810_v15  ;;  %v3949_v40 = vmax.f32 %v12681_v9, -6.0  ;;  %v3813_v21 = vadd.f32 %v9120_v18, %v12648_v22  ;;  %v12687_v5 = vadd.f32 %v3901_v28, %v3805_v19 }
 0x482   :  { %v3951_v37 = vmax.f32 %v12683_v34, -6.0  ;;  %v12690_v38 = vmin.f32 %v3949_v40, 2.0  ;;  %v12692_v32 = vadd.f32 %v9169_v14, %v3813_v21  ;;  %v3950_v35 = vmax.f32 %v12687_v5, -6.0 }
 0x483   :  { %v9121_v13 = vpop.f32.mrb[104].mxu1 }
 0x484   :  { %v12695_v0 = vmin.f32 %v3951_v37, 2.0  ;;  %v3981_v12 = vmul.f32 0.5, %v12690_v38  ;;  %v3952_v11 = vmax.f32 %v12692_v32, -6.0  ;;  %v12699_v59 = vmin.f32 %v3950_v35, 2.0  ;;  %v9122_v60 = vpop.f32.mrb[105].mxu1 }
 0x485   :  { %v9123_v41 = vadd.f32 %v9122_v60, %v9121_v13  ;;  %v9124_v36 = vpop.f32.mrb[106].mxu1 }
 0x486   :  { %v10464_v16 = vpop.eup %10463  ;;  %v3983_v39 = vmul.f32 0.5, %v12695_v0  ;;  %v4001_v10 = vmul.f32 1.442695, %v3981_v12  ;;  %v12704_v24 = vmin.f32 %v3952_v11, 2.0  ;;  %v3982_v52 = vmul.f32 0.5, %v12699_v59  ;;  %v9125_v20 = vpop.f32.mrb[107].mxu1 }
 0x487   :  { %v10466_v61 = vpop.eup %10465  ;;  %v9126_v23 = vadd.f32 %v9125_v20, %v9124_v36  ;;  %v4036_v54 = vmul.f32 %v10464_v16, %v12701_v56  ;;  %v3818_v8 = vadd.f32 %v9123_v41, %v12648_v22 }
 0x488   :  { %v10468_v57 = vpop.eup %10467  ;;  %v4005_v31 = vmul.f32 1.442695, %v3983_v39  ;;  %10471 = vpow2.f32 %v4001_v10  ;;  %v3984_v30 = vmul.f32 0.5, %v12704_v24  ;;  %v4003_v62 = vmul.f32 1.442695, %v3982_v52 }
 0x489   :  { %v10470_v44 = vpop.eup %10469  ;;  %4070 = vrot.lane.b32.xlu1 %v4036_v54, %s11452_s7  ;;  %v4034_v58 = vmul.f32 %v10466_v61, %v12701_v56  ;;  %v3821_v33 = vadd.f32 %v9126_v23, %v12648_v22  ;;  %v4037_v50 = vmul.f32 %v10468_v57, %v12701_v56 }
 0x48a   :  { %10473 = vpow2.f32 %v4005_v31  ;;  %v4007_v25 = vmul.f32 1.442695, %v3984_v30  ;;  %v4035_v4 = vmul.f32 %v10470_v44, %v12701_v56 }
 0x48b   :  { %10475 = vpow2.f32 %v4003_v62  ;;  %v9127_v51 = vpop.f32.mrb[108].mxu1  ;;  %v9172_v45 = vpop.f32.mrb[112].mxu0  ;;  %4066 = vrot.lane.b32.xlu0 %v4034_v58, %s11452_s7 }
 0x48c   :  { %10477 = vpow2.f32 %v4007_v25  ;;  %v9128_v49 = vpop.f32.mrb[109].mxu1  ;;  %v3914_v17 = vpop.f32.mrb[113].mxu0 }
 0x48d   :  { %v9129_v7 = vadd.f32 %v9128_v49, %v9127_v51  ;;  %v12714_v48 = vadd.f32 %v3914_v17, %v3818_v8  ;;  %v9130_v53 = vpop.f32.mrb[110].mxu1  ;;  %v9173_v1 = vpop.f32.mrb[114].mxu0  ;;  %4068 = vrot.lane.b32.xlu1 %v4035_v4, %s11452_s7 }
 0x48e   :  { %v9131_v6 = vpop.f32.mrb[111].mxu1  ;;  %v3917_v47 = vpop.f32.mrb[115].mxu0 }
 0x48f   :  { %v3826_v43 = vadd.f32 %v9129_v7, %v12648_v22  ;;  %v3953_v26 = vmax.f32 %v12714_v48, -6.0  ;;  %v9132_v19 = vadd.f32 %v9131_v6, %v9130_v53  ;;  %v12721_v15 = vadd.f32 %v3917_v47, %v3821_v33  ;;  %4072 = vrot.lane.b32.xlu0 %v4037_v50, %s11452_s7 }
 0x491   :  { %v12724_v14 = vadd.f32 %v9172_v45, %v3826_v43  ;;  %v12726_v18 = vmin.f32 %v3953_v26, 2.0  ;;  %v3829_v28 = vadd.f32 %v9132_v19, %v12648_v22  ;;  %v3954_v40 = vmax.f32 %v12721_v15, -6.0 }
 0x492   :  { %v10472_v21 = vpop.eup %10471 }
 0x493   :  { %v3955_v37 = vmax.f32 %v12724_v14, -6.0  ;;  %v3985_v35 = vmul.f32 0.5, %v12726_v18  ;;  %v12732_v13 = vadd.f32 %v9173_v1, %v3829_v28  ;;  %v12734_v12 = vmin.f32 %v3954_v40, 2.0 }
 0x494   :  { %v10474_v11 = vpop.eup %10473  ;;  %v9133_v60 = vpop.f32.mrb[112].mxu1  ;;  %v4038_v41 = vmul.f32 %v10472_v21, %v12701_v56 }
 0x495   :  { %v10476_v36 = vpop.eup %10475  ;;  %v12737_v16 = vmin.f32 %v3955_v37, 2.0  ;;  %v4009_v39 = vmul.f32 1.442695, %v3985_v35  ;;  %v3956_v10 = vmax.f32 %v12732_v13, -6.0  ;;  %v3986_v52 = vmul.f32 0.5, %v12734_v12  ;;  %v9134_v20 = vpop.f32.mrb[113].mxu1 }
 0x496   :  { %v10478_v61 = vpop.eup %10477  ;;  %v9135_v23 = vadd.f32 %v9134_v20, %v9133_v60  ;;  %4074 = vrot.lane.b32.xlu1 %v4038_v41, %s11452_s7  ;;  %v9136_v54 = vpop.f32.mrb[114].mxu1  ;;  %v4039_v57 = vmul.f32 %v10476_v36, %v12701_v56  ;;  %v4040_v31 = vmul.f32 %v10474_v11, %v12701_v56 }
 0x497   :  { %v3987_v30 = vmul.f32 0.5, %v12737_v16  ;;  %10479 = vpow2.f32 %v4009_v39  ;;  %v12745_v62 = vmin.f32 %v3956_v10, 2.0  ;;  %v4011_v44 = vmul.f32 1.442695, %v3986_v52  ;;  %v9137_v58 = vpop.f32.mrb[115].mxu1 }
 0x498   :  { %v9138_v25 = vadd.f32 %v9137_v58, %v9136_v54  ;;  %4076 = vrot.lane.b32.xlu0 %v4039_v57, %s11452_s7  ;;  %v4041_v4 = vmul.f32 %v10478_v61, %v12701_v56  ;;  %v3834_v7 = vadd.f32 %v9135_v23, %v12648_v22 }
 0x499   :  { %v4013_v51 = vmul.f32 1.442695, %v3987_v30  ;;  %v3988_v45 = vmul.f32 0.5, %v12745_v62  ;;  %10481 = vpow2.f32 %v4011_v44 }
 0x49a   :  { %4078 = vrot.lane.b32.xlu1 %v4040_v31, %s11452_s7  ;;  %v3837_v43 = vadd.f32 %v9138_v25, %v12648_v22 }
 0x49b   :  { %10483 = vpow2.f32 %v4013_v51  ;;  %v4015_v8 = vmul.f32 1.442695, %v3988_v45 }
 0x49c   :  { %4080 = vrot.lane.b32.xlu0 %v4041_v4, %s11452_s7  ;;  %v9139_v49 = vpop.f32.mrb[116].mxu1  ;;  %v9176_v17 = vpop.f32.mrb[116].mxu0 }
 0x49d   :  { %10485 = vpow2.f32 %v4015_v8  ;;  %v9140_v53 = vpop.f32.mrb[117].mxu1  ;;  %v3930_v1 = vpop.f32.mrb[117].mxu0 }
 0x49e   :  { %v9141_v33 = vadd.f32 %v9140_v53, %v9139_v49  ;;  %v12753_v50 = vadd.f32 %v3930_v1, %v3834_v7  ;;  %v9142_v6 = vpop.f32.mrb[118].mxu1  ;;  %v9177_v47 = vpop.f32.mrb[118].mxu0 }
 0x49f   :  { %v9143_v26 = vpop.f32.mrb[119].mxu1  ;;  %v3933_v19 = vpop.f32.mrb[119].mxu0 }
 0x4a0   :  { %v3842_v28 = vadd.f32 %v9141_v33, %v12648_v22  ;;  %v3957_v40 = vmax.f32 %v12753_v50, -6.0  ;;  %v9144_v21 = vadd.f32 %v9143_v26, %v9142_v6  ;;  %v12758_v37 = vadd.f32 %v3933_v19, %v3837_v43 }
 0x4a1   :  { %v10480_v35 = vpop.eup %10479 }
 0x4a2   :  { %v12760_v11 = vadd.f32 %v9176_v17, %v3842_v28  ;;  %v12762_v60 = vmin.f32 %v3957_v40, 2.0  ;;  %v3845_v41 = vadd.f32 %v9144_v21, %v12648_v22  ;;  %v3958_v36 = vmax.f32 %v12758_v37, -6.0 }
 0x4a3   :  { %v10482_v39 = vpop.eup %10481  ;;  %v4042_v10 = vmul.f32 %v10480_v35, %v12701_v56 }
 0x4a4   :  { %v3959_v52 = vmax.f32 %v12760_v11, -6.0  ;;  %v3989_v20 = vmul.f32 0.5, %v12762_v60  ;;  %v12769_v61 = vadd.f32 %v9177_v47, %v3845_v41  ;;  %v12771_v23 = vmin.f32 %v3958_v36, 2.0 }
 0x4a5   :  { %v10484_v54 = vpop.eup %10483  ;;  %4082 = vrot.lane.b32.xlu1 %v4042_v10, %s11452_s7  ;;  %v4043_v57 = vmul.f32 %v10482_v39, %v12701_v56 }
 0x4a6   :  { %v12775_v31 = vmin.f32 %v3959_v52, 2.0  ;;  %v4017_v22 = vmul.f32 1.442695, %v3989_v20  ;;  %v3960_v30 = vmax.f32 %v12769_v61, -6.0  ;;  %v3990_v44 = vmul.f32 0.5, %v12771_v23 }
 0x4a7   :  { %v10486_v58 = vpop.eup %10485  ;;  %4084 = vrot.lane.b32.xlu0 %v4043_v57, %s11452_s7  ;;  %v4044_v25 = vmul.f32 %v10484_v54, %v12701_v56 }
 0x4a8   :  { %v3991_v4 = vmul.f32 0.5, %v12775_v31  ;;  %10487 = vpow2.f32 %v4017_v22  ;;  %v12782_v51 = vmin.f32 %v3960_v30, 2.0  ;;  %v4019_v45 = vmul.f32 1.442695, %v3990_v44 }
 0x4a9   :  { %4086 = vrot.lane.b32.xlu1 %v4044_v25, %s11452_s7  ;;  %v4045_v8 = vmul.f32 %v10486_v58, %v12701_v56 }
 0x4aa   :  { %v4021_v49 = vmul.f32 1.442695, %v3991_v4  ;;  %v3992_v17 = vmul.f32 0.5, %v12782_v51  ;;  %10489 = vpow2.f32 %v4019_v45 }
 0x4ab   :  { %4088 = vrot.lane.b32.xlu0 %v4045_v8, %s11452_s7 }
 0x4ac   :  { %10491 = vpow2.f32 %v4021_v49  ;;  %v4023_v7 = vmul.f32 1.442695, %v3992_v17 }
 0x4ae   :  { %10493 = vpow2.f32 %v4023_v7 }
 0x4b2   :  { %v10488_v53 = vpop.eup %10487 }
 0x4b3   :  { %v4046_v1 = vmul.f32 %v10488_v53, %v12701_v56 }
 0x4b4   :  { %v10490_v33 = vpop.eup %10489 }
 0x4b5   :  { %4090 = vrot.lane.b32.xlu1 %v4046_v1, %s11452_s7  ;;  %v4047_v6 = vmul.f32 %v10490_v33, %v12701_v56 }
 0x4b6   :  { %v10492_v47 = vpop.eup %10491 }
 0x4b7   :  { %4092 = vrot.lane.b32.xlu0 %v4047_v6, %s11452_s7  ;;  %v4048_v43 = vmul.f32 %v10492_v47, %v12701_v56 }
 0x4b8   :  { %v10494_v26 = vpop.eup %10493 }
 0x4b9   :  { %4094 = vrot.lane.b32.xlu1 %v4048_v43, %s11452_s7  ;;  %v4049_v19 = vmul.f32 %v10494_v26, %v12701_v56 }
 0x4bb   :  { %4096 = vrot.lane.b32.xlu0 %v4049_v19, %s11452_s7 }
 0x4fb   :  { %v4071_v28 = vpop.permute.xlu1 %4070 }
 0x4fc   :  { %v12797_v40 = vadd.f32 %v4071_v28, %v12652_v2 }
 0x4fd   :  { %v4067_v21 = vpop.permute.xlu0 %4066 }
 0x4fe   :  { %14042 = vst [vmem:[#allocation39_spill] sm:$0xff] %v12797_v40  ;;  %v12800_v35 = vadd.f32 %v4067_v21, %v12655_v42 }
 0x4ff   :  { %v4069_v41 = vpop.permute.xlu1 %4068 }
 0x500   :  { %14043 = vst [vmem:[#allocation47_spill] sm:$0xff] %v12800_v35  ;;  %v12803_v36 = vadd.f32 %v4069_v41, %v12662_v46 }
 0x501   :  { %v4073_v39 = vpop.permute.xlu0 %4072 }
 0x502   :  { %14044 = vst [vmem:[#allocation46_spill] sm:$0xff] %v12803_v36  ;;  %v12806_v10 = vadd.f32 %v4073_v39, %v12659_v29 }
 0x504   :  { %14045 = vst [vmem:[#allocation42_spill] sm:$0xff] %v12806_v10 }
 0x508   :  { %v4075_v52 = vpop.permute.xlu1 %4074 }
 0x509   :  { %v12809_v56 = vadd.f32 %v4075_v52, %v12681_v9 }
 0x50a   :  { %v4077_v20 = vpop.permute.xlu0 %4076 }
 0x50b   :  { %14046 = vst [vmem:[#allocation43_spill] sm:$0xff] %v12809_v56  ;;  %v12812_v54 = vadd.f32 %v4077_v20, %v12687_v5 }
 0x50c   :  { %v4079_v57 = vpop.permute.xlu1 %4078 }
 0x50d   :  { %14047 = vst [vmem:[#allocation49_spill] sm:$0xff] %v12812_v54  ;;  %v12815_v22 = vadd.f32 %v4079_v57, %v12683_v34 }
 0x50e   :  { %v4081_v30 = vpop.permute.xlu0 %4080 }
 0x50f   :  { %14048 = vst [vmem:[#allocation48_spill] sm:$0xff] %v12815_v22  ;;  %v12818_v44 = vadd.f32 %v4081_v30, %v12692_v32 }
 0x511   :  { %14049 = vst [vmem:[#allocation50_spill] sm:$0xff] %v12818_v44 }
 0x517   :  { %v4083_v58 = vpop.permute.xlu1 %4082 }
 0x518   :  { %v12821_v25 = vadd.f32 %v4083_v58, %v12714_v48 }
 0x519   :  { %v4085_v4 = vpop.permute.xlu0 %4084 }
 0x51a   :  { %14050 = vst [vmem:[#allocation51_spill] sm:$0xff] %v12821_v25  ;;  %v12824_v45 = vadd.f32 %v4085_v4, %v12721_v15 }
 0x51b   :  { %v4087_v8 = vpop.permute.xlu1 %4086 }
 0x51c   :  { %14051 = vst [vmem:[#allocation52_spill] sm:$0xff] %v12824_v45  ;;  %v12827_v49 = vadd.f32 %v4087_v8, %v12724_v14 }
 0x51d   :  { %v4089_v17 = vpop.permute.xlu0 %4088 }
 0x51e   :  { %14052 = vst [vmem:[#allocation53_spill] sm:$0xff] %v12827_v49  ;;  %v12830_v7 = vadd.f32 %v4089_v17, %v12732_v13 }
 0x520   :  { %14053 = vst [vmem:[#allocation54_spill] sm:$0xff] %v12830_v7 }
 0x527   :  { %v4091_v53 = vpop.permute.xlu1 %4090 }
 0x528   :  { %v12833_v1 = vadd.f32 %v4091_v53, %v12753_v50 }
 0x529   :  { %v4093_v33 = vpop.permute.xlu0 %4092 }
 0x52a   :  { %14054 = vst [vmem:[#allocation55_spill] sm:$0xff] %v12833_v1  ;;  %v12836_v6 = vadd.f32 %v4093_v33, %v12758_v37 }
 0x52b   :  { %v4095_v47 = vpop.permute.xlu1 %4094 }
 0x52c   :  { %14055 = vst [vmem:[#allocation56_spill] sm:$0xff] %v12836_v6  ;;  %v12839_v43 = vadd.f32 %v4095_v47, %v12760_v11 }
 0x52d   :  { %v4097_v26 = vpop.permute.xlu0 %4096 }
 0x52e   :  { %14056 = vst [vmem:[#allocation57_spill] sm:$0xff] %v12839_v43  ;;  %v12842_v19 = vadd.f32 %v4097_v26, %v12769_v61 }
 0x530   :  { %14057 = vst [vmem:[#allocation58_spill] sm:$0xff] %v12842_v19 }
 0x531   :  { %11428 = dma.done.wait [#allocation8], 1536 }
 0x532   :  { %11429 = vsyncadd [#allocation8], 4294965760 }
 0x533   :  { %11430 = dma.done.wait [#allocation8 + $0x1], 96 }
 0x534   :  { %11431 = vsyncadd [#allocation8 + $0x1], 4294967200 }
 0x535   :  { %11432 = dma.done.wait [#allocation8 + $0x2], 14592 }
 0x536   :  { %11433 = vsyncadd [#allocation8 + $0x2], 4294952704 }
 0x537   :  { %11434 = dma.done.wait [#allocation8 + $0x3], 96 }
 0x538   :  { %11435 = vsyncadd [#allocation8 + $0x3], 4294967200 }
 0x539   :  { %11436 = dma.done.wait [#allocation8 + $0x4], 9728 }
 0x53a   :  { %11437 = vsyncadd [#allocation8 + $0x4], 4294957568 }
 0x53b   :  { %11438 = dma.done.wait [#allocation8 + $0x5], 64 }
 0x53c   :  { %11439 = vsyncadd [#allocation8 + $0x5], 4294967232  ;;  %v14058_v28 = vmov 0   ;;  %8013 = vrot.lane.b32.xlu0 %v12655_v42, %s11451_s10  ;;  %8017 = vrot.lane.b32.xlu1 %v12652_v2, %s11451_s10  ;;  %v4158_v21 = vld [vmem:[#allocation2 + $0x8] sm:$0xff]  ;;  %v4160_v41 = vld [vmem:[#allocation2 + $0x18] sm:$0xff]  ;;  %vm4201_vm2 = vcmask 261120  }
 0x53d   :  { %4258 = vmatprep.mubr.bf16.mxu1 %v14058_v28  ;;  %4371 = vmatprep.mubr.bf16.mxu0 %v14058_v28  ;;  %v4157_v39 = vld [vmem:[#allocation2] sm:$0xff]  ;;  %v4159_v52 = vld [vmem:[#allocation2 + $0x10] sm:$0xff]  ;;  %v4164_v20 = vld [vmem:[#allocation2 + $0x38] sm:$0xff]  ;;  %vm8141_vm3 = vcmask 523264   ;;  %vm8158_vm4 = vcmask 785408   ;;  %s11453_s20 = smov [#allocation15]  }
 0x53e   :  { %4226 = vmatprep.subr.bf16.mxu1 %v4158_v21  ;;  %4339 = vmatprep.subr.bf16.mxu0 %v4160_v41  ;;  %v4166_v57 = vld [vmem:[#allocation2 + $0x48] sm:$0xff]  ;;  %v4163_v42 = vld [vmem:[#allocation2 + $0x30] sm:$0xff]  ;;  %v4165_v2 = vld [vmem:[#allocation2 + $0x40] sm:$0xff]  ;;  %s8208_s21 = sshll.u32 %s11453_s20, 4  ;;  %s8209_s21 = int_to_ptr.vmem [resolvable:$true] %s8208_s21 }
 0x53f   :  { %4227 = vmatpush1.bf16.msra.mxu1 %v4157_v39  ;;  %4340 = vmatpush1.bf16.msra.mxu0 %v4159_v52  ;;  %v4162_v30 = vld [vmem:[#allocation2 + $0x28] sm:$0xff]  ;;  %v4168_v58 = vld [vmem:[#allocation2 + $0x58] sm:$0xff]  ;;  %s11380_s22 = scalar_lea.vmem %s8209_s21, 2048  ;;  %p11385_p5 = scmp.lt.s32.totalorder %s8209_s21, %s8209_s21 }
 0x540   :  { %8015 = vrot.lane.b32.xlu0 %v12662_v46, %s11451_s10  ;;  %8019 = vrot.lane.b32.xlu1 %v12659_v29, %s11451_s10  ;;  %v12860_v29 = vpack.c.bf16 %v12803_v36, %v12800_v35  ;;  %v4161_v46 = vld [vmem:[#allocation2 + $0x20] sm:$0xff]  ;;  %v10527_v4 = vld [vmem:[#allocation4 + $0xf4] ss:$24 sps:$4 sm:$0xff]   ;;  %v10525_v17 = vld [vmem:[#allocation4 + $0xf0] ss:$24 sps:$4 sm:$0xff]   ;;  %p11381_p4 = scmp.ne.s32.totalorder %s8209_s21, %s11380_s22  ;;  %p11386_p6 = scmp.lt.s32.totalorder %s11380_s22, %s11380_s22 }
 0x541   :  { %4228 = vmatprep.subr.bf16.mxu1 %v4164_v20  ;;  %4341 = vmatprep.subr.bf16.mxu0 %v4166_v57  ;;  %v10530_v8 = vld [vmem:[#allocation4 + $0xfc] ss:$24 sps:$4 sm:$0xff]   ;;  %v10528_v53 = vld [vmem:[#allocation4 + $0xf8] ss:$24 sps:$4 sm:$0xff]   ;;  %v10536_v47 = vld [vmem:[#allocation4 + $0x12c] ss:$24 sps:$4 sm:$0xff]  }
 0x542   :  { %v10533_v33 = vld [vmem:[#allocation4 + $0x124] ss:$24 sps:$4 sm:$0xff]   ;;  %v10531_v26 = vld [vmem:[#allocation4 + $0x120] ss:$24 sps:$4 sm:$0xff]   ;;  %v10539_v41 = vld [vmem:[#allocation4 + $0x154] ss:$24 sps:$4 sm:$0xff]   ;;  %p11387_p7 = por %p11386_p6, %p11385_p5 }
 0x543   :  { %4229 = vmatpush1.bf16.msra.mxu1 %v4163_v42  ;;  %4342 = vmatpush1.bf16.msra.mxu0 %v4165_v2  ;;  %v10534_v21 = vld [vmem:[#allocation4 + $0x128] ss:$24 sps:$4 sm:$0xff]   ;;  %v10542_v39 = vld [vmem:[#allocation4 + $0x15c] ss:$24 sps:$4 sm:$0xff]   ;;  %v10540_v20 = vld [vmem:[#allocation4 + $0x158] ss:$24 sps:$4 sm:$0xff]  }
 0x544   :  { %8021 = vrot.lane.b32.xlu0 %v12681_v9, %s11451_s10  ;;  %8023 = vrot.lane.b32.xlu1 %v12687_v5, %s11451_s10  ;;  %v4167_v9 = vld [vmem:[#allocation2 + $0x50] sm:$0xff]  ;;  %v4151_v5 = vpack.c.bf16 %v12812_v54, %v12809_v56  ;;  %v10545_v57 = vld [vmem:[#allocation4 + $0x184] ss:$24 sps:$4 sm:$0xff]   ;;  %v10543_v2 = vld [vmem:[#allocation4 + $0x180] ss:$24 sps:$4 sm:$0xff]   ;;  %p11388_p8 = pnand %p11387_p7, %p11381_p4 }
 0x545   :  { %4452 = vmatprep.subr.bf16.mxu1 %v4162_v30  ;;  %v10537_v52 = vld [vmem:[#allocation4 + $0x150] ss:$24 sps:$4 sm:$0xff]   ;;  %v10548_v42 = vld [vmem:[#allocation4 + $0x18c] ss:$24 sps:$4 sm:$0xff]  }
 0x546   :  { %8688 = vmatmul.mubr.msk.bf16.vlgmr.msra.gmra.mrb[120].mxu1 %vm4201_vm2, %v12860_v29  ;;  %8696 = vmatmul.mubr.msk.bf16.vlgmr.msra.gmra.mrb[120].mxu0 %vm4201_vm2, %v12860_v29  ;;  %v10546_v30 = vld [vmem:[#allocation4 + $0x188] ss:$24 sps:$4 sm:$0xff]  }
 0x547   :  { %4453 = vmatpush1.bf16.msra.mxu1 %v4161_v46  ;;  %4268 = vmatprep.mubr.bf16.mxu1 %v14058_v28  ;;  %v10554_v46 = vld [vmem:[#allocation4 + $0x1bc] ss:$24 sps:$4 sm:$0xff]   ;;  %v14065_v35 = vld [vmem:[#allocation41_spill] sm:$0xff] }
 0x548   :  { %8025 = vrot.lane.b32.xlu0 %v12683_v34, %s11451_s10  ;;  %8027 = vrot.lane.b32.xlu1 %v12692_v32, %s11451_s10  ;;  %v4150_v34 = vpack.c.bf16 %v12806_v10, %v12797_v40  ;;  %v4152_v32 = vpack.c.bf16 %v12818_v44, %v12815_v22 }
 0x549   :  { %4381 = vmatprep.mubr.bf16.mxu0 %v14058_v28  ;;  %4454 = vmatprep.subr.bf16.mxu1 %v4168_v58  ;;  %v10549_v58 = vld [vmem:[#allocation4 + $0x1b0] ss:$24 sps:$4 sm:$0xff]  }
 0x54b   :  { %4455 = vmatpush1.bf16.msra.mxu1 %v4167_v9  ;;  %v10552_v9 = vld [vmem:[#allocation4 + $0x1b8] ss:$24 sps:$4 sm:$0xff]  }
 0x54c   :  { %8029 = vrot.lane.b32.xlu0 %v12714_v48, %s11451_s10  ;;  %8031 = vrot.lane.b32.xlu1 %v12721_v15, %s11451_s10  ;;  %v10503_v48 = vld [vmem:[#allocation4 + $0x34] ss:$24 sps:$4 sm:$0xff]  }
 0x54d   :  { %v10506_v15 = vld [vmem:[#allocation4 + $0x3c] ss:$24 sps:$4 sm:$0xff]  }
 0x54e   :  { %8689 = vmatmul.mubr.msk.bf16.gmra.mrb[124].mxu1 %vm4201_vm2, %v4150_v34  ;;  %8697 = vmatmul.mubr.msk.bf16.gmra.mrb[124].mxu0 %vm4201_vm2, %v4150_v34 }
 0x54f   :  { %4278 = vmatprep.mubr.bf16.mxu1 %v14058_v28  ;;  %4391 = vmatprep.mubr.bf16.mxu0 %v14058_v28 }
 0x550   :  { %8033 = vrot.lane.b32.xlu0 %v12724_v14, %s11451_s10  ;;  %8035 = vrot.lane.b32.xlu1 %v12732_v13, %s11451_s10  ;;  %v10501_v14 = vld [vmem:[#allocation4 + $0x30] ss:$24 sps:$4 sm:$0xff]   ;;  %v10509_v13 = vld [vmem:[#allocation4 + $0x64] ss:$24 sps:$4 sm:$0xff]  }
 0x554   :  { %8037 = vrot.lane.b32.xlu0 %v12753_v50, %s11451_s10  ;;  %8039 = vrot.lane.b32.xlu1 %v12758_v37, %s11451_s10  ;;  %v10515_v50 = vld [vmem:[#allocation4 + $0x94] ss:$24 sps:$4 sm:$0xff]  }
 0x555   :  { %v10518_v37 = vld [vmem:[#allocation4 + $0x9c] ss:$24 sps:$4 sm:$0xff]  }
 0x556   :  { %8690 = vmatmul.mubr.msk.bf16.gmra.mrb[128].mxu1 %vm4201_vm2, %v4151_v5  ;;  %8698 = vmatmul.mubr.msk.bf16.gmra.mrb[128].mxu0 %vm4201_vm2, %v4151_v5 }
 0x557   :  { %4288 = vmatprep.mubr.bf16.mxu1 %v14058_v28  ;;  %4401 = vmatprep.mubr.bf16.mxu0 %v14058_v28 }
 0x558   :  { %8041 = vrot.lane.b32.xlu0 %v12760_v11, %s11451_s10  ;;  %8043 = vrot.lane.b32.xlu1 %v12769_v61, %s11451_s10  ;;  %v10513_v11 = vld [vmem:[#allocation4 + $0x90] ss:$24 sps:$4 sm:$0xff]   ;;  %v10521_v61 = vld [vmem:[#allocation4 + $0xc4] ss:$24 sps:$4 sm:$0xff]  }
 0x55c   :  { %8077 = vrot.lane.b32.xlu0 %v12667_v55, %s11451_s10  ;;  %8079 = vrot.lane.b32.xlu1 %v12674_v27, %s11451_s10  ;;  %v4154_v55 = vpack.c.bf16 %v12830_v7, %v12827_v49  ;;  %v4156_v27 = vpack.c.bf16 %v12842_v19, %v12839_v43 }
 0x55e   :  { %8691 = vmatmul.mubr.msk.bf16.gmra.mrb[132].mxu1 %vm4201_vm2, %v4152_v32  ;;  %8699 = vmatmul.mubr.msk.bf16.gmra.mrb[132].mxu0 %vm4201_vm2, %v4152_v32 }
 0x55f   :  { %4298 = vmatprep.mubr.bf16.mxu1 %v14058_v28  ;;  %4411 = vmatprep.mubr.bf16.mxu0 %v14058_v28 }
 0x560   :  { %8081 = vrot.lane.b32.xlu0 %v12664_v63, %s11451_s10  ;;  %8083 = vrot.lane.b32.xlu1 %v12671_v3, %s11451_s10  ;;  %v4153_v63 = vpack.c.bf16 %v12824_v45, %v12821_v25  ;;  %v4155_v3 = vpack.c.bf16 %v12836_v6, %v12833_v1 }
 0x564   :  { %8087 = vrot.lane.b32.xlu1 %v12699_v59, %s11451_s10  ;;  %8085 = vrot.lane.b32.xlu0 %v12690_v38, %s11451_s10  ;;  %v10497_v38 = vld [vmem:[#allocation4 + $0x4] ss:$24 sps:$4 sm:$0xff]   ;;  %v10495_v59 = vld [vmem:[#allocation4] ss:$24 sps:$4 sm:$0xff]  }
 0x565   :  { %5677 = vmatprep.subr.bf16.mxu0 %v10497_v38  ;;  %v10564_v38 = vld [vmem:[#allocation4 + $0x218] ss:$24 sps:$4 sm:$0xff]  }
 0x566   :  { %8692 = vmatmul.mubr.msk.bf16.gmra.mrb[136].mxu1 %vm4201_vm2, %v4153_v63  ;;  %8700 = vmatmul.mubr.msk.bf16.gmra.mrb[136].mxu0 %vm4201_vm2, %v4153_v63 }
 0x567   :  { %4308 = vmatprep.mubr.bf16.mxu1 %v14058_v28  ;;  %4421 = vmatprep.mubr.bf16.mxu0 %v14058_v28 }
 0x568   :  { %8091 = vrot.lane.b32.xlu1 %v12704_v24, %s11451_s10  ;;  %8089 = vrot.lane.b32.xlu0 %v12695_v0, %s11451_s10  ;;  %v10500_v0 = vld [vmem:[#allocation4 + $0xc] ss:$24 sps:$4 sm:$0xff]   ;;  %v10498_v24 = vld [vmem:[#allocation4 + $0x8] ss:$24 sps:$4 sm:$0xff]  }
 0x569   :  { %5903 = vmatprep.subr.bf16.mxu1 %v10500_v0  ;;  %5678 = vmatpush1.bf16.msra.mxu0 %v10495_v59  ;;  %v10569_v0 = vld [vmem:[#allocation4 + $0x244] ss:$24 sps:$4 sm:$0xff]  }
 0x56a   :  { %5679 = vmatprep.subr.bf16.mxu0 %v10503_v48  ;;  %v10572_v59 = vld [vmem:[#allocation4 + $0x24c] ss:$24 sps:$4 sm:$0xff]   ;;  %v10570_v48 = vld [vmem:[#allocation4 + $0x248] ss:$24 sps:$4 sm:$0xff]  }
 0x56c   :  { %8095 = vrot.lane.b32.xlu1 %v12734_v12, %s11451_s10  ;;  %8093 = vrot.lane.b32.xlu0 %v12726_v18, %s11451_s10  ;;  %v10504_v18 = vld [vmem:[#allocation4 + $0x38] ss:$24 sps:$4 sm:$0xff]   ;;  %v10512_v12 = vld [vmem:[#allocation4 + $0x6c] ss:$24 sps:$4 sm:$0xff]  }
 0x56d   :  { %5680 = vmatpush1.bf16.msra.mxu0 %v10501_v14  ;;  %v10578_v14 = vld [vmem:[#allocation4 + $0x27c] ss:$24 sps:$4 sm:$0xff]  }
 0x56e   :  { %8693 = vmatmul.mubr.msk.bf16.gmra.mrb[140].mxu1 %vm4201_vm2, %v4154_v55  ;;  %8701 = vmatmul.mubr.msk.bf16.gmra.mrb[140].mxu0 %vm4201_vm2, %v4154_v55 }
 0x56f   :  { %4318 = vmatprep.mubr.bf16.mxu1 %v14058_v28  ;;  %4431 = vmatprep.mubr.bf16.mxu0 %v14058_v28 }
 0x570   :  { %8099 = vrot.lane.b32.xlu1 %v12745_v62, %s11451_s10  ;;  %8097 = vrot.lane.b32.xlu0 %v12737_v16, %s11451_s10  ;;  %v10507_v16 = vld [vmem:[#allocation4 + $0x60] ss:$24 sps:$4 sm:$0xff]  }
 0x571   :  { %v10510_v62 = vld [vmem:[#allocation4 + $0x68] ss:$24 sps:$4 sm:$0xff]   ;;  %5681 = vmatprep.subr.bf16.mxu0 %v10509_v13  ;;  %v10576_v13 = vld [vmem:[#allocation4 + $0x278] ss:$24 sps:$4 sm:$0xff]  }
 0x572   :  { %5682 = vmatpush1.bf16.msra.mxu0 %v10507_v16  ;;  %v10584_v16 = vld [vmem:[#allocation4 + $0x2ac] ss:$24 sps:$4 sm:$0xff]  }
 0x573   :  { %5683 = vmatprep.subr.bf16.mxu0 %v10515_v50  ;;  %v10582_v50 = vld [vmem:[#allocation4 + $0x2a8] ss:$24 sps:$4 sm:$0xff]  }
 0x574   :  { %8103 = vrot.lane.b32.xlu1 %v12771_v23, %s11451_s10  ;;  %8101 = vrot.lane.b32.xlu0 %v12762_v60, %s11451_s10  ;;  %v10516_v60 = vld [vmem:[#allocation4 + $0x98] ss:$24 sps:$4 sm:$0xff]   ;;  %v10524_v23 = vld [vmem:[#allocation4 + $0xcc] ss:$24 sps:$4 sm:$0xff]  }
 0x576   :  { %8694 = vmatmul.mubr.msk.bf16.gmra.mrb[144].mxu1 %vm4201_vm2, %v4155_v3  ;;  %8702 = vmatmul.mubr.msk.bf16.gmra.mrb[144].mxu0 %vm4201_vm2, %v4155_v3 }
 0x577   :  { %4328 = vmatprep.mubr.bf16.mxu1 %v14058_v28  ;;  %4441 = vmatprep.mubr.bf16.mxu0 %v14058_v28 }
 0x578   :  { %8107 = vrot.lane.b32.xlu1 %v12782_v51, %s11451_s10  ;;  %8105 = vrot.lane.b32.xlu0 %v12775_v31, %s11451_s10  ;;  %v10519_v31 = vld [vmem:[#allocation4 + $0xc0] ss:$24 sps:$4 sm:$0xff]  }
 0x579   :  { %5684 = vmatpush1.bf16.msra.mxu0 %v10513_v11  ;;  %v10522_v51 = vld [vmem:[#allocation4 + $0xc8] ss:$24 sps:$4 sm:$0xff]   ;;  %v10590_v11 = vld [vmem:[#allocation4 + $0x2dc] ss:$24 sps:$4 sm:$0xff]  }
 0x57a   :  { %5685 = vmatprep.subr.bf16.mxu0 %v10521_v61  ;;  %v10588_v61 = vld [vmem:[#allocation4 + $0x2d8] ss:$24 sps:$4 sm:$0xff]  }
 0x57d   :  { %5686 = vmatpush1.bf16.msra.mxu0 %v10519_v31  ;;  %v12977_v31 = vld [vmem:[#allocation3] sm:$0x3f] }
 0x57e   :  { %8695 = vmatmul.mubr.msk.bf16.gmra.mrb[148].mxu1 %vm4201_vm2, %v4156_v27  ;;  %8703 = vmatmul.mubr.msk.bf16.gmra.mrb[148].mxu0 %vm4201_vm2, %v4156_v27 }
 0x57f   :  { %4484 = vmatprep.mubr.bf16.mxu1 %v14058_v28  ;;  %5687 = vmatprep.subr.bf16.mxu0 %v10527_v4 }
 0x581   :  { %5688 = vmatpush1.bf16.msra.mxu0 %v10525_v17 }
 0x582   :  { %5689 = vmatprep.subr.bf16.mxu0 %v10533_v33 }
 0x585   :  { %5690 = vmatpush1.bf16.msra.mxu0 %v10531_v26 }
 0x586   :  { %8704 = vmatmul.mubr.msk.bf16.vlgmr.msra.gmra.mrb[152].mxu1 %vm4201_vm2, %v12860_v29  ;;  %5691 = vmatprep.subr.bf16.mxu0 %v10539_v41  ;;  %v10551_v29 = vld [vmem:[#allocation4 + $0x1b4] ss:$24 sps:$4 sm:$0xff]  }
 0x587   :  { %4494 = vmatprep.mubr.bf16.mxu1 %v14058_v28  ;;  %5904 = vmatpush1.bf16.msra.mxu1 %v10498_v24  ;;  %v10567_v24 = vld [vmem:[#allocation4 + $0x240] ss:$24 sps:$4 sm:$0xff]  }
 0x588   :  { %5905 = vmatprep.subr.bf16.mxu1 %v10506_v15  ;;  %v10575_v15 = vld [vmem:[#allocation4 + $0x274] ss:$24 sps:$4 sm:$0xff]  }
 0x589   :  { %5692 = vmatpush1.bf16.msra.mxu0 %v10537_v52 }
 0x58a   :  { %5693 = vmatprep.subr.bf16.mxu0 %v10545_v57 }
 0x58b   :  { %5906 = vmatpush1.bf16.msra.mxu1 %v10504_v18  ;;  %v10573_v18 = vld [vmem:[#allocation4 + $0x270] ss:$24 sps:$4 sm:$0xff]  }
 0x58c   :  { %5907 = vmatprep.subr.bf16.mxu1 %v10512_v12  ;;  %v10581_v12 = vld [vmem:[#allocation4 + $0x2a4] ss:$24 sps:$4 sm:$0xff]  }
 0x58d   :  { %5694 = vmatpush1.bf16.msra.mxu0 %v10543_v2 }
 0x58e   :  { %8705 = vmatmul.mubr.msk.bf16.gmra.mrb[156].mxu1 %vm4201_vm2, %v4150_v34  ;;  %5695 = vmatprep.subr.bf16.mxu0 %v10551_v29  ;;  %v10557_v34 = vld [vmem:[#allocation4 + $0x1e4] ss:$24 sps:$4 sm:$0xff]  }
 0x58f   :  { %4504 = vmatprep.mubr.bf16.mxu1 %v14058_v28  ;;  %5908 = vmatpush1.bf16.msra.mxu1 %v10510_v62  ;;  %v10579_v62 = vld [vmem:[#allocation4 + $0x2a0] ss:$24 sps:$4 sm:$0xff]  }
 0x590   :  { %5909 = vmatprep.subr.bf16.mxu1 %v10518_v37  ;;  %v10587_v37 = vld [vmem:[#allocation4 + $0x2d4] ss:$24 sps:$4 sm:$0xff]  }
 0x591   :  { %5696 = vmatpush1.bf16.msra.mxu0 %v10549_v58 }
 0x592   :  { %5697 = vmatprep.subr.bf16.mxu0 %v10557_v34 }
 0x593   :  { %5910 = vmatpush1.bf16.msra.mxu1 %v10516_v60  ;;  %v10585_v60 = vld [vmem:[#allocation4 + $0x2d0] ss:$24 sps:$4 sm:$0xff]  }
 0x594   :  { %5911 = vmatprep.subr.bf16.mxu1 %v10524_v23  ;;  %v10593_v23 = vld [vmem:[#allocation4 + $0x304] ss:$24 sps:$4 sm:$0xff]  }
 0x596   :  { %8706 = vmatmul.mubr.msk.bf16.gmra.mrb[160].mxu1 %vm4201_vm2, %v4151_v5  ;;  %v10560_v5 = vld [vmem:[#allocation4 + $0x1ec] ss:$24 sps:$4 sm:$0xff]  }
 0x597   :  { %4514 = vmatprep.mubr.bf16.mxu1 %v14058_v28  ;;  %5912 = vmatpush1.bf16.msra.mxu1 %v10522_v51  ;;  %v14059_v51 = vld [vmem:[#allocation37_spill] sm:$0xff] }
 0x598   :  { %5913 = vmatprep.subr.bf16.mxu1 %v10530_v8  ;;  %v12981_v4 = vrot.slane %v12977_v31, %v14059_v51 }
 0x59b   :  { %5914 = vmatpush1.bf16.msra.mxu1 %v10528_v53 }
 0x59c   :  { %5915 = vmatprep.subr.bf16.mxu1 %v10536_v47 }
 0x59e   :  { %8707 = vmatmul.mubr.msk.bf16.gmra.mrb[164].mxu1 %vm4201_vm2, %v4152_v32  ;;  %v10555_v32 = vld [vmem:[#allocation4 + $0x1e0] ss:$24 sps:$4 sm:$0xff]  }
 0x59f   :  { %4524 = vmatprep.mubr.bf16.mxu1 %v14058_v28  ;;  %5916 = vmatpush1.bf16.msra.mxu1 %v10534_v21 }
 0x5a0   :  { %5917 = vmatprep.subr.bf16.mxu1 %v10542_v39  ;;  %5698 = vmatpush1.bf16.msra.mxu0 %v10555_v32 }
 0x5a3   :  { %5918 = vmatpush1.bf16.msra.mxu1 %v10540_v20 }
 0x5a4   :  { %5919 = vmatprep.subr.bf16.mxu1 %v10548_v42 }
 0x5a6   :  { %8708 = vmatmul.mubr.msk.bf16.gmra.mrb[168].mxu1 %vm4201_vm2, %v4153_v63  ;;  %v10558_v63 = vld [vmem:[#allocation4 + $0x1e8] ss:$24 sps:$4 sm:$0xff]  }
 0x5a7   :  { %4534 = vmatprep.mubr.bf16.mxu1 %v14058_v28  ;;  %5920 = vmatpush1.bf16.msra.mxu1 %v10546_v30 }
 0x5a8   :  { %5921 = vmatprep.subr.bf16.mxu1 %v10554_v46 }
 0x5ab   :  { %5922 = vmatpush1.bf16.msra.mxu1 %v10552_v9 }
 0x5ac   :  { %5923 = vmatprep.subr.bf16.mxu1 %v10560_v5 }
 0x5ae   :  { %8709 = vmatmul.mubr.msk.bf16.gmra.mrb[172].mxu1 %vm4201_vm2, %v4154_v55  ;;  %v10563_v55 = vld [vmem:[#allocation4 + $0x214] ss:$24 sps:$4 sm:$0xff]  }
 0x5af   :  { %4544 = vmatprep.mubr.bf16.mxu1 %v14058_v28  ;;  %5924 = vmatpush1.bf16.msra.mxu1 %v10558_v63 }
 0x5b0   :  { %5699 = vmatprep.subr.bf16.mxu0 %v10563_v55 }
 0x5b6   :  { %8710 = vmatmul.mubr.msk.bf16.gmra.mrb[176].mxu1 %vm4201_vm2, %v4155_v3  ;;  %v10566_v3 = vld [vmem:[#allocation4 + $0x21c] ss:$24 sps:$4 sm:$0xff]  }
 0x5b7   :  { %4554 = vmatprep.mubr.bf16.mxu1 %v14058_v28  ;;  %5925 = vmatprep.subr.bf16.mxu1 %v10566_v3 }
 0x5b8   :  { %5926 = vmatpush1.bf16.msra.mxu1 %v10564_v38 }
 0x5b9   :  { %5927 = vmatprep.subr.bf16.mxu1 %v10572_v59 }
 0x5bc   :  { %5928 = vmatpush1.bf16.msra.mxu1 %v10570_v48 }
 0x5bd   :  { %5929 = vmatprep.subr.bf16.mxu1 %v10578_v14 }
 0x5be   :  { %8711 = vmatmul.mubr.msk.bf16.gmra.mrb[180].mxu1 %vm4201_vm2, %v4156_v27  ;;  %v10561_v27 = vld [vmem:[#allocation4 + $0x210] ss:$24 sps:$4 sm:$0xff]  }
 0x5bf   :  { %5700 = vmatpush1.bf16.msra.mxu0 %v10561_v27 }
 0x5c0   :  { %5701 = vmatprep.subr.bf16.mxu0 %v10569_v0  ;;  %5930 = vmatpush1.bf16.msra.mxu1 %v10576_v13 }
 0x5c1   :  { %5931 = vmatprep.subr.bf16.mxu1 %v10584_v16 }
 0x5c3   :  { %5702 = vmatpush1.bf16.msra.mxu0 %v10567_v24 }
 0x5c4   :  { %5703 = vmatprep.subr.bf16.mxu0 %v10575_v15  ;;  %5932 = vmatpush1.bf16.msra.mxu1 %v10582_v50 }
 0x5c5   :  { %5933 = vmatprep.subr.bf16.mxu1 %v10590_v11 }
 0x5c7   :  { %5704 = vmatpush1.bf16.msra.mxu0 %v10573_v18 }
 0x5c8   :  { %5705 = vmatprep.subr.bf16.mxu0 %v10581_v12  ;;  %5934 = vmatpush1.bf16.msra.mxu1 %v10588_v61 }
 0x5cb   :  { %5706 = vmatpush1.bf16.msra.mxu0 %v10579_v62 }
 0x5cc   :  { %5707 = vmatprep.subr.bf16.mxu0 %v10587_v37 }
 0x5cf   :  { %5708 = vmatpush1.bf16.msra.mxu0 %v10585_v60  ;;  %v14060_v60 = vld [vmem:[#allocation38_spill] sm:$0xff] }
 0x5d0   :  { %5790 = vmatprep.subr.bf16.mxu0 %v10593_v23  ;;  %v13027_v61 = vrot.slane %v12977_v31, %v14060_v60 }
 0x619   :  { %v12983_v8 = vpop.f32.mrb[120].mxu1  ;;  %v12985_v17 = vpop.f32.mrb[120].mxu0 }
 0x61a   :  { %v12987_v53 = vpop.f32.mrb[121].mxu1  ;;  %v4375_v33 = vpop.f32.mrb[121].mxu0 }
 0x61b   :  { %v4376_v47 = vadd.f32 %v4375_v33, %v12981_v4  ;;  %v12990_v26 = vpop.f32.mrb[122].mxu1  ;;  %v12992_v21 = vpop.f32.mrb[122].mxu0 }
 0x61c   :  { %v12994_v41 = vpop.f32.mrb[123].mxu1  ;;  %v4379_v39 = vpop.f32.mrb[123].mxu0 }
 0x61d   :  { %v8712_v52 = vmul.f32 -1.442695, %v4376_v47  ;;  %v4380_v20 = vadd.f32 %v4379_v39, %v12981_v4  ;;  %v10602_v47 = vld [vmem:[#allocation4 + $0x30c] ss:$24 sps:$4 sm:$0xff]  }
 0x61e   :  { %6016 = vmatprep.subr.bf16.mxu1 %v10602_v47 }
 0x61f   :  { %10780 = vpow2.f32 %v8712_v52  ;;  %v8715_v57 = vmul.f32 -1.442695, %v4380_v20 }
 0x621   :  { %10782 = vpow2.f32 %v8715_v57  ;;  %v12997_v42 = vpop.f32.mrb[124].mxu1  ;;  %v12999_v2 = vpop.f32.mrb[124].mxu0 }
 0x622   :  { %v13001_v30 = vpop.f32.mrb[125].mxu1  ;;  %v4385_v29 = vpop.f32.mrb[125].mxu0 }
 0x623   :  { %v4386_v46 = vadd.f32 %v4385_v29, %v12981_v4  ;;  %v13004_v58 = vpop.f32.mrb[126].mxu1  ;;  %v13006_v9 = vpop.f32.mrb[126].mxu0 }
 0x624   :  { %v13008_v34 = vpop.f32.mrb[127].mxu1  ;;  %v4389_v5 = vpop.f32.mrb[127].mxu0 }
 0x625   :  { %v8718_v32 = vmul.f32 -1.442695, %v4386_v46  ;;  %v4390_v63 = vadd.f32 %v4389_v5, %v12981_v4 }
 0x627   :  { %10784 = vpow2.f32 %v8718_v32  ;;  %v8721_v55 = vmul.f32 -1.442695, %v4390_v63 }
 0x629   :  { %v10781_v3 = vpop.eup %10780  ;;  %10786 = vpow2.f32 %v8721_v55  ;;  %v13011_v27 = vpop.f32.mrb[128].mxu1 }
 0x62a   :  { %v13013_v38 = vpop.f32.mrb[128].mxu0  ;;  %v4709_v0 = vadd.f32 1.0, %v10781_v3  ;;  %v13015_v59 = vpop.f32.mrb[129].mxu1  ;;  %v4261_v3 = vadd.f32 %v12983_v8, %v13027_v61 }
 0x62b   :  { %v4395_v24 = vpop.f32.mrb[129].mxu0  ;;  %v10783_v48 = vpop.eup %10782 }
 0x62c   :  { %v4396_v15 = vadd.f32 %v4395_v24, %v12981_v4  ;;  %v13018_v14 = vpop.f32.mrb[130].mxu1  ;;  %v13020_v18 = vpop.f32.mrb[130].mxu0  ;;  %10788 = vrcp.f32 %v4709_v0  ;;  %v4712_v13 = vadd.f32 1.0, %v10783_v48 }
 0x62d   :  { %v13022_v12 = vpop.f32.mrb[131].mxu1  ;;  %v4399_v16 = vpop.f32.mrb[131].mxu0 }
 0x62e   :  { %v8724_v62 = vmul.f32 -1.442695, %v4396_v15  ;;  %v4400_v50 = vadd.f32 %v4399_v16, %v12981_v4  ;;  %10790 = vrcp.f32 %v4712_v13  ;;  %v4265_v15 = vadd.f32 %v12990_v26, %v13027_v61 }
 0x630   :  { %10792 = vpow2.f32 %v8724_v62  ;;  %v8727_v37 = vmul.f32 -1.442695, %v4400_v50 }
 0x631   :  { %v10785_v11 = vpop.eup %10784  ;;  %v13029_v23 = vpop.f32.mrb[132].mxu1 }
 0x632   :  { %10794 = vpow2.f32 %v8727_v37  ;;  %v13031_v33 = vpop.f32.mrb[132].mxu0  ;;  %v4715_v39 = vadd.f32 1.0, %v10785_v11  ;;  %v13033_v52 = vpop.f32.mrb[133].mxu1 }
 0x633   :  { %v4405_v20 = vpop.f32.mrb[133].mxu0  ;;  %v10787_v57 = vpop.eup %10786 }
 0x634   :  { %v4406_v29 = vadd.f32 %v4405_v20, %v12981_v4  ;;  %v13036_v46 = vpop.f32.mrb[134].mxu1  ;;  %v13038_v5 = vpop.f32.mrb[134].mxu0  ;;  %10796 = vrcp.f32 %v4715_v39  ;;  %v4718_v32 = vadd.f32 1.0, %v10787_v57 }
 0x635   :  { %v13040_v63 = vpop.f32.mrb[135].mxu1  ;;  %v4409_v55 = vpop.f32.mrb[135].mxu0 }
 0x636   :  { %v8730_v0 = vmul.f32 -1.442695, %v4406_v29  ;;  %v4410_v24 = vadd.f32 %v4409_v55, %v12981_v4  ;;  %v10789_v48 = vpop.eup %10788  ;;  %10798 = vrcp.f32 %v4718_v32 }
 0x637   :  { %v4853_v16 = vmul.f32 %v10789_v48, %v4261_v3  ;;  %v4271_v48 = vadd.f32 %v12997_v42, %v13027_v61 }
 0x638   :  { %10800 = vpow2.f32 %v8730_v0  ;;  %v8733_v13 = vmul.f32 -1.442695, %v4410_v24  ;;  %v10791_v62 = vpop.eup %10790 }
 0x639   :  { %v13047_v37 = vpop.f32.mrb[136].mxu1  ;;  %v13049_v11 = vpop.f32.mrb[136].mxu0  ;;  %v4856_v47 = vmul.f32 %v10791_v62, %v4265_v15 }
 0x63a   :  { %v10793_v50 = vpop.eup %10792  ;;  %10802 = vpow2.f32 %v8733_v13  ;;  %v13051_v39 = vpop.f32.mrb[137].mxu1 }
 0x63b   :  { %v4721_v8 = vadd.f32 1.0, %v10793_v50  ;;  %v4415_v20 = vpop.f32.mrb[137].mxu0  ;;  %v13054_v32 = vpop.f32.mrb[138].mxu1  ;;  %v13058_v55 = vpack.c.bf16 %v4856_v47, %v4853_v16  ;;  %v4275_v50 = vadd.f32 %v13004_v58, %v13027_v61 }
 0x63c   :  { %v10795_v57 = vpop.eup %10794  ;;  %v4416_v29 = vadd.f32 %v4415_v20, %v12981_v4  ;;  %v13056_v26 = vpop.f32.mrb[138].mxu0 }
 0x63d   :  { %14061 = vst [vmem:[#allocation59_spill] sm:$0xff] %v13058_v55  ;;  %10804 = vrcp.f32 %v4721_v8  ;;  %v4724_v3 = vadd.f32 1.0, %v10795_v57  ;;  %v13060_v0 = vpop.f32.mrb[139].mxu1  ;;  %v4419_v24 = vpop.f32.mrb[139].mxu0 }
 0x63e   :  { %v8736_v15 = vmul.f32 -1.442695, %v4416_v29  ;;  %v4420_v13 = vadd.f32 %v4419_v24, %v12981_v4  ;;  %v10797_v62 = vpop.eup %10796 }
 0x63f   :  { %10806 = vrcp.f32 %v4724_v3  ;;  %v4859_v16 = vmul.f32 %v10797_v62, %v4271_v48 }
 0x640   :  { %10808 = vpow2.f32 %v8736_v15  ;;  %v8739_v20 = vmul.f32 -1.442695, %v4420_v13  ;;  %v10799_v47 = vpop.eup %10798 }
 0x641   :  { %v13067_v57 = vpop.f32.mrb[140].mxu1  ;;  %v13069_v19 = vpop.f32.mrb[140].mxu0  ;;  %v4862_v43 = vmul.f32 %v10799_v47, %v4275_v50  ;;  %v4281_v50 = vadd.f32 %v13011_v27, %v13027_v61 }
 0x642   :  { %v10801_v8 = vpop.eup %10800  ;;  %10810 = vpow2.f32 %v8739_v20  ;;  %v13071_v29 = vpop.f32.mrb[141].mxu1 }
 0x643   :  { %v4727_v42 = vadd.f32 1.0, %v10801_v8  ;;  %v4425_v24 = vpop.f32.mrb[141].mxu0  ;;  %v13074_v1 = vpop.f32.mrb[142].mxu1  ;;  %v13078_v48 = vpack.c.bf16 %v4862_v43, %v4859_v16 }
 0x644   :  { %v10803_v6 = vpop.eup %10802  ;;  %v4426_v3 = vadd.f32 %v4425_v24, %v12981_v4  ;;  %v13076_v58 = vpop.f32.mrb[142].mxu0  ;;  %v4285_v24 = vadd.f32 %v13018_v14, %v13027_v61 }
 0x645   :  { %10812 = vrcp.f32 %v4727_v42  ;;  %v4730_v15 = vadd.f32 1.0, %v10803_v6  ;;  %v13080_v13 = vpop.f32.mrb[143].mxu1  ;;  %v4429_v62 = vpop.f32.mrb[143].mxu0 }
 0x646   :  { %v8742_v20 = vmul.f32 -1.442695, %v4426_v3  ;;  %v4430_v47 = vadd.f32 %v4429_v62, %v12981_v4 }
 0x647   :  { %v10805_v8 = vpop.eup %10804  ;;  %10814 = vrcp.f32 %v4730_v15 }
 0x648   :  { %10816 = vpow2.f32 %v8742_v20  ;;  %v8745_v7 = vmul.f32 -1.442695, %v4430_v47  ;;  %v4865_v43 = vmul.f32 %v10805_v8, %v4281_v50  ;;  %v4291_v8 = vadd.f32 %v13029_v23, %v13027_v61 }
 0x649   :  { %v10807_v16 = vpop.eup %10806  ;;  %v13087_v6 = vpop.f32.mrb[144].mxu1 }
 0x64a   :  { %v10809_v42 = vpop.eup %10808  ;;  %10818 = vpow2.f32 %v8745_v7  ;;  %v13089_v49 = vpop.f32.mrb[144].mxu0  ;;  %v4868_v45 = vmul.f32 %v10807_v16, %v4285_v24 }
 0x64b   :  { %v4733_v27 = vadd.f32 1.0, %v10809_v42  ;;  %v13091_v3 = vpop.f32.mrb[145].mxu1  ;;  %v4435_v62 = vpop.f32.mrb[145].mxu0 }
 0x64c   :  { %v10811_v25 = vpop.eup %10810  ;;  %v4436_v15 = vadd.f32 %v4435_v62, %v12981_v4  ;;  %v13094_v44 = vpop.f32.mrb[146].mxu1  ;;  %v13098_v50 = vpack.c.bf16 %v4868_v45, %v4865_v43  ;;  %v4295_v62 = vadd.f32 %v13036_v46, %v13027_v61 }
 0x64d   :  { %v13096_v14 = vpop.f32.mrb[146].mxu0  ;;  %10820 = vrcp.f32 %v4733_v27  ;;  %v4736_v7 = vadd.f32 1.0, %v10811_v25  ;;  %v13100_v20 = vpop.f32.mrb[147].mxu1 }
 0x64e   :  { %v4439_v47 = vpop.f32.mrb[147].mxu0  ;;  %v8748_v24 = vmul.f32 -1.442695, %v4436_v15 }
 0x64f   :  { %v4440_v16 = vadd.f32 %v4439_v47, %v12981_v4  ;;  %v10813_v42 = vpop.eup %10812  ;;  %10822 = vrcp.f32 %v4736_v7 }
 0x650   :  { %10824 = vpow2.f32 %v8748_v24  ;;  %v4871_v45 = vmul.f32 %v10813_v42, %v4291_v8  ;;  %v4301_v42 = vadd.f32 %v13047_v37, %v13027_v61 }
 0x651   :  { %v8751_v22 = vmul.f32 -1.442695, %v4440_v16  ;;  %v10815_v43 = vpop.eup %10814  ;;  %v13107_v25 = vpop.f32.mrb[148].mxu1 }
 0x652   :  { %v10817_v27 = vpop.eup %10816  ;;  %v13109_v54 = vpop.f32.mrb[148].mxu0  ;;  %v4874_v56 = vmul.f32 %v10815_v43, %v4295_v62 }
 0x653   :  { %10826 = vpow2.f32 %v8751_v22  ;;  %v4739_v23 = vadd.f32 1.0, %v10817_v27  ;;  %v13111_v15 = vpop.f32.mrb[149].mxu1  ;;  %v4445_v47 = vpop.f32.mrb[149].mxu0 }
 0x654   :  { %v10819_v10 = vpop.eup %10818  ;;  %v4446_v7 = vadd.f32 %v4445_v47, %v12981_v4  ;;  %v13114_v36 = vpop.f32.mrb[150].mxu1  ;;  %v13118_v8 = vpack.c.bf16 %v4874_v56, %v4871_v45  ;;  %v14064_v47 = vld [vmem:[#allocation40_spill] sm:$0xff]  ;;  %v13131_v56 = vrot.slane %v12977_v31, %v14065_v35 }
 0x655   :  { %v13116_v46 = vpop.f32.mrb[150].mxu0  ;;  %10828 = vrcp.f32 %v4739_v23  ;;  %v4742_v22 = vadd.f32 1.0, %v10819_v10  ;;  %v13120_v24 = vpop.f32.mrb[151].mxu1  ;;  %v13127_v40 = vrot.slane %v12977_v31, %v14064_v47  ;;  %v4305_v10 = vadd.f32 %v13054_v32, %v13027_v61 }
 0x656   :  { %14062 = vst [vmem:[#allocation60_spill] sm:$0xff] %v13116_v46  ;;  %14063 = vst [vmem:[#allocation61_spill] sm:$0xff] %v13120_v24  ;;  %v4449_v16 = vpop.f32.mrb[151].mxu0  ;;  %v8754_v62 = vmul.f32 -1.442695, %v4446_v7 }
 0x657   :  { %v4450_v43 = vadd.f32 %v4449_v16, %v12981_v4  ;;  %v10821_v27 = vpop.eup %10820  ;;  %10830 = vrcp.f32 %v4742_v22 }
 0x658   :  { %10832 = vpow2.f32 %v8754_v62  ;;  %v4877_v23 = vmul.f32 %v10821_v27, %v4301_v42  ;;  %v4311_v27 = vadd.f32 %v13067_v57, %v13027_v61 }
 0x659   :  { %v8757_v45 = vmul.f32 -1.442695, %v4450_v43  ;;  %v10823_v37 = vpop.eup %10822  ;;  %v4486_v4 = vpop.f32.mrb[152].mxu1 }
 0x65a   :  { %v10825_v7 = vpop.eup %10824  ;;  %v4880_v16 = vmul.f32 %v10823_v37, %v4305_v10  ;;  %v4487_v60 = vadd.f32 %v4486_v4, %v13127_v40  ;;  %v4488_v47 = vpop.f32.mrb[153].mxu1 }
 0x65b   :  { %10834 = vpow2.f32 %v8757_v45  ;;  %v4745_v22 = vadd.f32 1.0, %v10825_v7  ;;  %v4489_v28 = vadd.f32 %v4488_v47, %v13131_v56  ;;  %v4490_v35 = vpop.f32.mrb[154].mxu1  ;;  %v4315_v47 = vadd.f32 %v13074_v1, %v13027_v61 }
 0x65c   :  { %v13137_v46 = vpack.c.bf16 %v4880_v16, %v4877_v23  ;;  %v8713_v62 = vmul.f32 -1.442695, %v4487_v60  ;;  %v4491_v42 = vadd.f32 %v4490_v35, %v13127_v40  ;;  %v4492_v43 = vpop.f32.mrb[155].mxu1 }
 0x65d   :  { %v10827_v51 = vpop.eup %10826  ;;  %10836 = vrcp.f32 %v4745_v22  ;;  %v8714_v10 = vmul.f32 -1.442695, %v4489_v28  ;;  %v4493_v45 = vadd.f32 %v4492_v43, %v13131_v56 }
 0x65e   :  { %v4748_v32 = vadd.f32 1.0, %v10827_v51  ;;  %v8716_v7 = vmul.f32 -1.442695, %v4491_v42 }
 0x65f   :  { %v10829_v37 = vpop.eup %10828  ;;  %v8717_v23 = vmul.f32 -1.442695, %v4493_v45  ;;  %v4321_v45 = vadd.f32 %v13087_v6, %v13027_v61 }
 0x660   :  { %10838 = vrcp.f32 %v4748_v32  ;;  %v4883_v4 = vmul.f32 %v10829_v37, %v4311_v27 }
 0x661   :  { %10840 = vpow2.f32 %v8713_v62  ;;  %v10831_v51 = vpop.eup %10830  ;;  %v4496_v35 = vpop.f32.mrb[156].mxu1 }
 0x662   :  { %10842 = vpow2.f32 %v8714_v10  ;;  %v10833_v60 = vpop.eup %10832  ;;  %v4886_v16 = vmul.f32 %v10831_v51, %v4315_v47  ;;  %v4497_v28 = vadd.f32 %v4496_v35, %v13127_v40  ;;  %v4498_v57 = vpop.f32.mrb[157].mxu1  ;;  %v4325_v51 = vadd.f32 %v13094_v44, %v13027_v61 }
 0x663   :  { %10844 = vpow2.f32 %v8716_v7  ;;  %v4751_v22 = vadd.f32 1.0, %v10833_v60  ;;  %v4499_v32 = vadd.f32 %v4498_v57, %v13131_v56  ;;  %v4500_v42 = vpop.f32.mrb[158].mxu1 }
 0x664   :  { %10846 = vpow2.f32 %v8717_v23  ;;  %v13147_v24 = vpack.c.bf16 %v4886_v16, %v4883_v4  ;;  %v8719_v62 = vmul.f32 -1.442695, %v4497_v28  ;;  %v4501_v27 = vadd.f32 %v4500_v42, %v13127_v40  ;;  %v4502_v10 = vpop.f32.mrb[159].mxu1 }
 0x665   :  { %v10835_v43 = vpop.eup %10834  ;;  %10848 = vrcp.f32 %v4751_v22  ;;  %v8720_v37 = vmul.f32 -1.442695, %v4499_v32  ;;  %v4503_v7 = vadd.f32 %v4502_v10, %v13131_v56 }
 0x666   :  { %v4754_v1 = vadd.f32 1.0, %v10835_v43  ;;  %v8722_v23 = vmul.f32 -1.442695, %v4501_v27 }
 0x667   :  { %v10837_v47 = vpop.eup %10836  ;;  %v8723_v4 = vmul.f32 -1.442695, %v4503_v7 }
 0x668   :  { %10850 = vrcp.f32 %v4754_v1  ;;  %v4889_v60 = vmul.f32 %v10837_v47, %v4321_v45  ;;  %v4331_v1 = vadd.f32 %v13107_v25, %v13027_v61  ;;  %v14066_v25 = vld [vmem:[#allocation45_spill] sm:$0xff] }
 0x669   :  { %10852 = vpow2.f32 %v8719_v62  ;;  %v4506_v22 = vpop.f32.mrb[160].mxu1 }
 0x66a   :  { %v10839_v35 = vpop.eup %10838  ;;  %10854 = vpow2.f32 %v8720_v37  ;;  %v4507_v43 = vadd.f32 %v4506_v22, %v13127_v40  ;;  %v4508_v32 = vpop.f32.mrb[161].mxu1  ;;  %v13165_v22 = vrot.slane %v12977_v31, %v14066_v25  ;;  %v10606_v25 = vld [vmem:[#allocation4 + $0x36c] ss:$24 sps:$4 sm:$0x3f]  }
 0x66b   :  { %v10841_v16 = vpop.eup %10840  ;;  %10856 = vpow2.f32 %v8722_v23  ;;  %v4892_v28 = vmul.f32 %v10839_v35, %v4325_v51  ;;  %v4509_v62 = vadd.f32 %v4508_v32, %v13131_v56  ;;  %v4510_v27 = vpop.f32.mrb[162].mxu1 }
 0x66c   :  { %v10843_v57 = vpop.eup %10842  ;;  %v4710_v6 = vadd.f32 1.0, %v10841_v16  ;;  %10858 = vpow2.f32 %v8723_v4  ;;  %v8725_v7 = vmul.f32 -1.442695, %v4507_v43  ;;  %v4511_v47 = vadd.f32 %v4510_v27, %v13127_v40  ;;  %v4512_v23 = vpop.f32.mrb[163].mxu1 }
 0x66d   :  { %v10845_v42 = vpop.eup %10844  ;;  %v4711_v44 = vadd.f32 1.0, %v10843_v57  ;;  %v13159_v10 = vpack.c.bf16 %v4892_v28, %v4889_v60  ;;  %v8726_v4 = vmul.f32 -1.442695, %v4509_v62  ;;  %v4513_v35 = vadd.f32 %v4512_v23, %v13131_v56 }
 0x66e   :  { %v10847_v45 = vpop.eup %10846  ;;  %10860 = vrcp.f32 %v4710_v6  ;;  %v4713_v37 = vadd.f32 1.0, %v10845_v42  ;;  %v8728_v60 = vmul.f32 -1.442695, %v4511_v47  ;;  %v4335_v28 = vadd.f32 %v13114_v36, %v13027_v61  ;;  %v14067_v42 = vld [vmem:[#allocation44_spill] sm:$0xff] }
 0x66f   :  { %10862 = vrcp.f32 %v4711_v44  ;;  %v4714_v51 = vadd.f32 1.0, %v10847_v45  ;;  %v10849_v16 = vpop.eup %10848  ;;  %v8729_v57 = vmul.f32 -1.442695, %v4513_v35  ;;  %v13171_v44 = vrot.slane %v12977_v31, %v14067_v42 }
 0x670   :  { %10864 = vrcp.f32 %v4713_v37  ;;  %v4895_v6 = vmul.f32 %v10849_v16, %v4331_v1  ;;  %v4263_v37 = vadd.f32 %v12987_v53, %v13165_v22 }
 0x671   :  { %10866 = vrcp.f32 %v4714_v51  ;;  %v4516_v62 = vpop.f32.mrb[164].mxu1 }
 0x672   :  { %v10851_v43 = vpop.eup %10850  ;;  %10868 = vpow2.f32 %v8725_v7  ;;  %v4517_v36 = vadd.f32 %v4516_v62, %v13127_v40  ;;  %v4518_v61 = vpop.f32.mrb[165].mxu1 }
 0x673   :  { %v10853_v32 = vpop.eup %10852  ;;  %10870 = vpow2.f32 %v8726_v4  ;;  %v4898_v27 = vmul.f32 %v10851_v43, %v4335_v28  ;;  %v4519_v7 = vadd.f32 %v4518_v61, %v13131_v56  ;;  %v4520_v51 = vpop.f32.mrb[166].mxu1 }
 0x674   :  { %v10855_v45 = vpop.eup %10854  ;;  %v4716_v47 = vadd.f32 1.0, %v10853_v32  ;;  %10872 = vpow2.f32 %v8728_v60  ;;  %v8731_v16 = vmul.f32 -1.442695, %v4517_v36  ;;  %v4521_v28 = vadd.f32 %v4520_v51, %v13127_v40  ;;  %v4522_v53 = vpop.f32.mrb[167].mxu1 }
 0x675   :  { %v10857_v1 = vpop.eup %10856  ;;  %v4717_v23 = vadd.f32 1.0, %v10855_v45  ;;  %10874 = vpow2.f32 %v8729_v57  ;;  %v13177_v31 = vpack.c.bf16 %v4898_v27, %v4895_v6  ;;  %v8732_v43 = vmul.f32 -1.442695, %v4519_v7 }
 0x676   :  { %v10859_v4 = vpop.eup %10858  ;;  %10876 = vrcp.f32 %v4716_v47  ;;  %v4719_v35 = vadd.f32 1.0, %v10857_v1  ;;  %v4523_v32 = vadd.f32 %v4522_v53, %v13131_v56  ;;  %v4374_v57 = vadd.f32 %v12985_v17, %v13171_v44 }
 0x677   :  { %10878 = vrcp.f32 %v4717_v23  ;;  %v4720_v60 = vadd.f32 1.0, %v10859_v4  ;;  %v8734_v45 = vmul.f32 -1.442695, %v4521_v28  ;;  %v4267_v27 = vadd.f32 %v12994_v41, %v13165_v22 }
 0x678   :  { %v10861_v62 = vpop.eup %10860  ;;  %10880 = vrcp.f32 %v4719_v35  ;;  %v8735_v47 = vmul.f32 -1.442695, %v4523_v32  ;;  %v4378_v1 = vadd.f32 %v12992_v21, %v13171_v44  ;;  %v10591_v21 = vld [vmem:[#allocation4 + $0x300] ss:$24 sps:$4 sm:$0xff]  }
 0x679   :  { %v10863_v6 = vpop.eup %10862  ;;  %10882 = vrcp.f32 %v4720_v60  ;;  %v4854_v36 = vmul.f32 %v10861_v62, %v4263_v37  ;;  %v4526_v51 = vpop.f32.mrb[168].mxu1 }
 0x67a   :  { %v10865_v61 = vpop.eup %10864  ;;  %10884 = vpow2.f32 %v8731_v16  ;;  %v4855_v23 = vmul.f32 %v10863_v6, %v4374_v57  ;;  %v4527_v35 = vadd.f32 %v4526_v51, %v13127_v40  ;;  %v4528_v28 = vpop.f32.mrb[169].mxu1  ;;  %v10600_v16 = vld [vmem:[#allocation4 + $0x308] ss:$24 sps:$4 sm:$0xff]  }
 0x67b   :  { %v10867_v7 = vpop.eup %10866  ;;  %10886 = vpow2.f32 %v8732_v43  ;;  %v4857_v4 = vmul.f32 %v10865_v61, %v4267_v27  ;;  %v4529_v37 = vadd.f32 %v4528_v28, %v13131_v56  ;;  %v4530_v32 = vpop.f32.mrb[170].mxu1  ;;  %v4273_v43 = vadd.f32 %v13001_v30, %v13165_v22  ;;  %v10596_v61 = vld [vmem:[#allocation4 + $0x334] ss:$24 sps:$4 sm:$0xff]   ;;  %v10599_v30 = vld [vmem:[#allocation4 + $0x360] ss:$24 sps:$4 sm:$0x3f]  }
 0x67c   :  { %v10869_v17 = vpop.eup %10868  ;;  %10888 = vpow2.f32 %v8734_v45  ;;  %v4858_v53 = vmul.f32 %v10867_v7, %v4378_v1  ;;  %v4531_v45 = vadd.f32 %v4530_v32, %v13127_v40  ;;  %v4532_v27 = vpop.f32.mrb[171].mxu1  ;;  %v10605_v1 = vld [vmem:[#allocation4 + $0x33c] ss:$24 sps:$4 sm:$0xff]  }
 0x67d   :  { %v10871_v41 = vpop.eup %10870  ;;  %v4722_v60 = vadd.f32 1.0, %v10869_v17  ;;  %10890 = vpow2.f32 %v8735_v47  ;;  %v13189_v62 = vpack.c.bf16 %v4857_v4, %v4854_v36  ;;  %v8737_v17 = vmul.f32 -1.442695, %v4527_v35  ;;  %v10594_v4 = vld [vmem:[#allocation4 + $0x330] ss:$24 sps:$4 sm:$0xff]  }
 0x67e   :  { %v10873_v57 = vpop.eup %10872  ;;  %v4723_v6 = vadd.f32 1.0, %v10871_v41  ;;  %v13194_v7 = vpack.c.bf16 %v4858_v53, %v4855_v23  ;;  %v4533_v36 = vadd.f32 %v4532_v27, %v13131_v56  ;;  %v4384_v41 = vadd.f32 %v12999_v2, %v13171_v44  ;;  %v10597_v35 = vld [vmem:[#allocation4 + $0x364] ss:$24 sps:$4 sm:$0x3f]   ;;  %v10603_v53 = vld [vmem:[#allocation4 + $0x338] ss:$24 sps:$4 sm:$0xff]  }
 0x67f   :  { %14068 = vst [vmem:[#allocation62_spill] sm:$0xff] %v13189_v62  ;;  %v10875_v47 = vpop.eup %10874  ;;  %10892 = vrcp.f32 %v4722_v60  ;;  %v4725_v51 = vadd.f32 1.0, %v10873_v57  ;;  %5709 = vmatprep.mubr.bf16.mxu0 %v13189_v62  ;;  %5935 = vmatprep.mubr.bf16.mxu1 %v13189_v62  ;;  %v8738_v23 = vmul.f32 -1.442695, %v4529_v37  ;;  %v4277_v57 = vadd.f32 %v13008_v34, %v13165_v22 }
 0x680   :  { %v10877_v28 = vpop.eup %10876  ;;  %10894 = vrcp.f32 %v4723_v6  ;;  %v4726_v32 = vadd.f32 1.0, %v10875_v47  ;;  %5710 = vmatmul.mubr.bf16.vlgmr.msra.gmra.mrb[152].mxu0 %v13058_v55  ;;  %5936 = vmatmul.mubr.bf16.vlgmr.msra.gmra.mrb[184].mxu1 %v13058_v55  ;;  %v8740_v27 = vmul.f32 -1.442695, %v4531_v45  ;;  %v4388_v37 = vadd.f32 %v13006_v9, %v13171_v44  ;;  %v10608_v47 = vld [vmem:[#allocation4 + $0x368] ss:$24 sps:$4 sm:$0x3f]  }
 0x681   :  { %v10879_v60 = vpop.eup %10878  ;;  %10896 = vrcp.f32 %v4725_v51  ;;  %5791 = vmatpush1.bf16.msra.mxu0 %v10591_v21  ;;  %v4860_v42 = vmul.f32 %v10877_v28, %v4273_v43  ;;  %6017 = vmatpush1.bf16.msra.mxu1 %v10600_v16  ;;  %v8741_v6 = vmul.f32 -1.442695, %v4533_v36  ;;  %v4283_v34 = vadd.f32 %v13015_v59, %v13165_v22  ;;  %v4536_v45 = vpop.f32.mrb[172].mxu1 }
 0x682   :  { %v10881_v2 = vpop.eup %10880  ;;  %10898 = vrcp.f32 %v4726_v32  ;;  %5792 = vmatprep.subr.bf16.mxu0 %v10596_v61  ;;  %6018 = vmatprep.subr.bf16.mxu1 %v10605_v1  ;;  %v4861_v55 = vmul.f32 %v10879_v60, %v4384_v41  ;;  %v4537_v16 = vadd.f32 %v4536_v45, %v13127_v40  ;;  %v4538_v51 = vpop.f32.mrb[173].mxu1  ;;  %v5660_v9 = vsel %vm2509_vm0, %v10599_v30, 0  ;;  %v10611_v30 = vld [vmem:[#allocation4 + $0x14] ss:$24 sps:$4 sm:$0xff]  }
 0x683   :  { %v10883_v62 = vpop.eup %10882  ;;  %10900 = vpow2.f32 %v8737_v17  ;;  %v4863_v21 = vmul.f32 %v10881_v2, %v4277_v57  ;;  %v4539_v1 = vadd.f32 %v4538_v51, %v13131_v56  ;;  %v4540_v41 = vpop.f32.mrb[174].mxu1  ;;  %v4287_v45 = vadd.f32 %v13022_v12, %v13165_v22 }
 0x684   :  { %v10885_v43 = vpop.eup %10884  ;;  %10902 = vpow2.f32 %v8738_v23  ;;  %v4864_v28 = vmul.f32 %v10883_v62, %v4388_v37  ;;  %v4541_v23 = vadd.f32 %v4540_v41, %v13127_v40  ;;  %v4542_v60 = vpop.f32.mrb[175].mxu1  ;;  %v5666_v62 = vsel %vm2509_vm0, %v10608_v47, 0 }
 0x685   :  { %v10887_v36 = vpop.eup %10886  ;;  %v4728_v61 = vadd.f32 1.0, %v10885_v43  ;;  %10904 = vpow2.f32 %v8740_v27  ;;  %v13212_v32 = vpack.c.bf16 %v4863_v21, %v4860_v42  ;;  %5793 = vmatpush1.bf16.msra.mxu0 %v10594_v4  ;;  %6019 = vmatpush1.bf16.msra.mxu1 %v10603_v53  ;;  %v8743_v42 = vmul.f32 -1.442695, %v4537_v16 }
 0x686   :  { %v10889_v59 = vpop.eup %10888  ;;  %v4729_v17 = vadd.f32 1.0, %v10887_v36  ;;  %10906 = vpow2.f32 %v8741_v6  ;;  %8874 = vmatprep.subr.msk.bf16.mxu0 %vm2509_vm0, %v10597_v35  ;;  %8883 = vmatprep.subr.msk.bf16.mxu1 %vm2509_vm0, %v10606_v25  ;;  %v4543_v4 = vadd.f32 %v4542_v60, %v13131_v56  ;;  %v8744_v2 = vmul.f32 -1.442695, %v4539_v1 }
 0x687   :  { %v10891_v57 = vpop.eup %10890  ;;  %10908 = vrcp.f32 %v4728_v61  ;;  %v4731_v27 = vadd.f32 1.0, %v10889_v59  ;;  %5719 = vmatprep.mubr.bf16.mxu0 %v13212_v32  ;;  %5945 = vmatprep.mubr.bf16.mxu1 %v13212_v32  ;;  %v13223_v25 = vpack.c.bf16 %v4864_v28, %v4861_v55  ;;  %v4394_v37 = vadd.f32 %v13013_v38, %v13171_v44 }
 0x688   :  { %10910 = vrcp.f32 %v4729_v17  ;;  %v4732_v53 = vadd.f32 1.0, %v10891_v57  ;;  %5720 = vmatmul.mubr.bf16.gmra.mrb[156].mxu0 %v13078_v48  ;;  %5946 = vmatmul.mubr.bf16.gmra.mrb[188].mxu1 %v13078_v48  ;;  %v8746_v6 = vmul.f32 -1.442695, %v4541_v23  ;;  %v8747_v21 = vmul.f32 -1.442695, %v4543_v4 }
 0x689   :  { %v10893_v35 = vpop.eup %10892  ;;  %10912 = vrcp.f32 %v4731_v27  ;;  %5795 = vmatpush1.bf16.msra.mxu0 %v5660_v9  ;;  %6021 = vmatpush1.bf16.msra.mxu1 %v5666_v62  ;;  %v4398_v55 = vadd.f32 %v13020_v18, %v13171_v44  ;;  %v4546_v51 = vpop.f32.mrb[176].mxu1  ;;  %v4293_v62 = vadd.f32 %v13033_v52, %v13165_v22 }
 0x68a   :  { %v10895_v47 = vpop.eup %10894  ;;  %10914 = vrcp.f32 %v4732_v53  ;;  %v4866_v43 = vmul.f32 %v10893_v35, %v4283_v34  ;;  %6129 = vmatprep.subr.bf16.mxu0 %v10611_v30  ;;  %v4547_v9 = vadd.f32 %v4546_v51, %v13127_v40  ;;  %v4548_v36 = vpop.f32.mrb[177].mxu1 }
 0x68b   :  { %v10897_v16 = vpop.eup %10896  ;;  %10916 = vpow2.f32 %v8743_v42  ;;  %v4867_v28 = vmul.f32 %v10895_v47, %v4394_v37  ;;  %v4549_v12 = vadd.f32 %v4548_v36, %v13131_v56  ;;  %v4550_v41 = vpop.f32.mrb[178].mxu1  ;;  %v4404_v37 = vadd.f32 %v13031_v33, %v13171_v44 }
 0x68c   :  { %v10899_v38 = vpop.eup %10898  ;;  %10918 = vpow2.f32 %v8744_v2  ;;  %v4869_v61 = vmul.f32 %v10897_v16, %v4287_v45  ;;  %v4551_v18 = vadd.f32 %v4550_v41, %v13127_v40  ;;  %v4552_v23 = vpop.f32.mrb[179].mxu1  ;;  %v8749_v53 = vmul.f32 -1.442695, %v4547_v9 }
 0x68d   :  { %v10901_v1 = vpop.eup %10900  ;;  %10920 = vpow2.f32 %v8746_v6  ;;  %v4870_v34 = vmul.f32 %v10899_v38, %v4398_v55  ;;  %v4553_v57 = vadd.f32 %v4552_v23, %v13131_v56  ;;  %v8750_v47 = vmul.f32 -1.442695, %v4549_v12 }
 0x68e   :  { %v10903_v59 = vpop.eup %10902  ;;  %v4734_v17 = vadd.f32 1.0, %v10901_v1  ;;  %10922 = vpow2.f32 %v8747_v21  ;;  %v13237_v27 = vpack.c.bf16 %v4869_v61, %v4866_v43  ;;  %v4297_v45 = vadd.f32 %v13040_v63, %v13165_v22 }
 0x68f   :  { %v10905_v60 = vpop.eup %10904  ;;  %v4735_v30 = vadd.f32 1.0, %v10903_v59  ;;  %v13239_v2 = vpack.c.bf16 %v4870_v34, %v4867_v28  ;;  %v8752_v21 = vmul.f32 -1.442695, %v4551_v18  ;;  %v4408_v33 = vadd.f32 %v13038_v5, %v13171_v44 }
 0x690   :  { %v10907_v42 = vpop.eup %10906  ;;  %10924 = vrcp.f32 %v4734_v17  ;;  %v4737_v4 = vadd.f32 1.0, %v10905_v60  ;;  %5729 = vmatprep.mubr.bf16.mxu0 %v13237_v27  ;;  %5955 = vmatprep.mubr.bf16.mxu1 %v13237_v27  ;;  %v8753_v55 = vmul.f32 -1.442695, %v4553_v57  ;;  %v4303_v23 = vadd.f32 %v13051_v39, %v13165_v22 }
 0x691   :  { %v10909_v35 = vpop.eup %10908  ;;  %10926 = vrcp.f32 %v4735_v30  ;;  %v4738_v6 = vadd.f32 1.0, %v10907_v42  ;;  %5730 = vmatmul.mubr.bf16.gmra.mrb[160].mxu0 %v13098_v50  ;;  %5956 = vmatmul.mubr.bf16.gmra.mrb[192].mxu1 %v13098_v50  ;;  %v4556_v51 = vpop.f32.mrb[180].mxu1 }
 0x692   :  { %v10911_v52 = vpop.eup %10910  ;;  %10928 = vrcp.f32 %v4737_v4  ;;  %v4872_v43 = vmul.f32 %v10909_v35, %v4293_v62  ;;  %v4557_v9 = vadd.f32 %v4556_v51, %v13127_v40  ;;  %v4558_v63 = vpop.f32.mrb[181].mxu1 }
 0x693   :  { %v10913_v16 = vpop.eup %10912  ;;  %10930 = vrcp.f32 %v4738_v6  ;;  %v4873_v28 = vmul.f32 %v10911_v52, %v4404_v37  ;;  %v4559_v1 = vadd.f32 %v4558_v63, %v13131_v56  ;;  %v4560_v12 = vpop.f32.mrb[182].mxu1  ;;  %v4414_v6 = vadd.f32 %v13049_v11, %v13171_v44 }
 0x694   :  { %v10915_v38 = vpop.eup %10914  ;;  %10932 = vpow2.f32 %v8749_v53  ;;  %v4875_v36 = vmul.f32 %v10913_v16, %v4297_v45  ;;  %v4561_v5 = vadd.f32 %v4560_v12, %v13127_v40  ;;  %v4562_v17 = vpop.f32.mrb[183].mxu1  ;;  %v8755_v42 = vmul.f32 -1.442695, %v4557_v9 }
 0x695   :  { %v10917_v61 = vpop.eup %10916  ;;  %10934 = vpow2.f32 %v8750_v47  ;;  %v4876_v41 = vmul.f32 %v10915_v38, %v4408_v33  ;;  %v4563_v62 = vadd.f32 %v4562_v17, %v13131_v56  ;;  %v8756_v35 = vmul.f32 -1.442695, %v4559_v1 }
 0x696   :  { %v10919_v34 = vpop.eup %10918  ;;  %v4740_v59 = vadd.f32 1.0, %v10917_v61  ;;  %10936 = vpow2.f32 %v8752_v21  ;;  %v13257_v4 = vpack.c.bf16 %v4875_v36, %v4872_v43  ;;  %v8758_v39 = vmul.f32 -1.442695, %v4561_v5 }
 0x697   :  { %v10921_v18 = vpop.eup %10920  ;;  %v4741_v60 = vadd.f32 1.0, %v10919_v34  ;;  %10938 = vpow2.f32 %v8753_v55  ;;  %v13259_v37 = vpack.c.bf16 %v4876_v41, %v4873_v28  ;;  %v4307_v47 = vadd.f32 %v13060_v0, %v13165_v22 }
 0x698   :  { %v10923_v30 = vpop.eup %10922  ;;  %10940 = vrcp.f32 %v4740_v59  ;;  %v4743_v57 = vadd.f32 1.0, %v10921_v18  ;;  %5739 = vmatprep.mubr.bf16.mxu0 %v13257_v4  ;;  %5965 = vmatprep.mubr.bf16.mxu1 %v13257_v4  ;;  %v8759_v52 = vmul.f32 -1.442695, %v4563_v62  ;;  %v4418_v11 = vadd.f32 %v13056_v26, %v13171_v44 }
 0x699   :  { %10942 = vrcp.f32 %v4741_v60  ;;  %v4744_v53 = vadd.f32 1.0, %v10923_v30  ;;  %5740 = vmatmul.mubr.bf16.gmra.mrb[164].mxu0 %v13118_v8  ;;  %5966 = vmatmul.mubr.bf16.gmra.mrb[196].mxu1 %v13118_v8  ;;  %v4313_v26 = vadd.f32 %v13071_v29, %v13165_v22  ;;  %v4424_v41 = vadd.f32 %v13069_v19, %v13171_v44 }
 0x69a   :  { %v10925_v40 = vpop.eup %10924  ;;  %10944 = vrcp.f32 %v4743_v57  ;;  %v4317_v5 = vadd.f32 %v13080_v13, %v13165_v22  ;;  %v4428_v18 = vadd.f32 %v13076_v58, %v13171_v44  ;;  %v4323_v58 = vadd.f32 %v13091_v3, %v13165_v22 }
 0x69b   :  { %v10927_v56 = vpop.eup %10926  ;;  %10946 = vrcp.f32 %v4744_v53  ;;  %v4878_v45 = vmul.f32 %v10925_v40, %v4303_v23  ;;  %v4438_v3 = vadd.f32 %v13096_v14, %v13171_v44 }
 0x69c   :  { %v10929_v21 = vpop.eup %10928  ;;  %10948 = vpow2.f32 %v8755_v42  ;;  %v4879_v43 = vmul.f32 %v10927_v56, %v4414_v6 }
 0x69d   :  { %v10931_v16 = vpop.eup %10930  ;;  %10950 = vpow2.f32 %v8756_v35  ;;  %v4881_v33 = vmul.f32 %v10929_v21, %v4307_v47  ;;  %v4327_v21 = vadd.f32 %v13100_v20, %v13165_v22 }
 0x69e   :  { %v10933_v55 = vpop.eup %10932  ;;  %10952 = vpow2.f32 %v8758_v39  ;;  %v4882_v51 = vmul.f32 %v10931_v16, %v4418_v11 }
 0x69f   :  { %v10935_v0 = vpop.eup %10934  ;;  %v4746_v28 = vadd.f32 1.0, %v10933_v55  ;;  %10954 = vpow2.f32 %v8759_v52  ;;  %v13271_v38 = vpack.c.bf16 %v4881_v33, %v4878_v45  ;;  %v4434_v52 = vadd.f32 %v13089_v49, %v13171_v44 }
 0x6a0   :  { %v10937_v9 = vpop.eup %10936  ;;  %v4747_v63 = vadd.f32 1.0, %v10935_v0  ;;  %v13273_v36 = vpack.c.bf16 %v4882_v51, %v4879_v43 }
 0x6a1   :  { %v10939_v61 = vpop.eup %10938  ;;  %10956 = vrcp.f32 %v4746_v28  ;;  %v4749_v1 = vadd.f32 1.0, %v10937_v9  ;;  %5749 = vmatprep.mubr.bf16.mxu0 %v13271_v38  ;;  %5975 = vmatprep.mubr.bf16.mxu1 %v13271_v38  ;;  %v4333_v28 = vadd.f32 %v13111_v15, %v13165_v22  ;;  %v4444_v9 = vadd.f32 %v13109_v54, %v13171_v44  ;;  %v14070_v15 = vld [vmem:[#allocation60_spill] sm:$0xff] }
 0x6a2   :  { %v10941_v12 = vpop.eup %10940  ;;  %10958 = vrcp.f32 %v4747_v63  ;;  %v4750_v34 = vadd.f32 1.0, %v10939_v61  ;;  %5750 = vmatmul.mubr.bf16.gmra.mrb[168].mxu0 %v13137_v46  ;;  %5976 = vmatmul.mubr.bf16.gmra.mrb[200].mxu1 %v13137_v46  ;;  %v14069_v63 = vld [vmem:[#allocation61_spill] sm:$0xff] }
 0x6a3   :  { %v10943_v59 = vpop.eup %10942  ;;  %10960 = vrcp.f32 %v4749_v1  ;;  %v4884_v29 = vmul.f32 %v10941_v12, %v4313_v26  ;;  %v4337_v61 = vadd.f32 %v14069_v63, %v13165_v22  ;;  %v4448_v12 = vadd.f32 %v14070_v15, %v13171_v44  ;;  %v10609_v44 = vld [vmem:[#allocation4 + $0x10] ss:$24 sps:$4 sm:$0xff]   ;;  %v10654_v63 = vld [vmem:[#allocation4 + $0x2e0] ss:$24 sps:$4 sm:$0xff]  }
 0x6a4   :  { %v10945_v17 = vpop.eup %10944  ;;  %10962 = vrcp.f32 %v4750_v34  ;;  %v4885_v23 = vmul.f32 %v10943_v59, %v4424_v41  ;;  %v14071_v22 = vmov 0   ;;  %v14073_v15 = vld [vmem:[#allocation59_spill] sm:$0xff] }
 0x6a5   :  { %v10947_v60 = vpop.eup %10946  ;;  %v4887_v19 = vmul.f32 %v10945_v17, %v4317_v5  ;;  %v10614_v17 = vld [vmem:[#allocation4 + $0x44] ss:$24 sps:$4 sm:$0xff]  }
 0x6a6   :  { %v10949_v62 = vpop.eup %10948  ;;  %v4888_v30 = vmul.f32 %v10947_v60, %v4428_v18  ;;  %v10612_v18 = vld [vmem:[#allocation4 + $0x40] ss:$24 sps:$4 sm:$0xff]   ;;  %v10615_v60 = vld [vmem:[#allocation4 + $0x70] ss:$24 sps:$4 sm:$0xff]  }
 0x6a7   :  { %v10951_v57 = vpop.eup %10950  ;;  %v4752_v42 = vadd.f32 1.0, %v10949_v62  ;;  %v13287_v53 = vpack.c.bf16 %v4887_v19, %v4884_v29  ;;  %v10620_v19 = vld [vmem:[#allocation4 + $0xa4] ss:$24 sps:$4 sm:$0xff]   ;;  %v10618_v62 = vld [vmem:[#allocation4 + $0xa0] ss:$24 sps:$4 sm:$0xff]  }
 0x6a8   :  { %v10953_v13 = vpop.eup %10952  ;;  %v4753_v35 = vadd.f32 1.0, %v10951_v57  ;;  %v13289_v40 = vpack.c.bf16 %v4888_v30, %v4885_v23  ;;  %v10617_v23 = vld [vmem:[#allocation4 + $0x74] ss:$24 sps:$4 sm:$0xff]   ;;  %v10621_v57 = vld [vmem:[#allocation4 + $0xd0] ss:$24 sps:$4 sm:$0xff]  }
 0x6a9   :  { %v10955_v6 = vpop.eup %10954  ;;  %10964 = vrcp.f32 %v4752_v42  ;;  %v4755_v39 = vadd.f32 1.0, %v10953_v13  ;;  %5759 = vmatprep.mubr.bf16.mxu0 %v13287_v53  ;;  %5985 = vmatprep.mubr.bf16.mxu1 %v13287_v53  ;;  %v10623_v30 = vld [vmem:[#allocation4 + $0xd4] ss:$24 sps:$4 sm:$0xff]   ;;  %v10626_v42 = vld [vmem:[#allocation4 + $0x104] ss:$24 sps:$4 sm:$0xff]  }
 0x6aa   :  { %10966 = vrcp.f32 %v4753_v35  ;;  %v4756_v56 = vadd.f32 1.0, %v10955_v6  ;;  %5760 = vmatmul.mubr.bf16.gmra.mrb[172].mxu0 %v13147_v24  ;;  %5986 = vmatmul.mubr.bf16.gmra.mrb[204].mxu1 %v13147_v24  ;;  %v10624_v13 = vld [vmem:[#allocation4 + $0x100] ss:$24 sps:$4 sm:$0xff]   ;;  %v10629_v35 = vld [vmem:[#allocation4 + $0x134] ss:$24 sps:$4 sm:$0xff]  }
 0x6ab   :  { %v10957_v47 = vpop.eup %10956  ;;  %10968 = vrcp.f32 %v4755_v39  ;;  %v10627_v6 = vld [vmem:[#allocation4 + $0x130] ss:$24 sps:$4 sm:$0xff]   ;;  %v10632_v39 = vld [vmem:[#allocation4 + $0x164] ss:$24 sps:$4 sm:$0xff]  }
 0x6ac   :  { %v10959_v45 = vpop.eup %10958  ;;  %10970 = vrcp.f32 %v4756_v56  ;;  %v4890_v11 = vmul.f32 %v10957_v47, %v4323_v58  ;;  %v10630_v58 = vld [vmem:[#allocation4 + $0x160] ss:$24 sps:$4 sm:$0xff]   ;;  %v10635_v56 = vld [vmem:[#allocation4 + $0x194] ss:$24 sps:$4 sm:$0xff]   ;;  %v10633_v47 = vld [vmem:[#allocation4 + $0x190] ss:$24 sps:$4 sm:$0xff]  }
 0x6ad   :  { %v10961_v43 = vpop.eup %10960  ;;  %v4891_v16 = vmul.f32 %v10959_v45, %v4434_v52  ;;  %v10638_v52 = vld [vmem:[#allocation4 + $0x1c4] ss:$24 sps:$4 sm:$0xff]   ;;  %v10636_v45 = vld [vmem:[#allocation4 + $0x1c0] ss:$24 sps:$4 sm:$0xff]  }
 0x6ae   :  { %v10963_v33 = vpop.eup %10962  ;;  %v4893_v55 = vmul.f32 %v10961_v43, %v4327_v21  ;;  %v10641_v21 = vld [vmem:[#allocation4 + $0x1f4] ss:$24 sps:$4 sm:$0xff]   ;;  %v10644_v43 = vld [vmem:[#allocation4 + $0x224] ss:$24 sps:$4 sm:$0xff]  }
 0x6af   :  { %v4894_v51 = vmul.f32 %v10963_v33, %v4438_v3  ;;  %v10642_v3 = vld [vmem:[#allocation4 + $0x220] ss:$24 sps:$4 sm:$0xff]   ;;  %v10645_v33 = vld [vmem:[#allocation4 + $0x250] ss:$24 sps:$4 sm:$0xff]  }
 0x6b0   :  { %v13303_v49 = vpack.c.bf16 %v4893_v55, %v4890_v11  ;;  %v10639_v11 = vld [vmem:[#allocation4 + $0x1f0] ss:$24 sps:$4 sm:$0xff]   ;;  %v10650_v55 = vld [vmem:[#allocation4 + $0x284] ss:$24 sps:$4 sm:$0xff]  }
 0x6b1   :  { %v13305_v0 = vpack.c.bf16 %v4894_v51, %v4891_v16  ;;  %v10647_v16 = vld [vmem:[#allocation4 + $0x254] ss:$24 sps:$4 sm:$0xff]   ;;  %v10648_v51 = vld [vmem:[#allocation4 + $0x280] ss:$24 sps:$4 sm:$0xff]  }
 0x6b2   :  { %5769 = vmatprep.mubr.bf16.mxu0 %v13303_v49  ;;  %5995 = vmatprep.mubr.bf16.mxu1 %v13303_v49 }
 0x6b3   :  { %v10965_v20 = vpop.eup %10964  ;;  %5770 = vmatmul.mubr.bf16.gmra.mrb[176].mxu0 %v13159_v10  ;;  %5996 = vmatmul.mubr.bf16.gmra.mrb[208].mxu1 %v13159_v10 }
 0x6b4   :  { %v10967_v14 = vpop.eup %10966  ;;  %v4896_v26 = vmul.f32 %v10965_v20, %v4333_v28  ;;  %v10653_v28 = vld [vmem:[#allocation4 + $0x2b4] ss:$24 sps:$4 sm:$0xff]   ;;  %v10651_v20 = vld [vmem:[#allocation4 + $0x2b0] ss:$24 sps:$4 sm:$0xff]  }
 0x6b5   :  { %v10969_v1 = vpop.eup %10968  ;;  %v4897_v41 = vmul.f32 %v10967_v14, %v4444_v9  ;;  %v10656_v9 = vld [vmem:[#allocation4 + $0x2e4] ss:$24 sps:$4 sm:$0xff]   ;;  %v14072_v14 = vld [vmem:[#allocation62_spill] sm:$0xff] }
 0x6b6   :  { %v10971_v34 = vpop.eup %10970  ;;  %v4899_v59 = vmul.f32 %v10969_v1, %v4337_v61  ;;  %v10659_v61 = vld [vmem:[#allocation4 + $0x314] ss:$24 sps:$4 sm:$0xff]   ;;  %v10662_v1 = vld [vmem:[#allocation4 + $0x344] ss:$24 sps:$4 sm:$0xff]  }
 0x6b7   :  { %v4900_v5 = vmul.f32 %v10971_v34, %v4448_v12  ;;  %v10660_v12 = vld [vmem:[#allocation4 + $0x340] ss:$24 sps:$4 sm:$0xff]   ;;  %v10665_v34 = vld [vmem:[#allocation4 + $0x370] ss:$24 sps:$4 sm:$0x3f]  }
 0x6b8   :  { %v13319_v29 = vpack.c.bf16 %v4899_v59, %v4896_v26  ;;  %v10657_v26 = vld [vmem:[#allocation4 + $0x310] ss:$24 sps:$4 sm:$0xff]   ;;  %v5672_v59 = vsel %vm2509_vm0, %v10665_v34, 0 }
 0x6b9   :  { %v13321_v54 = vpack.c.bf16 %v4900_v5, %v4897_v41  ;;  %v10663_v41 = vld [vmem:[#allocation4 + $0x374] ss:$24 sps:$4 sm:$0x3f]  }
 0x6ba   :  { %5779 = vmatprep.mubr.bf16.mxu0 %v13319_v29  ;;  %6005 = vmatprep.mubr.bf16.mxu1 %v13319_v29  ;;  %v10690_v5 = vld [vmem:[#allocation6 + $0x80] ss:$16 sps:$4 sm:$0xff]  }
 0x6bb   :  { %5780 = vmatmul.mubr.bf16.gmra.mrb[180].mxu0 %v13177_v31  ;;  %6006 = vmatmul.mubr.bf16.gmra.mrb[212].mxu1 %v13177_v31 }
 0x6bc   :  { %5822 = vmatprep.mubr.bf16.mxu0 %v14071_v22  ;;  %6048 = vmatprep.mubr.bf16.mxu1 %v14071_v22 }
 0x6c3   :  { %8875 = vmatmul.mubr.msk.bf16.vlgmr.msra.gmra.mrb[152].mxu0 %vm2484_vm1, %v13194_v7  ;;  %8884 = vmatmul.mubr.msk.bf16.vlgmr.msra.gmra.mrb[184].mxu1 %vm2484_vm1, %v13194_v7 }
 0x6c4   :  { %6130 = vmatpush1.bf16.msra.mxu0 %v10609_v44  ;;  %5832 = vmatprep.mubr.bf16.mxu0 %v14071_v22  ;;  %v10701_v44 = vld [vmem:[#allocation6 + $0xac] ss:$16 sps:$4 sm:$0xff]  }
 0x6c5   :  { %6131 = vmatprep.subr.bf16.mxu0 %v10614_v17  ;;  %6058 = vmatprep.mubr.bf16.mxu1 %v14071_v22  ;;  %v10696_v17 = vld [vmem:[#allocation6 + $0xa0] ss:$16 sps:$4 sm:$0xff]  }
 0x6c8   :  { %6132 = vmatpush1.bf16.msra.mxu0 %v10612_v18  ;;  %v10704_v18 = vld [vmem:[#allocation6 + $0xc4] ss:$16 sps:$4 sm:$0xff]  }
 0x6c9   :  { %6133 = vmatprep.subr.bf16.mxu0 %v10617_v23  ;;  %v10699_v23 = vld [vmem:[#allocation6 + $0xa8] ss:$16 sps:$4 sm:$0xff]  }
 0x6cb   :  { %8876 = vmatmul.mubr.msk.bf16.gmra.mrb[156].mxu0 %vm2484_vm1, %v13223_v25  ;;  %8885 = vmatmul.mubr.msk.bf16.gmra.mrb[188].mxu1 %vm2484_vm1, %v13223_v25 }
 0x6cc   :  { %6134 = vmatpush1.bf16.msra.mxu0 %v10615_v60  ;;  %5842 = vmatprep.mubr.bf16.mxu0 %v14071_v22  ;;  %v10707_v60 = vld [vmem:[#allocation6 + $0xcc] ss:$16 sps:$4 sm:$0xff]  }
 0x6cd   :  { %6135 = vmatprep.subr.bf16.mxu0 %v10620_v19  ;;  %6068 = vmatprep.mubr.bf16.mxu1 %v14071_v22  ;;  %v10702_v19 = vld [vmem:[#allocation6 + $0xc0] ss:$16 sps:$4 sm:$0xff]  }
 0x6d0   :  { %6136 = vmatpush1.bf16.msra.mxu0 %v10618_v62  ;;  %v13417_v62 = vld [vmem:[#allocation5] sm:$0x3f] }
 0x6d1   :  { %6137 = vmatprep.subr.bf16.mxu0 %v10623_v30  ;;  %v14074_v30 = vld [vmem:[#allocation37_spill] sm:$0xff] }
 0x6d3   :  { %8877 = vmatmul.mubr.msk.bf16.gmra.mrb[160].mxu0 %vm2484_vm1, %v13239_v2  ;;  %8886 = vmatmul.mubr.msk.bf16.gmra.mrb[192].mxu1 %vm2484_vm1, %v13239_v2 }
 0x6d4   :  { %6138 = vmatpush1.bf16.msra.mxu0 %v10621_v57  ;;  %5852 = vmatprep.mubr.bf16.mxu0 %v14071_v22  ;;  %v13421_v57 = vrot.slane %v13417_v62, %v14074_v30 }
 0x6d5   :  { %6139 = vmatprep.subr.bf16.mxu0 %v10626_v42  ;;  %6078 = vmatprep.mubr.bf16.mxu1 %v14071_v22  ;;  %v10710_v42 = vld [vmem:[#allocation6 + $0xe4] ss:$16 sps:$4 sm:$0xff]  }
 0x6d8   :  { %6140 = vmatpush1.bf16.msra.mxu0 %v10624_v13  ;;  %v10713_v13 = vld [vmem:[#allocation6 + $0xec] ss:$16 sps:$4 sm:$0xff]  }
 0x6d9   :  { %6141 = vmatprep.subr.bf16.mxu0 %v10629_v35  ;;  %v10708_v35 = vld [vmem:[#allocation6 + $0xe0] ss:$16 sps:$4 sm:$0xff]  }
 0x6db   :  { %8878 = vmatmul.mubr.msk.bf16.gmra.mrb[164].mxu0 %vm2484_vm1, %v13259_v37  ;;  %8887 = vmatmul.mubr.msk.bf16.gmra.mrb[196].mxu1 %vm2484_vm1, %v13259_v37 }
 0x6dc   :  { %6142 = vmatpush1.bf16.msra.mxu0 %v10627_v6  ;;  %5862 = vmatprep.mubr.bf16.mxu0 %v14071_v22  ;;  %v10711_v6 = vld [vmem:[#allocation6 + $0xe8] ss:$16 sps:$4 sm:$0xff]  }
 0x6dd   :  { %6143 = vmatprep.subr.bf16.mxu0 %v10632_v39  ;;  %6088 = vmatprep.mubr.bf16.mxu1 %v14071_v22 }
 0x6e0   :  { %6144 = vmatpush1.bf16.msra.mxu0 %v10630_v58 }
 0x6e1   :  { %6145 = vmatprep.subr.bf16.mxu0 %v10635_v56 }
 0x6e3   :  { %8879 = vmatmul.mubr.msk.bf16.gmra.mrb[168].mxu0 %vm2484_vm1, %v13273_v36  ;;  %8888 = vmatmul.mubr.msk.bf16.gmra.mrb[200].mxu1 %vm2484_vm1, %v13273_v36 }
 0x6e4   :  { %6146 = vmatpush1.bf16.msra.mxu0 %v10633_v47  ;;  %5872 = vmatprep.mubr.bf16.mxu0 %v14071_v22 }
 0x6e5   :  { %6147 = vmatprep.subr.bf16.mxu0 %v10638_v52  ;;  %6098 = vmatprep.mubr.bf16.mxu1 %v14071_v22 }
 0x6e8   :  { %6148 = vmatpush1.bf16.msra.mxu0 %v10636_v45 }
 0x6e9   :  { %6149 = vmatprep.subr.bf16.mxu0 %v10641_v21  ;;  %v10716_v21 = vld [vmem:[#allocation6 + $0x104] ss:$16 sps:$4 sm:$0xff]  }
 0x6eb   :  { %8880 = vmatmul.mubr.msk.bf16.gmra.mrb[172].mxu0 %vm2484_vm1, %v13289_v40  ;;  %8889 = vmatmul.mubr.msk.bf16.gmra.mrb[204].mxu1 %vm2484_vm1, %v13289_v40 }
 0x6ec   :  { %6150 = vmatpush1.bf16.msra.mxu0 %v10639_v11  ;;  %5882 = vmatprep.mubr.bf16.mxu0 %v14071_v22  ;;  %v10719_v11 = vld [vmem:[#allocation6 + $0x10c] ss:$16 sps:$4 sm:$0xff]  }
 0x6ed   :  { %6151 = vmatprep.subr.bf16.mxu0 %v10644_v43  ;;  %6108 = vmatprep.mubr.bf16.mxu1 %v14071_v22 }
 0x6f0   :  { %6152 = vmatpush1.bf16.msra.mxu0 %v10642_v3 }
 0x6f1   :  { %6153 = vmatprep.subr.bf16.mxu0 %v10647_v16  ;;  %v10714_v16 = vld [vmem:[#allocation6 + $0x100] ss:$16 sps:$4 sm:$0xff]  }
 0x6f3   :  { %8881 = vmatmul.mubr.msk.bf16.gmra.mrb[176].mxu0 %vm2484_vm1, %v13305_v0  ;;  %8890 = vmatmul.mubr.msk.bf16.gmra.mrb[208].mxu1 %vm2484_vm1, %v13305_v0 }
 0x6f4   :  { %6154 = vmatpush1.bf16.msra.mxu0 %v10645_v33  ;;  %5892 = vmatprep.mubr.bf16.mxu0 %v14071_v22  ;;  %v10717_v33 = vld [vmem:[#allocation6 + $0x108] ss:$16 sps:$4 sm:$0xff]  }
 0x6f5   :  { %6155 = vmatprep.subr.bf16.mxu0 %v10650_v55  ;;  %6118 = vmatprep.mubr.bf16.mxu1 %v14071_v22 }
 0x6f8   :  { %6156 = vmatpush1.bf16.msra.mxu0 %v10648_v51 }
 0x6f9   :  { %6157 = vmatprep.subr.bf16.mxu0 %v10653_v28 }
 0x6fb   :  { %8882 = vmatmul.mubr.msk.bf16.gmra.mrb[180].mxu0 %vm2484_vm1, %v13321_v54  ;;  %8891 = vmatmul.mubr.msk.bf16.gmra.mrb[212].mxu1 %vm2484_vm1, %v13321_v54 }
 0x6fc   :  { %6158 = vmatpush1.bf16.msra.mxu0 %v10651_v20  ;;  %6161 = vmatprep.mubr.bf16.mxu0 %v14072_v14  ;;  %v10722_v20 = vld [vmem:[#allocation6 + $0x124] ss:$16 sps:$4 sm:$0xff]   ;;  %v10720_v14 = vld [vmem:[#allocation6 + $0x120] ss:$16 sps:$4 sm:$0xff]  }
 0x6fd   :  { %6159 = vmatprep.subr.bf16.mxu0 %v10656_v9  ;;  %v10725_v9 = vld [vmem:[#allocation6 + $0x12c] ss:$16 sps:$4 sm:$0xff]  }
 0x700   :  { %6160 = vmatpush1.bf16.msra.mxu0 %v10654_v63  ;;  %v10723_v63 = vld [vmem:[#allocation6 + $0x128] ss:$16 sps:$4 sm:$0xff]  }
 0x701   :  { %6242 = vmatprep.subr.bf16.mxu0 %v10659_v61 }
 0x703   :  { %6162 = vmatmul.mubr.bf16.vlgmr.msra.gmra.mrb[184].mxu0 %v14073_v15 }
 0x704   :  { %6171 = vmatprep.mubr.bf16.mxu0 %v13212_v32  ;;  %6243 = vmatpush1.bf16.msra.mxu0 %v10657_v26  ;;  %v10675_v32 = vld [vmem:[#allocation6 + $0x28] ss:$16 sps:$4 sm:$0xff]  }
 0x705   :  { %6244 = vmatprep.subr.bf16.mxu0 %v10662_v1 }
 0x708   :  { %6245 = vmatpush1.bf16.msra.mxu0 %v10660_v12 }
 0x709   :  { %8892 = vmatprep.subr.msk.bf16.mxu0 %vm2509_vm0, %v10663_v41 }
 0x70b   :  { %6172 = vmatmul.mubr.bf16.gmra.mrb[188].mxu0 %v13078_v48  ;;  %v10666_v48 = vld [vmem:[#allocation6] ss:$16 sps:$4 sm:$0xff]  }
 0x70c   :  { %6181 = vmatprep.mubr.bf16.mxu0 %v13237_v27  ;;  %6247 = vmatpush1.bf16.msra.mxu0 %v5672_v59  ;;  %v10678_v27 = vld [vmem:[#allocation6 + $0x40] ss:$16 sps:$4 sm:$0xff]   ;;  %v10728_v59 = vld [vmem:[#allocation6 + $0x144] ss:$16 sps:$4 sm:$0xff]  }
 0x713   :  { %6182 = vmatmul.mubr.bf16.gmra.mrb[192].mxu0 %v13098_v50  ;;  %v10668_v50 = vld [vmem:[#allocation6 + $0x4] ss:$16 sps:$4 sm:$0xff]  }
 0x714   :  { %6191 = vmatprep.mubr.bf16.mxu0 %v13257_v4  ;;  %7225 = vmatprep.subr.bf16.mxu1 %v10668_v50  ;;  %v10681_v4 = vld [vmem:[#allocation6 + $0x48] ss:$16 sps:$4 sm:$0xff]  }
 0x715   :  { %7226 = vmatpush1.bf16.msra.mxu1 %v10666_v48  ;;  %v10731_v48 = vld [vmem:[#allocation6 + $0x14c] ss:$16 sps:$4 sm:$0xff]  }
 0x71b   :  { %6192 = vmatmul.mubr.bf16.gmra.mrb[196].mxu0 %v13118_v8  ;;  %v10671_v8 = vld [vmem:[#allocation6 + $0xc] ss:$16 sps:$4 sm:$0xff]  }
 0x71c   :  { %6201 = vmatprep.mubr.bf16.mxu0 %v13271_v38  ;;  %7451 = vmatprep.subr.bf16.mxu0 %v10671_v8  ;;  %v10684_v38 = vld [vmem:[#allocation6 + $0x60] ss:$16 sps:$4 sm:$0xff]  }
 0x71d   :  { %v10726_v8 = vld [vmem:[#allocation6 + $0x140] ss:$16 sps:$4 sm:$0xff]  }
 0x723   :  { %6202 = vmatmul.mubr.bf16.gmra.mrb[200].mxu0 %v13137_v46  ;;  %v10669_v46 = vld [vmem:[#allocation6 + $0x8] ss:$16 sps:$4 sm:$0xff]  }
 0x724   :  { %6211 = vmatprep.mubr.bf16.mxu0 %v13287_v53  ;;  %v10687_v53 = vld [vmem:[#allocation6 + $0x68] ss:$16 sps:$4 sm:$0xff]  }
 0x72b   :  { %6212 = vmatmul.mubr.bf16.gmra.mrb[204].mxu0 %v13147_v24  ;;  %v10674_v24 = vld [vmem:[#allocation6 + $0x24] ss:$16 sps:$4 sm:$0xff]  }
 0x72c   :  { %6221 = vmatprep.mubr.bf16.mxu0 %v13303_v49  ;;  %7227 = vmatprep.subr.bf16.mxu1 %v10674_v24  ;;  %v10695_v49 = vld [vmem:[#allocation6 + $0x8c] ss:$16 sps:$4 sm:$0xff]   ;;  %v10729_v24 = vld [vmem:[#allocation6 + $0x148] ss:$16 sps:$4 sm:$0xff]  }
 0x733   :  { %6222 = vmatmul.mubr.bf16.gmra.mrb[208].mxu0 %v13159_v10  ;;  %v10677_v10 = vld [vmem:[#allocation6 + $0x2c] ss:$16 sps:$4 sm:$0xff]  }
 0x734   :  { %6231 = vmatprep.mubr.bf16.mxu0 %v13319_v29  ;;  %v10693_v29 = vld [vmem:[#allocation6 + $0x88] ss:$16 sps:$4 sm:$0xff]  }
 0x73b   :  { %6232 = vmatmul.mubr.bf16.gmra.mrb[212].mxu0 %v13177_v31  ;;  %v10672_v31 = vld [vmem:[#allocation6 + $0x20] ss:$16 sps:$4 sm:$0xff]  }
 0x73c   :  { %6274 = vmatprep.mubr.bf16.mxu0 %v14071_v22  ;;  %7228 = vmatpush1.bf16.msra.mxu1 %v10672_v31 }
 0x743   :  { %8893 = vmatmul.mubr.msk.bf16.vlgmr.msra.gmra.mrb[184].mxu0 %vm2484_vm1, %v13194_v7  ;;  %v10680_v7 = vld [vmem:[#allocation6 + $0x44] ss:$16 sps:$4 sm:$0xff]  }
 0x744   :  { %6284 = vmatprep.mubr.bf16.mxu0 %v14071_v22  ;;  %7452 = vmatpush1.bf16.msra.mxu0 %v10669_v46 }
 0x745   :  { %7453 = vmatprep.subr.bf16.mxu0 %v10677_v10  ;;  %7229 = vmatprep.subr.bf16.mxu1 %v10680_v7 }
 0x746   :  { %7230 = vmatpush1.bf16.msra.mxu1 %v10678_v27 }
 0x748   :  { %7454 = vmatpush1.bf16.msra.mxu0 %v10675_v32  ;;  %v10734_v32 = vld [vmem:[#allocation6 + $0x164] ss:$16 sps:$4 sm:$0xff]  }
 0x74b   :  { %8894 = vmatmul.mubr.msk.bf16.gmra.mrb[188].mxu0 %vm2484_vm1, %v13223_v25  ;;  %v10683_v25 = vld [vmem:[#allocation6 + $0x4c] ss:$16 sps:$4 sm:$0xff]  }
 0x74c   :  { %6294 = vmatprep.mubr.bf16.mxu0 %v14071_v22  ;;  %7455 = vmatprep.subr.bf16.mxu0 %v10683_v25  ;;  %v10737_v25 = vld [vmem:[#allocation6 + $0x16c] ss:$16 sps:$4 sm:$0xff]  }
 0x74d   :  { %7456 = vmatpush1.bf16.msra.mxu0 %v10681_v4 }
 0x753   :  { %8895 = vmatmul.mubr.msk.bf16.gmra.mrb[192].mxu0 %vm2484_vm1, %v13239_v2  ;;  %v10686_v2 = vld [vmem:[#allocation6 + $0x64] ss:$16 sps:$4 sm:$0xff]  }
 0x754   :  { %6304 = vmatprep.mubr.bf16.mxu0 %v14071_v22  ;;  %7231 = vmatprep.subr.bf16.mxu1 %v10686_v2 }
 0x755   :  { %7232 = vmatpush1.bf16.msra.mxu1 %v10684_v38  ;;  %v10735_v38 = vld [vmem:[#allocation6 + $0x168] ss:$16 sps:$4 sm:$0xff]  }
 0x75b   :  { %8896 = vmatmul.mubr.msk.bf16.gmra.mrb[196].mxu0 %vm2484_vm1, %v13259_v37  ;;  %v10689_v37 = vld [vmem:[#allocation6 + $0x6c] ss:$16 sps:$4 sm:$0xff]  }
 0x75c   :  { %6314 = vmatprep.mubr.bf16.mxu0 %v14071_v22  ;;  %7457 = vmatprep.subr.bf16.mxu0 %v10689_v37  ;;  %v10732_v37 = vld [vmem:[#allocation6 + $0x160] ss:$16 sps:$4 sm:$0xff]  }
 0x75d   :  { %7458 = vmatpush1.bf16.msra.mxu0 %v10687_v53 }
 0x75e   :  { %7459 = vmatprep.subr.bf16.mxu0 %v10695_v49 }
 0x761   :  { %7460 = vmatpush1.bf16.msra.mxu0 %v10693_v29 }
 0x762   :  { %7461 = vmatprep.subr.bf16.mxu0 %v10701_v44 }
 0x763   :  { %8897 = vmatmul.mubr.msk.bf16.gmra.mrb[200].mxu0 %vm2484_vm1, %v13273_v36  ;;  %v10692_v36 = vld [vmem:[#allocation6 + $0x84] ss:$16 sps:$4 sm:$0xff]  }
 0x764   :  { %6324 = vmatprep.mubr.bf16.mxu0 %v14071_v22  ;;  %7233 = vmatprep.subr.bf16.mxu1 %v10692_v36 }
 0x765   :  { %7234 = vmatpush1.bf16.msra.mxu1 %v10690_v5  ;;  %7462 = vmatpush1.bf16.msra.mxu0 %v10699_v23 }
 0x766   :  { %7463 = vmatprep.subr.bf16.mxu0 %v10707_v60  ;;  %v10740_v60 = vld [vmem:[#allocation6 + $0x184] ss:$16 sps:$4 sm:$0xff]  }
 0x76b   :  { %8898 = vmatmul.mubr.msk.bf16.gmra.mrb[204].mxu0 %vm2484_vm1, %v13289_v40  ;;  %v10698_v40 = vld [vmem:[#allocation6 + $0xa4] ss:$16 sps:$4 sm:$0xff]  }
 0x76c   :  { %6334 = vmatprep.mubr.bf16.mxu0 %v14071_v22  ;;  %7235 = vmatprep.subr.bf16.mxu1 %v10698_v40 }
 0x76d   :  { %7236 = vmatpush1.bf16.msra.mxu1 %v10696_v17 }
 0x76e   :  { %7237 = vmatprep.subr.bf16.mxu1 %v10704_v18 }
 0x771   :  { %7238 = vmatpush1.bf16.msra.mxu1 %v10702_v19 }
 0x772   :  { %7239 = vmatprep.subr.bf16.mxu1 %v10710_v42  ;;  %v10738_v42 = vld [vmem:[#allocation6 + $0x180] ss:$16 sps:$4 sm:$0xff]  }
 0x773   :  { %8899 = vmatmul.mubr.msk.bf16.gmra.mrb[208].mxu0 %vm2484_vm1, %v13305_v0  ;;  %v10705_v0 = vld [vmem:[#allocation6 + $0xc8] ss:$16 sps:$4 sm:$0xff]  }
 0x774   :  { %6344 = vmatprep.mubr.bf16.mxu0 %v14071_v22  ;;  %7464 = vmatpush1.bf16.msra.mxu0 %v10705_v0 }
 0x775   :  { %7465 = vmatprep.subr.bf16.mxu0 %v10713_v13  ;;  %7240 = vmatpush1.bf16.msra.mxu1 %v10708_v35  ;;  %v10741_v13 = vld [vmem:[#allocation6 + $0x188] ss:$16 sps:$4 sm:$0xff]   ;;  %v10743_v35 = vld [vmem:[#allocation6 + $0x18c] ss:$16 sps:$4 sm:$0xff]  }
 0x776   :  { %7241 = vmatprep.subr.bf16.mxu1 %v10716_v21 }
 0x778   :  { %7466 = vmatpush1.bf16.msra.mxu0 %v10711_v6 }
 0x779   :  { %7467 = vmatprep.subr.bf16.mxu0 %v10719_v11  ;;  %7242 = vmatpush1.bf16.msra.mxu1 %v10714_v16  ;;  %v14075_v11 = vld [vmem:[#allocation38_spill] sm:$0xff] }
 0x77a   :  { %7243 = vmatprep.subr.bf16.mxu1 %v10722_v20 }
 0x77b   :  { %8900 = vmatmul.mubr.msk.bf16.gmra.mrb[212].mxu0 %vm2484_vm1, %v13321_v54 }
 0x77c   :  { %7468 = vmatpush1.bf16.msra.mxu0 %v10717_v33 }
 0x77d   :  { %7469 = vmatprep.subr.bf16.mxu0 %v10725_v9  ;;  %7244 = vmatpush1.bf16.msra.mxu1 %v10720_v14 }
 0x77e   :  { %7245 = vmatprep.subr.bf16.mxu1 %v10728_v59 }
 0x780   :  { %7470 = vmatpush1.bf16.msra.mxu0 %v10723_v63 }
 0x781   :  { %7471 = vmatprep.subr.bf16.mxu0 %v10731_v48  ;;  %7246 = vmatpush1.bf16.msra.mxu1 %v10726_v8  ;;  %v10752_v8 = vld [vmem:[#allocation6 + $0x1c4] ss:$16 sps:$4 sm:$0xff]  }
 0x782   :  { %7247 = vmatprep.subr.bf16.mxu1 %v10734_v32  ;;  %v10753_v32 = vld [vmem:[#allocation6 + $0x1c8] ss:$16 sps:$4 sm:$0xff]  }
 0x784   :  { %7472 = vmatpush1.bf16.msra.mxu0 %v10729_v24 }
 0x785   :  { %7473 = vmatprep.subr.bf16.mxu0 %v10737_v25  ;;  %7248 = vmatpush1.bf16.msra.mxu1 %v10732_v37 }
 0x786   :  { %7249 = vmatprep.subr.bf16.mxu1 %v10740_v60 }
 0x788   :  { %7474 = vmatpush1.bf16.msra.mxu0 %v10735_v38 }
 0x789   :  { %7250 = vmatpush1.bf16.msra.mxu1 %v10738_v42  ;;  %7475 = vmatprep.subr.bf16.mxu0 %v10743_v35  ;;  %v10756_v42 = vld [vmem:[#allocation6 + $0x1e0] ss:$16 sps:$4 sm:$0xff]  }
 0x78c   :  { %7476 = vmatpush1.bf16.msra.mxu0 %v10741_v13 }
 0x796   :  { %v13423_v39 = vpop.f32.mrb[152].mxu0  ;;  %v13425_v58 = vpop.f32.mrb[184].mxu1 }
 0x797   :  { %v13427_v54 = vpop.f32.mrb[153].mxu0  ;;  %v6052_v56 = vpop.f32.mrb[185].mxu1 }
 0x798   :  { %v9323_v47 = vadd.f32 %v6052_v56, %v13421_v57  ;;  %v13430_v52 = vpop.f32.mrb[154].mxu0  ;;  %v13432_v45 = vpop.f32.mrb[186].mxu1  ;;  %v10746_v56 = vld [vmem:[#allocation6 + $0x1a4] ss:$16 sps:$4 sm:$0xff]  }
 0x799   :  { %v13434_v43 = vpop.f32.mrb[155].mxu0  ;;  %v6056_v3 = vpop.f32.mrb[187].mxu1  ;;  %7251 = vmatprep.subr.bf16.mxu1 %v10746_v56 }
 0x79a   :  { %v8901_v55 = vmul.f32 -1.442695, %v9323_v47  ;;  %v9325_v51 = vadd.f32 %v6056_v3, %v13421_v57  ;;  %v10749_v47 = vld [vmem:[#allocation6 + $0x1ac] ss:$16 sps:$4 sm:$0xff]   ;;  %v13467_v3 = vrot.slane %v13417_v62, %v14075_v11 }
 0x79b   :  { %7477 = vmatprep.subr.bf16.mxu0 %v10749_v47  ;;  %v10759_v47 = vld [vmem:[#allocation6 + $0x1e8] ss:$16 sps:$4 sm:$0xff]  }
 0x79c   :  { %10972 = vpow2.f32 %v8901_v55  ;;  %v8904_v28 = vmul.f32 -1.442695, %v9325_v51  ;;  %v10744_v55 = vld [vmem:[#allocation6 + $0x1a0] ss:$16 sps:$4 sm:$0xff]   ;;  %v10747_v51 = vld [vmem:[#allocation6 + $0x1a8] ss:$16 sps:$4 sm:$0xff]   ;;  %v9290_v24 = vadd.f32 %v13423_v39, %v13467_v3  ;;  %v9292_v37 = vadd.f32 %v13430_v52, %v13467_v3 }
 0x79d   :  { %7252 = vmatpush1.bf16.msra.mxu1 %v10744_v55  ;;  %7478 = vmatpush1.bf16.msra.mxu0 %v10747_v51 }
 0x79e   :  { %10974 = vpow2.f32 %v8904_v28  ;;  %v13437_v61 = vpop.f32.mrb[156].mxu0  ;;  %v13439_v26 = vpop.f32.mrb[188].mxu1  ;;  %7253 = vmatprep.subr.bf16.mxu1 %v10752_v8 }
 0x79f   :  { %v13441_v1 = vpop.f32.mrb[157].mxu0  ;;  %v6062_v15 = vpop.f32.mrb[189].mxu1 }
 0x7a0   :  { %v9327_v12 = vadd.f32 %v6062_v15, %v13421_v57  ;;  %v13444_v41 = vpop.f32.mrb[158].mxu0  ;;  %v13446_v34 = vpop.f32.mrb[190].mxu1 }
 0x7a1   :  { %v13448_v50 = vpop.f32.mrb[159].mxu0  ;;  %v6066_v46 = vpop.f32.mrb[191].mxu1 }
 0x7a2   :  { %v8907_v10 = vmul.f32 -1.442695, %v9327_v12  ;;  %v9329_v31 = vadd.f32 %v6066_v46, %v13421_v57 }
 0x7a4   :  { %10976 = vpow2.f32 %v8907_v10  ;;  %v8910_v7 = vmul.f32 -1.442695, %v9329_v31 }
 0x7a6   :  { %v10973_v27 = vpop.eup %10972  ;;  %10978 = vpow2.f32 %v8910_v7  ;;  %v13451_v2 = vpop.f32.mrb[160].mxu0  ;;  %v10750_v7 = vld [vmem:[#allocation6 + $0x1c0] ss:$16 sps:$4 sm:$0xff]  }
 0x7a7   :  { %v13453_v4 = vpop.f32.mrb[192].mxu1  ;;  %v6499_v36 = vadd.f32 1.0, %v10973_v27  ;;  %v13455_v53 = vpop.f32.mrb[161].mxu0  ;;  %v10755_v27 = vld [vmem:[#allocation6 + $0x1cc] ss:$16 sps:$4 sm:$0xff]   ;;  %7254 = vmatpush1.bf16.msra.mxu1 %v10750_v7 }
 0x7a8   :  { %v6072_v49 = vpop.f32.mrb[193].mxu1  ;;  %v10975_v5 = vpop.eup %10974  ;;  %7479 = vmatprep.subr.bf16.mxu0 %v10755_v27 }
 0x7a9   :  { %v9331_v40 = vadd.f32 %v6072_v49, %v13421_v57  ;;  %v13458_v29 = vpop.f32.mrb[162].mxu0  ;;  %v13460_v44 = vpop.f32.mrb[194].mxu1  ;;  %10980 = vrcp.f32 %v6499_v36  ;;  %v6502_v17 = vadd.f32 1.0, %v10975_v5  ;;  %7480 = vmatpush1.bf16.msra.mxu0 %v10753_v32 }
 0x7aa   :  { %v13462_v18 = vpop.f32.mrb[163].mxu0  ;;  %v6076_v23 = vpop.f32.mrb[195].mxu1 }
 0x7ab   :  { %v8913_v19 = vmul.f32 -1.442695, %v9331_v40  ;;  %v9333_v0 = vadd.f32 %v6076_v23, %v13421_v57  ;;  %10982 = vrcp.f32 %v6502_v17  ;;  %v10758_v17 = vld [vmem:[#allocation6 + $0x1e4] ss:$16 sps:$4 sm:$0xff]   ;;  %v10761_v23 = vld [vmem:[#allocation6 + $0x1ec] ss:$16 sps:$4 sm:$0xff]  }
 0x7ac   :  { %7255 = vmatprep.subr.bf16.mxu1 %v10758_v17  ;;  %7481 = vmatprep.subr.bf16.mxu0 %v10761_v23 }
 0x7ad   :  { %10984 = vpow2.f32 %v8913_v19  ;;  %v8916_v6 = vmul.f32 -1.442695, %v9333_v0  ;;  %7256 = vmatpush1.bf16.msra.mxu1 %v10756_v42  ;;  %7482 = vmatpush1.bf16.msra.mxu0 %v10759_v47 }
 0x7ae   :  { %v10977_v21 = vpop.eup %10976  ;;  %v13469_v16 = vpop.f32.mrb[164].mxu0 }
 0x7af   :  { %10986 = vpow2.f32 %v8916_v6  ;;  %v13471_v33 = vpop.f32.mrb[196].mxu1  ;;  %v6505_v28 = vadd.f32 1.0, %v10977_v21  ;;  %v13473_v20 = vpop.f32.mrb[165].mxu0 }
 0x7b0   :  { %v6082_v9 = vpop.f32.mrb[197].mxu1  ;;  %v10979_v14 = vpop.eup %10978 }
 0x7b1   :  { %v9335_v63 = vadd.f32 %v6082_v9, %v13421_v57  ;;  %v13476_v15 = vpop.f32.mrb[166].mxu0  ;;  %v13478_v12 = vpop.f32.mrb[198].mxu1  ;;  %10988 = vrcp.f32 %v6505_v28  ;;  %v6508_v59 = vadd.f32 1.0, %v10979_v14  ;;  %v9294_v9 = vadd.f32 %v13437_v61, %v13467_v3 }
 0x7b2   :  { %v13480_v48 = vpop.f32.mrb[167].mxu0  ;;  %v6086_v46 = vpop.f32.mrb[199].mxu1 }
 0x7b3   :  { %v8919_v10 = vmul.f32 -1.442695, %v9335_v63  ;;  %v9337_v31 = vadd.f32 %v6086_v46, %v13421_v57  ;;  %v10981_v25 = vpop.eup %10980  ;;  %10990 = vrcp.f32 %v6508_v59  ;;  %v9296_v46 = vadd.f32 %v13444_v41, %v13467_v3 }
 0x7b4   :  { %v6643_v36 = vmul.f32 %v10981_v25, %v9290_v24 }
 0x7b5   :  { %10992 = vpow2.f32 %v8919_v10  ;;  %v8922_v38 = vmul.f32 -1.442695, %v9337_v31  ;;  %v10983_v49 = vpop.eup %10982 }
 0x7b6   :  { %v13487_v5 = vpop.f32.mrb[168].mxu0  ;;  %v13489_v40 = vpop.f32.mrb[200].mxu1  ;;  %v6646_v60 = vmul.f32 %v10983_v49, %v9292_v37 }
 0x7b7   :  { %v10985_v39 = vpop.eup %10984  ;;  %10994 = vpow2.f32 %v8922_v38  ;;  %v13491_v0 = vpop.f32.mrb[169].mxu0 }
 0x7b8   :  { %v6511_v19 = vadd.f32 1.0, %v10985_v39  ;;  %v6092_v52 = vpop.f32.mrb[201].mxu1  ;;  %v13494_v6 = vpop.f32.mrb[170].mxu0  ;;  %v13498_v21 = vpack.c.bf16 %v6646_v60, %v6643_v36 }
 0x7b9   :  { %v10987_v13 = vpop.eup %10986  ;;  %v9339_v35 = vadd.f32 %v6092_v52, %v13421_v57  ;;  %v13496_v56 = vpop.f32.mrb[202].mxu1 }
 0x7ba   :  { %10996 = vrcp.f32 %v6511_v19  ;;  %v6514_v55 = vadd.f32 1.0, %v10987_v13  ;;  %v13500_v51 = vpop.f32.mrb[171].mxu0  ;;  %v6096_v28 = vpop.f32.mrb[203].mxu1  ;;  %v9298_v19 = vadd.f32 %v13451_v2, %v13467_v3 }
 0x7bb   :  { %v8925_v14 = vmul.f32 -1.442695, %v9339_v35  ;;  %v9341_v63 = vadd.f32 %v6096_v28, %v13421_v57  ;;  %v10989_v59 = vpop.eup %10988  ;;  %v9300_v35 = vadd.f32 %v13458_v29, %v13467_v3 }
 0x7bc   :  { %10998 = vrcp.f32 %v6514_v55  ;;  %v6649_v24 = vmul.f32 %v10989_v59, %v9294_v9 }
 0x7bd   :  { %11000 = vpow2.f32 %v8925_v14  ;;  %v8928_v8 = vmul.f32 -1.442695, %v9341_v63  ;;  %v10991_v10 = vpop.eup %10990 }
 0x7be   :  { %v13507_v7 = vpop.f32.mrb[172].mxu0  ;;  %v13509_v32 = vpop.f32.mrb[204].mxu1  ;;  %v6652_v61 = vmul.f32 %v10991_v10, %v9296_v46 }
 0x7bf   :  { %v10993_v31 = vpop.eup %10992  ;;  %11002 = vpow2.f32 %v8928_v8  ;;  %v13511_v27 = vpop.f32.mrb[173].mxu0 }
 0x7c0   :  { %v6517_v25 = vadd.f32 1.0, %v10993_v31  ;;  %v6102_v37 = vpop.f32.mrb[205].mxu1  ;;  %v13514_v49 = vpop.f32.mrb[174].mxu0  ;;  %v13518_v39 = vpack.c.bf16 %v6652_v61, %v6649_v24 }
 0x7c1   :  { %v10995_v38 = vpop.eup %10994  ;;  %v9343_v36 = vadd.f32 %v6102_v37, %v13421_v57  ;;  %v13516_v41 = vpop.f32.mrb[206].mxu1 }
 0x7c2   :  { %11004 = vrcp.f32 %v6517_v25  ;;  %v6520_v17 = vadd.f32 1.0, %v10995_v38  ;;  %v13520_v23 = vpop.f32.mrb[175].mxu0  ;;  %v6106_v60 = vpop.f32.mrb[207].mxu1 }
 0x7c3   :  { %v8931_v52 = vmul.f32 -1.442695, %v9343_v36  ;;  %v9345_v42 = vadd.f32 %v6106_v60, %v13421_v57  ;;  %v9302_v36 = vadd.f32 %v13469_v16, %v13467_v3 }
 0x7c4   :  { %v10997_v13 = vpop.eup %10996  ;;  %11006 = vrcp.f32 %v6520_v17 }
 0x7c5   :  { %11008 = vpow2.f32 %v8931_v52  ;;  %v8934_v47 = vmul.f32 -1.442695, %v9345_v42  ;;  %v6655_v55 = vmul.f32 %v10997_v13, %v9298_v19  ;;  %v9304_v52 = vadd.f32 %v13476_v15, %v13467_v3 }
 0x7c6   :  { %v10999_v28 = vpop.eup %10998  ;;  %v13527_v14 = vpop.f32.mrb[176].mxu0 }
 0x7c7   :  { %v11001_v9 = vpop.eup %11000  ;;  %11010 = vpow2.f32 %v8934_v47  ;;  %v13529_v63 = vpop.f32.mrb[208].mxu1  ;;  %v6658_v59 = vmul.f32 %v10999_v28, %v9300_v35  ;;  %v10764_v47 = vld [vmem:[#allocation6 + $0x204] ss:$16 sps:$4 sm:$0xff]  }
 0x7c8   :  { %v6523_v2 = vadd.f32 1.0, %v11001_v9  ;;  %v13531_v46 = vpop.f32.mrb[177].mxu0  ;;  %v6112_v8 = vpop.f32.mrb[209].mxu1  ;;  %7338 = vmatprep.subr.bf16.mxu1 %v10764_v47  ;;  %v9308_v47 = vadd.f32 %v13494_v6, %v13467_v3  ;;  %v9312_v6 = vadd.f32 %v13514_v49, %v13467_v3 }
 0x7c9   :  { %v11003_v24 = vpop.eup %11002  ;;  %v9347_v10 = vadd.f32 %v6112_v8, %v13421_v57  ;;  %v13534_v31 = vpop.f32.mrb[178].mxu0  ;;  %v13538_v61 = vpack.c.bf16 %v6658_v59, %v6655_v55 }
 0x7ca   :  { %v13536_v29 = vpop.f32.mrb[210].mxu1  ;;  %11012 = vrcp.f32 %v6523_v2  ;;  %v6526_v25 = vadd.f32 1.0, %v11003_v24  ;;  %v13540_v37 = vpop.f32.mrb[179].mxu0 }
 0x7cb   :  { %v6116_v38 = vpop.f32.mrb[211].mxu1  ;;  %v8937_v17 = vmul.f32 -1.442695, %v9347_v10 }
 0x7cc   :  { %v9349_v60 = vadd.f32 %v6116_v38, %v13421_v57  ;;  %v11005_v19 = vpop.eup %11004  ;;  %11014 = vrcp.f32 %v6526_v25 }
 0x7cd   :  { %11016 = vpow2.f32 %v8937_v17  ;;  %v6661_v13 = vmul.f32 %v11005_v19, %v9302_v36  ;;  %v9306_v19 = vadd.f32 %v13487_v5, %v13467_v3 }
 0x7ce   :  { %v8940_v42 = vmul.f32 -1.442695, %v9349_v60  ;;  %v11007_v35 = vpop.eup %11006  ;;  %v5894_v28 = vpop.f32.mrb[180].mxu0 }
 0x7cf   :  { %v11009_v55 = vpop.eup %11008  ;;  %v13547_v9 = vpop.f32.mrb[212].mxu1  ;;  %v6664_v59 = vmul.f32 %v11007_v35, %v9304_v52 }
 0x7d0   :  { %11018 = vpow2.f32 %v8940_v42  ;;  %v6529_v16 = vadd.f32 1.0, %v11009_v55  ;;  %v13549_v2 = vpop.f32.mrb[181].mxu0  ;;  %v6122_v8 = vpop.f32.mrb[213].mxu1 }
 0x7d1   :  { %v11011_v24 = vpop.eup %11010  ;;  %v9351_v10 = vadd.f32 %v6122_v8, %v13421_v57  ;;  %v5898_v15 = vpop.f32.mrb[182].mxu0  ;;  %v13554_v38 = vpack.c.bf16 %v6664_v59, %v6661_v13 }
 0x7d2   :  { %v13552_v25 = vpop.f32.mrb[214].mxu1  ;;  %11020 = vrcp.f32 %v6529_v16  ;;  %v6532_v36 = vadd.f32 1.0, %v11011_v24  ;;  %v13556_v17 = vpop.f32.mrb[183].mxu0 }
 0x7d3   :  { %v6126_v60 = vpop.f32.mrb[215].mxu1  ;;  %v8943_v52 = vmul.f32 -1.442695, %v9351_v10 }
 0x7d4   :  { %v9353_v42 = vadd.f32 %v6126_v60, %v13421_v57  ;;  %v11013_v35 = vpop.eup %11012  ;;  %11022 = vrcp.f32 %v6532_v36  ;;  %v9310_v57 = vadd.f32 %v13507_v7, %v13467_v3  ;;  %v9316_v7 = vadd.f32 %v13534_v31, %v13467_v3 }
 0x7d5   :  { %11024 = vpow2.f32 %v8943_v52  ;;  %v6667_v13 = vmul.f32 %v11013_v35, %v9306_v19 }
 0x7d6   :  { %v8946_v55 = vmul.f32 -1.442695, %v9353_v42  ;;  %v11015_v59 = vpop.eup %11014 }
 0x7d7   :  { %v11017_v16 = vpop.eup %11016  ;;  %v6670_v8 = vmul.f32 %v11015_v59, %v9308_v47 }
 0x7d8   :  { %11026 = vpow2.f32 %v8946_v55  ;;  %v6535_v24 = vadd.f32 1.0, %v11017_v16  ;;  %v10770_v16 = vld [vmem:[#allocation6 + $0x20c] ss:$16 sps:$4 sm:$0xff]  }
 0x7d9   :  { %v13563_v11 = vpack.c.bf16 %v6670_v8, %v6667_v13  ;;  %7564 = vmatprep.subr.bf16.mxu0 %v10770_v16 }
 0x7da   :  { %v11019_v30 = vpop.eup %11018  ;;  %11028 = vrcp.f32 %v6535_v24 }
 0x7db   :  { %v6538_v5 = vadd.f32 1.0, %v11019_v30  ;;  %v9314_v30 = vadd.f32 %v13527_v14, %v13467_v3 }
 0x7dc   :  { %v11021_v10 = vpop.eup %11020 }
 0x7dd   :  { %11030 = vrcp.f32 %v6538_v5  ;;  %v6673_v36 = vmul.f32 %v11021_v10, %v9310_v57  ;;  %v9318_v5 = vadd.f32 %v5894_v28, %v13467_v3  ;;  %v9320_v10 = vadd.f32 %v5898_v15, %v13467_v3 }
 0x7de   :  { %v11023_v60 = vpop.eup %11022 }
 0x7df   :  { %v11025_v19 = vpop.eup %11024  ;;  %v6676_v52 = vmul.f32 %v11023_v60, %v9312_v6 }
 0x7e0   :  { %v6541_v42 = vadd.f32 1.0, %v11025_v19  ;;  %v14077_v19 = vld [vmem:[#allocation40_spill] sm:$0xff] }
 0x7e1   :  { %v13569_v47 = vpack.c.bf16 %v6676_v52, %v6673_v36  ;;  %v13583_v31 = vrot.slane %v13417_v62, %v14077_v19  ;;  %v14078_v52 = vld [vmem:[#allocation41_spill] sm:$0xff] }
 0x7e2   :  { %v11027_v35 = vpop.eup %11026  ;;  %11032 = vrcp.f32 %v6541_v42  ;;  %v13587_v42 = vrot.slane %v13417_v62, %v14078_v52 }
 0x7e3   :  { %v6544_v55 = vadd.f32 1.0, %v11027_v35 }
 0x7e4   :  { %v11029_v13 = vpop.eup %11028 }
 0x7e5   :  { %11034 = vrcp.f32 %v6544_v55  ;;  %v6679_v59 = vmul.f32 %v11029_v13, %v9314_v30 }
 0x7e7   :  { %v11031_v49 = vpop.eup %11030 }
 0x7e8   :  { %v6682_v8 = vmul.f32 %v11031_v49, %v9316_v7 }
 0x7ea   :  { %v13575_v24 = vpack.c.bf16 %v6682_v8, %v6679_v59 }
 0x7ec   :  { %v11033_v57 = vpop.eup %11032 }
 0x7ed   :  { %v6685_v6 = vmul.f32 %v11033_v57, %v9318_v5 }
 0x7ef   :  { %v11035_v36 = vpop.eup %11034 }
 0x7f0   :  { %v6688_v14 = vmul.f32 %v11035_v36, %v9320_v10 }
 0x7f2   :  { %v13579_v60 = vpack.c.bf16 %v6688_v14, %v6685_v6 }
 0x7f4   :  { %14076 = vst [vmem:[#allocation61_spill] sm:$0xff] %v13579_v60 }
 0x816   :  { %v6276_v35 = vpop.f32.mrb[184].mxu0 }
 0x817   :  { %v9354_v55 = vadd.f32 %v6276_v35, %v13583_v31  ;;  %v6278_v28 = vpop.f32.mrb[185].mxu0 }
 0x818   :  { %v9355_v30 = vadd.f32 %v6278_v28, %v13587_v42  ;;  %v6280_v3 = vpop.f32.mrb[186].mxu0 }
 0x819   :  { %v8902_v15 = vmul.f32 -1.442695, %v9354_v55  ;;  %v9356_v13 = vadd.f32 %v6280_v3, %v13583_v31  ;;  %v6282_v7 = vpop.f32.mrb[187].mxu0 }
 0x81a   :  { %v8903_v59 = vmul.f32 -1.442695, %v9355_v30  ;;  %v9357_v49 = vadd.f32 %v6282_v7, %v13587_v42 }
 0x81b   :  { %11036 = vpow2.f32 %v8902_v15  ;;  %v8905_v16 = vmul.f32 -1.442695, %v9356_v13 }
 0x81c   :  { %11038 = vpow2.f32 %v8903_v59  ;;  %v8906_v8 = vmul.f32 -1.442695, %v9357_v49 }
 0x81d   :  { %11040 = vpow2.f32 %v8905_v16 }
 0x81e   :  { %11042 = vpow2.f32 %v8906_v8  ;;  %v6286_v5 = vpop.f32.mrb[188].mxu0 }
 0x81f   :  { %v9358_v57 = vadd.f32 %v6286_v5, %v13583_v31  ;;  %v6288_v10 = vpop.f32.mrb[189].mxu0 }
 0x820   :  { %v9359_v6 = vadd.f32 %v6288_v10, %v13587_v42  ;;  %v6290_v36 = vpop.f32.mrb[190].mxu0 }
 0x821   :  { %v8908_v14 = vmul.f32 -1.442695, %v9358_v57  ;;  %v9360_v19 = vadd.f32 %v6290_v36, %v13583_v31  ;;  %v6292_v52 = vpop.f32.mrb[191].mxu0 }
 0x822   :  { %v8909_v35 = vmul.f32 -1.442695, %v9359_v6  ;;  %v9361_v55 = vadd.f32 %v6292_v52, %v13587_v42 }
 0x823   :  { %11044 = vpow2.f32 %v8908_v14  ;;  %v8911_v28 = vmul.f32 -1.442695, %v9360_v19 }
 0x824   :  { %11046 = vpow2.f32 %v8909_v35  ;;  %v8912_v30 = vmul.f32 -1.442695, %v9361_v55 }
 0x825   :  { %v11037_v3 = vpop.eup %11036  ;;  %11048 = vpow2.f32 %v8911_v28 }
 0x826   :  { %v11039_v15 = vpop.eup %11038  ;;  %v6500_v13 = vadd.f32 1.0, %v11037_v3  ;;  %11050 = vpow2.f32 %v8912_v30  ;;  %v6296_v7 = vpop.f32.mrb[192].mxu0  ;;  %v14079_v30 = vld [vmem:[#allocation45_spill] sm:$0xff] }
 0x827   :  { %v11041_v59 = vpop.eup %11040  ;;  %v6501_v49 = vadd.f32 1.0, %v11039_v15  ;;  %v9362_v16 = vadd.f32 %v6296_v7, %v13583_v31  ;;  %v6298_v8 = vpop.f32.mrb[193].mxu0  ;;  %v13603_v3 = vrot.slane %v13417_v62, %v14079_v30 }
 0x828   :  { %v11043_v5 = vpop.eup %11042  ;;  %11052 = vrcp.f32 %v6500_v13  ;;  %v6503_v57 = vadd.f32 1.0, %v11041_v59  ;;  %v9363_v10 = vadd.f32 %v6298_v8, %v13587_v42  ;;  %v6300_v6 = vpop.f32.mrb[194].mxu0  ;;  %v14080_v59 = vld [vmem:[#allocation44_spill] sm:$0xff] }
 0x829   :  { %11054 = vrcp.f32 %v6501_v49  ;;  %v6504_v36 = vadd.f32 1.0, %v11043_v5  ;;  %v8914_v14 = vmul.f32 -1.442695, %v9362_v16  ;;  %v9364_v19 = vadd.f32 %v6300_v6, %v13583_v31  ;;  %v6302_v52 = vpop.f32.mrb[195].mxu0 }
 0x82a   :  { %11056 = vrcp.f32 %v6503_v57  ;;  %v8915_v35 = vmul.f32 -1.442695, %v9363_v10  ;;  %v9365_v55 = vadd.f32 %v6302_v52, %v13587_v42  ;;  %v13607_v49 = vrot.slane %v13417_v62, %v14080_v59 }
 0x82b   :  { %11058 = vrcp.f32 %v6504_v36  ;;  %v8917_v28 = vmul.f32 -1.442695, %v9364_v19 }
 0x82c   :  { %11060 = vpow2.f32 %v8914_v14  ;;  %v8918_v15 = vmul.f32 -1.442695, %v9365_v55  ;;  %v9291_v14 = vadd.f32 %v13427_v54, %v13603_v3 }
 0x82d   :  { %v11045_v13 = vpop.eup %11044  ;;  %11062 = vpow2.f32 %v8915_v35 }
 0x82e   :  { %v11047_v7 = vpop.eup %11046  ;;  %v6506_v16 = vadd.f32 1.0, %v11045_v13  ;;  %11064 = vpow2.f32 %v8917_v28  ;;  %v6306_v8 = vpop.f32.mrb[196].mxu0 }
 0x82f   :  { %v11049_v5 = vpop.eup %11048  ;;  %v6507_v57 = vadd.f32 1.0, %v11047_v7  ;;  %11066 = vpow2.f32 %v8918_v15  ;;  %v9366_v10 = vadd.f32 %v6306_v8, %v13583_v31  ;;  %v6308_v6 = vpop.f32.mrb[197].mxu0  ;;  %v9322_v15 = vadd.f32 %v13425_v58, %v13607_v49 }
 0x830   :  { %v11051_v36 = vpop.eup %11050  ;;  %11068 = vrcp.f32 %v6506_v16  ;;  %v6509_v19 = vadd.f32 1.0, %v11049_v5  ;;  %v9367_v52 = vadd.f32 %v6308_v6, %v13587_v42  ;;  %v6310_v35 = vpop.f32.mrb[198].mxu0  ;;  %v9293_v16 = vadd.f32 %v13434_v43, %v13603_v3 }
 0x831   :  { %11070 = vrcp.f32 %v6507_v57  ;;  %v6510_v62 = vadd.f32 1.0, %v11051_v36  ;;  %v8920_v55 = vmul.f32 -1.442695, %v9366_v10  ;;  %v9368_v28 = vadd.f32 %v6310_v35, %v13583_v31  ;;  %v6312_v13 = vpop.f32.mrb[199].mxu0 }
 0x832   :  { %v11053_v7 = vpop.eup %11052  ;;  %11072 = vrcp.f32 %v6509_v19  ;;  %v8921_v8 = vmul.f32 -1.442695, %v9367_v52  ;;  %v9369_v30 = vadd.f32 %v6312_v13, %v13587_v42  ;;  %v9324_v10 = vadd.f32 %v13432_v45, %v13607_v49 }
 0x833   :  { %v11055_v54 = vpop.eup %11054  ;;  %11074 = vrcp.f32 %v6510_v62  ;;  %v8923_v5 = vmul.f32 -1.442695, %v9368_v28  ;;  %v6644_v57 = vmul.f32 %v11053_v7, %v9291_v14  ;;  %v9326_v52 = vadd.f32 %v13439_v26, %v13607_v49 }
 0x834   :  { %v11057_v6 = vpop.eup %11056  ;;  %11076 = vpow2.f32 %v8920_v55  ;;  %v8924_v36 = vmul.f32 -1.442695, %v9369_v30  ;;  %v6645_v35 = vmul.f32 %v11055_v54, %v9322_v15  ;;  %v10762_v55 = vld [vmem:[#allocation6 + $0x200] ss:$16 sps:$4 sm:$0xff]   ;;  %v10768_v30 = vld [vmem:[#allocation6 + $0x208] ss:$16 sps:$4 sm:$0xff]  }
 0x835   :  { %v11059_v59 = vpop.eup %11058  ;;  %11078 = vpow2.f32 %v8921_v8  ;;  %v6647_v58 = vmul.f32 %v11057_v6, %v9293_v16  ;;  %v9295_v8 = vadd.f32 %v13441_v1, %v13603_v3  ;;  %v10773_v6 = vld [vmem:[#allocation6 + $0x240] ss:$16 sps:$4 sm:$0x3f]  }
 0x836   :  { %v11061_v19 = vpop.eup %11060  ;;  %11080 = vpow2.f32 %v8923_v5  ;;  %v6316_v13 = vpop.f32.mrb[200].mxu0  ;;  %v6648_v43 = vmul.f32 %v11059_v59, %v9324_v10  ;;  %v10767_v5 = vld [vmem:[#allocation6 + $0x224] ss:$16 sps:$4 sm:$0xff]   ;;  %v10776_v59 = vld [vmem:[#allocation6 + $0x22c] ss:$16 sps:$4 sm:$0xff]  }
 0x837   :  { %v11063_v62 = vpop.eup %11062  ;;  %v6512_v28 = vadd.f32 1.0, %v11061_v19  ;;  %11082 = vpow2.f32 %v8924_v36  ;;  %v9370_v14 = vadd.f32 %v6316_v13, %v13583_v31  ;;  %v6318_v7 = vpop.f32.mrb[201].mxu0  ;;  %v6692_v45 = vpack.c.bf16 %v6647_v58, %v6644_v57 }
 0x838   :  { %v11065_v15 = vpop.eup %11064  ;;  %v6513_v54 = vadd.f32 1.0, %v11063_v62  ;;  %v9371_v16 = vadd.f32 %v6318_v7, %v13587_v42  ;;  %v6320_v26 = vpop.f32.mrb[202].mxu0  ;;  %v13627_v10 = vpack.c.bf16 %v6648_v43, %v6645_v35  ;;  %v10771_v35 = vld [vmem:[#allocation6 + $0x244] ss:$16 sps:$4 sm:$0x3f]  }
 0x839   :  { %v11067_v36 = vpop.eup %11066  ;;  %11084 = vrcp.f32 %v6512_v28  ;;  %v6515_v19 = vadd.f32 1.0, %v11065_v15  ;;  %v8926_v13 = vmul.f32 -1.442695, %v9370_v14  ;;  %v9372_v57 = vadd.f32 %v6320_v26, %v13583_v31  ;;  %v6322_v58 = vpop.f32.mrb[203].mxu0  ;;  %7257 = vmatprep.mubr.bf16.mxu1 %v6692_v45  ;;  %7483 = vmatprep.mubr.bf16.mxu0 %v6692_v45  ;;  %v10765_v26 = vld [vmem:[#allocation6 + $0x220] ss:$16 sps:$4 sm:$0xff]  }
 0x83a   :  { %14081 = vst [vmem:[#allocation60_spill] sm:$0xff] %v13627_v10  ;;  %v11069_v22 = vpop.eup %11068  ;;  %11086 = vrcp.f32 %v6513_v54  ;;  %v6516_v1 = vadd.f32 1.0, %v11067_v36  ;;  %v8927_v62 = vmul.f32 -1.442695, %v9371_v16  ;;  %v9373_v7 = vadd.f32 %v6322_v58, %v13587_v42  ;;  %7258 = vmatmul.mubr.bf16.vlgmr.msra.gmra.mrb[216].mxu1 %v13498_v21  ;;  %7484 = vmatmul.mubr.bf16.vlgmr.msra.gmra.mrb[216].mxu0 %v13498_v21  ;;  %v10774_v54 = vld [vmem:[#allocation6 + $0x228] ss:$16 sps:$4 sm:$0xff]  }
 0x83b   :  { %v10779_v43 = vld [vmem:[#allocation6 + $0x248] ss:$16 sps:$4 sm:$0x3f]   ;;  %v11071_v28 = vpop.eup %11070  ;;  %v9297_v14 = vadd.f32 %v13448_v50, %v13603_v3  ;;  %11088 = vrcp.f32 %v6515_v19  ;;  %v8929_v15 = vmul.f32 -1.442695, %v9372_v57  ;;  %7339 = vmatpush1.bf16.msra.mxu1 %v10762_v55  ;;  %v6650_v45 = vmul.f32 %v11069_v22, %v9295_v8  ;;  %7565 = vmatpush1.bf16.msra.mxu0 %v10768_v30 }
 0x83c   :  { %v11073_v16 = vpop.eup %11072  ;;  %v9328_v36 = vadd.f32 %v13446_v34, %v13607_v49  ;;  %11090 = vrcp.f32 %v6516_v1  ;;  %v8930_v58 = vmul.f32 -1.442695, %v9373_v7  ;;  %7340 = vmatprep.subr.bf16.mxu1 %v10767_v5  ;;  %7566 = vmatprep.subr.bf16.mxu0 %v10776_v59  ;;  %v10777_v21 = vld [vmem:[#allocation6 + $0x24c] ss:$16 sps:$4 sm:$0x3f]   ;;  %v6651_v10 = vmul.f32 %v11071_v28, %v9326_v52 }
 0x83d   :  { %v11075_v60 = vpop.eup %11074  ;;  %v9299_v50 = vadd.f32 %v13455_v53, %v13603_v3  ;;  %11092 = vpow2.f32 %v8926_v13  ;;  %v6653_v55 = vmul.f32 %v11073_v16, %v9297_v14  ;;  %v7214_v8 = vsel %vm2509_vm0, %v10773_v6, 0 }
 0x83e   :  { %v11077_v22 = vpop.eup %11076  ;;  %11094 = vpow2.f32 %v8927_v62  ;;  %v6326_v30 = vpop.f32.mrb[204].mxu0  ;;  %v7220_v19 = vsel %vm2509_vm0, %v10779_v43, 0  ;;  %v6654_v34 = vmul.f32 %v11075_v60, %v9328_v36 }
 0x83f   :  { %v11079_v57 = vpop.eup %11078  ;;  %v6518_v1 = vadd.f32 1.0, %v11077_v22  ;;  %11096 = vpow2.f32 %v8929_v15  ;;  %v9374_v5 = vadd.f32 %v6326_v30, %v13583_v31  ;;  %v6328_v52 = vpop.f32.mrb[205].mxu0  ;;  %v6695_v59 = vpack.c.bf16 %v6653_v55, %v6650_v45  ;;  %7341 = vmatpush1.bf16.msra.mxu1 %v10765_v26  ;;  %7567 = vmatpush1.bf16.msra.mxu0 %v10774_v54 }
 0x840   :  { %v11081_v53 = vpop.eup %11080  ;;  %v6519_v13 = vadd.f32 1.0, %v11079_v57  ;;  %11098 = vpow2.f32 %v8930_v58  ;;  %v9375_v62 = vadd.f32 %v6328_v52, %v13587_v42  ;;  %v6330_v7 = vpop.f32.mrb[206].mxu0  ;;  %9025 = vmatprep.subr.msk.bf16.mxu1 %vm2509_vm0, %v10771_v35  ;;  %9034 = vmatprep.subr.msk.bf16.mxu0 %vm2509_vm0, %v10777_v21  ;;  %v13645_v60 = vpack.c.bf16 %v6654_v34, %v6651_v10 }
 0x841   :  { %v11083_v6 = vpop.eup %11082  ;;  %11100 = vrcp.f32 %v6518_v1  ;;  %v6521_v43 = vadd.f32 1.0, %v11081_v53  ;;  %v8932_v28 = vmul.f32 -1.442695, %v9374_v5  ;;  %v9376_v14 = vadd.f32 %v6330_v7, %v13583_v31  ;;  %v6332_v15 = vpop.f32.mrb[207].mxu0  ;;  %7267 = vmatprep.mubr.bf16.mxu1 %v6695_v59  ;;  %7493 = vmatprep.mubr.bf16.mxu0 %v6695_v59 }
 0x842   :  { %11102 = vrcp.f32 %v6519_v13  ;;  %v6522_v45 = vadd.f32 1.0, %v11083_v6  ;;  %v8933_v26 = vmul.f32 -1.442695, %v9375_v62  ;;  %v9377_v54 = vadd.f32 %v6332_v15, %v13587_v42  ;;  %7268 = vmatmul.mubr.bf16.gmra.mrb[220].mxu1 %v13518_v39  ;;  %7494 = vmatmul.mubr.bf16.gmra.mrb[220].mxu0 %v13518_v39 }
 0x843   :  { %v11085_v10 = vpop.eup %11084  ;;  %v9330_v35 = vadd.f32 %v13453_v4, %v13607_v49  ;;  %11104 = vrcp.f32 %v6521_v43  ;;  %v8935_v16 = vmul.f32 -1.442695, %v9376_v14  ;;  %7343 = vmatpush1.bf16.msra.mxu1 %v7214_v8  ;;  %7569 = vmatpush1.bf16.msra.mxu0 %v7220_v19  ;;  %v9301_v58 = vadd.f32 %v13462_v18, %v13603_v3 }
 0x844   :  { %v11087_v36 = vpop.eup %11086  ;;  %11106 = vrcp.f32 %v6522_v45  ;;  %v8936_v21 = vmul.f32 -1.442695, %v9377_v54  ;;  %v6656_v55 = vmul.f32 %v11085_v10, %v9299_v50  ;;  %v9332_v30 = vadd.f32 %v13460_v44, %v13607_v49 }
 0x845   :  { %v11089_v22 = vpop.eup %11088  ;;  %11108 = vpow2.f32 %v8932_v28  ;;  %v6657_v39 = vmul.f32 %v11087_v36, %v9330_v35  ;;  %v9303_v13 = vadd.f32 %v13473_v20, %v13603_v3  ;;  %v9334_v54 = vadd.f32 %v13471_v33, %v13607_v49 }
 0x846   :  { %v11091_v34 = vpop.eup %11090  ;;  %11110 = vpow2.f32 %v8933_v26  ;;  %v6336_v4 = vpop.f32.mrb[208].mxu0  ;;  %v6659_v57 = vmul.f32 %v11089_v22, %v9301_v58 }
 0x847   :  { %v11093_v1 = vpop.eup %11092  ;;  %11112 = vpow2.f32 %v8935_v16  ;;  %v9378_v8 = vadd.f32 %v6336_v4, %v13583_v31  ;;  %v6338_v19 = vpop.f32.mrb[209].mxu0  ;;  %v6660_v5 = vmul.f32 %v11091_v34, %v9332_v30  ;;  %v9305_v16 = vadd.f32 %v13480_v48, %v13603_v3 }
 0x848   :  { %v11095_v18 = vpop.eup %11094  ;;  %v6524_v52 = vadd.f32 1.0, %v11093_v1  ;;  %11114 = vpow2.f32 %v8936_v21  ;;  %v9379_v50 = vadd.f32 %v6338_v19, %v13587_v42  ;;  %v6340_v59 = vpop.f32.mrb[210].mxu0  ;;  %v6698_v53 = vpack.c.bf16 %v6659_v57, %v6656_v55 }
 0x849   :  { %v11097_v44 = vpop.eup %11096  ;;  %v6525_v62 = vadd.f32 1.0, %v11095_v18  ;;  %v9380_v7 = vadd.f32 %v6340_v59, %v13583_v31  ;;  %v6342_v6 = vpop.f32.mrb[211].mxu0  ;;  %v13662_v43 = vpack.c.bf16 %v6660_v5, %v6657_v39  ;;  %v8938_v15 = vmul.f32 -1.442695, %v9378_v8 }
 0x84a   :  { %v11099_v28 = vpop.eup %11098  ;;  %11116 = vrcp.f32 %v6524_v52  ;;  %v6527_v14 = vadd.f32 1.0, %v11097_v44  ;;  %v9381_v45 = vadd.f32 %v6342_v6, %v13587_v42  ;;  %7277 = vmatprep.mubr.bf16.mxu1 %v6698_v53  ;;  %7503 = vmatprep.mubr.bf16.mxu0 %v6698_v53  ;;  %v8939_v10 = vmul.f32 -1.442695, %v9379_v50 }
 0x84b   :  { %v11101_v26 = vpop.eup %11100  ;;  %11118 = vrcp.f32 %v6525_v62  ;;  %v6528_v20 = vadd.f32 1.0, %v11099_v28  ;;  %7278 = vmatmul.mubr.bf16.gmra.mrb[224].mxu1 %v13538_v61  ;;  %7504 = vmatmul.mubr.bf16.gmra.mrb[224].mxu0 %v13538_v61  ;;  %v8941_v36 = vmul.f32 -1.442695, %v9380_v7  ;;  %v9336_v55 = vadd.f32 %v13478_v12, %v13607_v49 }
 0x84c   :  { %v11103_v35 = vpop.eup %11102  ;;  %11120 = vrcp.f32 %v6527_v14  ;;  %v6662_v58 = vmul.f32 %v11101_v26, %v9303_v13  ;;  %v8942_v33 = vmul.f32 -1.442695, %v9381_v45  ;;  %v9307_v52 = vadd.f32 %v13491_v0, %v13603_v3 }
 0x84d   :  { %v11105_v21 = vpop.eup %11104  ;;  %11122 = vrcp.f32 %v6528_v20  ;;  %v6663_v22 = vmul.f32 %v11103_v35, %v9334_v54 }
 0x84e   :  { %v11107_v30 = vpop.eup %11106  ;;  %11124 = vpow2.f32 %v8938_v15  ;;  %v6346_v39 = vpop.f32.mrb[212].mxu0  ;;  %v6665_v34 = vmul.f32 %v11105_v21, %v9305_v16 }
 0x84f   :  { %v11109_v4 = vpop.eup %11108  ;;  %11126 = vpow2.f32 %v8939_v10  ;;  %v9382_v61 = vadd.f32 %v6346_v39, %v13583_v31  ;;  %v6348_v57 = vpop.f32.mrb[213].mxu0  ;;  %v6666_v48 = vmul.f32 %v11107_v30, %v9336_v55  ;;  %v9340_v10 = vadd.f32 %v13496_v56, %v13607_v49 }
 0x850   :  { %v11111_v1 = vpop.eup %11110  ;;  %v6530_v8 = vadd.f32 1.0, %v11109_v4  ;;  %11128 = vpow2.f32 %v8941_v36  ;;  %v9383_v19 = vadd.f32 %v6348_v57, %v13587_v42  ;;  %v6350_v5 = vpop.f32.mrb[214].mxu0  ;;  %v6701_v12 = vpack.c.bf16 %v6665_v34, %v6662_v58 }
 0x851   :  { %v11113_v18 = vpop.eup %11112  ;;  %v6531_v50 = vadd.f32 1.0, %v11111_v1  ;;  %11130 = vpow2.f32 %v8942_v33  ;;  %v9384_v59 = vadd.f32 %v6350_v5, %v13583_v31  ;;  %v6352_v53 = vpop.f32.mrb[215].mxu0  ;;  %v8944_v62 = vmul.f32 -1.442695, %v9382_v61 }
 0x852   :  { %v11115_v44 = vpop.eup %11114  ;;  %11132 = vrcp.f32 %v6530_v8  ;;  %v6533_v13 = vadd.f32 1.0, %v11113_v18  ;;  %v9385_v7 = vadd.f32 %v6352_v53, %v13587_v42  ;;  %7287 = vmatprep.mubr.bf16.mxu1 %v6701_v12  ;;  %7513 = vmatprep.mubr.bf16.mxu0 %v6701_v12  ;;  %v8945_v28 = vmul.f32 -1.442695, %v9383_v19 }
 0x853   :  { %11134 = vrcp.f32 %v6531_v50  ;;  %v6534_v6 = vadd.f32 1.0, %v11115_v44  ;;  %7288 = vmatmul.mubr.bf16.gmra.mrb[228].mxu1 %v13554_v38  ;;  %7514 = vmatmul.mubr.bf16.gmra.mrb[228].mxu0 %v13554_v38  ;;  %v13681_v0 = vpack.c.bf16 %v6666_v48, %v6663_v22  ;;  %v9338_v31 = vadd.f32 %v13489_v40, %v13607_v49 }
 0x854   :  { %v11117_v14 = vpop.eup %11116  ;;  %11136 = vrcp.f32 %v6533_v13  ;;  %v8947_v15 = vmul.f32 -1.442695, %v9384_v59  ;;  %v9309_v42 = vadd.f32 %v13500_v51, %v13603_v3  ;;  %v8948_v26 = vmul.f32 -1.442695, %v9385_v7 }
 0x855   :  { %v11119_v45 = vpop.eup %11118  ;;  %11138 = vrcp.f32 %v6534_v6  ;;  %v6668_v54 = vmul.f32 %v11117_v14, %v9307_v52  ;;  %v9311_v56 = vadd.f32 %v13511_v27, %v13603_v3  ;;  %v9342_v4 = vadd.f32 %v13509_v32, %v13607_v49 }
 0x856   :  { %v11121_v20 = vpop.eup %11120  ;;  %11140 = vpow2.f32 %v8944_v62  ;;  %v6669_v38 = vmul.f32 %v11119_v45, %v9338_v31  ;;  %v9313_v48 = vadd.f32 %v13520_v23, %v13603_v3  ;;  %v9344_v8 = vadd.f32 %v13516_v41, %v13607_v49 }
 0x857   :  { %v11123_v35 = vpop.eup %11122  ;;  %11142 = vpow2.f32 %v8945_v28  ;;  %v6671_v16 = vmul.f32 %v11121_v20, %v9309_v42  ;;  %v9315_v41 = vadd.f32 %v13531_v46, %v13603_v3  ;;  %v9346_v6 = vadd.f32 %v13529_v63, %v13607_v49 }
 0x858   :  { %v11125_v36 = vpop.eup %11124  ;;  %11144 = vpow2.f32 %v8947_v15  ;;  %v6672_v40 = vmul.f32 %v11123_v35, %v9340_v10  ;;  %v9317_v14 = vadd.f32 %v13540_v37, %v13603_v3  ;;  %v9348_v46 = vadd.f32 %v13536_v29, %v13607_v49 }
 0x859   :  { %v11127_v58 = vpop.eup %11126  ;;  %v6536_v21 = vadd.f32 1.0, %v11125_v36  ;;  %11146 = vpow2.f32 %v8948_v26  ;;  %v6704_v55 = vpack.c.bf16 %v6671_v16, %v6668_v54  ;;  %v9319_v63 = vadd.f32 %v13549_v2, %v13603_v3 }
 0x85a   :  { %v11129_v51 = vpop.eup %11128  ;;  %v6537_v33 = vadd.f32 1.0, %v11127_v58  ;;  %v13689_v22 = vpack.c.bf16 %v6672_v40, %v6669_v38  ;;  %v9350_v37 = vadd.f32 %v13547_v9, %v13607_v49  ;;  %v9321_v38 = vadd.f32 %v13556_v17, %v13603_v3  ;;  %v14082_v9 = vld [vmem:[#allocation61_spill] sm:$0xff]  ;;  %v14084_v17 = vld [vmem:[#allocation60_spill] sm:$0xff]  ;;  %v8018_v3 = vpop.permute.xlu1 %8017 }
 0x85b   :  { %v11131_v30 = vpop.eup %11130  ;;  %11148 = vrcp.f32 %v6536_v21  ;;  %v6539_v39 = vadd.f32 1.0, %v11129_v51  ;;  %7297 = vmatprep.mubr.bf16.mxu1 %v6704_v55  ;;  %7523 = vmatprep.mubr.bf16.mxu0 %v6704_v55  ;;  %v9352_v36 = vadd.f32 %v13552_v25, %v13607_v49  ;;  %v8014_v25 = vpop.permute.xlu0 %8013 }
 0x85c   :  { %v11133_v34 = vpop.eup %11132  ;;  %11150 = vrcp.f32 %v6537_v33  ;;  %v6540_v61 = vadd.f32 1.0, %v11131_v30  ;;  %7298 = vmatmul.mubr.bf16.gmra.mrb[232].mxu1 %v13563_v11  ;;  %7524 = vmatmul.mubr.bf16.gmra.mrb[232].mxu0 %v13563_v11 }
 0x85d   :  { %v11135_v57 = vpop.eup %11134  ;;  %11152 = vrcp.f32 %v6539_v39  ;;  %v6674_v27 = vmul.f32 %v11133_v34, %v9311_v56 }
 0x85e   :  { %v11137_v1 = vpop.eup %11136  ;;  %11154 = vrcp.f32 %v6540_v61  ;;  %v6675_v19 = vmul.f32 %v11135_v57, %v9342_v4 }
 0x85f   :  { %v11139_v5 = vpop.eup %11138  ;;  %v6677_v32 = vmul.f32 %v11137_v1, %v9313_v48  ;;  %v8016_v49 = vpop.permute.xlu0 %8015  ;;  %v14085_v1 = vld [vmem:[#allocation47_spill] sm:$0xff] }
 0x860   :  { %v11141_v12 = vpop.eup %11140  ;;  %v6678_v18 = vmul.f32 %v11139_v5, %v9344_v8  ;;  %v8125_v8 = vsel %vm4201_vm2, %v14085_v1, %v8014_v25 }
 0x861   :  { %v11143_v52 = vpop.eup %11142  ;;  %v6542_v50 = vadd.f32 1.0, %v11141_v12  ;;  %v6707_v59 = vpack.c.bf16 %v6677_v32, %v6674_v27 }
 0x862   :  { %v11145_v11 = vpop.eup %11144  ;;  %v6543_v53 = vadd.f32 1.0, %v11143_v52  ;;  %v13701_v44 = vpack.c.bf16 %v6678_v18, %v6675_v19  ;;  %v14086_v19 = vld [vmem:[#allocation39_spill] sm:$0xff] }
 0x863   :  { %v11147_v23 = vpop.eup %11146  ;;  %11156 = vrcp.f32 %v6542_v50  ;;  %v6545_v13 = vadd.f32 1.0, %v11145_v11  ;;  %7307 = vmatprep.mubr.bf16.mxu1 %v6707_v59  ;;  %7533 = vmatprep.mubr.bf16.mxu0 %v6707_v59  ;;  %v8127_v5 = vsel %vm4201_vm2, %v14086_v19, %v8018_v3  ;;  %v14087_v50 = vld [vmem:[#allocation46_spill] sm:$0xff] }
 0x864   :  { %11158 = vrcp.f32 %v6543_v53  ;;  %v6546_v62 = vadd.f32 1.0, %v11147_v23  ;;  %7308 = vmatmul.mubr.bf16.gmra.mrb[236].mxu1 %v13569_v47  ;;  %7534 = vmatmul.mubr.bf16.gmra.mrb[236].mxu0 %v13569_v47  ;;  %v8126_v59 = vsel %vm4201_vm2, %v14087_v50, %v8016_v49  ;;  %v14095_v49 = vld [vmem:[#allocation53_spill] sm:$0xff]  ;;  %v14100_v50 = vld [vmem:[#allocation58_spill] sm:$0xff] }
 0x865   :  { %v11149_v7 = vpop.eup %11148  ;;  %11160 = vrcp.f32 %v6545_v13 }
 0x866   :  { %v11151_v28 = vpop.eup %11150  ;;  %11162 = vrcp.f32 %v6546_v62  ;;  %v6680_v31 = vmul.f32 %v11149_v7, %v9315_v41 }
 0x867   :  { %v11153_v15 = vpop.eup %11152  ;;  %v6681_v45 = vmul.f32 %v11151_v28, %v9346_v6  ;;  %v14089_v6 = vld [vmem:[#allocation43_spill] sm:$0xff] }
 0x868   :  { %v11155_v42 = vpop.eup %11154  ;;  %v6683_v26 = vmul.f32 %v11153_v15, %v9317_v14  ;;  %v14090_v14 = vld [vmem:[#allocation49_spill] sm:$0xff] }
 0x869   :  { %v6684_v54 = vmul.f32 %v11155_v42, %v9348_v46 }
 0x86a   :  { %v6710_v47 = vpack.c.bf16 %v6683_v26, %v6680_v31 }
 0x86b   :  { %v6711_v20 = vpack.c.bf16 %v6684_v54, %v6681_v45  ;;  %v14091_v54 = vld [vmem:[#allocation48_spill] sm:$0xff] }
 0x86c   :  { %7317 = vmatprep.mubr.bf16.mxu1 %v6710_v47  ;;  %7543 = vmatprep.mubr.bf16.mxu0 %v6710_v47 }
 0x86d   :  { %v11157_v10 = vpop.eup %11156  ;;  %7318 = vmatmul.mubr.bf16.gmra.mrb[240].mxu1 %v13575_v24  ;;  %7544 = vmatmul.mubr.bf16.gmra.mrb[240].mxu0 %v13575_v24  ;;  %v14083_v24 = vmov 0  }
 0x86e   :  { %v11159_v29 = vpop.eup %11158  ;;  %v6686_v35 = vmul.f32 %v11157_v10, %v9319_v63 }
 0x86f   :  { %v11161_v16 = vpop.eup %11160  ;;  %v6687_v2 = vmul.f32 %v11159_v29, %v9350_v37 }
 0x870   :  { %v11163_v40 = vpop.eup %11162  ;;  %v6689_v58 = vmul.f32 %v11161_v16, %v9321_v38 }
 0x871   :  { %v6690_v21 = vmul.f32 %v11163_v40, %v9352_v36  ;;  %v14093_v36 = vld [vmem:[#allocation51_spill] sm:$0xff]  ;;  %v14094_v40 = vld [vmem:[#allocation52_spill] sm:$0xff] }
 0x872   :  { %v6713_v55 = vpack.c.bf16 %v6689_v58, %v6686_v35 }
 0x873   :  { %v6714_v51 = vpack.c.bf16 %v6690_v21, %v6687_v2 }
 0x874   :  { %7327 = vmatprep.mubr.bf16.mxu1 %v6713_v55  ;;  %7553 = vmatprep.mubr.bf16.mxu0 %v6713_v55 }
 0x875   :  { %7328 = vmatmul.mubr.bf16.gmra.mrb[244].mxu1 %v14082_v9  ;;  %7554 = vmatmul.mubr.bf16.gmra.mrb[244].mxu0 %v14082_v9 }
 0x876   :  { %7370 = vmatprep.mubr.bf16.mxu1 %v14083_v24  ;;  %7596 = vmatprep.mubr.bf16.mxu0 %v14083_v24 }
 0x87d   :  { %9026 = vmatmul.mubr.msk.bf16.vlgmr.msra.gmra.mrb[216].mxu1 %vm2484_vm1, %v14084_v17  ;;  %9035 = vmatmul.mubr.msk.bf16.vlgmr.msra.gmra.mrb[216].mxu0 %vm2484_vm1, %v14084_v17 }
 0x87e   :  { %7380 = vmatprep.mubr.bf16.mxu1 %v14083_v24  ;;  %7606 = vmatprep.mubr.bf16.mxu0 %v14083_v24 }
 0x885   :  { %9027 = vmatmul.mubr.msk.bf16.gmra.mrb[220].mxu1 %vm2484_vm1, %v13645_v60  ;;  %9036 = vmatmul.mubr.msk.bf16.gmra.mrb[220].mxu0 %vm2484_vm1, %v13645_v60  ;;  %v8020_v60 = vpop.permute.xlu1 %8019 }
 0x886   :  { %7390 = vmatprep.mubr.bf16.mxu1 %v14083_v24  ;;  %7616 = vmatprep.mubr.bf16.mxu0 %v14083_v24 }
 0x88d   :  { %9028 = vmatmul.mubr.msk.bf16.gmra.mrb[224].mxu1 %vm2484_vm1, %v13662_v43  ;;  %9037 = vmatmul.mubr.msk.bf16.gmra.mrb[224].mxu0 %vm2484_vm1, %v13662_v43  ;;  %v8022_v43 = vpop.permute.xlu0 %8021 }
 0x88e   :  { %7400 = vmatprep.mubr.bf16.mxu1 %v14083_v24  ;;  %7626 = vmatprep.mubr.bf16.mxu0 %v14083_v24  ;;  %v8129_v28 = vsel %vm4201_vm2, %v14089_v6, %v8022_v43  ;;  %v14096_v43 = vld [vmem:[#allocation54_spill] sm:$0xff] }
 0x891   :  { %v8026_v33 = vpop.permute.xlu0 %8025 }
 0x892   :  { %v8131_v47 = vsel %vm4201_vm2, %v14091_v54, %v8026_v33 }
 0x895   :  { %9029 = vmatmul.mubr.msk.bf16.gmra.mrb[228].mxu1 %vm2484_vm1, %v13681_v0  ;;  %9038 = vmatmul.mubr.msk.bf16.gmra.mrb[228].mxu0 %vm2484_vm1, %v13681_v0  ;;  %v8024_v0 = vpop.permute.xlu1 %8023  ;;  %v8030_v30 = vpop.permute.xlu0 %8029 }
 0x896   :  { %7410 = vmatprep.mubr.bf16.mxu1 %v14083_v24  ;;  %7636 = vmatprep.mubr.bf16.mxu0 %v14083_v24  ;;  %v8130_v31 = vsel %vm4201_vm2, %v14090_v14, %v8024_v0  ;;  %v8133_v2 = vsel %vm4201_vm2, %v14093_v36, %v8030_v30 }
 0x899   :  { %v8034_v39 = vpop.permute.xlu0 %8033 }
 0x89d   :  { %9030 = vmatmul.mubr.msk.bf16.gmra.mrb[232].mxu1 %vm2484_vm1, %v13689_v22  ;;  %9039 = vmatmul.mubr.msk.bf16.gmra.mrb[232].mxu0 %vm2484_vm1, %v13689_v22  ;;  %v8028_v22 = vpop.permute.xlu1 %8027  ;;  %v13769_v4 = vpop.permute.xlu0 %8037 }
 0x89e   :  { %7420 = vmatprep.mubr.bf16.mxu1 %v14083_v24  ;;  %7646 = vmatprep.mubr.bf16.mxu0 %v14083_v24 }
 0x8a1   :  { %v8032_v56 = vpop.permute.xlu1 %8031  ;;  %v13773_v57 = vpop.permute.xlu0 %8041 }
 0x8a2   :  { %v8134_v58 = vsel %vm4201_vm2, %v14094_v40, %v8032_v56 }
 0x8a5   :  { %9031 = vmatmul.mubr.msk.bf16.gmra.mrb[236].mxu1 %vm2484_vm1, %v13701_v44  ;;  %9040 = vmatmul.mubr.msk.bf16.gmra.mrb[236].mxu0 %vm2484_vm1, %v13701_v44  ;;  %v8036_v34 = vpop.permute.xlu1 %8035  ;;  %v8078_v27 = vpop.permute.xlu0 %8077  ;;  %v14088_v44 = vld [vmem:[#allocation42_spill] sm:$0xff] }
 0x8a6   :  { %7430 = vmatprep.mubr.bf16.mxu1 %v14083_v24  ;;  %7656 = vmatprep.mubr.bf16.mxu0 %v14083_v24  ;;  %v8142_v18 = vsel %vm8141_vm3, %v8125_v8, %v8078_v27  ;;  %v8128_v23 = vsel %vm4201_vm2, %v14088_v44, %v8020_v60  ;;  %v8135_v60 = vsel %vm4201_vm2, %v14095_v49, %v8034_v39  ;;  %v14097_v27 = vld [vmem:[#allocation55_spill] sm:$0xff]  ;;  %v14098_v8 = vld [vmem:[#allocation56_spill] sm:$0xff] }
 0x8a7   :  { %v8159_v11 = vsel %vm8158_vm4, %v8142_v18, 0.0  ;;  %v8136_v0 = vsel %vm4201_vm2, %v14096_v43, %v8036_v34  ;;  %v8137_v1 = vsel %vm4201_vm2, %v14097_v27, %v13769_v4 }
 0x8a8   :  { %8175 = vst [vmem:[#allocation15] sm:$0xff] %v8159_v11 }
 0x8a9   :  { %v13771_v61 = vpop.permute.xlu1 %8039  ;;  %v8082_v12 = vpop.permute.xlu0 %8081 }
 0x8aa   :  { %v8144_v52 = vsel %vm8141_vm3, %v8127_v5, %v8082_v12  ;;  %v8138_v19 = vsel %vm4201_vm2, %v14098_v8, %v13771_v61 }
 0x8ab   :  { %v8161_v53 = vsel %vm8158_vm4, %v8144_v52, 0.0  ;;  %v14099_v52 = vld [vmem:[#allocation57_spill] sm:$0xff] }
 0x8ac   :  { %8177 = vst [vmem:[#allocation15 + $0x10] sm:$0xff] %v8161_v53  ;;  %v8139_v4 = vsel %vm4201_vm2, %v14099_v52, %v13773_v57 }
 0x8ad   :  { %9032 = vmatmul.mubr.msk.bf16.gmra.mrb[240].mxu1 %vm2484_vm1, %v6711_v20  ;;  %9041 = vmatmul.mubr.msk.bf16.gmra.mrb[240].mxu0 %vm2484_vm1, %v6711_v20  ;;  %v13775_v48 = vpop.permute.xlu1 %8043  ;;  %v8086_v45 = vpop.permute.xlu0 %8085  ;;  %v14092_v20 = vld [vmem:[#allocation50_spill] sm:$0xff] }
 0x8ae   :  { %7440 = vmatprep.mubr.bf16.mxu1 %v14083_v24  ;;  %7666 = vmatprep.mubr.bf16.mxu0 %v14083_v24  ;;  %v8146_v26 = vsel %vm8141_vm3, %v8129_v28, %v8086_v45  ;;  %v8132_v63 = vsel %vm4201_vm2, %v14092_v20, %v8028_v22  ;;  %v8140_v61 = vsel %vm4201_vm2, %v14100_v50, %v13775_v48 }
 0x8af   :  { %v8163_v37 = vsel %vm8158_vm4, %v8146_v26, 0.0 }
 0x8b0   :  { %8179 = vst [vmem:[#allocation15 + $0x20] sm:$0xff] %v8163_v37 }
 0x8b1   :  { %v8080_v32 = vpop.permute.xlu1 %8079  ;;  %v8090_v38 = vpop.permute.xlu0 %8089 }
 0x8b2   :  { %v8143_v13 = vsel %vm8141_vm3, %v8126_v59, %v8080_v32  ;;  %v8148_v16 = vsel %vm8141_vm3, %v8131_v47, %v8090_v38 }
 0x8b3   :  { %v8160_v62 = vsel %vm8158_vm4, %v8143_v13, 0.0  ;;  %v8165_v55 = vsel %vm8158_vm4, %v8148_v16, 0.0 }
 0x8b4   :  { %8176 = vst [vmem:[#allocation15 + $0x8] sm:$0xff] %v8160_v62  ;;  %8181 = vst [vmem:[#allocation15 + $0x30] sm:$0xff] %v8165_v55 }
 0x8b5   :  { %9033 = vmatmul.mubr.msk.bf16.gmra.mrb[244].mxu1 %vm2484_vm1, %v6714_v51  ;;  %9042 = vmatmul.mubr.msk.bf16.gmra.mrb[244].mxu0 %vm2484_vm1, %v6714_v51  ;;  %v8084_v41 = vpop.permute.xlu1 %8083  ;;  %v8094_v9 = vpop.permute.xlu0 %8093 }
 0x8b6   :  { %v8145_v7 = vsel %vm8141_vm3, %v8128_v23, %v8084_v41  ;;  %v8150_v17 = vsel %vm8141_vm3, %v8133_v2, %v8094_v9 }
 0x8b7   :  { %v8162_v15 = vsel %vm8158_vm4, %v8145_v7, 0.0  ;;  %v8167_v3 = vsel %vm8158_vm4, %v8150_v17, 0.0 }
 0x8b8   :  { %8178 = vst [vmem:[#allocation15 + $0x18] sm:$0xff] %v8162_v15  ;;  %8183 = vst [vmem:[#allocation15 + $0x40] sm:$0xff] %v8167_v3 }
 0x8b9   :  { %v8088_v46 = vpop.permute.xlu1 %8087  ;;  %v8098_v22 = vpop.permute.xlu0 %8097 }
 0x8ba   :  { %v8147_v42 = vsel %vm8141_vm3, %v8130_v31, %v8088_v46  ;;  %v8152_v56 = vsel %vm8141_vm3, %v8135_v60, %v8098_v22 }
 0x8bb   :  { %v8164_v10 = vsel %vm8158_vm4, %v8147_v42, 0.0  ;;  %v8169_v34 = vsel %vm8158_vm4, %v8152_v56, 0.0 }
 0x8bc   :  { %8180 = vst [vmem:[#allocation15 + $0x28] sm:$0xff] %v8164_v10  ;;  %8185 = vst [vmem:[#allocation15 + $0x50] sm:$0xff] %v8169_v34 }
 0x8bd   :  { %v8092_v29 = vpop.permute.xlu1 %8091  ;;  %v8102_v32 = vpop.permute.xlu0 %8101 }
 0x8be   :  { %v8149_v35 = vsel %vm8141_vm3, %v8132_v63, %v8092_v29  ;;  %v8154_v18 = vsel %vm8141_vm3, %v8137_v1, %v8102_v32 }
 0x8bf   :  { %v8166_v21 = vsel %vm8158_vm4, %v8149_v35, 0.0  ;;  %v8171_v11 = vsel %vm8158_vm4, %v8154_v18, 0.0 }
 0x8c0   :  { %8182 = vst [vmem:[#allocation15 + $0x38] sm:$0xff] %v8166_v21  ;;  %8187 = vst [vmem:[#allocation15 + $0x60] sm:$0xff] %v8171_v11 }
 0x8c1   :  { %v8096_v51 = vpop.permute.xlu1 %8095  ;;  %v8106_v44 = vpop.permute.xlu0 %8105 }
 0x8c2   :  { %v8151_v24 = vsel %vm8141_vm3, %v8134_v58, %v8096_v51  ;;  %v8156_v13 = vsel %vm8141_vm3, %v8139_v4, %v8106_v44 }
 0x8c3   :  { %v8168_v25 = vsel %vm8158_vm4, %v8151_v24, 0.0  ;;  %v8173_v57 = vsel %vm8158_vm4, %v8156_v13, 0.0 }
 0x8c4   :  { %8184 = vst [vmem:[#allocation15 + $0x48] sm:$0xff] %v8168_v25  ;;  %8189 = vst [vmem:[#allocation15 + $0x70] sm:$0xff] %v8173_v57 }
 0x8c5   :  { %v8100_v33 = vpop.permute.xlu1 %8099 }
 0x8c6   :  { %v8153_v30 = vsel %vm8141_vm3, %v8136_v0, %v8100_v33 }
 0x8c7   :  { %v8170_v39 = vsel %vm8158_vm4, %v8153_v30, 0.0 }
 0x8c8   :  { %8186 = vst [vmem:[#allocation15 + $0x58] sm:$0xff] %v8170_v39 }
 0x8c9   :  { %v8104_v5 = vpop.permute.xlu1 %8103 }
 0x8ca   :  { %v8155_v12 = vsel %vm8141_vm3, %v8138_v19, %v8104_v5 }
 0x8cb   :  { %v8172_v59 = vsel %vm8158_vm4, %v8155_v12, 0.0 }
 0x8cc   :  { %8188 = vst [vmem:[#allocation15 + $0x68] sm:$0xff] %v8172_v59 }
 0x8cd   :  { %v8108_v53 = vpop.permute.xlu1 %8107 }
 0x8ce   :  { %v8157_v23 = vsel %vm8141_vm3, %v8140_v61, %v8108_v53 }
 0x8cf   :  { %v8174_v41 = vsel %vm8158_vm4, %v8157_v23, 0.0 }
 0x8d0   :  { %8190 = vst [vmem:[#allocation15 + $0x78] sm:$0xff] %v8174_v41 }
 0x8d1   :  { %11391 = shalt.err (!%p11388_p8)
}
 0x8d2   :  { %s11392_s11 = scalar_lea.hbm %s13961_s15, 2048 }
 0x8d3   :  { %p11393_p9 = scmp.ne.s32.totalorder %s13961_s15, %s11392_s11  ;;  %p11396_p10 = scmp.lt.u32.totalorder %s11392_s11, %s13961_s15 }
 0x8d5   :  { %p11398_p11 = pnand %p11396_p10, %p11393_p9 }
 0x8d7   :  { %11401 = shalt.err (!%p11398_p11)
}
 0x8d8   :  { %s11454_s18 = smov 128   ;;  %s11455_s23 = smov 8   ;;  %v6791_v48 = vld [vmem:[#allocation7] sm:$0xf]  ;;  %v14102_v6 = vld [vmem:[#allocation44_spill] sm:$0xff]  ;;  %v14103_v14 = vld [vmem:[#allocation45_spill] sm:$0xff] }
 0x8d9   :  { %8214 = dma.vmem_to_hbm [thread:$0]  %s8209_s21, 2048, %s13961_s15, [#allocation16], %s11454_s18, %s11454_s18, %s11455_s23   ;;  %v14101_v62 = vld [vmem:[#allocation38_spill] sm:$0xff]  ;;  %v13861_v28 = vrot.slane %v6791_v48, %v14102_v6  ;;  %v13864_v31 = vrot.slane %v6791_v48, %v14103_v14  ;;  %v14104_v15 = vld [vmem:[#allocation37_spill] sm:$0xff] }
 0x8da   :  { %v13858_v7 = vrot.slane %v6791_v48, %v14101_v62  ;;  %v13867_v46 = vrot.slane %v6791_v48, %v14104_v15  ;;  %s11456_s15 = smov [#allocation14]  }
 0x8db   :  { %s8196_s26 = sshll.u32 %s11456_s15, 4  ;;  %s8197_s26 = int_to_ptr.vmem [resolvable:$true] %s8196_s26 }
 0x8dc   :  { %s11402_s27 = scalar_lea.vmem %s8197_s26, 8192  ;;  %p11407_p13 = scmp.lt.s32.totalorder %s8197_s26, %s8197_s26 }
 0x8dd   :  { %p11403_p12 = scmp.ne.s32.totalorder %s8197_s26, %s11402_s27  ;;  %p11408_p0 = scmp.lt.s32.totalorder %s11402_s27, %s11402_s27 }
 0x8df   :  { %p11409_p1 = por %p11408_p0, %p11407_p13 }
 0x8e1   :  { %p11410_p2 = pnand %p11409_p1, %p11403_p12 }
 0x950   :  { %v7372_v45 = vpop.f32.mrb[216].mxu1  ;;  %v7598_v42 = vpop.f32.mrb[216].mxu0 }
 0x951   :  { %v9386_v26 = vadd.f32 %v7372_v45, %v13858_v7  ;;  %v9418_v54 = vadd.f32 %v7598_v42, %v13861_v28  ;;  %v7374_v47 = vpop.f32.mrb[217].mxu1  ;;  %v7600_v20 = vpop.f32.mrb[217].mxu0 }
 0x952   :  { %v9387_v63 = vadd.f32 %v7374_v47, %v13864_v31  ;;  %v9419_v10 = vadd.f32 %v7600_v20, %v13867_v46  ;;  %v7376_v37 = vpop.f32.mrb[218].mxu1  ;;  %v7602_v29 = vpop.f32.mrb[218].mxu0 }
 0x953   :  { %v9043_v38 = vmul.f32 -1.442695, %v9386_v26  ;;  %v7869_v35 = vmax.f32 %v9418_v54, -4.5  ;;  %v9388_v16 = vadd.f32 %v7376_v37, %v13858_v7  ;;  %v9420_v36 = vadd.f32 %v7602_v29, %v13861_v28  ;;  %v7378_v2 = vpop.f32.mrb[219].mxu1  ;;  %v7604_v40 = vpop.f32.mrb[219].mxu0 }
 0x954   :  { %v9044_v58 = vmul.f32 -1.442695, %v9387_v63  ;;  %v7870_v21 = vmax.f32 %v9419_v10, -4.5  ;;  %v9389_v55 = vadd.f32 %v7378_v2, %v13864_v31  ;;  %v9421_v51 = vadd.f32 %v7604_v40, %v13867_v46 }
 0x955   :  { %11164 = vpow2.f32 %v9043_v38  ;;  %v7901_v9 = vmin.f32 %v7869_v35, 0.0  ;;  %v9045_v24 = vmul.f32 -1.442695, %v9388_v16  ;;  %v7871_v17 = vmax.f32 %v9420_v36, -4.5 }
 0x956   :  { %11166 = vpow2.f32 %v9044_v58  ;;  %v7902_v25 = vmin.f32 %v7870_v21, 0.0  ;;  %v9046_v3 = vmul.f32 -1.442695, %v9389_v55  ;;  %v7872_v49 = vmax.f32 %v9421_v51, -4.5 }
 0x957   :  { %7935 = vst [vmem:[#allocation14 + $0x10] sm:$0xff] %v7901_v9  ;;  %11168 = vpow2.f32 %v9045_v24  ;;  %v7903_v60 = vmin.f32 %v7871_v17, 0.0 }
 0x958   :  { %7936 = vst [vmem:[#allocation14 + $0x18] sm:$0xff] %v7902_v25  ;;  %11170 = vpow2.f32 %v9046_v3  ;;  %v7904_v43 = vmin.f32 %v7872_v49, 0.0  ;;  %v7382_v0 = vpop.f32.mrb[220].mxu1  ;;  %v7608_v33 = vpop.f32.mrb[220].mxu0 }
 0x959   :  { %7939 = vst [vmem:[#allocation14 + $0x30] sm:$0xff] %v7903_v60  ;;  %v9390_v22 = vadd.f32 %v7382_v0, %v13858_v7  ;;  %v9422_v30 = vadd.f32 %v7608_v33, %v13861_v28  ;;  %v7384_v56 = vpop.f32.mrb[221].mxu1  ;;  %v7610_v27 = vpop.f32.mrb[221].mxu0 }
 0x95a   :  { %7940 = vst [vmem:[#allocation14 + $0x38] sm:$0xff] %v7904_v43  ;;  %v9391_v1 = vadd.f32 %v7384_v56, %v13864_v31  ;;  %v9423_v8 = vadd.f32 %v7610_v27, %v13867_v46  ;;  %v7386_v19 = vpop.f32.mrb[222].mxu1  ;;  %v7612_v39 = vpop.f32.mrb[222].mxu0 }
 0x95b   :  { %v9047_v34 = vmul.f32 -1.442695, %v9390_v22  ;;  %v7873_v5 = vmax.f32 %v9422_v30, -4.5  ;;  %v9392_v32 = vadd.f32 %v7386_v19, %v13858_v7  ;;  %v9424_v12 = vadd.f32 %v7612_v39, %v13861_v28  ;;  %v7388_v18 = vpop.f32.mrb[223].mxu1  ;;  %v7614_v52 = vpop.f32.mrb[223].mxu0 }
 0x95c   :  { %v9048_v4 = vmul.f32 -1.442695, %v9391_v1  ;;  %v7874_v50 = vmax.f32 %v9423_v8, -4.5  ;;  %v9393_v61 = vadd.f32 %v7388_v18, %v13864_v31  ;;  %v9425_v59 = vadd.f32 %v7614_v52, %v13867_v46 }
 0x95d   :  { %11172 = vpow2.f32 %v9047_v34  ;;  %v7905_v11 = vmin.f32 %v7873_v5, 0.0  ;;  %v9049_v53 = vmul.f32 -1.442695, %v9392_v32  ;;  %v7875_v44 = vmax.f32 %v9424_v12, -4.5 }
 0x95e   :  { %11174 = vpow2.f32 %v9048_v4  ;;  %v7906_v23 = vmin.f32 %v7874_v50, 0.0  ;;  %v9050_v13 = vmul.f32 -1.442695, %v9393_v61  ;;  %v7876_v41 = vmax.f32 %v9425_v59, -4.5 }
 0x95f   :  { %v11165_v57 = vpop.eup %11164  ;;  %7943 = vst [vmem:[#allocation14 + $0x50] sm:$0xff] %v7905_v11  ;;  %11176 = vpow2.f32 %v9049_v53  ;;  %v7907_v48 = vmin.f32 %v7875_v44, 0.0 }
 0x960   :  { %v11167_v62 = vpop.eup %11166  ;;  %v7773_v6 = vadd.f32 1.0, %v11165_v57  ;;  %7944 = vst [vmem:[#allocation14 + $0x58] sm:$0xff] %v7906_v23  ;;  %11178 = vpow2.f32 %v9050_v13  ;;  %v7908_v14 = vmin.f32 %v7876_v41, 0.0  ;;  %v7392_v15 = vpop.f32.mrb[224].mxu1 }
 0x961   :  { %v7618_v45 = vpop.f32.mrb[224].mxu0  ;;  %v11169_v42 = vpop.eup %11168  ;;  %v7774_v26 = vadd.f32 1.0, %v11167_v62  ;;  %7947 = vst [vmem:[#allocation14 + $0x70] sm:$0xff] %v7907_v48  ;;  %v9394_v54 = vadd.f32 %v7392_v15, %v13858_v7 }
 0x962   :  { %v9426_v47 = vadd.f32 %v7618_v45, %v13861_v28  ;;  %v7394_v20 = vpop.f32.mrb[225].mxu1  ;;  %v7620_v63 = vpop.f32.mrb[225].mxu0  ;;  %11180 = vrcp.f32 %v7773_v6  ;;  %v7775_v37 = vadd.f32 1.0, %v11169_v42  ;;  %7948 = vst [vmem:[#allocation14 + $0x78] sm:$0xff] %v7908_v14 }
 0x963   :  { %v11171_v10 = vpop.eup %11170  ;;  %v9395_v29 = vadd.f32 %v7394_v20, %v13864_v31  ;;  %v9427_v38 = vadd.f32 %v7620_v63, %v13867_v46  ;;  %v7396_v35 = vpop.f32.mrb[226].mxu1  ;;  %11182 = vrcp.f32 %v7774_v26  ;;  %v9051_v2 = vmul.f32 -1.442695, %v9394_v54 }
 0x964   :  { %v7622_v16 = vpop.f32.mrb[226].mxu0  ;;  %v7776_v36 = vadd.f32 1.0, %v11171_v10  ;;  %v7877_v40 = vmax.f32 %v9426_v47, -4.5  ;;  %v7398_v58 = vpop.f32.mrb[227].mxu1  ;;  %11184 = vrcp.f32 %v7775_v37  ;;  %v9396_v9 = vadd.f32 %v7396_v35, %v13858_v7 }
 0x965   :  { %v7624_v21 = vpop.f32.mrb[227].mxu0  ;;  %v9052_v55 = vmul.f32 -1.442695, %v9395_v29  ;;  %v7878_v51 = vmax.f32 %v9427_v38, -4.5  ;;  %v9428_v17 = vadd.f32 %v7622_v16, %v13861_v28  ;;  %v9397_v25 = vadd.f32 %v7398_v58, %v13864_v31 }
 0x966   :  { %11186 = vrcp.f32 %v7776_v36  ;;  %v7909_v24 = vmin.f32 %v7877_v40, 0.0  ;;  %v9053_v49 = vmul.f32 -1.442695, %v9396_v9  ;;  %v9429_v60 = vadd.f32 %v7624_v21, %v13867_v46 }
 0x967   :  { %11188 = vpow2.f32 %v9051_v2  ;;  %v7910_v3 = vmin.f32 %v7878_v51, 0.0  ;;  %v11173_v43 = vpop.eup %11172  ;;  %v7879_v0 = vmax.f32 %v9428_v17, -4.5  ;;  %v9054_v33 = vmul.f32 -1.442695, %v9397_v25 }
 0x968   :  { %7951 = vst [vmem:[#allocation14 + $0x90] sm:$0xff] %v7909_v24  ;;  %11190 = vpow2.f32 %v9052_v55  ;;  %v11175_v22 = vpop.eup %11174  ;;  %v7777_v30 = vadd.f32 1.0, %v11173_v43  ;;  %v7880_v56 = vmax.f32 %v9429_v60, -4.5  ;;  %v7402_v27 = vpop.f32.mrb[228].mxu1 }
 0x969   :  { %7952 = vst [vmem:[#allocation14 + $0x98] sm:$0xff] %v7910_v3  ;;  %11192 = vpow2.f32 %v9053_v49  ;;  %v7628_v1 = vpop.f32.mrb[228].mxu0  ;;  %v11177_v8 = vpop.eup %11176  ;;  %v7778_v19 = vadd.f32 1.0, %v11175_v22  ;;  %v7911_v39 = vmin.f32 %v7879_v0, 0.0  ;;  %v9398_v34 = vadd.f32 %v7402_v27, %v13858_v7 }
 0x96a   :  { %11194 = vpow2.f32 %v9054_v33  ;;  %v7404_v5 = vpop.f32.mrb[229].mxu1  ;;  %v7630_v32 = vpop.f32.mrb[229].mxu0  ;;  %v7779_v18 = vadd.f32 1.0, %v11177_v8  ;;  %v7912_v52 = vmin.f32 %v7880_v56, 0.0  ;;  %v9430_v4 = vadd.f32 %v7628_v1, %v13861_v28 }
 0x96b   :  { %v11179_v12 = vpop.eup %11178  ;;  %11196 = vrcp.f32 %v7777_v30  ;;  %v7406_v50 = vpop.f32.mrb[230].mxu1  ;;  %7955 = vst [vmem:[#allocation14 + $0xb0] sm:$0xff] %v7911_v39  ;;  %v9055_v11 = vmul.f32 -1.442695, %v9398_v34  ;;  %v9399_v53 = vadd.f32 %v7404_v5, %v13864_v31  ;;  %v9431_v57 = vadd.f32 %v7630_v32, %v13867_v46 }
 0x96c   :  { %v7632_v61 = vpop.f32.mrb[230].mxu0  ;;  %11198 = vrcp.f32 %v7778_v19  ;;  %v7780_v59 = vadd.f32 1.0, %v11179_v12  ;;  %v7408_v44 = vpop.f32.mrb[231].mxu1  ;;  %7956 = vst [vmem:[#allocation14 + $0xb8] sm:$0xff] %v7912_v52  ;;  %v7881_v41 = vmax.f32 %v9430_v4, -4.5  ;;  %v9400_v48 = vadd.f32 %v7406_v50, %v13858_v7 }
 0x96d   :  { %v7634_v23 = vpop.f32.mrb[231].mxu0  ;;  %v11181_v13 = vpop.eup %11180  ;;  %11200 = vrcp.f32 %v7779_v18  ;;  %v9056_v6 = vmul.f32 -1.442695, %v9399_v53  ;;  %v9432_v14 = vadd.f32 %v7632_v61, %v13861_v28  ;;  %v9401_v15 = vadd.f32 %v7408_v44, %v13864_v31 }
 0x96e   :  { %v11183_v62 = vpop.eup %11182  ;;  %7933 = vst [vmem:[#allocation14] sm:$0xff] %v11181_v13  ;;  %11202 = vrcp.f32 %v7780_v59  ;;  %v7913_v42 = vmin.f32 %v7881_v41, 0.0  ;;  %v7882_v26 = vmax.f32 %v9431_v57, -4.5  ;;  %v9057_v54 = vmul.f32 -1.442695, %v9400_v48 }
 0x96f   :  { %v11185_v45 = vpop.eup %11184  ;;  %7934 = vst [vmem:[#allocation14 + $0x8] sm:$0xff] %v11183_v62  ;;  %11204 = vpow2.f32 %v9055_v11  ;;  %v7883_v20 = vmax.f32 %v9432_v14, -4.5  ;;  %v9058_v63 = vmul.f32 -1.442695, %v9401_v15  ;;  %v9433_v10 = vadd.f32 %v7634_v23, %v13867_v46 }
 0x970   :  { %v11187_v47 = vpop.eup %11186  ;;  %7937 = vst [vmem:[#allocation14 + $0x20] sm:$0xff] %v11185_v45  ;;  %11206 = vpow2.f32 %v9056_v6  ;;  %7959 = vst [vmem:[#allocation14 + $0xd0] sm:$0xff] %v7913_v42  ;;  %v7914_v29 = vmin.f32 %v7882_v26, 0.0  ;;  %v7412_v38 = vpop.f32.mrb[232].mxu1 }
 0x971   :  { %v11189_v37 = vpop.eup %11188  ;;  %7938 = vst [vmem:[#allocation14 + $0x28] sm:$0xff] %v11187_v47  ;;  %11208 = vpow2.f32 %v9057_v54  ;;  %v7638_v35 = vpop.f32.mrb[232].mxu0  ;;  %v7915_v2 = vmin.f32 %v7883_v20, 0.0  ;;  %v7884_v40 = vmax.f32 %v9433_v10, -4.5  ;;  %v9402_v9 = vadd.f32 %v7412_v38, %v13858_v7 }
 0x972   :  { %v11191_v16 = vpop.eup %11190  ;;  %v7781_v36 = vadd.f32 1.0, %v11189_v37  ;;  %11210 = vpow2.f32 %v9058_v63  ;;  %v7414_v58 = vpop.f32.mrb[233].mxu1  ;;  %7960 = vst [vmem:[#allocation14 + $0xd8] sm:$0xff] %v7914_v29  ;;  %v9434_v24 = vadd.f32 %v7638_v35, %v13861_v28 }
 0x973   :  { %v7640_v21 = vpop.f32.mrb[233].mxu0  ;;  %v11193_v55 = vpop.eup %11192  ;;  %v7782_v51 = vadd.f32 1.0, %v11191_v16  ;;  %v9403_v17 = vadd.f32 %v7414_v58, %v13864_v31  ;;  %7963 = vst [vmem:[#allocation14 + $0xf0] sm:$0xff] %v7915_v2  ;;  %v7916_v43 = vmin.f32 %v7884_v40, 0.0  ;;  %v9059_v27 = vmul.f32 -1.442695, %v9402_v9 }
 0x974   :  { %v7416_v25 = vpop.f32.mrb[234].mxu1  ;;  %v7642_v3 = vpop.f32.mrb[234].mxu0  ;;  %11212 = vrcp.f32 %v7781_v36  ;;  %v7783_v60 = vadd.f32 1.0, %v11193_v55  ;;  %v9435_v0 = vadd.f32 %v7640_v21, %v13867_v46  ;;  %v7885_v1 = vmax.f32 %v9434_v24, -4.5 }
 0x975   :  { %v11195_v49 = vpop.eup %11194  ;;  %v7418_v33 = vpop.f32.mrb[235].mxu1  ;;  %11214 = vrcp.f32 %v7782_v51  ;;  %7964 = vst [vmem:[#allocation14 + $0xf8] sm:$0xff] %v7916_v43  ;;  %v9060_v19 = vmul.f32 -1.442695, %v9403_v17  ;;  %v9404_v34 = vadd.f32 %v7416_v25, %v13858_v7  ;;  %v9436_v12 = vadd.f32 %v7642_v3, %v13861_v28 }
 0x976   :  { %v7644_v22 = vpop.f32.mrb[235].mxu0  ;;  %v11197_v30 = vpop.eup %11196  ;;  %v7784_v56 = vadd.f32 1.0, %v11195_v49  ;;  %11216 = vrcp.f32 %v7783_v60  ;;  %v7886_v39 = vmax.f32 %v9435_v0, -4.5  ;;  %v7917_v32 = vmin.f32 %v7885_v1, 0.0 }
 0x977   :  { %v11199_v8 = vpop.eup %11198  ;;  %7941 = vst [vmem:[#allocation14 + $0x40] sm:$0xff] %v11197_v30  ;;  %v9405_v18 = vadd.f32 %v7418_v33, %v13864_v31  ;;  %v9061_v50 = vmul.f32 -1.442695, %v9404_v34  ;;  %v9437_v61 = vadd.f32 %v7644_v22, %v13867_v46  ;;  %v7887_v11 = vmax.f32 %v9436_v12, -4.5 }
 0x978   :  { %v11201_v5 = vpop.eup %11200  ;;  %7942 = vst [vmem:[#allocation14 + $0x48] sm:$0xff] %v11199_v8  ;;  %11218 = vrcp.f32 %v7784_v56  ;;  %v7918_v4 = vmin.f32 %v7886_v39, 0.0  ;;  %7967 = vst [vmem:[#allocation14 + $0x110] sm:$0xff] %v7917_v32  ;;  %v7422_v44 = vpop.f32.mrb[236].mxu1 }
 0x979   :  { %v11203_v52 = vpop.eup %11202  ;;  %7945 = vst [vmem:[#allocation14 + $0x60] sm:$0xff] %v11201_v5  ;;  %11220 = vpow2.f32 %v9059_v27  ;;  %v9062_v53 = vmul.f32 -1.442695, %v9405_v18  ;;  %v7648_v23 = vpop.f32.mrb[236].mxu0  ;;  %v7888_v57 = vmax.f32 %v9437_v61, -4.5  ;;  %v9406_v48 = vadd.f32 %v7422_v44, %v13858_v7 }
 0x97a   :  { %v11205_v59 = vpop.eup %11204  ;;  %7946 = vst [vmem:[#allocation14 + $0x68] sm:$0xff] %v11203_v52  ;;  %11222 = vpow2.f32 %v9060_v19  ;;  %7968 = vst [vmem:[#allocation14 + $0x118] sm:$0xff] %v7918_v4  ;;  %v7424_v62 = vpop.f32.mrb[237].mxu1  ;;  %v7919_v45 = vmin.f32 %v7887_v11, 0.0  ;;  %v9438_v42 = vadd.f32 %v7648_v23, %v13861_v28 }
 0x97b   :  { %v11207_v13 = vpop.eup %11206  ;;  %v7785_v41 = vadd.f32 1.0, %v11205_v59  ;;  %11224 = vpow2.f32 %v9061_v50  ;;  %v7650_v6 = vpop.f32.mrb[237].mxu0  ;;  %v7920_v63 = vmin.f32 %v7888_v57, 0.0  ;;  %v9063_v10 = vmul.f32 -1.442695, %v9406_v48 }
 0x97c   :  { %v11209_v14 = vpop.eup %11208  ;;  %v7786_v15 = vadd.f32 1.0, %v11207_v13  ;;  %11226 = vpow2.f32 %v9062_v53  ;;  %v7426_v26 = vpop.f32.mrb[238].mxu1  ;;  %7971 = vst [vmem:[#allocation14 + $0x130] sm:$0xff] %v7919_v45  ;;  %v7889_v35 = vmax.f32 %v9438_v42, -4.5  ;;  %v9407_v16 = vadd.f32 %v7424_v62, %v13864_v31 }
 0x97d   :  { %v7652_v54 = vpop.f32.mrb[238].mxu0  ;;  %v11211_v47 = vpop.eup %11210  ;;  %11228 = vrcp.f32 %v7785_v41  ;;  %v7787_v20 = vadd.f32 1.0, %v11209_v14  ;;  %7972 = vst [vmem:[#allocation14 + $0x138] sm:$0xff] %v7920_v63  ;;  %v9439_v2 = vadd.f32 %v7650_v6, %v13867_v46  ;;  %v9408_v40 = vadd.f32 %v7426_v26, %v13858_v7 }
 0x97e   :  { %v7428_v37 = vpop.f32.mrb[239].mxu1  ;;  %v7654_v29 = vpop.f32.mrb[239].mxu0  ;;  %11230 = vrcp.f32 %v7786_v15  ;;  %v7788_v38 = vadd.f32 1.0, %v11211_v47  ;;  %v9440_v58 = vadd.f32 %v7652_v54, %v13861_v28  ;;  %v7921_v55 = vmin.f32 %v7889_v35, 0.0 }
 0x97f   :  { %v11213_v36 = vpop.eup %11212  ;;  %11232 = vrcp.f32 %v7787_v20  ;;  %v9064_v51 = vmul.f32 -1.442695, %v9407_v16  ;;  %v9409_v9 = vadd.f32 %v7428_v37, %v13864_v31  ;;  %v7890_v17 = vmax.f32 %v9439_v2, -4.5 }
 0x980   :  { %v11215_v21 = vpop.eup %11214  ;;  %7949 = vst [vmem:[#allocation14 + $0x80] sm:$0xff] %v11213_v36  ;;  %11234 = vrcp.f32 %v7788_v38  ;;  %v9065_v25 = vmul.f32 -1.442695, %v9408_v40  ;;  %v7891_v3 = vmax.f32 %v9440_v58, -4.5  ;;  %7975 = vst [vmem:[#allocation14 + $0x150] sm:$0xff] %v7921_v55  ;;  %v9441_v43 = vadd.f32 %v7654_v29, %v13867_v46  ;;  %v7432_v0 = vpop.f32.mrb[240].mxu1 }
 0x981   :  { %v11217_v24 = vpop.eup %11216  ;;  %7950 = vst [vmem:[#allocation14 + $0x88] sm:$0xff] %v11215_v21  ;;  %11236 = vpow2.f32 %v9063_v10  ;;  %v9066_v60 = vmul.f32 -1.442695, %v9409_v9  ;;  %v7658_v33 = vpop.f32.mrb[240].mxu0  ;;  %v7922_v30 = vmin.f32 %v7890_v17, 0.0  ;;  %v9410_v27 = vadd.f32 %v7432_v0, %v13858_v7 }
 0x982   :  { %v11219_v49 = vpop.eup %11218  ;;  %7953 = vst [vmem:[#allocation14 + $0xa0] sm:$0xff] %v11217_v24  ;;  %11238 = vpow2.f32 %v9064_v51  ;;  %v7923_v56 = vmin.f32 %v7891_v3, 0.0  ;;  %v7434_v1 = vpop.f32.mrb[241].mxu1  ;;  %v7892_v34 = vmax.f32 %v9441_v43, -4.5  ;;  %v9442_v5 = vadd.f32 %v7658_v33, %v13861_v28 }
 0x983   :  { %v11221_v22 = vpop.eup %11220  ;;  %7954 = vst [vmem:[#allocation14 + $0xa8] sm:$0xff] %v11219_v49  ;;  %11240 = vpow2.f32 %v9065_v25  ;;  %v7660_v8 = vpop.f32.mrb[241].mxu0  ;;  %7976 = vst [vmem:[#allocation14 + $0x158] sm:$0xff] %v7922_v30  ;;  %v9067_v4 = vmul.f32 -1.442695, %v9410_v27  ;;  %v9411_v50 = vadd.f32 %v7434_v1, %v13864_v31 }
 0x984   :  { %v11223_v19 = vpop.eup %11222  ;;  %v7789_v39 = vadd.f32 1.0, %v11221_v22  ;;  %11242 = vpow2.f32 %v9066_v60  ;;  %v7436_v32 = vpop.f32.mrb[242].mxu1  ;;  %7979 = vst [vmem:[#allocation14 + $0x170] sm:$0xff] %v7923_v56  ;;  %v9443_v61 = vadd.f32 %v7660_v8, %v13867_v46  ;;  %v7924_v23 = vmin.f32 %v7892_v34, 0.0 }
 0x985   :  { %v7662_v12 = vpop.f32.mrb[242].mxu0  ;;  %v11225_v18 = vpop.eup %11224  ;;  %v7790_v52 = vadd.f32 1.0, %v11223_v19  ;;  %v7893_v13 = vmax.f32 %v9442_v5, -4.5  ;;  %v9068_v48 = vmul.f32 -1.442695, %v9411_v50  ;;  %v9412_v15 = vadd.f32 %v7436_v32, %v13858_v7 }
 0x986   :  { %v7438_v59 = vpop.f32.mrb[243].mxu1  ;;  %v7664_v11 = vpop.f32.mrb[243].mxu0  ;;  %11244 = vrcp.f32 %v7789_v39  ;;  %v7791_v44 = vadd.f32 1.0, %v11225_v18  ;;  %v7894_v62 = vmax.f32 %v9443_v61, -4.5  ;;  %7980 = vst [vmem:[#allocation14 + $0x178] sm:$0xff] %v7924_v23  ;;  %v9444_v45 = vadd.f32 %v7662_v12, %v13861_v28 }
 0x987   :  { %v11227_v53 = vpop.eup %11226  ;;  %11246 = vrcp.f32 %v7790_v52  ;;  %v7925_v14 = vmin.f32 %v7893_v13, 0.0  ;;  %v9413_v54 = vadd.f32 %v7438_v59, %v13864_v31  ;;  %v9445_v47 = vadd.f32 %v7664_v11, %v13867_v46 }
 0x988   :  { %v11229_v41 = vpop.eup %11228  ;;  %v7792_v57 = vadd.f32 1.0, %v11227_v53  ;;  %11248 = vrcp.f32 %v7791_v44  ;;  %v7926_v26 = vmin.f32 %v7894_v62, 0.0  ;;  %v9069_v63 = vmul.f32 -1.442695, %v9412_v15  ;;  %v7442_v37 = vpop.f32.mrb[244].mxu1 }
 0x989   :  { %v11231_v6 = vpop.eup %11230  ;;  %7957 = vst [vmem:[#allocation14 + $0xc0] sm:$0xff] %v11229_v41  ;;  %7983 = vst [vmem:[#allocation14 + $0x190] sm:$0xff] %v7925_v14  ;;  %v7895_v10 = vmax.f32 %v9444_v45, -4.5  ;;  %v7668_v29 = vpop.f32.mrb[244].mxu0  ;;  %v9070_v35 = vmul.f32 -1.442695, %v9413_v54  ;;  %v9414_v36 = vadd.f32 %v7442_v37, %v13858_v7 }
 0x98a   :  { %v11233_v42 = vpop.eup %11232  ;;  %7958 = vst [vmem:[#allocation14 + $0xc8] sm:$0xff] %v11231_v6  ;;  %11250 = vrcp.f32 %v7792_v57  ;;  %7984 = vst [vmem:[#allocation14 + $0x198] sm:$0xff] %v7926_v26  ;;  %v7896_v16 = vmax.f32 %v9445_v47, -4.5  ;;  %v7444_v2 = vpop.f32.mrb[245].mxu1  ;;  %v9446_v51 = vadd.f32 %v7668_v29, %v13861_v28 }
 0x98b   :  { %v11235_v20 = vpop.eup %11234  ;;  %7961 = vst [vmem:[#allocation14 + $0xe0] sm:$0xff] %v11233_v42  ;;  %11252 = vpow2.f32 %v9067_v4  ;;  %v7670_v40 = vpop.f32.mrb[245].mxu0  ;;  %v7927_v55 = vmin.f32 %v7895_v10, 0.0  ;;  %v9071_v49 = vmul.f32 -1.442695, %v9414_v36  ;;  %v9415_v30 = vadd.f32 %v7444_v2, %v13864_v31 }
 0x98c   :  { %v11237_v38 = vpop.eup %11236  ;;  %7962 = vst [vmem:[#allocation14 + $0xe8] sm:$0xff] %v11235_v20  ;;  %11254 = vpow2.f32 %v9068_v48  ;;  %v7446_v9 = vpop.f32.mrb[246].mxu1  ;;  %v7928_v3 = vmin.f32 %v7896_v16, 0.0  ;;  %v7897_v22 = vmax.f32 %v9446_v51, -4.5  ;;  %v9447_v27 = vadd.f32 %v7670_v40, %v13867_v46 }
 0x98d   :  { %v11239_v58 = vpop.eup %11238  ;;  %v7793_v21 = vadd.f32 1.0, %v11237_v38  ;;  %11256 = vpow2.f32 %v9069_v63  ;;  %v7672_v24 = vpop.f32.mrb[246].mxu0  ;;  %7987 = vst [vmem:[#allocation14 + $0x1b0] sm:$0xff] %v7927_v55  ;;  %v9416_v1 = vadd.f32 %v7446_v9, %v13858_v7  ;;  %v9072_v39 = vmul.f32 -1.442695, %v9415_v30 }
 0x98e   :  { %v11241_v17 = vpop.eup %11240  ;;  %v7794_v25 = vadd.f32 1.0, %v11239_v58  ;;  %11258 = vpow2.f32 %v9070_v35  ;;  %v7448_v60 = vpop.f32.mrb[247].mxu1  ;;  %7988 = vst [vmem:[#allocation14 + $0x1b8] sm:$0xff] %v7928_v3  ;;  %v7929_v19 = vmin.f32 %v7897_v22, 0.0  ;;  %v9448_v34 = vadd.f32 %v7672_v24, %v13861_v28 }
 0x98f   :  { %v7674_v43 = vpop.f32.mrb[247].mxu0  ;;  %v11243_v0 = vpop.eup %11242  ;;  %11260 = vrcp.f32 %v7793_v21  ;;  %v7795_v33 = vadd.f32 1.0, %v11241_v17  ;;  %v7898_v32 = vmax.f32 %v9447_v27, -4.5  ;;  %v9073_v12 = vmul.f32 -1.442695, %v9416_v1 }
 0x990   :  { %11262 = vrcp.f32 %v7794_v25  ;;  %v7796_v56 = vadd.f32 1.0, %v11243_v0  ;;  %v11245_v8 = vpop.eup %11244  ;;  %v9417_v18 = vadd.f32 %v7448_v60, %v13864_v31  ;;  %7991 = vst [vmem:[#allocation14 + $0x1d0] sm:$0xff] %v7929_v19  ;;  %v7899_v4 = vmax.f32 %v9448_v34, -4.5 }
 0x991   :  { %11264 = vrcp.f32 %v7795_v33  ;;  %v11247_v5 = vpop.eup %11246  ;;  %7965 = vst [vmem:[#allocation14 + $0x100] sm:$0xff] %v11245_v8  ;;  %v9449_v7 = vadd.f32 %v7674_v43, %v13867_v46  ;;  %v7930_v61 = vmin.f32 %v7898_v32, 0.0 }
 0x992   :  { %11266 = vrcp.f32 %v7796_v56  ;;  %v11249_v52 = vpop.eup %11248  ;;  %7966 = vst [vmem:[#allocation14 + $0x108] sm:$0xff] %v11247_v5  ;;  %v9074_v59 = vmul.f32 -1.442695, %v9417_v18  ;;  %v7931_v11 = vmin.f32 %v7899_v4, 0.0 }
 0x993   :  { %11268 = vpow2.f32 %v9071_v49  ;;  %7969 = vst [vmem:[#allocation14 + $0x120] sm:$0xff] %v11249_v52  ;;  %v7900_v53 = vmax.f32 %v9449_v7, -4.5  ;;  %7992 = vst [vmem:[#allocation14 + $0x1d8] sm:$0xff] %v7930_v61 }
 0x994   :  { %v11251_v50 = vpop.eup %11250  ;;  %11270 = vpow2.f32 %v9072_v39  ;;  %7995 = vst [vmem:[#allocation14 + $0x1f0] sm:$0xff] %v7931_v11 }
 0x995   :  { %v11253_v28 = vpop.eup %11252  ;;  %7970 = vst [vmem:[#allocation14 + $0x128] sm:$0xff] %v11251_v50  ;;  %11272 = vpow2.f32 %v9073_v12  ;;  %v7932_v41 = vmin.f32 %v7900_v53, 0.0 }
 0x996   :  { %v11255_v44 = vpop.eup %11254  ;;  %v7797_v23 = vadd.f32 1.0, %v11253_v28  ;;  %11274 = vpow2.f32 %v9074_v59 }
 0x997   :  { %v11257_v31 = vpop.eup %11256  ;;  %v7798_v13 = vadd.f32 1.0, %v11255_v44  ;;  %7996 = vst [vmem:[#allocation14 + $0x1f8] sm:$0xff] %v7932_v41 }
 0x998   :  { %v11259_v57 = vpop.eup %11258  ;;  %11276 = vrcp.f32 %v7797_v23  ;;  %v7799_v46 = vadd.f32 1.0, %v11257_v31 }
 0x999   :  { %v11261_v48 = vpop.eup %11260  ;;  %11278 = vrcp.f32 %v7798_v13  ;;  %v7800_v62 = vadd.f32 1.0, %v11259_v57 }
 0x99a   :  { %v11263_v6 = vpop.eup %11262  ;;  %7973 = vst [vmem:[#allocation14 + $0x140] sm:$0xff] %v11261_v48  ;;  %11280 = vrcp.f32 %v7799_v46 }
 0x99b   :  { %v11265_v14 = vpop.eup %11264  ;;  %7974 = vst [vmem:[#allocation14 + $0x148] sm:$0xff] %v11263_v6  ;;  %11282 = vrcp.f32 %v7800_v62 }
 0x99c   :  { %v11267_v15 = vpop.eup %11266  ;;  %7977 = vst [vmem:[#allocation14 + $0x160] sm:$0xff] %v11265_v14 }
 0x99d   :  { %v11269_v45 = vpop.eup %11268  ;;  %7978 = vst [vmem:[#allocation14 + $0x168] sm:$0xff] %v11267_v15 }
 0x99e   :  { %v11271_v42 = vpop.eup %11270  ;;  %v7801_v26 = vadd.f32 1.0, %v11269_v45 }
 0x99f   :  { %v11273_v54 = vpop.eup %11272  ;;  %v7802_v47 = vadd.f32 1.0, %v11271_v42 }
 0x9a0   :  { %v11275_v20 = vpop.eup %11274  ;;  %11284 = vrcp.f32 %v7801_v26  ;;  %v7803_v63 = vadd.f32 1.0, %v11273_v54 }
 0x9a1   :  { %11286 = vrcp.f32 %v7802_v47  ;;  %v7804_v10 = vadd.f32 1.0, %v11275_v20 }
 0x9a2   :  { %v11277_v37 = vpop.eup %11276  ;;  %11288 = vrcp.f32 %v7803_v63 }
 0x9a3   :  { %v11279_v29 = vpop.eup %11278  ;;  %7981 = vst [vmem:[#allocation14 + $0x180] sm:$0xff] %v11277_v37  ;;  %11290 = vrcp.f32 %v7804_v10 }
 0x9a4   :  { %v11281_v38 = vpop.eup %11280  ;;  %7982 = vst [vmem:[#allocation14 + $0x188] sm:$0xff] %v11279_v29 }
 0x9a5   :  { %v11283_v35 = vpop.eup %11282  ;;  %7985 = vst [vmem:[#allocation14 + $0x1a0] sm:$0xff] %v11281_v38 }
 0x9a6   :  { %7986 = vst [vmem:[#allocation14 + $0x1a8] sm:$0xff] %v11283_v35 }
 0x9aa   :  { %v11285_v16 = vpop.eup %11284 }
 0x9ab   :  { %v11287_v36 = vpop.eup %11286  ;;  %7989 = vst [vmem:[#allocation14 + $0x1c0] sm:$0xff] %v11285_v16 }
 0x9ac   :  { %v11289_v2 = vpop.eup %11288  ;;  %7990 = vst [vmem:[#allocation14 + $0x1c8] sm:$0xff] %v11287_v36 }
 0x9ad   :  { %v11291_v40 = vpop.eup %11290  ;;  %7993 = vst [vmem:[#allocation14 + $0x1e0] sm:$0xff] %v11289_v2 }
 0x9ae   :  { %7994 = vst [vmem:[#allocation14 + $0x1e8] sm:$0xff] %v11291_v40 }
 0x9af   :  { %11413 = shalt.err (!%p11410_p2)
}
 0x9b0   :  { %s11414_s16 = scalar_lea.hbm %s13960_s14, 8192 }
 0x9b1   :  { %p11415_p3 = scmp.ne.s32.totalorder %s13960_s14, %s11414_s16  ;;  %p11418_p4 = scmp.lt.u32.totalorder %s11414_s16, %s13960_s14 }
 0x9b3   :  { %p11420_p5 = pnand %p11418_p4, %p11415_p3 }
 0x9b5   :  { %11423 = shalt.err (!%p11420_p5)
}
 0x9b6   :  { %s11457_s30 = smov 512  }
 0x9b7   :  { %8202 = dma.vmem_to_hbm [thread:$0]  %s8197_s26, 8192, %s13960_s14, [#allocation11], %s11457_s30, %s11457_s30, %s11451_s10  }
 0x9b8   :  { %11440 = dma.done.wait [#allocation11], 8192  }
 0x9b9   :  { %11441 = vsyncadd [#allocation11], 4294959104 }
 0x9ba   :  { %11442 = dma.done.wait [#allocation16], 2048  }
 0x9bb   :  { %11443 = vsyncadd [#allocation16], 4294965248 }
 0x9bc   :  { %8221 = vsyncpa [#allocation10], 1 }
 0x9bd   :  { %8222 = vsyncpa [#allocation13], 1 }
 0x9be   :  { %8223 = vsyncpa [#allocation11], 1 }
 0x9bf   :  { %8224 = vsyncpa [#allocation16], 1 }
 0x9c0   :  { %8225 = vsyncmov [#allocation8] }
 0x9c3   :  { %s8226_s8 = vpop.sfrf %8225 }
 0x9c4   :  { %p9075_p6 = scmp.ne.s32.totalorder %s8226_s8, 0 }
 0x9c6   :  { %8230 = shalt.err (%p9075_p6)  }
 0x9c7   :  { %8232 = vsyncmov [#allocation8 + $0x1] }
 0x9ca   :  { %s8233_s7 = vpop.sfrf %8232 }
 0x9cb   :  { %p9076_p7 = scmp.ne.s32.totalorder %s8233_s7, 0 }
 0x9cd   :  { %8237 = shalt.err (%p9076_p7)  }
 0x9ce   :  { %8239 = vsyncmov [#allocation8 + $0x2] }
 0x9d1   :  { %s8240_s20 = vpop.sfrf %8239 }
 0x9d2   :  { %p9077_p8 = scmp.ne.s32.totalorder %s8240_s20, 0 }
 0x9d4   :  { %8244 = shalt.err (%p9077_p8)  }
 0x9d5   :  { %8246 = vsyncmov [#allocation8 + $0x3] }
 0x9d8   :  { %s8247_s14 = vpop.sfrf %8246 }
 0x9d9   :  { %p9078_p9 = scmp.ne.s32.totalorder %s8247_s14, 0 }
 0x9db   :  { %8251 = shalt.err (%p9078_p9)  }
 0x9dc   :  { %8253 = vsyncmov [#allocation8 + $0x4] }
 0x9df   :  { %s8254_s10 = vpop.sfrf %8253 }
 0x9e0   :  { %p9079_p10 = scmp.ne.s32.totalorder %s8254_s10, 0 }
 0x9e2   :  { %8258 = shalt.err (%p9079_p10)  }
 0x9e3   :  { %8260 = vsyncmov [#allocation8 + $0x5] }
 0x9e6   :  { %s8261_s21 = vpop.sfrf %8260 }
 0x9e7   :  { %p9080_p11 = scmp.ne.s32.totalorder %s8261_s21, 0 }
 0x9e9   :  { %8265 = shalt.err (%p9080_p11)  }

</bundles_post_ra>
